<compile_context>
chip_gen: v6e
topology: v6e:2x2x1
jax: 0.10.0
libtpu: 0.0.40
codegen_flags: <defaults>
</compile_context>

<pallas_src>
import numpy as np

import jax
import jax.numpy as jnp
from jax.experimental import pallas as pl
from jax.experimental.pallas import tpu as pltpu


IN_H, IN_W = 345, 456
OUT_H, OUT_W = 270, 270


# ----------------------------------------------------------------------------
# Weight construction (NumPy, compile-time constants).  Mirrors the fx graph's
# iota / trunc-to-int64 / clamp / where / normalize arithmetic in float32.
# ----------------------------------------------------------------------------
def _aa_taps(in_size, out_size, scale, support, inv_scale):
    """Returns (xmin[int64, out], weights[f32, 5, out]) matching the fx graph."""
    scale = np.float32(scale)
    support = np.float32(support)
    inv_scale = np.float32(inv_scale)

    j = np.arange(out_size, dtype=np.float32)
    center = (j + np.float32(0.5)) * scale                      # mul_1 / mul_9

    # convert_element_type -> int64 truncates toward zero (matches the graph).
    xmin = (center - support + np.float32(0.5)).astype(np.int64)
    xmin = np.maximum(xmin, 0)                                   # clamp_min
    xmax = (center + support + np.float32(0.5)).astype(np.int64)
    xmax = np.minimum(xmax, in_size)                             # clamp_max
    xsize = np.clip(xmax - xmin, 0, 5)                           # clamp [0, 5]

    k = np.arange(5, dtype=np.int64).reshape(5, 1)
    dist = ((k + xmin).astype(np.float32) - center + np.float32(0.5)) * inv_scale
    w = np.float32(1.0) - np.minimum(np.abs(dist), np.float32(1.0))
    w = np.where(k < xsize, w, np.float32(0.0)).astype(np.float32)
    w = w / np.sum(w, axis=0)                                    # normalize over 5 taps
    return xmin, w.astype(np.float32)


def _build_resample_matrix(in_size, xmin, weights, max_index, n_taps):
    """Dense [in_size, out_size] matrix: column j holds output pixel j's tap
    weights scattered at their (clamped) source indices."""
    out_size = xmin.shape[0]
    cols = np.arange(out_size)
    mat = np.zeros((in_size, out_size), np.float32)
    for k in range(n_taps):
        src = np.minimum(xmin + k, max_index)
        np.add.at(mat, (src, cols), weights[k])
    return mat


# Horizontal pass: W 456 -> 270.  The graph multiplies the 5th gathered tap by
# a zero vector (full_default_2), so only taps 0..3 contribute -- but the
# normalization sum still runs over all 5 taps (handled inside _aa_taps).
_xmin_w, _w_w = _aa_taps(
    in_size=456, out_size=270,
    scale=1.6888888888888889,
    support=1.6888889074325562,
    inv_scale=0.5921052631578947)
_MW_NP = _build_resample_matrix(456, _xmin_w, _w_w, max_index=455, n_taps=4)

# Vertical pass: H 345 -> 270, all 5 taps.  Pre-transposed so the kernel
# computes MHT @ tmp and the result is already [OUT_H, OUT_W] (no transposes).
_xmin_h, _w_h = _aa_taps(
    in_size=345, out_size=270,
    scale=1.2777777777777777,
    support=1.2777777910232544,
    inv_scale=0.782608695652174)
_MH_NP = _build_resample_matrix(345, _xmin_h, _w_h, max_index=344, n_taps=5)

_MW_F32 = jnp.asarray(_MW_NP)            # [456, 270] (reference only)
_MHT_F32 = jnp.asarray(_MH_NP.T)         # [270, 345] (reference only)
_MW = _MW_F32.astype(jnp.bfloat16)       # bf16 MXU operands
_MHT = _MHT_F32.astype(jnp.bfloat16)


# ----------------------------------------------------------------------------
# Fused Pallas kernel: one batch image (C channels) per grid step.
# Per channel p:
#   tmp[p] = bf16( x[p] @ MW )      (345, 456) @ (456, 270) -> (345, 270)
#   out[p] = MHT @ tmp[p]           (270, 345) @ (345, 270) -> (270, 270)
# ----------------------------------------------------------------------------
def _fused_resize_kernel(x_ref, mw_ref, mht_ref, o_ref, tmp_ref):
    C = x_ref.shape[1]
    for p in range(C):  # static unroll (C == 3)
        # Horizontal pass (contract over W).  bf16 operands, f32 accumulate.
        t = jnp.dot(x_ref[0, p].astype(jnp.bfloat16), mw_ref[...],
                    preferred_element_type=jnp.float32)
        tmp_ref[p] = t.astype(jnp.bfloat16)
        # Vertical pass (contract over H); result is already (OUT_H, OUT_W).
        o_ref[0, p] = jnp.dot(mht_ref[...], tmp_ref[p],
                              preferred_element_type=jnp.float32)


@jax.jit
def repro_forward(x):
    # x: [N, C, 345, 456] float32 (NCHW)
    N, C, H, W = x.shape
    assert (H, W) == (IN_H, IN_W)

    out = pl.pallas_call(
        _fused_resize_kernel,
        out_shape=jax.ShapeDtypeStruct((N, C, OUT_H, OUT_W), jnp.float32),
        grid=(N,),
        in_specs=[
            # One image (all channels) per grid step; last two dims full extent.
            pl.BlockSpec((1, C, H, W), lambda i: (i, 0, 0, 0)),
            # Weight matrices: constant index maps -> resident in VMEM.
            pl.BlockSpec((W, OUT_W), lambda i: (0, 0)),
            pl.BlockSpec((OUT_H, H), lambda i: (0, 0)),
        ],
        out_specs=pl.BlockSpec((1, C, OUT_H, OUT_W), lambda i: (i, 0, 0, 0)),
        scratch_shapes=[pltpu.VMEM((C, H, OUT_W), jnp.bfloat16)],
        compiler_params=pltpu.CompilerParams(
            dimension_semantics=("parallel",),
            vmem_limit_bytes=32 * 1024 * 1024),
    )(x, _MW, _MHT)

    return out


def _reference(x):
    """Pure-JAX f32 reference of the separable resize (highest precision)."""
    hp = jax.lax.Precision.HIGHEST
    tmp = jnp.einsum('nchw,wo->ncho', x, _MW_F32, precision=hp)
    return jnp.einsum('kh,ncho->ncko', _MHT_F32, tmp, precision=hp)


if __name__ == "__main__":
    key = jax.random.PRNGKey(0)
    # Shapes are fixed by the module's baked-in resize constants (456->270, 345->270).
    x = jax.random.normal(key, (2, 3, IN_H, IN_W), dtype=jnp.float32)
    out = repro_forward(x)
    out = jax.block_until_ready(out)
    assert out.shape == (2, 3, OUT_H, OUT_W) and out.dtype == jnp.float32
    assert bool(jnp.all(jnp.isfinite(out)))
    # Loose sanity check against the f32 reference (bf16 MXU operands introduce
    # small, bounded deviation; weights sum to 1 per output pixel).
    ref = jax.block_until_ready(_reference(x))
    rel_err = jnp.max(jnp.abs(out - ref) / (1.0 + jnp.abs(ref)))
    assert bool(rel_err < 8e-2), f"relative error too large: {rel_err}"
    print("KERNEL_OK")
</pallas_src>

<mosaic_0001>
module attributes {stable_mosaic.version = 11 : i64} {
  func.func @_fused_resize_kernel(%arg0: i32, %arg1: memref<1x3x345x456xf32, #tpu.memory_space<vmem>>, %arg2: memref<456x270xbf16, #tpu.memory_space<vmem>>, %arg3: memref<270x345xbf16, #tpu.memory_space<vmem>>, %arg4: memref<1x3x270x270xf32, #tpu.memory_space<vmem>>, %arg5: memref<3x345x270xbf16, #tpu.memory_space<vmem>>) attributes {dimension_semantics = [#tpu.dimension_semantics<parallel>], iteration_bounds = array<i64: 2>, scalar_prefetch = 0 : i64, scratch_operands = 1 : i64, tpu.core_type = #tpu.core_type<tc>, window_params = [{transform_indices = @transform_0, window_bounds = array<i64: 1, 3, 345, 456>}, {pipeline_mode = #tpu.pipeline_mode<synchronous>, transform_indices = @transform_1, window_bounds = array<i64: 456, 270>}, {pipeline_mode = #tpu.pipeline_mode<synchronous>, transform_indices = @transform_2, window_bounds = array<i64: 270, 345>}, {transform_indices = @transform_3, window_bounds = array<i64: 1, 3, 270, 270>}]} {
    %c0 = arith.constant 0 : index
    %c0_0 = arith.constant 0 : index
    %c0_1 = arith.constant 0 : index
    %c0_2 = arith.constant 0 : index
    %0 = vector.load %arg1[%c0, %c0_0, %c0_1, %c0_2] : memref<1x3x345x456xf32, #tpu.memory_space<vmem>>, vector<1x1x345x456xf32>
    %1 = vector.shape_cast %0 : vector<1x1x345x456xf32> to vector<345x456xf32>
    %2 = arith.truncf %1 : vector<345x456xf32> to vector<345x456xbf16>
    %c0_3 = arith.constant 0 : index
    %c0_4 = arith.constant 0 : index
    %3 = vector.load %arg2[%c0_3, %c0_4] : memref<456x270xbf16, #tpu.memory_space<vmem>>, vector<456x270xbf16>
    %cst = arith.constant dense<0.000000e+00> : vector<345x270xf32>
    %4 = tpu.matmul %2, %3, %cst {dimension_numbers = #tpu.dot_dimension_numbers<[1], [0], [0], [1], [0, 0, 1, 1], [], []>} : vector<345x456xbf16>, vector<456x270xbf16>, vector<345x270xf32> -> vector<345x270xf32>
    %5 = arith.truncf %4 : vector<345x270xf32> to vector<345x270xbf16>
    %c0_5 = arith.constant 0 : index
    %c0_6 = arith.constant 0 : index
    %c0_7 = arith.constant 0 : index
    %6 = vector.load %arg5[%c0_5, %c0_6, %c0_7] : memref<3x345x270xbf16, #tpu.memory_space<vmem>>, vector<1x345x270xbf16>
    %7 = vector.shape_cast %6 : vector<1x345x270xbf16> to vector<345x270xbf16>
    %8 = vector.shape_cast %5 : vector<345x270xbf16> to vector<1x345x270xbf16>
    tpu.vector_store %arg5[%c0_5, %c0_6, %c0_7], %8 {strides = array<i32>} : memref<3x345x270xbf16, #tpu.memory_space<vmem>>, vector<1x345x270xbf16>,
    %c0_8 = arith.constant 0 : index
    %c0_9 = arith.constant 0 : index
    %9 = vector.load %arg3[%c0_8, %c0_9] : memref<270x345xbf16, #tpu.memory_space<vmem>>, vector<270x345xbf16>
    %c0_10 = arith.constant 0 : index
    %c0_11 = arith.constant 0 : index
    %c0_12 = arith.constant 0 : index
    %10 = vector.load %arg5[%c0_10, %c0_11, %c0_12] : memref<3x345x270xbf16, #tpu.memory_space<vmem>>, vector<1x345x270xbf16>
    %11 = vector.shape_cast %10 : vector<1x345x270xbf16> to vector<345x270xbf16>
    %cst_13 = arith.constant dense<0.000000e+00> : vector<270x270xf32>
    %12 = tpu.matmul %9, %11, %cst_13 {dimension_numbers = #tpu.dot_dimension_numbers<[1], [0], [0], [1], [0, 0, 1, 1], [], []>} : vector<270x345xbf16>, vector<345x270xbf16>, vector<270x270xf32> -> vector<270x270xf32>
    %c0_14 = arith.constant 0 : index
    %c0_15 = arith.constant 0 : index
    %c0_16 = arith.constant 0 : index
    %c0_17 = arith.constant 0 : index
    %13 = vector.load %arg4[%c0_14, %c0_15, %c0_16, %c0_17] : memref<1x3x270x270xf32, #tpu.memory_space<vmem>>, vector<1x1x270x270xf32>
    %14 = vector.shape_cast %13 : vector<1x1x270x270xf32> to vector<270x270xf32>
    %15 = vector.shape_cast %12 : vector<270x270xf32> to vector<1x1x270x270xf32>
    tpu.vector_store %arg4[%c0_14, %c0_15, %c0_16, %c0_17], %15 {strides = array<i32>} : memref<1x3x270x270xf32, #tpu.memory_space<vmem>>, vector<1x1x270x270xf32>,
    %c0_18 = arith.constant 0 : index
    %c1 = arith.constant 1 : index
    %c0_19 = arith.constant 0 : index
    %c0_20 = arith.constant 0 : index
    %16 = vector.load %arg1[%c0_18, %c1, %c0_19, %c0_20] : memref<1x3x345x456xf32, #tpu.memory_space<vmem>>, vector<1x1x345x456xf32>
    %17 = vector.shape_cast %16 : vector<1x1x345x456xf32> to vector<345x456xf32>
    %18 = arith.truncf %17 : vector<345x456xf32> to vector<345x456xbf16>
    %c0_21 = arith.constant 0 : index
    %c0_22 = arith.constant 0 : index
    %19 = vector.load %arg2[%c0_21, %c0_22] : memref<456x270xbf16, #tpu.memory_space<vmem>>, vector<456x270xbf16>
    %cst_23 = arith.constant dense<0.000000e+00> : vector<345x270xf32>
    %20 = tpu.matmul %18, %19, %cst_23 {dimension_numbers = #tpu.dot_dimension_numbers<[1], [0], [0], [1], [0, 0, 1, 1], [], []>} : vector<345x456xbf16>, vector<456x270xbf16>, vector<345x270xf32> -> vector<345x270xf32>
    %21 = arith.truncf %20 : vector<345x270xf32> to vector<345x270xbf16>
    %c1_24 = arith.constant 1 : index
    %c0_25 = arith.constant 0 : index
    %c0_26 = arith.constant 0 : index
    %22 = vector.load %arg5[%c1_24, %c0_25, %c0_26] : memref<3x345x270xbf16, #tpu.memory_space<vmem>>, vector<1x345x270xbf16>
    %23 = vector.shape_cast %22 : vector<1x345x270xbf16> to vector<345x270xbf16>
    %24 = vector.shape_cast %21 : vector<345x270xbf16> to vector<1x345x270xbf16>
    tpu.vector_store %arg5[%c1_24, %c0_25, %c0_26], %24 {strides = array<i32>} : memref<3x345x270xbf16, #tpu.memory_space<vmem>>, vector<1x345x270xbf16>,
    %c0_27 = arith.constant 0 : index
    %c0_28 = arith.constant 0 : index
    %25 = vector.load %arg3[%c0_27, %c0_28] : memref<270x345xbf16, #tpu.memory_space<vmem>>, vector<270x345xbf16>
    %c1_29 = arith.constant 1 : index
    %c0_30 = arith.constant 0 : index
    %c0_31 = arith.constant 0 : index
    %26 = vector.load %arg5[%c1_29, %c0_30, %c0_31] : memref<3x345x270xbf16, #tpu.memory_space<vmem>>, vector<1x345x270xbf16>
    %27 = vector.shape_cast %26 : vector<1x345x270xbf16> to vector<345x270xbf16>
    %cst_32 = arith.constant dense<0.000000e+00> : vector<270x270xf32>
    %28 = tpu.matmul %25, %27, %cst_32 {dimension_numbers = #tpu.dot_dimension_numbers<[1], [0], [0], [1], [0, 0, 1, 1], [], []>} : vector<270x345xbf16>, vector<345x270xbf16>, vector<270x270xf32> -> vector<270x270xf32>
    %c0_33 = arith.constant 0 : index
    %c1_34 = arith.constant 1 : index
    %c0_35 = arith.constant 0 : index
    %c0_36 = arith.constant 0 : index
    %29 = vector.load %arg4[%c0_33, %c1_34, %c0_35, %c0_36] : memref<1x3x270x270xf32, #tpu.memory_space<vmem>>, vector<1x1x270x270xf32>
    %30 = vector.shape_cast %29 : vector<1x1x270x270xf32> to vector<270x270xf32>
    %31 = vector.shape_cast %28 : vector<270x270xf32> to vector<1x1x270x270xf32>
    tpu.vector_store %arg4[%c0_33, %c1_34, %c0_35, %c0_36], %31 {strides = array<i32>} : memref<1x3x270x270xf32, #tpu.memory_space<vmem>>, vector<1x1x270x270xf32>,
    %c0_37 = arith.constant 0 : index
    %c2 = arith.constant 2 : index
    %c0_38 = arith.constant 0 : index
    %c0_39 = arith.constant 0 : index
    %32 = vector.load %arg1[%c0_37, %c2, %c0_38, %c0_39] : memref<1x3x345x456xf32, #tpu.memory_space<vmem>>, vector<1x1x345x456xf32>
    %33 = vector.shape_cast %32 : vector<1x1x345x456xf32> to vector<345x456xf32>
    %34 = arith.truncf %33 : vector<345x456xf32> to vector<345x456xbf16>
    %c0_40 = arith.constant 0 : index
    %c0_41 = arith.constant 0 : index
    %35 = vector.load %arg2[%c0_40, %c0_41] : memref<456x270xbf16, #tpu.memory_space<vmem>>, vector<456x270xbf16>
    %cst_42 = arith.constant dense<0.000000e+00> : vector<345x270xf32>
    %36 = tpu.matmul %34, %35, %cst_42 {dimension_numbers = #tpu.dot_dimension_numbers<[1], [0], [0], [1], [0, 0, 1, 1], [], []>} : vector<345x456xbf16>, vector<456x270xbf16>, vector<345x270xf32> -> vector<345x270xf32>
    %37 = arith.truncf %36 : vector<345x270xf32> to vector<345x270xbf16>
    %c2_43 = arith.constant 2 : index
    %c0_44 = arith.constant 0 : index
    %c0_45 = arith.constant 0 : index
    %38 = vector.load %arg5[%c2_43, %c0_44, %c0_45] : memref<3x345x270xbf16, #tpu.memory_space<vmem>>, vector<1x345x270xbf16>
    %39 = vector.shape_cast %38 : vector<1x345x270xbf16> to vector<345x270xbf16>
    %40 = vector.shape_cast %37 : vector<345x270xbf16> to vector<1x345x270xbf16>
    tpu.vector_store %arg5[%c2_43, %c0_44, %c0_45], %40 {strides = array<i32>} : memref<3x345x270xbf16, #tpu.memory_space<vmem>>, vector<1x345x270xbf16>,
    %c0_46 = arith.constant 0 : index
    %c0_47 = arith.constant 0 : index
    %41 = vector.load %arg3[%c0_46, %c0_47] : memref<270x345xbf16, #tpu.memory_space<vmem>>, vector<270x345xbf16>
    %c2_48 = arith.constant 2 : index
    %c0_49 = arith.constant 0 : index
    %c0_50 = arith.constant 0 : index
    %42 = vector.load %arg5[%c2_48, %c0_49, %c0_50] : memref<3x345x270xbf16, #tpu.memory_space<vmem>>, vector<1x345x270xbf16>
    %43 = vector.shape_cast %42 : vector<1x345x270xbf16> to vector<345x270xbf16>
    %cst_51 = arith.constant dense<0.000000e+00> : vector<270x270xf32>
    %44 = tpu.matmul %41, %43, %cst_51 {dimension_numbers = #tpu.dot_dimension_numbers<[1], [0], [0], [1], [0, 0, 1, 1], [], []>} : vector<270x345xbf16>, vector<345x270xbf16>, vector<270x270xf32> -> vector<270x270xf32>
    %c0_52 = arith.constant 0 : index
    %c2_53 = arith.constant 2 : index
    %c0_54 = arith.constant 0 : index
    %c0_55 = arith.constant 0 : index
    %45 = vector.load %arg4[%c0_52, %c2_53, %c0_54, %c0_55] : memref<1x3x270x270xf32, #tpu.memory_space<vmem>>, vector<1x1x270x270xf32>
    %46 = vector.shape_cast %45 : vector<1x1x270x270xf32> to vector<270x270xf32>
    %47 = vector.shape_cast %44 : vector<270x270xf32> to vector<1x1x270x270xf32>
    tpu.vector_store %arg4[%c0_52, %c2_53, %c0_54, %c0_55], %47 {strides = array<i32>} : memref<1x3x270x270xf32, #tpu.memory_space<vmem>>, vector<1x1x270x270xf32>,
    return
  }
  func.func @transform_0(%arg0: i32) -> (i32, i32, i32, i32) {
    %c0_i32 = arith.constant 0 : i32
    %c0_i32_0 = arith.constant 0 : i32
    %c0_i32_1 = arith.constant 0 : i32
    %c0_i32_2 = arith.constant 0 : i32
    return %arg0, %c0_i32, %c0_i32_0, %c0_i32_1 : i32, i32, i32, i32
  }
  func.func @transform_1(%arg0: i32) -> (i32, i32) {
    %c0_i32 = arith.constant 0 : i32
    %c0_i32_0 = arith.constant 0 : i32
    %c0_i32_1 = arith.constant 0 : i32
    return %c0_i32, %c0_i32_0 : i32, i32
  }
  func.func @transform_2(%arg0: i32) -> (i32, i32) {
    %c0_i32 = arith.constant 0 : i32
    %c0_i32_0 = arith.constant 0 : i32
    %c0_i32_1 = arith.constant 0 : i32
    return %c0_i32, %c0_i32_0 : i32, i32
  }
  func.func @transform_3(%arg0: i32) -> (i32, i32, i32, i32) {
    %c0_i32 = arith.constant 0 : i32
    %c0_i32_0 = arith.constant 0 : i32
    %c0_i32_1 = arith.constant 0 : i32
    %c0_i32_2 = arith.constant 0 : i32
    return %arg0, %c0_i32, %c0_i32_0, %c0_i32_1 : i32, i32, i32, i32
  }
}

</mosaic_0001>

<bundles_post_ra>
// kernel: repro_forward.1
= control target key start
LH: loop header
LB: loop body
LE: loop exit
PB: predicated region body
PF: predicated region fallthrough
CT: control target
= control target key end

     0   :  { %s15465_s12 = smov 0   ;;  %s22267_s0 = inlined_call_operand.vmem [shape: f32[2,3,345,456], index: 0, kind: input, shape index: {}]   ;;  %s22268_s1 = inlined_call_operand.vmem [shape: bf16[456,270], index: 1, kind: input, shape index: {}]   ;;  %s22269_s2 = inlined_call_operand.vmem [shape: bf16[270,345], index: 2, kind: input, shape index: {}]   ;;  %s22270_s3 = inlined_call_operand.vmem [shape: f32[2,3,270,270], index: 3, kind: output, shape index: {}]  }
   0x1 LB: > { %s12344_s13 = sadd.s32 4294967295, %s15439_s12   ;;  %p12348_p0 = scmp.ge.s32.totalorder %s15439_s12, 1  ;;  %s15439_s12 = sphi %s15465_s12, %s13_s12  }
   0x2   : > { %p137_p1 = scmp.lt.s32.totalorder %s15439_s12, 3 }
   0x4   : > { %p138_p2 = pnand %p12348_p0, %p137_p1 }
   0x6   : > { %141 = sbr.rel (%p138_p2) target bundleno = 2413 (0x96d), region = 32 }
   0xb   : > { %v14609_v0 = vld [vmem:[%s22268_s1 + $0xac] ss:$12 sps:$4 sm:$0xff]   ;;  %v14611_v1 = vld [vmem:[%s22268_s1 + $0xa8] ss:$12 sps:$4 sm:$0xff]   ;;  %v14614_v3 = vld [vmem:[%s22268_s1 + $0x90] ss:$12 sps:$4 sm:$0xff]  }
   0xc   : > { %1083 = vmatprep.subr.bf16.mxu0 %v14609_v0  ;;  %v14612_v2 = vld [vmem:[%s22268_s1 + $0x94] ss:$12 sps:$4 sm:$0xff]   ;;  %v14615_v4 = vld [vmem:[%s22268_s1 + $0x22c] ss:$12 sps:$4 sm:$0xff]   ;;  %v14618_v6 = vld [vmem:[%s22268_s1 + $0x7c] ss:$12 sps:$4 sm:$0xff]  }
   0xd   : > { %1084 = vmatpush1.bf16.msra.mxu0 %v14611_v1  ;;  %v14617_v5 = vld [vmem:[%s22268_s1 + $0x228] ss:$12 sps:$4 sm:$0xff]   ;;  %1336 = vmatprep.subr.bf16.mxu1 %v14615_v4  ;;  %v14623_v8 = vld [vmem:[%s22268_s1 + $0x210] ss:$12 sps:$4 sm:$0xff]   ;;  %v14620_v9 = vld [vmem:[%s22268_s1 + $0x78] ss:$12 sps:$4 sm:$0xff]  }
   0xe   : > { %1085 = vmatprep.subr.bf16.mxu0 %v14612_v2  ;;  %1337 = vmatpush1.bf16.msra.mxu1 %v14617_v5  ;;  %v14621_v7 = vld [vmem:[%s22268_s1 + $0x214] ss:$12 sps:$4 sm:$0xff]   ;;  %v14624_v10 = vld [vmem:[%s22268_s1 + $0x64] ss:$12 sps:$4 sm:$0xff]   ;;  %v14627_v11 = vld [vmem:[%s22268_s1 + $0x1fc] ss:$12 sps:$4 sm:$0xff]  }
   0xf   : > { %1338 = vmatprep.subr.bf16.mxu1 %v14621_v7  ;;  %v14629_v12 = vld [vmem:[%s22268_s1 + $0x1f8] ss:$12 sps:$4 sm:$0xff]   ;;  %v14626_v13 = vld [vmem:[%s22268_s1 + $0x60] ss:$12 sps:$4 sm:$0xff]   ;;  %v14632_v17 = vld [vmem:[%s22268_s1 + $0x48] ss:$12 sps:$4 sm:$0xff]  }
  0x10   : > { %v14633_v14 = vld [vmem:[%s22268_s1 + $0x1e4] ss:$12 sps:$4 sm:$0xff]   ;;  %v14630_v15 = vld [vmem:[%s22268_s1 + $0x4c] ss:$12 sps:$4 sm:$0xff]   ;;  %v14636_v19 = vld [vmem:[%s22268_s1 + $0x34] ss:$12 sps:$4 sm:$0xff]  }
  0x11   : > { %1086 = vmatpush1.bf16.msra.mxu0 %v14614_v3  ;;  %v14635_v16 = vld [vmem:[%s22268_s1 + $0x1e0] ss:$12 sps:$4 sm:$0xff]   ;;  %v14641_v20 = vld [vmem:[%s22268_s1 + $0x1c8] ss:$12 sps:$4 sm:$0xff]   ;;  %v14638_v21 = vld [vmem:[%s22268_s1 + $0x30] ss:$12 sps:$4 sm:$0xff]  }
  0x12   : > { %1087 = vmatprep.subr.bf16.mxu0 %v14618_v6  ;;  %1339 = vmatpush1.bf16.msra.mxu1 %v14623_v8  ;;  %v14639_v18 = vld [vmem:[%s22268_s1 + $0x1cc] ss:$12 sps:$4 sm:$0xff]   ;;  %v14645_v22 = vld [vmem:[%s22268_s1 + $0x1b4] ss:$12 sps:$4 sm:$0xff]   ;;  %v14642_v23 = vld [vmem:[%s22268_s1 + $0x1c] ss:$12 sps:$4 sm:$0xff]  }
  0x13   : > { %1340 = vmatprep.subr.bf16.mxu1 %v14627_v11  ;;  %p161_p3 = scmp.lt.s32.totalorder %s12344_s13, 1  ;;  %v14647_v24 = vld [vmem:[%s22268_s1 + $0x1b0] ss:$12 sps:$4 sm:$0xff]   ;;  %v14644_v25 = vld [vmem:[%s22268_s1 + $0x18] ss:$12 sps:$4 sm:$0xff]   ;;  %vm1073_vm0 = vcmask 1043456  }
  0x14   : > { %v14651_v26 = vld [vmem:[%s22268_s1 + $0x19c] ss:$12 sps:$4 sm:$0xff]   ;;  %v14648_v27 = vld [vmem:[%s22268_s1 + $0x4] ss:$12 sps:$4 sm:$0xff]   ;;  %v14650_v28 = vld [vmem:[%s22268_s1] ss:$12 sps:$4 sm:$0xff]  }
  0x15   : > { %1088 = vmatpush1.bf16.msra.mxu0 %v14620_v9  ;;  %s22762_s13 = smov (!%p161_p3, %s12344_s13), 1  ;;  %v14653_v29 = vld [vmem:[%s22268_s1 + $0x198] ss:$12 sps:$4 sm:$0xff]   ;;  %v14659_v33 = vld [vmem:[%s22268_s1 + $0x180] ss:$12 sps:$4 sm:$0xff]   ;;  %vm1006_vm1 = vcmask 588800  }
  0x16   : > { %1089 = vmatprep.subr.bf16.mxu0 %v14624_v10  ;;  %1341 = vmatpush1.bf16.msra.mxu1 %v14629_v12  ;;  %v14654_v30 = vld [vmem:[%s22268_s1 + $0x16c] ss:$12 sps:$4 sm:$0xff]   ;;  %v14657_v31 = vld [vmem:[%s22268_s1 + $0x184] ss:$12 sps:$4 sm:$0xff]   ;;  %s14595_s30 = smul.u32 4224, %s22762_s13  ;;  %v22271_v6 = vmov 0  }
  0x17   : > { %1342 = vmatprep.subr.bf16.mxu1 %v14633_v14  ;;  %v548_v32 = vld [vmem:[%s22268_s1 + $0x2a0] sm:$0xff]  ;;  %v14656_v34 = vld [vmem:[%s22268_s1 + $0x168] ss:$12 sps:$4 sm:$0xff]   ;;  %v14662_v38 = vld [vmem:[%s22268_s1 + $0x150] ss:$12 sps:$4 sm:$0xff]   ;;  %vm2534_vm2 = vcmask 1040384  }
  0x18   : > { %v12436_v35 = vcombine.high %v548_v32, %v548_v32  ;;  %v12435_v36 = vcombine.low %v548_v32, %v548_v32  ;;  %v14660_v37 = vld [vmem:[%s22268_s1 + $0x154] ss:$12 sps:$4 sm:$0xff]   ;;  %s15591_s14 = scalar_lea.vmem %s22267_s0, %s14595_s30  ;;  %v14668_v40 = vld [vmem:[%s22268_s1 + $0x28c] ss:$12 sps:$4 sm:$0xff]   ;;  %v14665_v41 = vld [vmem:[%s22268_s1 + $0x13c] ss:$12 sps:$4 sm:$0xff]  }
  0x19   : > { %1090 = vmatpush1.bf16.msra.mxu0 %v14626_v13  ;;  %v175_v42 = vld [vmem:[%s15591_s14 + $0x18] sm:$0xff]  ;;  %v14670_v46 = vld [vmem:[%s22268_s1 + $0x288] ss:$12 sps:$4 sm:$0xff]   ;;  %v14671_v50 = vld [vmem:[%s22268_s1 + $0x124] ss:$12 sps:$4 sm:$0xff]   ;;  %vm2537_vm4 = vcmask 1044484  }
  0x1a   : > { %1091 = vmatprep.subr.bf16.mxu0 %v14630_v15  ;;  %1343 = vmatpush1.bf16.msra.mxu1 %v14635_v16  ;;  %v1075_v39 = vsel %vm1073_vm0, %v12435_v36, 0  ;;  %v179_v43 = vld [vmem:[%s15591_s14 + $0x38] sm:$0xff]  ;;  %v14674_v47 = vld [vmem:[%s22268_s1 + $0x274] ss:$12 sps:$4 sm:$0xff]   ;;  %v173_v48 = vld [vmem:[%s15591_s14 + $0x8] sm:$0xff]  ;;  %vm2448_vm9 = vcmask 109568  }
  0x1b   : > { %1344 = vmatprep.subr.bf16.mxu1 %v14639_v18  ;;  %v15606_v44 = vpack.c.bf16 %v179_v43, %v175_v42  ;;  %v14667_v45 = vld [vmem:[%s22268_s1 + $0x138] ss:$12 sps:$4 sm:$0xff]   ;;  %v177_v49 = vld [vmem:[%s15591_s14 + $0x28] sm:$0xff]  ;;  %v14676_v52 = vld [vmem:[%s22268_s1 + $0x270] ss:$12 sps:$4 sm:$0xff]   ;;  %vm3361_vm10 = vcmask 1044480  }
  0x1c   : > { %v15624_v51 = vpack.c.bf16 %v177_v49, %v173_v48  ;;  %v14673_v53 = vld [vmem:[%s22268_s1 + $0x120] ss:$12 sps:$4 sm:$0xff]   ;;  %v14680_v54 = vld [vmem:[%s22268_s1 + $0x25c] ss:$12 sps:$4 sm:$0xff]   ;;  %v14682_v56 = vld [vmem:[%s22268_s1 + $0x258] ss:$12 sps:$4 sm:$0xff]  }
  0x1d   : > { %1092 = vmatpush1.bf16.msra.mxu0 %v14632_v17  ;;  %12439 = vmatprep.mubr.msk.bf16.mxu1 %vm1006_vm1, %v15606_v44  ;;  %v14677_v55 = vld [vmem:[%s22268_s1 + $0x10c] ss:$12 sps:$4 sm:$0xff]   ;;  %v14679_v57 = vld [vmem:[%s22268_s1 + $0x108] ss:$12 sps:$4 sm:$0xff]   ;;  %v14686_v58 = vld [vmem:[%s22268_s1 + $0x244] ss:$12 sps:$4 sm:$0xff]  }
  0x1e   : > { %1093 = vmatprep.subr.bf16.mxu0 %v14636_v19  ;;  %1345 = vmatpush1.bf16.msra.mxu1 %v14641_v20  ;;  %v14683_v59 = vld [vmem:[%s22268_s1 + $0xf4] ss:$12 sps:$4 sm:$0xff]   ;;  %v14685_v63 = vld [vmem:[%s22268_s1 + $0xf0] ss:$12 sps:$4 sm:$0xff]   ;;  %v14691_v5 = vld [vmem:[%s22268_s1 + $0xd8] ss:$12 sps:$4 sm:$0xff]  }
  0x1f   : > { %1346 = vmatprep.subr.bf16.mxu1 %v14645_v22  ;;  %1115 = vmatprep.mubr.bf16.mxu0 %v15624_v51  ;;  %v14688_v60 = vld [vmem:[%s22268_s1 + $0x240] ss:$12 sps:$4 sm:$0xff]   ;;  %v174_v61 = vld [vmem:[%s15591_s14 + $0x10] sm:$0xff]  ;;  %v183_v0 = vld [vmem:[%s15591_s14 + $0x58] sm:$0xff]  ;;  %vm2535_vm3 = vsmask.f32 256 }
  0x20   : > { %v178_v62 = vld [vmem:[%s15591_s14 + $0x30] sm:$0xff]  ;;  %v187_v1 = vld [vmem:[%s15591_s14 + $0x78] sm:$0xff]  ;;  %v14694_v8 = vld [vmem:[%s22268_s1 + $0xc0] ss:$12 sps:$4 sm:$0xff]   ;;  %vm2538_vm5 = vsmask.f32 4352 }
  0x21   : > { %1094 = vmatpush1.bf16.msra.mxu0 %v14638_v21  ;;  %v14689_v2 = vld [vmem:[%s22268_s1 + $0xdc] ss:$12 sps:$4 sm:$0xff]   ;;  %v15664_v3 = vpack.c.bf16 %v178_v62, %v174_v61  ;;  %v15666_v4 = vpack.c.bf16 %v187_v1, %v183_v0  ;;  %v14692_v7 = vld [vmem:[%s22268_s1 + $0xc4] ss:$12 sps:$4 sm:$0xff]   ;;  %vm2536_vm6 = vmand %vm2534_vm2, %vm2535_vm3  ;;  %vm3309_vm11 = vcmask 728064   ;;  %vm15444_vm12 = vmmov 0  }
  0x22   : > { %1095 = vmatprep.subr.bf16.mxu0 %v14642_v23  ;;  %1347 = vmatpush1.bf16.msra.mxu1 %v14647_v24  ;;  %v172_v9 = vld [vmem:[%s15591_s14] sm:$0xff]  ;;  %v182_v10 = vld [vmem:[%s15591_s14 + $0x50] sm:$0xff]  ;;  %v191_v13 = vld [vmem:[%s15591_s14 + $0x98] sm:$0xff]  ;;  %vm2544_vm13 = vcmask 106496   ;;  %s14596_s29 = smul.u32 2448, %s22762_s13  ;;  %vm4119_vm15 = vcmask 113664  }
  0x23   : > { %1348 = vmatprep.subr.bf16.mxu1 %v14651_v26  ;;  %v186_v11 = vld [vmem:[%s15591_s14 + $0x70] sm:$0xff]  ;;  %v176_v12 = vld [vmem:[%s15591_s14 + $0x20] sm:$0xff]  ;;  %v195_v14 = vld [vmem:[%s15591_s14 + $0xb8] sm:$0xff]  ;;  %vm4219_vm2 = vcmask 111616  }
  0x24   : > { %v181_v15 = vld [vmem:[%s15591_s14 + $0x48] sm:$0xff]  ;;  %v15689_v17 = vpack.c.bf16 %v186_v11, %v182_v10  ;;  %v15691_v18 = vpack.c.bf16 %v176_v12, %v172_v9  ;;  %v15693_v19 = vpack.c.bf16 %v195_v14, %v191_v13  ;;  %v180_v21 = vld [vmem:[%s15591_s14 + $0x40] sm:$0xff]  ;;  %v190_v22 = vld [vmem:[%s15591_s14 + $0x90] sm:$0xff]  ;;  %s17134_s8 = scalar_lea.vmem %s22270_s3, %s14596_s29 }
  0x25   : > { %1096 = vmatpush1.bf16.msra.mxu0 %v14644_v25  ;;  %v185_v16 = vld [vmem:[%s15591_s14 + $0x68] sm:$0xff]  ;;  %v194_v23 = vld [vmem:[%s15591_s14 + $0xb0] sm:$0xff]  ;;  %v184_v24 = vld [vmem:[%s15591_s14 + $0x60] sm:$0xff] }
  0x26   : > { %1097 = vmatprep.subr.bf16.mxu0 %v14648_v27  ;;  %1349 = vmatpush1.bf16.msra.mxu1 %v14653_v29  ;;  %v15695_v20 = vpack.c.bf16 %v185_v16, %v181_v15  ;;  %v199_v25 = vld [vmem:[%s15591_s14 + $0xd8] sm:$0xff]  ;;  %v189_v27 = vld [vmem:[%s15591_s14 + $0x88] sm:$0xff]  ;;  %v15711_v29 = vpack.c.bf16 %v194_v23, %v190_v22  ;;  %v202_v36 = vld [vmem:[%s15591_s14 + $0xf0] sm:$0xff] }
  0x27   : > { %1350 = vmatprep.subr.bf16.mxu1 %v14657_v31  ;;  %v203_v26 = vld [vmem:[%s15591_s14 + $0xf8] sm:$0xff]  ;;  %v206_v48 = vld [vmem:[%s15591_s14 + $0x110] sm:$0xff]  ;;  %v204_v0 = vld [vmem:[%s15591_s14 + $0x100] sm:$0xff] }
  0x28   : > { %v15715_v31 = vpack.c.bf16 %v203_v26, %v199_v25  ;;  %v14695_v42 = vld [vmem:[%s22268_s1 + $0xb0] ss:$12 sps:$4 sm:$0xff]   ;;  %v208_v1 = vld [vmem:[%s15591_s14 + $0x120] sm:$0xff]  ;;  %v217_v12 = vld [vmem:[%s15591_s14 + $0x168] sm:$0xff] }
  0x29   : > { %1098 = vmatpush1.bf16.msra.mxu0 %v14650_v28  ;;  %v193_v28 = vld [vmem:[%s15591_s14 + $0xa8] sm:$0xff]  ;;  %v210_v49 = vld [vmem:[%s15591_s14 + $0x130] sm:$0xff]  ;;  %v227_v9 = vld [vmem:[%s15591_s14 + $0x1b8] sm:$0xff]  ;;  %v15802_v14 = vpack.c.bf16 %v208_v1, %v204_v0 }
  0x2a   : > { %1099 = vmatprep.subr.bf16.mxu0 %v14654_v30  ;;  %1351 = vmatpush1.bf16.msra.mxu1 %v14659_v33  ;;  %v15713_v30 = vpack.c.bf16 %v184_v24, %v180_v21  ;;  %v15717_v32 = vpack.c.bf16 %v193_v28, %v189_v27  ;;  %v188_v33 = vld [vmem:[%s15591_s14 + $0x80] sm:$0xff]  ;;  %v14700_v10 = vld [vmem:[%s22268_s1 + $0x50] ss:$12 sps:$4 sm:$0xff]   ;;  %v221_v27 = vld [vmem:[%s15591_s14 + $0x188] sm:$0xff] }
  0x2b   : > { %12438 = vmatprep.subr.msk.bf16.mxu1 %vm1073_vm0, %v12436_v35  ;;  %v198_v35 = vld [vmem:[%s15591_s14 + $0xd0] sm:$0xff]  ;;  %v14702_v11 = vld [vmem:[%s22268_s1 + $0x218] ss:$12 sps:$4 sm:$0xff]   ;;  %v14704_v16 = vld [vmem:[%s22268_s1 + $0x200] ss:$12 sps:$4 sm:$0xff]  }
  0x2c   : > { %v14701_v22 = vld [vmem:[%s22268_s1 + $0x38] ss:$12 sps:$4 sm:$0xff]   ;;  %v222_v23 = vld [vmem:[%s15591_s14 + $0x190] sm:$0xff]  ;;  %v14712_v0 = vld [vmem:[%s22268_s1 + $0x1a0] ss:$12 sps:$4 sm:$0xff]  }
  0x2d   : > { %1100 = vmatpush2.bf16.msra.mxu0 %v14656_v34  ;;  %v192_v34 = vld [vmem:[%s15591_s14 + $0xa0] sm:$0xff]  ;;  %v226_v26 = vld [vmem:[%s15591_s14 + $0x1b0] sm:$0xff]  ;;  %v231_v28 = vld [vmem:[%s15591_s14 + $0x1d8] sm:$0xff] }
  0x2e   : > { %1101 = vmatprep.subr.bf16.mxu0 %v14660_v37  ;;  %1359 = vmatpush2.bf16.msra.mxu1 %v1075_v39  ;;  %v197_v37 = vld [vmem:[%s15591_s14 + $0xc8] sm:$0xff]  ;;  %v211_v39 = vld [vmem:[%s15591_s14 + $0x138] sm:$0xff]  ;;  %v15737_v43 = vpack.c.bf16 %v192_v34, %v188_v33  ;;  %v212_v24 = vld [vmem:[%s15591_s14 + $0x140] sm:$0xff] }
  0x2f   : > { %1360 = vmatprep.subr.bf16.mxu1 %v14668_v40  ;;  %v201_v40 = vld [vmem:[%s15591_s14 + $0xe8] sm:$0xff]  ;;  %v216_v25 = vld [vmem:[%s15591_s14 + $0x160] sm:$0xff]  ;;  %v235_v33 = vld [vmem:[%s15591_s14 + $0x1f8] sm:$0xff] }
  0x30   : > { %v14706_v34 = vld [vmem:[%s22268_s1 + $0x1e8] ss:$12 sps:$4 sm:$0xff]   ;;  %vm2539_vm7 = vmand %vm2537_vm4, %vm2538_vm5 }
  0x31   : > { %1102 = vmatpush2.bf16.msra.mxu0 %v14662_v38  ;;  %v207_v38 = vld [vmem:[%s15591_s14 + $0x118] sm:$0xff]  ;;  %vm16580_vm8 = vmor %vm2539_vm7, %vm2536_vm6 }
  0x32   : > { %1103 = vmatprep.subr.bf16.mxu0 %v14665_v41  ;;  %1361 = vmatpush2.bf16.msra.mxu1 %v14670_v46  ;;  %v15732_v41 = vpack.c.bf16 %v202_v36, %v198_v35  ;;  %v15741_v46 = vpack.c.bf16 %v201_v40, %v197_v37  ;;  %v14703_v35 = vld [vmem:[%s22268_s1 + $0x20] ss:$12 sps:$4 sm:$0xff]   ;;  %v15837_v37 = vpack.c.bf16 %v226_v26, %v222_v23  ;;  %v251_v23 = vld [vmem:[%s15591_s14 + $0x278] sm:$0xff]  ;;  %vm16886_vm14 = vmand %vm2544_vm13, %vm2535_vm3 }
  0x33   : > { %1362 = vmatprep.subr.bf16.mxu1 %v14674_v47  ;;  %v14696_v47 = vld [vmem:[%s22268_s1 + $0x98] ss:$12 sps:$4 sm:$0xff]   ;;  %v225_v36 = vld [vmem:[%s15591_s14 + $0x1a8] sm:$0xff]  ;;  %v15844_v40 = vpack.c.bf16 %v235_v33, %v231_v28 }
  0x34   : > { %v241_v26 = vld [vmem:[%s15591_s14 + $0x228] sm:$0xff] }
  0x35   : > { %1104 = vmatpush2.bf16.msra.mxu0 %v14667_v45  ;;  %v15739_v45 = vpack.c.bf16 %v211_v39, %v207_v38  ;;  %v14708_v38 = vld [vmem:[%s22268_s1 + $0x1d0] ss:$12 sps:$4 sm:$0xff]   ;;  %v15842_v39 = vpack.c.bf16 %v216_v25, %v212_v24  ;;  %v14711_v24 = vld [vmem:[%s22268_s1 + $0x140] ss:$12 sps:$4 sm:$0xff]  }
  0x36   : > { %1105 = vmatprep.subr.bf16.mxu0 %v14671_v50  ;;  %1363 = vmatpush2.bf16.msra.mxu1 %v14676_v52  ;;  %v196_v50 = vld [vmem:[%s15591_s14 + $0xc0] sm:$0xff]  ;;  %v237_v25 = vld [vmem:[%s15591_s14 + $0x208] sm:$0xff] }
  0x37   : > { %1364 = vmatprep.subr.bf16.mxu1 %v14680_v54  ;;  %v200_v52 = vld [vmem:[%s15591_s14 + $0xe0] sm:$0xff]  ;;  %v14698_v54 = vld [vmem:[%s22268_s1 + $0x230] ss:$12 sps:$4 sm:$0xff]  }
  0x39   : > { %1106 = vmatpush2.bf16.msra.mxu0 %v14673_v53  ;;  %v215_v53 = vld [vmem:[%s15591_s14 + $0x158] sm:$0xff] }
  0x3a   : > { %1107 = vmatprep.subr.bf16.mxu0 %v14677_v55  ;;  %1365 = vmatpush2.bf16.msra.mxu1 %v14682_v56  ;;  %v219_v55 = vld [vmem:[%s15591_s14 + $0x178] sm:$0xff]  ;;  %v14697_v56 = vld [vmem:[%s22268_s1 + $0x80] ss:$12 sps:$4 sm:$0xff]  }
  0x3b   : > { %1366 = vmatprep.subr.bf16.mxu1 %v14686_v58  ;;  %v209_v58 = vld [vmem:[%s15591_s14 + $0x128] sm:$0xff]  ;;  %v15772_v61 = vpack.c.bf16 %v219_v55, %v215_v53  ;;  %v14710_v53 = vld [vmem:[%s22268_s1 + $0x1b8] ss:$12 sps:$4 sm:$0xff]  }
  0x3c   : > { %v239_v55 = vld [vmem:[%s15591_s14 + $0x218] sm:$0xff] }
  0x3d   : > { %1108 = vmatpush2.bf16.msra.mxu0 %v14679_v57  ;;  %v205_v57 = vld [vmem:[%s15591_s14 + $0x108] sm:$0xff] }
  0x3e   : > { %1109 = vmatprep.subr.bf16.mxu0 %v14683_v59  ;;  %1367 = vmatpush2.bf16.msra.mxu1 %v14688_v60  ;;  %v15767_v59 = vpack.c.bf16 %v210_v49, %v206_v48  ;;  %v15770_v60 = vpack.c.bf16 %v200_v52, %v196_v50  ;;  %v15774_v62 = vpack.c.bf16 %v209_v58, %v205_v57  ;;  %v230_v48 = vld [vmem:[%s15591_s14 + $0x1d0] sm:$0xff]  ;;  %v220_v49 = vld [vmem:[%s15591_s14 + $0x180] sm:$0xff]  ;;  %v233_v58 = vld [vmem:[%s15591_s14 + $0x1e8] sm:$0xff] }
  0x3f   : > { %1589 = vmatprep.subr.bf16.mxu1 %v22271_v6  ;;  %v224_v50 = vld [vmem:[%s15591_s14 + $0x1a0] sm:$0xff]  ;;  %v234_v52 = vld [vmem:[%s15591_s14 + $0x1f0] sm:$0xff] }
  0x40   : > { %v14707_v57 = vld [vmem:[%s22268_s1 + $0x170] ss:$12 sps:$4 sm:$0xff]   ;;  %v15879_v1 = vpack.c.bf16 %v224_v50, %v220_v49  ;;  %v240_v49 = vld [vmem:[%s15591_s14 + $0x220] sm:$0xff] }
  0x41   : > { %1110 = vmatpush2.bf16.msra.mxu0 %v14685_v63  ;;  %1369 = vmatmul.mubr.bf16.vlgmr.msra.gmra.mxu1 %v15664_v3  ;;  %v14699_v63 = vld [vmem:[%s22268_s1 + $0x68] ss:$12 sps:$4 sm:$0xff]   ;;  %v14718_v50 = vld [vmem:[%s22268_s1 + $0x290] ss:$12 sps:$4 sm:$0xff]  }
  0x42   : > { %1111 = vmatprep.subr.bf16.mxu0 %v14689_v2  ;;  %12440 = vmatprep.mubr.msk.bf16.mxu1 %vm1006_vm1, %v15666_v4  ;;  %v214_v2 = vld [vmem:[%s15591_s14 + $0x150] sm:$0xff] }
  0x43   : > { %1590 = vmatpush1.bf16.msra.mxu1 %v14695_v42  ;;  %v15847_v42 = vpack.c.bf16 %v225_v36, %v221_v27  ;;  %v14713_v36 = vld [vmem:[%s22268_s1 + $0x128] ss:$12 sps:$4 sm:$0xff]  }
  0x44   : > { %1591 = vmatprep.subr.bf16.mxu1 %v22271_v6 }
  0x45   : > { %1112 = vmatpush2.bf16.msra.mxu0 %v14691_v5  ;;  %v218_v5 = vld [vmem:[%s15591_s14 + $0x170] sm:$0xff] }
  0x46   : > { %1113 = vmatprep.subr.bf16.mxu0 %v14692_v7  ;;  %v213_v7 = vld [vmem:[%s15591_s14 + $0x148] sm:$0xff]  ;;  %v15800_v13 = vpack.c.bf16 %v218_v5, %v214_v2 }
  0x47   : > { %1592 = vmatpush1.bf16.msra.mxu1 %v14696_v47  ;;  %v15810_v21 = vpack.c.bf16 %v217_v12, %v213_v7  ;;  %v14705_v47 = vld [vmem:[%s22268_s1 + $0x8] ss:$12 sps:$4 sm:$0xff]   ;;  %v14709_v7 = vld [vmem:[%s22268_s1 + $0x158] ss:$12 sps:$4 sm:$0xff]  }
  0x48   : > { %1593 = vmatprep.subr.bf16.mxu1 %v22271_v6  ;;  %v14714_v12 = vld [vmem:[%s22268_s1 + $0x188] ss:$12 sps:$4 sm:$0xff]  }
  0x49   : > { %1114 = vmatpush2.bf16.msra.mxu0 %v14694_v8  ;;  %1379 = vmatmul.mubr.bf16.gmra.mxu1 %v15689_v17  ;;  %v223_v8 = vld [vmem:[%s15591_s14 + $0x198] sm:$0xff] }
  0x4a   : > { %1798 = vmatprep.subr.bf16.mxu0 %v22271_v6  ;;  %12441 = vmatprep.mubr.msk.bf16.mxu1 %vm1006_vm1, %v15693_v19  ;;  %v15804_v15 = vpack.c.bf16 %v227_v9, %v223_v8  ;;  %v238_v8 = vld [vmem:[%s15591_s14 + $0x210] sm:$0xff]  ;;  %v228_v9 = vld [vmem:[%s15591_s14 + $0x1c0] sm:$0xff] }
  0x4b   : > { %1594 = vmatpush1.bf16.msra.mxu1 %v14697_v56  ;;  %v243_v56 = vld [vmem:[%s15591_s14 + $0x238] sm:$0xff] }
  0x4c   : > { %1116 = vmatmul.mubr.bf16.vlgmr.msra.gmra.mxu0 %v15691_v18  ;;  %1595 = vmatprep.subr.bf16.mxu1 %v22271_v6  ;;  %v15881_v2 = vpack.c.bf16 %v243_v56, %v239_v55  ;;  %v259_v55 = vld [vmem:[%s15591_s14 + $0x2b8] sm:$0xff] }
  0x4d   : > { %1125 = vmatprep.mubr.bf16.mxu0 %v15695_v20  ;;  %1799 = vmatpush1.bf16.msra.mxu0 %v14698_v54  ;;  %v229_v54 = vld [vmem:[%s15591_s14 + $0x1c8] sm:$0xff]  ;;  %v14715_v56 = vld [vmem:[%s22268_s1 + $0x110] ss:$12 sps:$4 sm:$0xff]  }
  0x4e   : > { %1800 = vmatprep.subr.bf16.mxu0 %v22271_v6  ;;  %v15884_v5 = vpack.c.bf16 %v233_v58, %v229_v54  ;;  %v255_v54 = vld [vmem:[%s15591_s14 + $0x298] sm:$0xff] }
  0x4f   : > { %1596 = vmatpush1.bf16.msra.mxu1 %v14699_v63  ;;  %v15874_v63 = vpack.c.bf16 %v234_v52, %v230_v48  ;;  %v236_v48 = vld [vmem:[%s15591_s14 + $0x200] sm:$0xff]  ;;  %v245_v52 = vld [vmem:[%s15591_s14 + $0x248] sm:$0xff] }
  0x50   : > { %1597 = vmatprep.subr.bf16.mxu1 %v22271_v6 }
  0x51   : > { %1389 = vmatmul.mubr.bf16.gmra.mxu1 %v15711_v29  ;;  %1801 = vmatpush1.bf16.msra.mxu0 %v14702_v11  ;;  %v242_v11 = vld [vmem:[%s15591_s14 + $0x230] sm:$0xff] }
  0x52   : > { %12442 = vmatprep.mubr.msk.bf16.mxu1 %vm1006_vm1, %v15715_v31  ;;  %1802 = vmatprep.subr.bf16.mxu0 %v22271_v6  ;;  %v15914_v27 = vpack.c.bf16 %v242_v11, %v238_v8  ;;  %v15959_v8 = vpack.c.bf16 %v259_v55, %v255_v54  ;;  %v254_v11 = vld [vmem:[%s15591_s14 + $0x290] sm:$0xff]  ;;  %v252_v54 = vld [vmem:[%s15591_s14 + $0x280] sm:$0xff] }
  0x53   : > { %1598 = vmatpush1.bf16.msra.mxu1 %v14700_v10  ;;  %v232_v10 = vld [vmem:[%s15591_s14 + $0x1e0] sm:$0xff] }
  0x54   : > { %1126 = vmatmul.mubr.bf16.gmra.mxu0 %v15713_v30  ;;  %1599 = vmatprep.subr.bf16.mxu1 %v22271_v6  ;;  %v15916_v28 = vpack.c.bf16 %v232_v10, %v228_v9  ;;  %v14722_v10 = vld [vmem:[%s22268_s1 + $0x260] ss:$12 sps:$4 sm:$0xff]  }
  0x55   : > { %1135 = vmatprep.mubr.bf16.mxu0 %v15717_v32  ;;  %1803 = vmatpush1.bf16.msra.mxu0 %v14704_v16  ;;  %v247_v16 = vld [vmem:[%s15591_s14 + $0x258] sm:$0xff]  ;;  %v256_v55 = vld [vmem:[%s15591_s14 + $0x2a0] sm:$0xff] }
  0x56   : > { %1804 = vmatprep.subr.bf16.mxu0 %v22271_v6  ;;  %v15918_v33 = vpack.c.bf16 %v251_v23, %v247_v16  ;;  %v244_v16 = vld [vmem:[%s15591_s14 + $0x240] sm:$0xff]  ;;  %v263_v23 = vld [vmem:[%s15591_s14 + $0x2d8] sm:$0xff] }
  0x57   : > { %1600 = vmatpush1.bf16.msra.mxu1 %v14701_v22  ;;  %v14716_v22 = vld [vmem:[%s22268_s1 + $0x2a8] ss:$0 sps:$4 sm:$0xff]  }
  0x58   : > { %1601 = vmatprep.subr.bf16.mxu1 %v22271_v6 }
  0x59   : > { %1399 = vmatmul.mubr.bf16.gmra.mxu1 %v15732_v41  ;;  %1805 = vmatpush1.bf16.msra.mxu0 %v14706_v34  ;;  %v1081_v34 = vsel %vm1073_vm0, %v14716_v22, 0  ;;  %v248_v22 = vld [vmem:[%s15591_s14 + $0x260] sm:$0xff] }
  0x5a   : > { %12443 = vmatprep.mubr.msk.bf16.mxu1 %vm1006_vm1, %v15739_v45  ;;  %1806 = vmatprep.subr.bf16.mxu0 %v22271_v6 }
  0x5b   : > { %1602 = vmatpush1.bf16.msra.mxu1 %v14703_v35  ;;  %v15922_v35 = vpack.c.bf16 %v241_v26, %v237_v25  ;;  %v14719_v25 = vld [vmem:[%s22268_s1 + $0xe0] ss:$12 sps:$4 sm:$0xff]  }
  0x5c   : > { %1136 = vmatmul.mubr.bf16.gmra.mxu0 %v15737_v43  ;;  %1603 = vmatprep.subr.bf16.mxu1 %v22271_v6  ;;  %v253_v26 = vld [vmem:[%s15591_s14 + $0x288] sm:$0xff] }
  0x5d   : > { %1145 = vmatprep.mubr.bf16.mxu0 %v15741_v46  ;;  %1807 = vmatpush1.bf16.msra.mxu0 %v14708_v38  ;;  %v246_v38 = vld [vmem:[%s15591_s14 + $0x250] sm:$0xff] }
  0x5e   : > { %1808 = vmatprep.subr.bf16.mxu0 %v22271_v6 }
  0x5f   : > { %1604 = vmatpush1.bf16.msra.mxu1 %v14705_v47  ;;  %v250_v47 = vld [vmem:[%s15591_s14 + $0x270] sm:$0xff] }
  0x60   : > { %1605 = vmatprep.subr.bf16.mxu1 %v22271_v6  ;;  %v15952_v58 = vpack.c.bf16 %v250_v47, %v246_v38  ;;  %v14721_v47 = vld [vmem:[%s22268_s1 + $0xc8] ss:$12 sps:$4 sm:$0xff]  }
  0x61   : > { %1409 = vmatmul.mubr.bf16.gmra.mxu1 %v15767_v59  ;;  %1809 = vmatpush1.bf16.msra.mxu0 %v14710_v53  ;;  %v249_v53 = vld [vmem:[%s15591_s14 + $0x268] sm:$0xff] }
  0x62   : > { %12444 = vmatprep.mubr.msk.bf16.mxu1 %vm1006_vm1, %v15772_v61  ;;  %1810 = vmatprep.subr.bf16.mxu0 %v22271_v6  ;;  %v15962_v9 = vpack.c.bf16 %v249_v53, %v245_v52  ;;  %v262_v52 = vld [vmem:[%s15591_s14 + $0x2d0] sm:$0xff] }
  0x63   : > { %1606 = vmatpush2.bf16.msra.mxu1 %v14707_v57  ;;  %v14720_v57 = vld [vmem:[%s22268_s1 + $0x278] ss:$12 sps:$4 sm:$0xff]   ;;  %v266_v53 = vld [vmem:[%s15591_s14 + $0x2f0] sm:$0xff] }
  0x64   : > { %1146 = vmatmul.mubr.bf16.gmra.mxu0 %v15770_v60  ;;  %1607 = vmatprep.subr.bf16.mxu1 %v22271_v6 }
  0x65   : > { %1155 = vmatprep.mubr.bf16.mxu0 %v15774_v62  ;;  %1811 = vmatpush1.bf16.msra.mxu0 %v14712_v0  ;;  %v14717_v0 = vld [vmem:[%s22268_s1 + $0xf8] ss:$12 sps:$4 sm:$0xff]  }
  0x66   : > { %1812 = vmatprep.subr.bf16.mxu0 %v22271_v6 }
  0x67   : > { %1608 = vmatpush2.bf16.msra.mxu1 %v14709_v7  ;;  %v15957_v7 = vpack.c.bf16 %v240_v49, %v236_v48  ;;  %v15994_v48 = vpack.c.bf16 %v248_v22, %v244_v16 }
  0x68   : > { %1609 = vmatprep.subr.bf16.mxu1 %v22271_v6 }
  0x69   : > { %1419 = vmatmul.mubr.bf16.gmra.mxu1 %v15800_v13  ;;  %1813 = vmatpush1.bf16.msra.mxu0 %v14714_v12  ;;  %v258_v12 = vld [vmem:[%s15591_s14 + $0x2b0] sm:$0xff] }
  0x6a   : > { %12445 = vmatprep.mubr.msk.bf16.mxu1 %vm1006_vm1, %v15804_v15  ;;  %1820 = vmatprep.subr.bf16.mxu0 %v22271_v6  ;;  %v15989_v38 = vpack.c.bf16 %v258_v12, %v254_v11  ;;  %v16015_v11 = vpack.c.bf16 %v266_v53, %v262_v52  ;;  %v16017_v12 = vpack.c.bf16 %v256_v55, %v252_v54  ;;  %v273_v52 = vld [vmem:[%s15591_s14 + $0x328] sm:$0xff] }
  0x6b   : > { %1610 = vmatpush2.bf16.msra.mxu1 %v14711_v24  ;;  %v267_v24 = vld [vmem:[%s15591_s14 + $0x2f8] sm:$0xff] }
  0x6c   : > { %1156 = vmatmul.mubr.bf16.gmra.mxu0 %v15802_v14  ;;  %1611 = vmatprep.subr.bf16.mxu1 %v22271_v6  ;;  %v15996_v49 = vpack.c.bf16 %v267_v24, %v263_v23  ;;  %22423 = vst [vmem:[#allocation4_spill] sm:$0xff] %v16015_v11  ;;  %v270_v23 = vld [vmem:[%s15591_s14 + $0x310] sm:$0xff] }
  0x6d   : > { %1165 = vmatprep.mubr.bf16.mxu0 %v15810_v21  ;;  %1821 = vmatpush2.bf16.msra.mxu0 %v1081_v34  ;;  %v257_v34 = vld [vmem:[%s15591_s14 + $0x2a8] sm:$0xff]  ;;  %v274_v24 = vld [vmem:[%s15591_s14 + $0x330] sm:$0xff] }
  0x6e   : > { %1822 = vmatprep.subr.bf16.mxu0 %v22271_v6  ;;  %22422 = vst [vmem:[#allocation3_spill] sm:$0xff] %v15996_v49  ;;  %v16036_v53 = vpack.c.bf16 %v274_v24, %v270_v23  ;;  %v291_v23 = vld [vmem:[%s15591_s14 + $0x3b8] sm:$0xff]  ;;  %v277_v24 = vld [vmem:[%s15591_s14 + $0x348] sm:$0xff] }
  0x6f   : > { %1612 = vmatpush2.bf16.msra.mxu1 %v14713_v36  ;;  %v14723_v36 = vld [vmem:[%s22268_s1 + $0x248] ss:$12 sps:$4 sm:$0xff]  }
  0x70   : > { %1613 = vmatprep.subr.bf16.mxu1 %v22271_v6  ;;  %22425 = vst [vmem:[#allocation6_spill] sm:$0xff] %v16036_v53 }
  0x71   : > { %1429 = vmatmul.mubr.bf16.gmra.mxu1 %v15837_v37  ;;  %1823 = vmatpush2.bf16.msra.mxu0 %v14718_v50  ;;  %v15999_v50 = vpack.c.bf16 %v257_v34, %v253_v26  ;;  %v264_v26 = vld [vmem:[%s15591_s14 + $0x2e0] sm:$0xff]  ;;  %v279_v34 = vld [vmem:[%s15591_s14 + $0x358] sm:$0xff] }
  0x72   : > { %12446 = vmatprep.mubr.msk.bf16.mxu1 %vm1006_vm1, %v15844_v40  ;;  %1824 = vmatprep.subr.bf16.mxu0 %v22271_v6 }
  0x73   : > { %1614 = vmatpush2.bf16.msra.mxu1 %v14715_v56  ;;  %v271_v56 = vld [vmem:[%s15591_s14 + $0x318] sm:$0xff] }
  0x74   : > { %1166 = vmatmul.mubr.bf16.gmra.mxu0 %v15842_v39  ;;  %1615 = vmatprep.subr.bf16.mxu1 %v22271_v6 }
  0x75   : > { %1175 = vmatprep.mubr.bf16.mxu0 %v15847_v42  ;;  %1825 = vmatpush2.bf16.msra.mxu0 %v14720_v57  ;;  %v275_v57 = vld [vmem:[%s15591_s14 + $0x338] sm:$0xff] }
  0x76   : > { %1826 = vmatprep.subr.bf16.mxu0 %v22271_v6  ;;  %v16019_v16 = vpack.c.bf16 %v275_v57, %v271_v56  ;;  %v278_v57 = vld [vmem:[%s15591_s14 + $0x350] sm:$0xff] }
  0x77   : > { %1616 = vmatpush2.bf16.msra.mxu1 %v14717_v0  ;;  %v261_v0 = vld [vmem:[%s15591_s14 + $0x2c8] sm:$0xff] }
  0x78   : > { %1617 = vmatprep.subr.bf16.mxu1 %v22271_v6  ;;  %22424 = vst [vmem:[#allocation5_spill] sm:$0xff] %v16019_v16 }
  0x79   : > { %1439 = vmatmul.mubr.bf16.gmra.mxu1 %v15874_v63  ;;  %1827 = vmatpush2.bf16.msra.mxu0 %v14722_v10  ;;  %v265_v10 = vld [vmem:[%s15591_s14 + $0x2e8] sm:$0xff] }
  0x7a   : > { %12447 = vmatprep.mubr.msk.bf16.mxu1 %vm1006_vm1, %v15881_v2  ;;  %1828 = vmatprep.subr.bf16.mxu0 %v22271_v6  ;;  %v16021_v22 = vpack.c.bf16 %v265_v10, %v261_v0  ;;  %v282_v0 = vld [vmem:[%s15591_s14 + $0x370] sm:$0xff]  ;;  %v268_v10 = vld [vmem:[%s15591_s14 + $0x300] sm:$0xff] }
  0x7b   : > { %1618 = vmatpush2.bf16.msra.mxu1 %v14719_v25  ;;  %v260_v25 = vld [vmem:[%s15591_s14 + $0x2c0] sm:$0xff] }
  0x7c   : > { %1176 = vmatmul.mubr.bf16.gmra.mxu0 %v15879_v1  ;;  %1619 = vmatprep.subr.bf16.mxu1 %v22271_v6  ;;  %v16038_v54 = vpack.c.bf16 %v264_v26, %v260_v25  ;;  %v272_v6 = vld [vmem:[%s15591_s14 + $0x320] sm:$0xff]  ;;  %v281_v25 = vld [vmem:[%s15591_s14 + $0x368] sm:$0xff]  ;;  %v16057_v26 = vpack.c.bf16 %v282_v0, %v278_v57  ;;  %v299_v57 = vld [vmem:[%s15591_s14 + $0x3f8] sm:$0xff] }
  0x7d   : > { %1185 = vmatprep.mubr.bf16.mxu0 %v15884_v5  ;;  %1829 = vmatpush2.bf16.msra.mxu0 %v14723_v36  ;;  %v283_v36 = vld [vmem:[%s15591_s14 + $0x378] sm:$0xff] }
  0x7e   : > { %v16040_v55 = vpack.c.bf16 %v283_v36, %v279_v34  ;;  %22428 = vst [vmem:[#allocation9_spill] sm:$0xff] %v16057_v26  ;;  %v16059_v34 = vpack.c.bf16 %v272_v6, %v268_v10  ;;  %v285_v6 = vld [vmem:[%s15591_s14 + $0x388] sm:$0xff] }
  0x7f   : > { %1620 = vmatpush2.bf16.msra.mxu1 %v14721_v47  ;;  %v269_v47 = vld [vmem:[%s15591_s14 + $0x308] sm:$0xff] }
  0x80   : > { %22426 = vst [vmem:[#allocation7_spill] sm:$0xff] %v16040_v55  ;;  %v16042_v56 = vpack.c.bf16 %v273_v52, %v269_v47  ;;  %22429 = vst [vmem:[#allocation10_spill] sm:$0xff] %v16059_v34  ;;  %v16063_v47 = vpack.c.bf16 %v281_v25, %v277_v24  ;;  %v286_v52 = vld [vmem:[%s15591_s14 + $0x390] sm:$0xff] }
  0x81   : > { %1449 = vmatmul.mubr.bf16.gmra.mxu1 %v15914_v27  ;;  %v294_v25 = vld [vmem:[%s15591_s14 + $0x3d0] sm:$0xff] }
  0x82   : > { %12448 = vmatprep.mubr.msk.bf16.mxu1 %vm1006_vm1, %v15918_v33  ;;  %22427 = vst [vmem:[#allocation8_spill] sm:$0xff] %v16042_v56  ;;  %22431 = vst [vmem:[#allocation12_spill] sm:$0xff] %v16063_v47 }
  0x84   : > { %1186 = vmatmul.mubr.bf16.gmra.mxu0 %v15916_v28 }
  0x85   : > { %1195 = vmatprep.mubr.bf16.mxu0 %v15922_v35 }
  0x89   : > { %1459 = vmatmul.mubr.bf16.gmra.mxu1 %v15952_v58 }
  0x8a   : > { %12449 = vmatprep.mubr.msk.bf16.mxu1 %vm1006_vm1, %v15959_v8 }
  0x8c   : > { %1196 = vmatmul.mubr.bf16.gmra.mxu0 %v15957_v7 }
  0x8d   : > { %1205 = vmatprep.mubr.bf16.mxu0 %v15962_v9 }
  0x91   : > { %1469 = vmatmul.mubr.bf16.gmra.mxu1 %v15989_v38 }
  0x92   : > { %12450 = vmatprep.mubr.msk.bf16.mxu1 %vm1006_vm1, %v15996_v49  ;;  %v295_v49 = vld [vmem:[%s15591_s14 + $0x3d8] sm:$0xff] }
  0x94   : > { %1206 = vmatmul.mubr.bf16.gmra.mxu0 %v15994_v48 }
  0x95   : > { %1215 = vmatprep.mubr.bf16.mxu0 %v15999_v50 }
  0x99   : > { %1479 = vmatmul.mubr.bf16.gmra.mxu1 %v16015_v11  ;;  %v280_v11 = vld [vmem:[%s15591_s14 + $0x360] sm:$0xff] }
  0x9a   : > { %12451 = vmatprep.mubr.msk.bf16.mxu1 %vm1006_vm1, %v16019_v16  ;;  %v287_v16 = vld [vmem:[%s15591_s14 + $0x398] sm:$0xff] }
  0x9b   : > { %v16061_v36 = vpack.c.bf16 %v291_v23, %v287_v16  ;;  %v289_v16 = vld [vmem:[%s15591_s14 + $0x3a8] sm:$0xff]  ;;  %v16082_v23 = vpack.c.bf16 %v299_v57, %v295_v49 }
  0x9c   : > { %1216 = vmatmul.mubr.bf16.gmra.mxu0 %v16017_v12  ;;  %v16084_v24 = vpack.c.bf16 %v289_v16, %v285_v6  ;;  %v293_v49 = vld [vmem:[%s15591_s14 + $0x3c8] sm:$0xff]  ;;  %v302_v16 = vld [vmem:[%s15591_s14 + $0x410] sm:$0xff] }
  0x9d   : > { %1225 = vmatprep.mubr.bf16.mxu0 %v16021_v22  ;;  %22430 = vst [vmem:[#allocation11_spill] sm:$0xff] %v16061_v36  ;;  %22434 = vst [vmem:[#allocation15_spill] sm:$0xff] %v16082_v23 }
  0x9e   : > { %22435 = vst [vmem:[#allocation16_spill] sm:$0xff] %v16084_v24 }
  0xa1   : > { %1489 = vmatmul.mubr.bf16.gmra.mxu1 %v16036_v53  ;;  %v290_v53 = vld [vmem:[%s15591_s14 + $0x3b0] sm:$0xff] }
  0xa2   : > { %12452 = vmatprep.mubr.msk.bf16.mxu1 %vm1006_vm1, %v16040_v55  ;;  %v276_v55 = vld [vmem:[%s15591_s14 + $0x340] sm:$0xff]  ;;  %v16078_v0 = vpack.c.bf16 %v290_v53, %v286_v52  ;;  %v307_v53 = vld [vmem:[%s15591_s14 + $0x438] sm:$0xff] }
  0xa3   : > { %v16080_v10 = vpack.c.bf16 %v280_v11, %v276_v55  ;;  %v297_v11 = vld [vmem:[%s15591_s14 + $0x3e8] sm:$0xff] }
  0xa4   : > { %1226 = vmatmul.mubr.bf16.gmra.mxu0 %v16038_v54  ;;  %22432 = vst [vmem:[#allocation13_spill] sm:$0xff] %v16078_v0  ;;  %v16105_v6 = vpack.c.bf16 %v297_v11, %v293_v49  ;;  %v310_v11 = vld [vmem:[%s15591_s14 + $0x450] sm:$0xff] }
  0xa5   : > { %1235 = vmatprep.mubr.bf16.mxu0 %v16042_v56  ;;  %22433 = vst [vmem:[#allocation14_spill] sm:$0xff] %v16080_v10  ;;  %v303_v56 = vld [vmem:[%s15591_s14 + $0x418] sm:$0xff] }
  0xa6   : > { %v16103_v57 = vpack.c.bf16 %v307_v53, %v303_v56  ;;  %22439 = vst [vmem:[#allocation20_spill] sm:$0xff] %v16105_v6  ;;  %v301_v56 = vld [vmem:[%s15591_s14 + $0x408] sm:$0xff] }
  0xa8   : > { %22438 = vst [vmem:[#allocation19_spill] sm:$0xff] %v16103_v57 }
  0xa9   : > { %1499 = vmatmul.mubr.bf16.gmra.mxu1 %v16057_v26  ;;  %v298_v26 = vld [vmem:[%s15591_s14 + $0x3f0] sm:$0xff] }
  0xaa   : > { %12453 = vmatprep.mubr.msk.bf16.mxu1 %vm1006_vm1, %v16061_v36  ;;  %v284_v36 = vld [vmem:[%s15591_s14 + $0x380] sm:$0xff]  ;;  %v16099_v55 = vpack.c.bf16 %v298_v26, %v294_v25  ;;  %v315_v26 = vld [vmem:[%s15591_s14 + $0x478] sm:$0xff] }
  0xac   : > { %1236 = vmatmul.mubr.bf16.gmra.mxu0 %v16059_v34  ;;  %v288_v34 = vld [vmem:[%s15591_s14 + $0x3a0] sm:$0xff]  ;;  %22436 = vst [vmem:[#allocation17_spill] sm:$0xff] %v16099_v55 }
  0xad   : > { %1245 = vmatprep.mubr.bf16.mxu0 %v16063_v47  ;;  %v16101_v52 = vpack.c.bf16 %v288_v34, %v284_v36  ;;  %v311_v47 = vld [vmem:[%s15591_s14 + $0x458] sm:$0xff]  ;;  %v305_v34 = vld [vmem:[%s15591_s14 + $0x428] sm:$0xff] }
  0xae   : > { %v16124_v53 = vpack.c.bf16 %v315_v26, %v311_v47  ;;  %v16126_v49 = vpack.c.bf16 %v305_v34, %v301_v56  ;;  %v309_v47 = vld [vmem:[%s15591_s14 + $0x448] sm:$0xff]  ;;  %v318_v34 = vld [vmem:[%s15591_s14 + $0x490] sm:$0xff] }
  0xaf   : > { %22437 = vst [vmem:[#allocation18_spill] sm:$0xff] %v16101_v52 }
  0xb0   : > { %22442 = vst [vmem:[#allocation23_spill] sm:$0xff] %v16124_v53  ;;  %22443 = vst [vmem:[#allocation24_spill] sm:$0xff] %v16126_v49 }
  0xb1   : > { %1509 = vmatmul.mubr.bf16.gmra.mxu1 %v16078_v0  ;;  %v306_v0 = vld [vmem:[%s15591_s14 + $0x430] sm:$0xff] }
  0xb2   : > { %12454 = vmatprep.mubr.msk.bf16.mxu1 %vm1006_vm1, %v16082_v23  ;;  %v292_v23 = vld [vmem:[%s15591_s14 + $0x3c0] sm:$0xff]  ;;  %v16120_v36 = vpack.c.bf16 %v306_v0, %v302_v16  ;;  %v323_v0 = vld [vmem:[%s15591_s14 + $0x4b8] sm:$0xff] }
  0xb4   : > { %1246 = vmatmul.mubr.bf16.gmra.mxu0 %v16080_v10  ;;  %v296_v10 = vld [vmem:[%s15591_s14 + $0x3e0] sm:$0xff]  ;;  %22440 = vst [vmem:[#allocation21_spill] sm:$0xff] %v16120_v36 }
  0xb5   : > { %1255 = vmatprep.mubr.bf16.mxu0 %v16084_v24  ;;  %v16122_v25 = vpack.c.bf16 %v296_v10, %v292_v23  ;;  %v319_v24 = vld [vmem:[%s15591_s14 + $0x498] sm:$0xff]  ;;  %v313_v10 = vld [vmem:[%s15591_s14 + $0x468] sm:$0xff] }
  0xb6   : > { %v16145_v26 = vpack.c.bf16 %v323_v0, %v319_v24  ;;  %v16147_v56 = vpack.c.bf16 %v313_v10, %v309_v47  ;;  %v317_v24 = vld [vmem:[%s15591_s14 + $0x488] sm:$0xff]  ;;  %v326_v10 = vld [vmem:[%s15591_s14 + $0x4d0] sm:$0xff] }
  0xb7   : > { %22441 = vst [vmem:[#allocation22_spill] sm:$0xff] %v16122_v25 }
  0xb8   : > { %22446 = vst [vmem:[#allocation27_spill] sm:$0xff] %v16145_v26  ;;  %22447 = vst [vmem:[#allocation28_spill] sm:$0xff] %v16147_v56 }
  0xb9   : > { %1519 = vmatmul.mubr.bf16.gmra.mxu1 %v16099_v55  ;;  %v314_v55 = vld [vmem:[%s15591_s14 + $0x470] sm:$0xff] }
  0xba   : > { %12455 = vmatprep.mubr.msk.bf16.mxu1 %vm1006_vm1, %v16103_v57  ;;  %v300_v57 = vld [vmem:[%s15591_s14 + $0x400] sm:$0xff]  ;;  %v16141_v23 = vpack.c.bf16 %v314_v55, %v310_v11  ;;  %v331_v55 = vld [vmem:[%s15591_s14 + $0x4f8] sm:$0xff] }
  0xbc   : > { %1256 = vmatmul.mubr.bf16.gmra.mxu0 %v16101_v52  ;;  %v304_v52 = vld [vmem:[%s15591_s14 + $0x420] sm:$0xff]  ;;  %22444 = vst [vmem:[#allocation25_spill] sm:$0xff] %v16141_v23 }
  0xbd   : > { %1265 = vmatprep.mubr.bf16.mxu0 %v16105_v6  ;;  %v16143_v16 = vpack.c.bf16 %v304_v52, %v300_v57  ;;  %v327_v6 = vld [vmem:[%s15591_s14 + $0x4d8] sm:$0xff]  ;;  %v321_v52 = vld [vmem:[%s15591_s14 + $0x4a8] sm:$0xff] }
  0xbe   : > { %v16166_v0 = vpack.c.bf16 %v331_v55, %v327_v6  ;;  %v16168_v47 = vpack.c.bf16 %v321_v52, %v317_v24  ;;  %v325_v6 = vld [vmem:[%s15591_s14 + $0x4c8] sm:$0xff]  ;;  %v334_v52 = vld [vmem:[%s15591_s14 + $0x510] sm:$0xff] }
  0xbf   : > { %22445 = vst [vmem:[#allocation26_spill] sm:$0xff] %v16143_v16 }
  0xc0   : > { %22450 = vst [vmem:[#allocation31_spill] sm:$0xff] %v16166_v0  ;;  %22451 = vst [vmem:[#allocation32_spill] sm:$0xff] %v16168_v47 }
  0xc1   : > { %1529 = vmatmul.mubr.bf16.gmra.mxu1 %v16120_v36  ;;  %v322_v36 = vld [vmem:[%s15591_s14 + $0x4b0] sm:$0xff] }
  0xc2   : > { %12456 = vmatprep.mubr.msk.bf16.mxu1 %vm1006_vm1, %v16124_v53  ;;  %v308_v53 = vld [vmem:[%s15591_s14 + $0x440] sm:$0xff]  ;;  %v16162_v57 = vpack.c.bf16 %v322_v36, %v318_v34  ;;  %v339_v36 = vld [vmem:[%s15591_s14 + $0x538] sm:$0xff] }
  0xc4   : > { %1266 = vmatmul.mubr.bf16.gmra.mxu0 %v16122_v25  ;;  %v312_v25 = vld [vmem:[%s15591_s14 + $0x460] sm:$0xff]  ;;  %22448 = vst [vmem:[#allocation29_spill] sm:$0xff] %v16162_v57 }
  0xc5   : > { %1275 = vmatprep.mubr.bf16.mxu0 %v16126_v49  ;;  %v16164_v11 = vpack.c.bf16 %v312_v25, %v308_v53  ;;  %v335_v49 = vld [vmem:[%s15591_s14 + $0x518] sm:$0xff]  ;;  %v329_v25 = vld [vmem:[%s15591_s14 + $0x4e8] sm:$0xff] }
  0xc6   : > { %v16187_v55 = vpack.c.bf16 %v339_v36, %v335_v49  ;;  %v16189_v24 = vpack.c.bf16 %v329_v25, %v325_v6  ;;  %v333_v49 = vld [vmem:[%s15591_s14 + $0x508] sm:$0xff]  ;;  %v342_v6 = vld [vmem:[%s15591_s14 + $0x550] sm:$0xff] }
  0xc7   : > { %22449 = vst [vmem:[#allocation30_spill] sm:$0xff] %v16164_v11  ;;  %v346_v25 = vld [vmem:[%s15591_s14 + $0x570] sm:$0x1] }
  0xc8   : > { %22453 = vst [vmem:[#allocation34_spill] sm:$0xff] %v16187_v55 }
  0xc9   : > { %1539 = vmatmul.mubr.bf16.gmra.mxu1 %v16141_v23  ;;  %v330_v23 = vld [vmem:[%s15591_s14 + $0x4f0] sm:$0xff] }
  0xca   : > { %12457 = vmatprep.mubr.msk.bf16.mxu1 %vm1006_vm1, %v16145_v26  ;;  %v316_v26 = vld [vmem:[%s15591_s14 + $0x480] sm:$0xff]  ;;  %v16183_v53 = vpack.c.bf16 %v330_v23, %v326_v10  ;;  %v337_v23 = vld [vmem:[%s15591_s14 + $0x528] sm:$0xff] }
  0xcb   : > { %v16210_v36 = vpack.c.bf16 %v337_v23, %v333_v49  ;;  %v344_v49 = vld [vmem:[%s15591_s14 + $0x560] sm:$0x1] }
  0xcc   : > { %1276 = vmatmul.mubr.bf16.gmra.mxu0 %v16143_v16  ;;  %v320_v16 = vld [vmem:[%s15591_s14 + $0x4a0] sm:$0xff]  ;;  %22452 = vst [vmem:[#allocation33_spill] sm:$0xff] %v16183_v53 }
  0xcd   : > { %1285 = vmatprep.mubr.bf16.mxu0 %v16147_v56  ;;  %v16185_v34 = vpack.c.bf16 %v320_v16, %v316_v26  ;;  %v343_v56 = vld [vmem:[%s15591_s14 + $0x558] sm:$0xff] }
  0xd1   : > { %1549 = vmatmul.mubr.bf16.gmra.mxu1 %v16162_v57  ;;  %v338_v57 = vld [vmem:[%s15591_s14 + $0x530] sm:$0xff] }
  0xd2   : > { %12458 = vmatprep.mubr.msk.bf16.mxu1 %vm1006_vm1, %v16166_v0  ;;  %v324_v0 = vld [vmem:[%s15591_s14 + $0x4c0] sm:$0xff]  ;;  %v16204_v16 = vpack.c.bf16 %v338_v57, %v334_v52  ;;  %v341_v57 = vld [vmem:[%s15591_s14 + $0x548] sm:$0xff] }
  0xd3   : > { %v340_v52 = vld [vmem:[%s15591_s14 + $0x540] sm:$0xff] }
  0xd4   : > { %1286 = vmatmul.mubr.bf16.gmra.mxu0 %v16164_v11  ;;  %v328_v11 = vld [vmem:[%s15591_s14 + $0x4e0] sm:$0xff]  ;;  %v16235_v23 = vpack.c.bf16 %v344_v49, %v340_v52 }
  0xd5   : > { %1295 = vmatprep.mubr.bf16.mxu0 %v16168_v47  ;;  %v347_v47 = vld [vmem:[%s15591_s14 + $0x578] sm:$0x1]  ;;  %v16206_v26 = vpack.c.bf16 %v328_v11, %v324_v0  ;;  %v345_v11 = vld [vmem:[%s15591_s14 + $0x568] sm:$0x1] }
  0xd6   : > { %v16208_v10 = vpack.c.bf16 %v347_v47, %v343_v56  ;;  %v16223_v56 = vpack.c.bf16 %v346_v25, %v342_v6  ;;  %v16227_v47 = vpack.c.bf16 %v345_v11, %v341_v57 }
  0xd9   : > { %1559 = vmatmul.mubr.bf16.gmra.mxu1 %v16183_v53  ;;  %v336_v53 = vld [vmem:[%s15591_s14 + $0x520] sm:$0xff] }
  0xda   : > { %12459 = vmatprep.mubr.msk.bf16.mxu1 %vm1006_vm1, %v16187_v55  ;;  %v332_v55 = vld [vmem:[%s15591_s14 + $0x500] sm:$0xff] }
  0xdb   : > { %v16225_v0 = vpack.c.bf16 %v336_v53, %v332_v55 }
  0xdc   : > { %1296 = vmatmul.mubr.bf16.gmra.mxu0 %v16185_v34 }
  0xdd   : > { %1305 = vmatprep.mubr.bf16.mxu0 %v16189_v24 }
  0xe1   : > { %1569 = vmatmul.mubr.bf16.gmra.mxu1 %v16204_v16 }
  0xe2   : > { %12460 = vmatprep.mubr.msk.bf16.mxu1 %vm1006_vm1, %v16208_v10 }
  0xe4   : > { %1306 = vmatmul.mubr.bf16.gmra.mxu0 %v16206_v26 }
  0xe5   : > { %1315 = vmatprep.mubr.bf16.mxu0 %v16210_v36 }
  0xe9   : > { %1579 = vmatmul.mubr.bf16.gmra.mxu1 %v16223_v56 }
  0xea   : > { %1621 = vmatprep.mubr.bf16.mxu1 %v15624_v51 }
  0xec   : > { %1316 = vmatmul.mubr.bf16.gmra.mxu0 %v16225_v0 }
  0xed   : > { %1325 = vmatprep.mubr.bf16.mxu0 %v16227_v47 }
  0xf1   : > { %1622 = vmatmul.mubr.bf16.vlgmr.msra.gmra.mxu1 %v15691_v18 }
  0xf2   : > { %1629 = vmatprep.mubr.bf16.mxu1 %v15695_v20 }
  0xf4   : > { %1326 = vmatmul.mubr.bf16.gmra.mxu0 %v16235_v23 }
  0xf5   : > { %12461 = vmatprep.mubr.msk.bf16.mxu0 %vm1006_vm1, %v15606_v44 }
  0xf9   : > { %1630 = vmatmul.mubr.bf16.gmra.mxu1 %v15713_v30 }
  0xfa   : > { %1637 = vmatprep.mubr.bf16.mxu1 %v15717_v32 }
  0xfc   : > { %1831 = vmatmul.mubr.bf16.vlgmr.msra.gmra.mxu0 %v15664_v3 }
  0xfd   : > { %12462 = vmatprep.mubr.msk.bf16.mxu0 %vm1006_vm1, %v15666_v4 }
 0x101   : > { %v1370_v51 = vpop.f32.mrf.mxu1  ;;  %1638 = vmatmul.mubr.bf16.gmra.mxu1 %v15737_v43 }
 0x102   : > { %1645 = vmatprep.mubr.bf16.mxu1 %v15741_v46 }
 0x103   : > { %v1372_v18 = vpop.f32.mrf.mxu1 }
 0x104   : > { %1839 = vmatmul.mubr.bf16.gmra.mxu0 %v15689_v17 }
 0x105   : > { %12463 = vmatprep.mubr.msk.bf16.mxu0 %vm1006_vm1, %v15693_v19  ;;  %v1374_v44 = vpop.f32.mrf.mxu1 }
 0x107   : > { %v1376_v20 = vpop.f32.mrf.mxu1 }
 0x109   : > { %v1380_v30 = vpop.f32.mrf.mxu1  ;;  %1646 = vmatmul.mubr.bf16.gmra.mxu1 %v15770_v60 }
 0x10a   : > { %1653 = vmatprep.mubr.bf16.mxu1 %v15774_v62 }
 0x10b   : > { %v1382_v4 = vpop.f32.mrf.mxu1 }
 0x10c   : > { %v1117_v3 = vpop.f32.mrf.mxu0  ;;  %1847 = vmatmul.mubr.bf16.gmra.mxu0 %v15711_v29 }
 0x10d   : > { %12464 = vmatprep.mubr.msk.bf16.mxu0 %vm1006_vm1, %v15715_v31  ;;  %v16257_v32 = vadd.f32 %v1370_v51, %v1117_v3  ;;  %v1384_v19 = vpop.f32.mrf.mxu1 }
 0x10e   : > { %v1119_v17 = vpop.f32.mrf.mxu0 }
 0x10f   : > { %v16259_v43 = vadd.f32 %v1372_v18, %v1119_v17  ;;  %v1386_v53 = vpop.f32.mrf.mxu1 }
 0x110   : > { %v1121_v46 = vpop.f32.mrf.mxu0 }
 0x111   : > { %v16261_v6 = vadd.f32 %v1374_v44, %v1121_v46  ;;  %v1390_v29 = vpop.f32.mrf.mxu1  ;;  %1654 = vmatmul.mubr.bf16.gmra.mxu1 %v15802_v14  ;;  %v22455_v14 = vld [vmem:[#allocation3_spill] sm:$0xff] }
 0x112   : > { %v1123_v55 = vpop.f32.mrf.mxu0  ;;  %1661 = vmatprep.mubr.bf16.mxu1 %v15810_v21 }
 0x113   : > { %v16263_v60 = vadd.f32 %v1376_v20, %v1123_v55  ;;  %v1392_v31 = vpop.f32.mrf.mxu1 }
 0x114   : > { %v1127_v62 = vpop.f32.mrf.mxu0  ;;  %1855 = vmatmul.mubr.bf16.gmra.mxu0 %v15732_v41 }
 0x115   : > { %12465 = vmatprep.mubr.msk.bf16.mxu0 %vm1006_vm1, %v15739_v45  ;;  %v16270_v57 = vadd.f32 %v1380_v30, %v1127_v62  ;;  %v1394_v52 = vpop.f32.mrf.mxu1 }
 0x116   : > { %v1129_v25 = vpop.f32.mrf.mxu0 }
 0x117   : > { %v16272_v11 = vadd.f32 %v1382_v4, %v1129_v25  ;;  %v1396_v41 = vpop.f32.mrf.mxu1 }
 0x118   : > { %v1131_v51 = vpop.f32.mrf.mxu0 }
 0x119   : > { %v16278_v21 = vadd.f32 %v1384_v19, %v1131_v51  ;;  %v1400_v45 = vpop.f32.mrf.mxu1  ;;  %1662 = vmatmul.mubr.bf16.gmra.mxu1 %v15842_v39 }
 0x11a   : > { %v1133_v18 = vpop.f32.mrf.mxu0  ;;  %1669 = vmatprep.mubr.bf16.mxu1 %v15847_v42 }
 0x11b   : > { %v16280_v44 = vadd.f32 %v1386_v53, %v1133_v18  ;;  %v1402_v30 = vpop.f32.mrf.mxu1 }
 0x11c   : > { %v1137_v20 = vpop.f32.mrf.mxu0  ;;  %1863 = vmatmul.mubr.bf16.gmra.mxu0 %v15767_v59 }
 0x11d   : > { %12466 = vmatprep.mubr.msk.bf16.mxu0 %vm1006_vm1, %v15772_v61  ;;  %v16287_v4 = vadd.f32 %v1390_v29, %v1137_v20  ;;  %v1404_v19 = vpop.f32.mrf.mxu1  ;;  %v15310_v39 = vpack.c.bf16 %v16280_v44, %v16272_v11  ;;  %v22471_v44 = vld [vmem:[#allocation13_spill] sm:$0xff] }
 0x11e   : > { %v1139_v3 = vpop.f32.mrf.mxu0 }
 0x11f   : > { %v16289_v17 = vadd.f32 %v1392_v31, %v1139_v3  ;;  %v1406_v59 = vpop.f32.mrf.mxu1 }
 0x120   : > { %v1141_v53 = vpop.f32.mrf.mxu0 }
 0x121   : > { %v16295_v42 = vadd.f32 %v1394_v52, %v1141_v53  ;;  %v1410_v61 = vpop.f32.mrf.mxu1  ;;  %1670 = vmatmul.mubr.bf16.gmra.mxu1 %v15879_v1 }
 0x122   : > { %v1143_v55 = vpop.f32.mrf.mxu0  ;;  %1677 = vmatprep.mubr.bf16.mxu1 %v15884_v5 }
 0x123   : > { %v16297_v62 = vadd.f32 %v1396_v41, %v1143_v55  ;;  %v1412_v31 = vpop.f32.mrf.mxu1 }
 0x124   : > { %v1147_v29 = vpop.f32.mrf.mxu0  ;;  %1871 = vmatmul.mubr.bf16.gmra.mxu0 %v15800_v13 }
 0x125   : > { %12467 = vmatprep.mubr.msk.bf16.mxu0 %vm1006_vm1, %v15804_v15  ;;  %v16304_v51 = vadd.f32 %v1400_v45, %v1147_v29  ;;  %v1414_v52 = vpop.f32.mrf.mxu1 }
 0x126   : > { %v1149_v25 = vpop.f32.mrf.mxu0 }
 0x127   : > { %v16306_v18 = vadd.f32 %v1402_v30, %v1149_v25  ;;  %v1416_v20 = vpop.f32.mrf.mxu1 }
 0x128   : > { %v1151_v41 = vpop.f32.mrf.mxu0 }
 0x129   : > { %v16308_v53 = vadd.f32 %v1404_v19, %v1151_v41  ;;  %v1420_v13 = vpop.f32.mrf.mxu1  ;;  %1678 = vmatmul.mubr.bf16.gmra.mxu1 %v15916_v28 }
 0x12a   : > { %v1153_v3 = vpop.f32.mrf.mxu0  ;;  %1685 = vmatprep.mubr.bf16.mxu1 %v15922_v35 }
 0x12b   : > { %v16310_v1 = vadd.f32 %v1406_v59, %v1153_v3  ;;  %v1422_v15 = vpop.f32.mrf.mxu1 }
 0x12c   : > { %v1157_v5 = vpop.f32.mrf.mxu0  ;;  %1879 = vmatmul.mubr.bf16.gmra.mxu0 %v15837_v37 }
 0x12d   : > { %12468 = vmatprep.mubr.msk.bf16.mxu0 %vm1006_vm1, %v15844_v40  ;;  %v16317_v30 = vadd.f32 %v1410_v61, %v1157_v5  ;;  %v1424_v19 = vpop.f32.mrf.mxu1 }
 0x12e   : > { %v1159_v45 = vpop.f32.mrf.mxu0 }
 0x12f   : > { %v16319_v55 = vadd.f32 %v1412_v31, %v1159_v45  ;;  %v1426_v29 = vpop.f32.mrf.mxu1 }
 0x130   : > { %v1161_v59 = vpop.f32.mrf.mxu0 }
 0x131   : > { %v16321_v41 = vadd.f32 %v1414_v52, %v1161_v59  ;;  %v1430_v37 = vpop.f32.mrf.mxu1  ;;  %1686 = vmatmul.mubr.bf16.gmra.mxu1 %v15957_v7 }
 0x132   : > { %v1163_v25 = vpop.f32.mrf.mxu0  ;;  %1693 = vmatprep.mubr.bf16.mxu1 %v15962_v9 }
 0x133   : > { %v16323_v28 = vadd.f32 %v1416_v20, %v1163_v25  ;;  %v1432_v40 = vpop.f32.mrf.mxu1 }
 0x134   : > { %v1167_v35 = vpop.f32.mrf.mxu0  ;;  %1887 = vmatmul.mubr.bf16.gmra.mxu0 %v15874_v63 }
 0x135   : > { %12469 = vmatprep.mubr.msk.bf16.mxu0 %vm1006_vm1, %v15881_v2  ;;  %v16330_v31 = vadd.f32 %v1420_v13, %v1167_v35  ;;  %v1434_v52 = vpop.f32.mrf.mxu1 }
 0x136   : > { %v1169_v61 = vpop.f32.mrf.mxu0 }
 0x137   : > { %v16332_v3 = vadd.f32 %v1422_v15, %v1169_v61  ;;  %v1436_v5 = vpop.f32.mrf.mxu1 }
 0x138   : > { %v1171_v20 = vpop.f32.mrf.mxu0 }
 0x139   : > { %v16334_v59 = vadd.f32 %v1424_v19, %v1171_v20  ;;  %v1440_v63 = vpop.f32.mrf.mxu1  ;;  %1694 = vmatmul.mubr.bf16.gmra.mxu1 %v15994_v48 }
 0x13a   : > { %v1173_v45 = vpop.f32.mrf.mxu0  ;;  %1701 = vmatprep.mubr.bf16.mxu1 %v15999_v50 }
 0x13b   : > { %v16336_v7 = vadd.f32 %v1426_v29, %v1173_v45  ;;  %v1442_v2 = vpop.f32.mrf.mxu1 }
 0x13c   : > { %v1177_v9 = vpop.f32.mrf.mxu0  ;;  %1895 = vmatmul.mubr.bf16.gmra.mxu0 %v15914_v27 }
 0x13d   : > { %12470 = vmatprep.mubr.msk.bf16.mxu0 %vm1006_vm1, %v15918_v33  ;;  %v1431_v15 = vadd.f32 %v1430_v37, %v1177_v9  ;;  %v1444_v35 = vpop.f32.mrf.mxu1 }
 0x13e   : > { %v1179_v13 = vpop.f32.mrf.mxu0 }
 0x13f   : > { %v1433_v25 = vadd.f32 %v1432_v40, %v1179_v13  ;;  %v1446_v61 = vpop.f32.mrf.mxu1 }
 0x140   : > { %v1181_v19 = vpop.f32.mrf.mxu0 }
 0x141   : > { %v1435_v20 = vadd.f32 %v1434_v52, %v1181_v19  ;;  %v1450_v49 = vpop.f32.mrf.mxu1  ;;  %1702 = vmatmul.mubr.bf16.gmra.mxu1 %v16017_v12 }
 0x142   : > { %v1183_v29 = vpop.f32.mrf.mxu0  ;;  %1709 = vmatprep.mubr.bf16.mxu1 %v16021_v22 }
 0x143   : > { %v1437_v45 = vadd.f32 %v1436_v5, %v1183_v29  ;;  %v1452_v27 = vpop.f32.mrf.mxu1 }
 0x144   : > { %v1187_v48 = vpop.f32.mrf.mxu0  ;;  %1903 = vmatmul.mubr.bf16.gmra.mxu0 %v15952_v58  ;;  %v22454_v58 = vld [vmem:[#allocation8_spill] sm:$0xff] }
 0x145   : > { %12471 = vmatprep.mubr.msk.bf16.mxu0 %vm1006_vm1, %v15959_v8  ;;  %v1441_v50 = vadd.f32 %v1440_v63, %v1187_v48  ;;  %v1454_v40 = vpop.f32.mrf.mxu1 }
 0x146   : > { %v1189_v33 = vpop.f32.mrf.mxu0 }
 0x147   : > { %v1443_v37 = vadd.f32 %v1442_v2, %v1189_v33  ;;  %v1456_v13 = vpop.f32.mrf.mxu1 }
 0x148   : > { %v1191_v9 = vpop.f32.mrf.mxu0 }
 0x149   : > { %v1445_v5 = vadd.f32 %v1444_v35, %v1191_v9  ;;  %v1460_v29 = vpop.f32.mrf.mxu1  ;;  %1710 = vmatmul.mubr.bf16.gmra.mxu1 %v16038_v54  ;;  %v15313_v54 = vpack.c.bf16 %v1437_v45, %v1433_v25  ;;  %v15315_v25 = vpack.c.bf16 %v16336_v7, %v16332_v3  ;;  %v15319_v3 = vpack.c.bf16 %v16323_v28, %v16319_v55  ;;  %v22463_v55 = vld [vmem:[#allocation7_spill] sm:$0xff] }
 0x14a   : > { %v1193_v52 = vpop.f32.mrf.mxu0  ;;  %1717 = vmatprep.mubr.bf16.mxu1 %v22454_v58  ;;  %v15321_v28 = vpack.c.bf16 %v16310_v1, %v16306_v18  ;;  %v15325_v18 = vpack.c.bf16 %v16297_v62, %v16289_v17  ;;  %v22467_v17 = vld [vmem:[#allocation11_spill] sm:$0xff] }
 0x14b   : > { %v1447_v19 = vadd.f32 %v1446_v61, %v1193_v52  ;;  %v1462_v22 = vpop.f32.mrf.mxu1  ;;  %v15311_v35 = vpack.c.bf16 %v1445_v5, %v1441_v50  ;;  %v22458_v50 = vld [vmem:[#allocation12_spill] sm:$0xff]  ;;  %v22459_v5 = vld [vmem:[#allocation5_spill] sm:$0xff] }
 0x14c   : > { %v1197_v12 = vpop.f32.mrf.mxu0  ;;  %1911 = vmatmul.mubr.bf16.gmra.mxu0 %v15989_v38 }
 0x14d   : > { %12472 = vmatprep.mubr.msk.bf16.mxu0 %vm1006_vm1, %v22455_v14  ;;  %v16353_v63 = vadd.f32 %v1450_v49, %v1197_v12  ;;  %v1464_v48 = vpop.f32.mrf.mxu1  ;;  %v15312_v61 = vpack.c.bf16 %v1447_v19, %v1443_v37  ;;  %v22456_v14 = vld [vmem:[#allocation10_spill] sm:$0xff]  ;;  %v15314_v12 = vpack.c.bf16 %v1435_v20, %v1431_v15 }
 0x14e   : > { %v1199_v8 = vpop.f32.mrf.mxu0 }
 0x14f   : > { %v16355_v2 = vadd.f32 %v1452_v27, %v1199_v8  ;;  %v1466_v9 = vpop.f32.mrf.mxu1  ;;  %3373 = vmatprep.subr.bf16.mxu1 %v15312_v61  ;;  %v22457_v27 = vld [vmem:[#allocation4_spill] sm:$0xff] }
 0x150   : > { %v1201_v33 = vpop.f32.mrf.mxu0  ;;  %3374 = vmatpush1.bf16.msra.mxu1 %v15311_v35  ;;  %v15318_v35 = vpack.c.bf16 %v16334_v59, %v16330_v31  ;;  %v15320_v31 = vpack.c.bf16 %v16321_v41, %v16317_v30  ;;  %v22462_v59 = vld [vmem:[#allocation16_spill] sm:$0xff] }
 0x151   : > { %v16357_v38 = vadd.f32 %v1454_v40, %v1201_v33  ;;  %v1470_v46 = vpop.f32.mrf.mxu1  ;;  %1718 = vmatmul.mubr.bf16.gmra.mxu1 %v22456_v14  ;;  %3375 = vmatprep.subr.bf16.mxu1 %v15313_v54  ;;  %v22460_v54 = vld [vmem:[#allocation14_spill] sm:$0xff] }
 0x152   : > { %v1203_v52 = vpop.f32.mrf.mxu0  ;;  %1725 = vmatprep.mubr.bf16.mxu1 %v22458_v50  ;;  %v22461_v14 = vld [vmem:[#allocation6_spill] sm:$0xff] }
 0x153   : > { %v16359_v58 = vadd.f32 %v1456_v13, %v1203_v52  ;;  %v1472_v37 = vpop.f32.mrf.mxu1  ;;  %v15316_v15 = vpack.c.bf16 %v16357_v38, %v16353_v63 }
 0x154   : > { %v1207_v49 = vpop.f32.mrf.mxu0  ;;  %1919 = vmatmul.mubr.bf16.gmra.mxu0 %v22457_v27  ;;  %3376 = vmatpush1.bf16.msra.mxu1 %v15314_v12 }
 0x155   : > { %12473 = vmatprep.mubr.msk.bf16.mxu0 %vm1006_vm1, %v22459_v5  ;;  %v16368_v40 = vadd.f32 %v1460_v29, %v1207_v49  ;;  %v1474_v19 = vpop.f32.mrf.mxu1  ;;  %3377 = vmatprep.subr.bf16.mxu1 %v15315_v25  ;;  %v15317_v20 = vpack.c.bf16 %v16359_v58, %v16355_v2  ;;  %v15324_v5 = vpack.c.bf16 %v16308_v53, %v16304_v51  ;;  %v22466_v53 = vld [vmem:[#allocation20_spill] sm:$0xff] }
 0x156   : > { %v1209_v45 = vpop.f32.mrf.mxu0  ;;  %v15326_v51 = vpack.c.bf16 %v16295_v42, %v16287_v4  ;;  %v22468_v42 = vpack.c.bf16 %v16278_v21, %v16270_v57  ;;  %v22474_v21 = vpack.c.bf16 %v16261_v6, %v16257_v32  ;;  %v22477_v32 = vld [vmem:[#allocation28_spill] sm:$0xff] }
 0x157   : > { %v16370_v13 = vadd.f32 %v1462_v22, %v1209_v45  ;;  %v1476_v61 = vpop.f32.mrf.mxu1 }
 0x158   : > { %v1211_v8 = vpop.f32.mrf.mxu0  ;;  %3378 = vmatpush1.bf16.msra.mxu1 %v15318_v35 }
 0x159   : > { %v16380_v29 = vadd.f32 %v1464_v48, %v1211_v8  ;;  %v1480_v33 = vpop.f32.mrf.mxu1  ;;  %1726 = vmatmul.mubr.bf16.gmra.mxu1 %v22460_v54  ;;  %3379 = vmatprep.subr.bf16.mxu1 %v15319_v3  ;;  %v22464_v8 = vld [vmem:[#allocation18_spill] sm:$0xff]  ;;  %v22465_v3 = vld [vmem:[#allocation9_spill] sm:$0xff] }
 0x15a   : > { %v1213_v7 = vpop.f32.mrf.mxu0  ;;  %1733 = vmatprep.mubr.bf16.mxu1 %v22462_v59 }
 0x15b   : > { %v16382_v22 = vadd.f32 %v1466_v9, %v1213_v7  ;;  %v1482_v49 = vpop.f32.mrf.mxu1  ;;  %v15322_v30 = vpack.c.bf16 %v16380_v29, %v16368_v40  ;;  %v14731_v40 = vld [vmem:[%s22269_s2 + $0x1c] ss:$12 sps:$4 sm:$0xff]  }
 0x15c   : > { %v1217_v52 = vpop.f32.mrf.mxu0  ;;  %1927 = vmatmul.mubr.bf16.gmra.mxu0 %v22461_v14  ;;  %3380 = vmatpush1.bf16.msra.mxu1 %v15320_v31 }
 0x15d   : > { %12474 = vmatprep.mubr.msk.bf16.mxu0 %vm1006_vm1, %v22463_v55  ;;  %v16393_v9 = vadd.f32 %v1470_v46, %v1217_v52  ;;  %v1484_v12 = vpop.f32.mrf.mxu1  ;;  %3381 = vmatprep.subr.bf16.mxu1 %v15321_v28  ;;  %v15323_v41 = vpack.c.bf16 %v16382_v22, %v16370_v13  ;;  %v22469_v55 = vld [vmem:[#allocation22_spill] sm:$0xff] }
 0x15e   : > { %v1219_v48 = vpop.f32.mrf.mxu0  ;;  %v14724_v13 = vld [vmem:[%s22269_s2] ss:$12 sps:$4 sm:$0xff]  }
 0x15f   : > { %v16395_v27 = vadd.f32 %v1472_v37, %v1219_v48  ;;  %v1486_v25 = vpop.f32.mrf.mxu1  ;;  %v22473_v48 = vld [vmem:[#allocation15_spill] sm:$0xff] }
 0x160   : > { %v1221_v50 = vpop.f32.mrf.mxu0  ;;  %3382 = vmatpush1.bf16.msra.mxu1 %v15324_v5 }
 0x161   : > { %v16405_v1 = vadd.f32 %v1474_v19, %v1221_v50  ;;  %v1490_v45 = vpop.f32.mrf.mxu1  ;;  %1734 = vmatmul.mubr.bf16.gmra.mxu1 %v22464_v8  ;;  %3383 = vmatprep.subr.bf16.mxu1 %v15325_v18 }
 0x162   : > { %v1223_v46 = vpop.f32.mrf.mxu0  ;;  %1741 = vmatprep.mubr.bf16.mxu1 %v22466_v53 }
 0x163   : > { %v16407_v37 = vadd.f32 %v1476_v61, %v1223_v46  ;;  %v1492_v7 = vpop.f32.mrf.mxu1 }
 0x164   : > { %v1227_v35 = vpop.f32.mrf.mxu0  ;;  %1935 = vmatmul.mubr.bf16.gmra.mxu0 %v22465_v3  ;;  %3384 = vmatpush1.bf16.msra.mxu1 %v15326_v51  ;;  %v22476_v51 = vld [vmem:[#allocation17_spill] sm:$0xff] }
 0x165   : > { %12475 = vmatprep.mubr.msk.bf16.mxu0 %vm1006_vm1, %v22467_v17  ;;  %v16416_v19 = vadd.f32 %v1480_v33, %v1227_v35  ;;  %v1494_v54 = vpop.f32.mrf.mxu1  ;;  %3385 = vmatprep.subr.bf16.mxu1 %v15310_v39  ;;  %v22472_v39 = vld [vmem:[#allocation24_spill] sm:$0xff]  ;;  %v22475_v35 = vld [vmem:[#allocation26_spill] sm:$0xff] }
 0x166   : > { %v1229_v62 = vpop.f32.mrf.mxu0 }
 0x167   : > { %v16418_v61 = vadd.f32 %v1482_v49, %v1229_v62  ;;  %v1496_v14 = vpop.f32.mrf.mxu1  ;;  %v22470_v49 = vpack.c.bf16 %v16263_v60, %v16259_v43 }
 0x168   : > { %v1231_v52 = vpop.f32.mrf.mxu0  ;;  %3386 = vmatpush1.bf16.msra.mxu1 %v22468_v42 }
 0x169   : > { %v16426_v31 = vadd.f32 %v1484_v12, %v1231_v52  ;;  %v1500_v33 = vpop.f32.mrf.mxu1  ;;  %1742 = vmatmul.mubr.bf16.gmra.mxu1 %v22469_v55  ;;  %3387 = vmatprep.subr.bf16.mxu1 %v22470_v49  ;;  %v22479_v49 = vld [vmem:[#allocation30_spill] sm:$0xff] }
 0x16a   : > { %v1233_v4 = vpop.f32.mrf.mxu0  ;;  %1749 = vmatprep.mubr.bf16.mxu1 %v22472_v39  ;;  %v22481_v39 = vld [vmem:[#allocation32_spill] sm:$0xff] }
 0x16b   : > { %v16428_v59 = vadd.f32 %v1486_v25, %v1233_v4  ;;  %v1502_v28 = vpop.f32.mrf.mxu1 }
 0x16c   : > { %v1237_v11 = vpop.f32.mrf.mxu0  ;;  %1943 = vmatmul.mubr.bf16.gmra.mxu0 %v22471_v44  ;;  %3388 = vmatpush1.bf16.msra.mxu1 %v22474_v21  ;;  %v22480_v44 = vld [vmem:[#allocation21_spill] sm:$0xff] }
 0x16d   : > { %12476 = vmatprep.mubr.msk.bf16.mxu0 %vm1006_vm1, %v22473_v48  ;;  %v16441_v12 = vadd.f32 %v1490_v45, %v1237_v11  ;;  %v1504_v43 = vpop.f32.mrf.mxu1  ;;  %v22478_v45 = vld [vmem:[#allocation19_spill] sm:$0xff] }
 0x16e   : > { %v1239_v57 = vpop.f32.mrf.mxu0  ;;  %v22482_v48 = vld [vmem:[#allocation23_spill] sm:$0xff] }
 0x16f   : > { %v16443_v50 = vadd.f32 %v1492_v7, %v1239_v57  ;;  %v1506_v5 = vpop.f32.mrf.mxu1 }
 0x170   : > { %v1241_v60 = vpop.f32.mrf.mxu0 }
 0x171   : > { %v16445_v18 = vadd.f32 %v1494_v54, %v1241_v60  ;;  %v1510_v8 = vpop.f32.mrf.mxu1  ;;  %1750 = vmatmul.mubr.bf16.gmra.mxu1 %v22475_v35 }
 0x172   : > { %v1243_v25 = vpop.f32.mrf.mxu0  ;;  %1757 = vmatprep.mubr.bf16.mxu1 %v22477_v32 }
 0x173   : > { %v16447_v46 = vadd.f32 %v1496_v14, %v1243_v25  ;;  %v1512_v6 = vpop.f32.mrf.mxu1 }
 0x174   : > { %v1247_v3 = vpop.f32.mrf.mxu0  ;;  %1951 = vmatmul.mubr.bf16.gmra.mxu0 %v22476_v51 }
 0x175   : > { %12477 = vmatprep.mubr.msk.bf16.mxu0 %vm1006_vm1, %v22478_v45  ;;  %v16454_v7 = vadd.f32 %v1500_v33, %v1247_v3  ;;  %v1514_v62 = vpop.f32.mrf.mxu1  ;;  %v22483_v45 = vld [vmem:[#allocation25_spill] sm:$0xff] }
 0x176   : > { %v1249_v53 = vpop.f32.mrf.mxu0 }
 0x177   : > { %v16456_v17 = vadd.f32 %v1502_v28, %v1249_v53  ;;  %v1516_v52 = vpop.f32.mrf.mxu1 }
 0x178   : > { %v1251_v54 = vpop.f32.mrf.mxu0 }
 0x179   : > { %v16458_v4 = vadd.f32 %v1504_v43, %v1251_v54  ;;  %v1520_v55 = vpop.f32.mrf.mxu1  ;;  %1758 = vmatmul.mubr.bf16.gmra.mxu1 %v22479_v49  ;;  %v22484_v54 = vld [vmem:[#allocation27_spill] sm:$0xff] }
 0x17a   : > { %v1253_v14 = vpop.f32.mrf.mxu0  ;;  %1765 = vmatprep.mubr.bf16.mxu1 %v22481_v39 }
 0x17b   : > { %v16460_v42 = vadd.f32 %v1506_v5, %v1253_v14  ;;  %v1522_v33 = vpop.f32.mrf.mxu1 }
 0x17c   : > { %v1257_v11 = vpop.f32.mrf.mxu0  ;;  %1959 = vmatmul.mubr.bf16.gmra.mxu0 %v22480_v44 }
 0x17d   : > { %12478 = vmatprep.mubr.msk.bf16.mxu0 %vm1006_vm1, %v22482_v48  ;;  %v1511_v57 = vadd.f32 %v1510_v8, %v1257_v11  ;;  %v1524_v60 = vpop.f32.mrf.mxu1 }
 0x17e   : > { %v1259_v28 = vpop.f32.mrf.mxu0 }
 0x17f   : > { %v1513_v21 = vadd.f32 %v1512_v6, %v1259_v28  ;;  %v1526_v25 = vpop.f32.mrf.mxu1  ;;  %v22485_v28 = vld [vmem:[#allocation29_spill] sm:$0xff] }
 0x180   : > { %v1261_v43 = vpop.f32.mrf.mxu0 }
 0x181   : > { %v1515_v35 = vadd.f32 %v1514_v62, %v1261_v43  ;;  %v1530_v51 = vpop.f32.mrf.mxu1  ;;  %1766 = vmatmul.mubr.bf16.gmra.mxu1 %v16185_v34  ;;  %v22486_v43 = vld [vmem:[#allocation31_spill] sm:$0xff] }
 0x182   : > { %v1263_v5 = vpop.f32.mrf.mxu0  ;;  %1773 = vmatprep.mubr.bf16.mxu1 %v16189_v24 }
 0x183   : > { %v1517_v3 = vadd.f32 %v1516_v52, %v1263_v5  ;;  %v1532_v53 = vpop.f32.mrf.mxu1 }
 0x184   : > { %v1267_v32 = vpop.f32.mrf.mxu0  ;;  %1967 = vmatmul.mubr.bf16.gmra.mxu0 %v22483_v45 }
 0x185   : > { %12479 = vmatprep.mubr.msk.bf16.mxu0 %vm1006_vm1, %v22484_v54  ;;  %v1521_v6 = vadd.f32 %v1520_v55, %v1267_v32  ;;  %v1534_v49 = vpop.f32.mrf.mxu1 }
 0x186   : > { %v1269_v8 = vpop.f32.mrf.mxu0 }
 0x187   : > { %v1523_v14 = vadd.f32 %v1522_v33, %v1269_v8  ;;  %v1536_v44 = vpop.f32.mrf.mxu1 }
 0x188   : > { %v1271_v11 = vpop.f32.mrf.mxu0 }
 0x189   : > { %v1525_v52 = vadd.f32 %v1524_v60, %v1271_v11  ;;  %v1540_v48 = vpop.f32.mrf.mxu1  ;;  %1774 = vmatmul.mubr.bf16.gmra.mxu1 %v16206_v26  ;;  %v15329_v26 = vpack.c.bf16 %v1517_v3, %v1513_v21  ;;  %v15331_v21 = vpack.c.bf16 %v16460_v42, %v16456_v17  ;;  %v16505_v17 = vld [vmem:[%s22269_s2 + $0x4] ss:$12 sps:$4 sm:$0xff]  }
 0x18a   : > { %v1273_v62 = vpop.f32.mrf.mxu0  ;;  %1781 = vmatprep.mubr.bf16.mxu1 %v16210_v36 }
 0x18b   : > { %v1527_v39 = vadd.f32 %v1526_v25, %v1273_v62  ;;  %v1542_v24 = vpop.f32.mrf.mxu1  ;;  %v15327_v60 = vpack.c.bf16 %v1525_v52, %v1521_v6  ;;  %v15334_v52 = vpack.c.bf16 %v16458_v4, %v16454_v7  ;;  %v15336_v4 = vpack.c.bf16 %v16445_v18, %v16441_v12 }
 0x18c   : > { %v1277_v34 = vpop.f32.mrf.mxu0  ;;  %1975 = vmatmul.mubr.bf16.gmra.mxu0 %v22485_v28  ;;  %v15338_v12 = vpack.c.bf16 %v16426_v31, %v16416_v19  ;;  %v22489_v19 = vmov 0  }
 0x18d   : > { %12480 = vmatprep.mubr.msk.bf16.mxu0 %vm1006_vm1, %v22486_v43  ;;  %v16477_v33 = vadd.f32 %v1530_v51, %v1277_v34  ;;  %v1544_v32 = vpop.f32.mrf.mxu1  ;;  %v15328_v25 = vpack.c.bf16 %v1527_v39, %v1523_v14  ;;  %v15330_v34 = vpack.c.bf16 %v1515_v35, %v1511_v57  ;;  %v22488_v14 = vld [vmem:[#allocation34_spill] sm:$0xff]  ;;  %v15335_v39 = vpack.c.bf16 %v16447_v46, %v16443_v50 }
 0x18e   : > { %v1279_v55 = vpop.f32.mrf.mxu0  ;;  %v15337_v50 = vpack.c.bf16 %v16428_v59, %v16418_v61 }
 0x18f   : > { %v16479_v5 = vadd.f32 %v1532_v53, %v1279_v55  ;;  %v1546_v54 = vpop.f32.mrf.mxu1  ;;  %3389 = vmatprep.subr.bf16.mxu1 %v15328_v25  ;;  %v22487_v53 = vld [vmem:[#allocation33_spill] sm:$0xff]  ;;  %v15339_v25 = vpack.c.bf16 %v16407_v37, %v16395_v27 }
 0x190   : > { %v1281_v45 = vpop.f32.mrf.mxu0  ;;  %3390 = vmatpush2.bf16.msra.mxu1 %v15327_v60 }
 0x191   : > { %v16481_v11 = vadd.f32 %v1534_v49, %v1281_v45  ;;  %v1550_v62 = vpop.f32.mrf.mxu1  ;;  %1782 = vmatmul.mubr.bf16.gmra.mxu1 %v16225_v0  ;;  %3391 = vmatprep.subr.bf16.mxu1 %v15329_v26  ;;  %v15340_v26 = vpack.c.bf16 %v16405_v1, %v16393_v9 }
 0x192   : > { %v1283_v8 = vpop.f32.mrf.mxu0  ;;  %1789 = vmatprep.mubr.bf16.mxu1 %v16227_v47 }
 0x193   : > { %v16483_v36 = vadd.f32 %v1536_v44, %v1283_v8  ;;  %v1552_v6 = vpop.f32.mrf.mxu1  ;;  %v15332_v57 = vpack.c.bf16 %v16481_v11, %v16477_v33  ;;  %v14760_v33 = vld [vmem:[%s22269_s2 + $0xa8] ss:$12 sps:$4 sm:$0xff]  }
 0x194   : > { %v1287_v51 = vpop.f32.mrf.mxu0  ;;  %1983 = vmatmul.mubr.bf16.gmra.mxu0 %v22487_v53  ;;  %3392 = vmatpush2.bf16.msra.mxu1 %v15330_v34 }
 0x195   : > { %12481 = vmatprep.mubr.msk.bf16.mxu0 %vm1006_vm1, %v22488_v14  ;;  %v16492_v49 = vadd.f32 %v1540_v48, %v1287_v51  ;;  %v1554_v0 = vpop.f32.mrf.mxu1  ;;  %3393 = vmatprep.subr.bf16.mxu1 %v15331_v21  ;;  %v15333_v47 = vpack.c.bf16 %v16483_v36, %v16479_v5 }
 0x196   : > { %v1289_v3 = vpop.f32.mrf.mxu0 }
 0x197   : > { %v16494_v44 = vadd.f32 %v1542_v24, %v1289_v3  ;;  %v1556_v42 = vpop.f32.mrf.mxu1 }
 0x198   : > { %v1291_v35 = vpop.f32.mrf.mxu0  ;;  %3394 = vmatpush2.bf16.msra.mxu1 %v15334_v52  ;;  %v14737_v52 = vld [vmem:[%s22269_s2 + $0x34] ss:$12 sps:$4 sm:$0xff]  }
 0x199   : > { %v16509_v28 = vadd.f32 %v1544_v32, %v1291_v35  ;;  %v1560_v43 = vpop.f32.mrf.mxu1  ;;  %1790 = vmatmul.mubr.bf16.gmra.mxu1 %v16235_v23  ;;  %3395 = vmatprep.subr.bf16.mxu1 %v15335_v39 }
 0x19a   : > { %v1293_v48 = vpop.f32.mrf.mxu0  ;;  %3405 = vmatprep.mubr.bf16.mxu1 %v16505_v17 }
 0x19b   : > { %v16511_v24 = vadd.f32 %v1546_v54, %v1293_v48  ;;  %v1562_v55 = vpop.f32.mrf.mxu1 }
 0x19c   : > { %v1297_v7 = vpop.f32.mrf.mxu0  ;;  %1991 = vmatmul.mubr.bf16.gmra.mxu0 %v16204_v16  ;;  %3396 = vmatpush2.bf16.msra.mxu1 %v15336_v4 }
 0x19d   : > { %12482 = vmatprep.mubr.msk.bf16.mxu0 %vm1006_vm1, %v16208_v10  ;;  %v16522_v32 = vadd.f32 %v1550_v62, %v1297_v7  ;;  %v1564_v60 = vpop.f32.mrf.mxu1  ;;  %3397 = vmatprep.subr.bf16.mxu1 %v15337_v50 }
 0x19e   : > { %v1299_v46 = vpop.f32.mrf.mxu0 }
 0x19f   : > { %v16524_v23 = vadd.f32 %v1552_v6, %v1299_v46  ;;  %v1566_v18 = vpop.f32.mrf.mxu1 }
 0x1a0   : > { %v1301_v16 = vpop.f32.mrf.mxu0  ;;  %3398 = vmatpush2.bf16.msra.mxu1 %v15338_v12  ;;  %v2541_v12 = vld [vmem:[#allocation2 + $0x204] sm:$0x11] }
 0x1a1   : > { %v16530_v45 = vadd.f32 %v1554_v0, %v1301_v16  ;;  %v1570_v59 = vpop.f32.mrf.mxu1  ;;  %3399 = vmatprep.subr.bf16.mxu1 %v15339_v25  ;;  %v14729_v0 = vld [vmem:[%s22269_s2 + $0x18] ss:$12 sps:$4 sm:$0xff]   ;;  %v22490_v16 = vmov 0 }
 0x1a2   : > { %v1303_v10 = vpop.f32.mrf.mxu0  ;;  %v22491_v16 = vsel %vm16580_vm8, 4294967295, %v22490_v16 }
 0x1a3   : > { %v16532_v61 = vadd.f32 %v1556_v42, %v1303_v10  ;;  %v1572_v8 = vpop.f32.mrf.mxu1  ;;  %22492 = vst [vmem:[#allocation8_spill] sm:$0xff] %v22491_v16 }
 0x1a4   : > { %v1307_v54 = vpop.f32.mrf.mxu0  ;;  %1999 = vmatmul.mubr.bf16.gmra.mxu0 %v16223_v56  ;;  %3400 = vmatpush2.bf16.msra.mxu1 %v15340_v26 }
 0x1a5   : > { %3608 = vmatprep.mubr.bf16.mxu0 %v22489_v19  ;;  %v16538_v27 = vadd.f32 %v1560_v43, %v1307_v54  ;;  %v1574_v62 = vpop.f32.mrf.mxu1  ;;  %3401 = vmatprep.subr.bf16.mxu1 %v15323_v41  ;;  %v14735_v54 = vld [vmem:[%s22269_s2 + $0x30] ss:$12 sps:$4 sm:$0xff]  }
 0x1a6   : > { %v1309_v31 = vpop.f32.mrf.mxu0 }
 0x1a7   : > { %v16540_v37 = vadd.f32 %v1562_v55, %v1309_v31  ;;  %v1576_v53 = vpop.f32.mrf.mxu1 }
 0x1a8   : > { %v1311_v51 = vpop.f32.mrf.mxu0  ;;  %3402 = vmatpush2.bf16.msra.mxu1 %v15322_v30 }
 0x1a9   : > { %v16548_v9 = vadd.f32 %v1564_v60, %v1311_v51  ;;  %v1580_v34 = vpop.f32.mrf.mxu1  ;;  %3403 = vmatprep.subr.bf16.mxu1 %v15317_v20 }
 0x1aa   : > { %v1313_v56 = vpop.f32.mrf.mxu0 }
 0x1ab   : > { %v16550_v1 = vadd.f32 %v1566_v18, %v1313_v56  ;;  %v1582_v14 = vpop.f32.mrf.mxu1 }
 0x1ac   : > { %v1317_v6 = vpop.f32.mrf.mxu0  ;;  %3404 = vmatpush2.bf16.msra.mxu1 %v15316_v15 }
 0x1ad   : > { %v16564_v29 = vadd.f32 %v1570_v59, %v1317_v6  ;;  %v1584_v2 = vpop.f32.mrf.mxu1  ;;  %3779 = vmatprep.subr.bf16.mxu1 %v22489_v19 }
 0x1ae   : > { %v1319_v22 = vpop.f32.mrf.mxu0 }
 0x1af   : > { %v16566_v30 = vadd.f32 %v1572_v8, %v1319_v22  ;;  %v1586_v20 = vpop.f32.mrf.mxu1  ;;  %3406 = vmatmul.mubr.bf16.vlgmr.msra.gmra.mxu1 %v14724_v13  ;;  %v14743_v8 = vld [vmem:[%s22269_s2 + $0x4c] ss:$12 sps:$4 sm:$0xff]  }
 0x1b0   : > { %v1321_v58 = vpop.f32.mrf.mxu0  ;;  %3415 = vmatprep.mubr.bf16.mxu1 %v14731_v40  ;;  %v15442_v40 = vmov 65535  }
 0x1b1   : > { %v16569_v21 = vadd.f32 %v1574_v62, %v1321_v58  ;;  %v1623_v38 = vpop.f32.mrf.mxu1 }
 0x1b2   : > { %v1323_v41 = vpop.f32.mrf.mxu0 }
 0x1b3   : > { %v16571_v63 = vadd.f32 %v1576_v53, %v1323_v41  ;;  %v1625_v3 = vpop.f32.mrf.mxu1  ;;  %v14741_v41 = vld [vmem:[%s22269_s2 + $0x48] ss:$12 sps:$4 sm:$0xff]  }
 0x1b4   : > { %v1327_v15 = vpop.f32.mrf.mxu0 }
 0x1b5   : > { %v1581_v42 = vadd.f32 %v1580_v34, %v1327_v15  ;;  %v1626_v48 = vpop.f32.mrf.mxu1  ;;  %v14749_v15 = vld [vmem:[%s22269_s2 + $0x64] ss:$12 sps:$4 sm:$0xff]  }
 0x1b6   : > { %v1329_v35 = vpop.f32.mrf.mxu0 }
 0x1b7   : > { %v1583_v39 = vadd.f32 %v1582_v14, %v1329_v35  ;;  %v1628_v4 = vpop.f32.mrf.mxu1  ;;  %3416 = vmatmul.mubr.bf16.gmra.mxu1 %v14729_v0 }
 0x1b8   : > { %v1331_v43 = vpop.f32.mrf.mxu0  ;;  %3425 = vmatprep.mubr.bf16.mxu1 %v14737_v52 }
 0x1b9   : > { %v14106_v7 = vpack.c.bf16 %v1583_v39, %v1581_v42  ;;  %v1585_v50 = vadd.f32 %v1584_v2, %v1331_v43  ;;  %v1631_v60 = vpop.f32.mrf.mxu1  ;;  %v3362_v2 = vsel %vm1073_vm0, 4294967295, %v15442_v40  ;;  %v15346_v40 = vpack.c.bf16 %v16530_v45, %v16522_v32 }
 0x1ba   : > { %v1333_v55 = vpop.f32.mrf.mxu0  ;;  %v16601_v52 = vsel %vm3361_vm10, %v3362_v2, 0  ;;  %v15347_v2 = vpack.c.bf16 %v16511_v24, %v16494_v44  ;;  %v14756_v24 = vld [vmem:[%s22269_s2 + $0x90] ss:$12 sps:$4 sm:$0xff]  }
 0x1bb   : > { %v1587_v46 = vadd.f32 %v1586_v20, %v1333_v55  ;;  %v1633_v59 = vpop.f32.mrf.mxu1  ;;  %22493 = vst [vmem:[#allocation3_spill] sm:$0xff] %v16601_v52 }
 0x1bc   : > { %v1832_v18 = vpop.f32.mrf.mxu0  ;;  %v14747_v59 = vld [vmem:[%s22269_s2 + $0x60] ss:$12 sps:$4 sm:$0xff]  }
 0x1bd   : > { %v14108_v25 = vpack.c.bf16 %v1587_v46, %v1585_v50  ;;  %v1833_v10 = vadd.f32 %v1832_v18, %v1623_v38  ;;  %v1634_v51 = vpop.f32.mrf.mxu1 }
 0x1be   : > { %v1834_v26 = vpop.f32.mrf.mxu0 }
 0x1bf   : > { %v2542_v31 = vsel %vm16580_vm8, %v14108_v25, %v2541_v12  ;;  %v14023_v62 = vpack.c.bf16 %v1833_v10, %v1833_v10  ;;  %v1636_v34 = vpop.f32.mrf.mxu1  ;;  %3426 = vmatmul.mubr.bf16.gmra.mxu1 %v14735_v54  ;;  %v15341_v25 = vpack.c.bf16 %v16571_v63, %v16566_v30  ;;  %v14754_v26 = vld [vmem:[%s22269_s2 + $0x7c] ss:$12 sps:$4 sm:$0xff]  }
 0x1c0   : > { %2543 = vst [vmem:[#allocation2 + $0x204] sm:$0x11] %v2542_v31  ;;  %v1835_v53 = vpop.f32.mrf.mxu0  ;;  %3435 = vmatprep.mubr.bf16.mxu1 %v14743_v8  ;;  %v15342_v31 = vpack.c.bf16 %v16569_v21, %v16564_v29  ;;  %v15345_v21 = vpack.c.bf16 %v16532_v61, %v16524_v23 }
 0x1c1   : > { %2449 = vst.msk [vmem:[#allocation2 + $0x8] sm:$0xf] %vm2448_vm9, %v14023_v62  ;;  %v1836_v56 = vadd.f32 %v1835_v53, %v1626_v48  ;;  %v1639_v13 = vpop.f32.mrf.mxu1  ;;  %v15343_v62 = vpack.c.bf16 %v16550_v1, %v16540_v37 }
 0x1c2   : > { %v1837_v6 = vpop.f32.mrf.mxu0 }
 0x1c3   : > { %v14025_v14 = vpack.c.bf16 %v1836_v56, %v1836_v56  ;;  %v1641_v20 = vpop.f32.mrf.mxu1  ;;  %v15344_v6 = vpack.c.bf16 %v16548_v9, %v16538_v27  ;;  %v14758_v27 = vld [vmem:[%s22269_s2 + $0x94] ss:$12 sps:$4 sm:$0xff]  }
 0x1c4   : > { %v1840_v22 = vpop.f32.mrf.mxu0 }
 0x1c5   : > { %2451 = vst.msk [vmem:[#allocation2 + $0x14] sm:$0xf] %vm2448_vm9, %v14025_v14  ;;  %v1841_v58 = vadd.f32 %v1840_v22, %v1631_v60  ;;  %v1642_v0 = vpop.f32.mrf.mxu1 }
 0x1c6   : > { %v1842_v38 = vpop.f32.mrf.mxu0 }
 0x1c7   : > { %v14027_v3 = vpack.c.bf16 %v1841_v58, %v1841_v58  ;;  %v2703_v35 = vld [vmem:[#allocation2 + $0x204] sm:$0x11]  ;;  %v1644_v4 = vpop.f32.mrf.mxu1  ;;  %3436 = vmatmul.mubr.bf16.gmra.mxu1 %v14741_v41 }
 0x1c8   : > { %v1843_v42 = vpop.f32.mrf.mxu0  ;;  %v12685_v39 = vcombine.low %v14106_v7, %v2703_v35  ;;  %v12686_v48 = vcombine.high %v14106_v7, %v2703_v35  ;;  %3445 = vmatprep.mubr.bf16.mxu1 %v14749_v15  ;;  %v15348_v15 = vpack.c.bf16 %v16509_v28, %v16492_v49  ;;  %v14762_v49 = vld [vmem:[%s22269_s2 + $0xac] ss:$12 sps:$4 sm:$0xff]  }
 0x1c9   : > { %2453 = vst.msk [vmem:[#allocation2 + $0x20] sm:$0xf] %vm2448_vm9, %v14027_v3  ;;  %v1844_v43 = vadd.f32 %v1843_v42, %v1634_v51  ;;  %v1647_v12 = vpop.f32.mrf.mxu1 }
 0x1ca   : > { %v1845_v55 = vpop.f32.mrf.mxu0  ;;  %v3368_v50 = vand.u32 %v12686_v48, %v16601_v52  ;;  %v3365_v46 = vand.u32 %v12685_v39, %v16601_v52  ;;  %v14727_v39 = vld [vmem:[%s22269_s2 + $0x8] ss:$12 sps:$4 sm:$0xff]  }
 0x1cb   : > { %v14029_v60 = vpack.c.bf16 %v1844_v43, %v1844_v43  ;;  %v1649_v10 = vpop.f32.mrf.mxu1 }
 0x1cc   : > { %v1848_v18 = vpop.f32.mrf.mxu0  ;;  %3580 = vmatprep.subr.bf16.mxu0 %v3368_v50 }
 0x1cd   : > { %2455 = vst.msk [vmem:[#allocation2 + $0x2c] sm:$0xf] %vm2448_vm9, %v14029_v60  ;;  %v1849_v7 = vadd.f32 %v1848_v18, %v1639_v13  ;;  %3581 = vmatpush1.bf16.msra.mxu0 %v3365_v46  ;;  %v1650_v30 = vpop.f32.mrf.mxu1  ;;  %v14752_v13 = vld [vmem:[%s22269_s2 + $0x78] ss:$12 sps:$4 sm:$0xff]   ;;  %v14732_v18 = vld [vmem:[%s22269_s2 + $0x20] ss:$12 sps:$4 sm:$0xff]  }
 0x1ce   : > { %v1850_v54 = vpop.f32.mrf.mxu0  ;;  %3582 = vmatprep.subr.bf16.mxu0 %v15341_v25 }
 0x1cf   : > { %v14031_v8 = vpack.c.bf16 %v1849_v7, %v1849_v7  ;;  %v1652_v53 = vpop.f32.mrf.mxu1  ;;  %3446 = vmatmul.mubr.bf16.gmra.mxu1 %v14747_v59 }
 0x1d0   : > { %v1851_v63 = vpop.f32.mrf.mxu0  ;;  %3455 = vmatprep.mubr.bf16.mxu1 %v14754_v26 }
 0x1d1   : > { %2457 = vst.msk [vmem:[#allocation2 + $0x38] sm:$0xf] %vm2448_vm9, %v14031_v8  ;;  %v1852_v51 = vadd.f32 %v1851_v63, %v1642_v0  ;;  %3583 = vmatpush1.bf16.msra.mxu0 %v15342_v31  ;;  %v1655_v14 = vpop.f32.mrf.mxu1 }
 0x1d2   : > { %v1853_v56 = vpop.f32.mrf.mxu0  ;;  %3584 = vmatprep.subr.bf16.mxu0 %v15343_v62  ;;  %v14771_v62 = vld [vmem:[%s22269_s2 + $0xdc] ss:$12 sps:$4 sm:$0xff]  }
 0x1d3   : > { %v14033_v34 = vpack.c.bf16 %v1852_v51, %v1852_v51  ;;  %v1657_v1 = vpop.f32.mrf.mxu1 }
 0x1d4   : > { %v1856_v29 = vpop.f32.mrf.mxu0 }
 0x1d5   : > { %2459 = vst.msk [vmem:[#allocation2 + $0x44] sm:$0xf] %vm2448_vm9, %v14033_v34  ;;  %v1857_v37 = vadd.f32 %v1856_v29, %v1647_v12  ;;  %3585 = vmatpush1.bf16.msra.mxu0 %v15344_v6  ;;  %v1658_v23 = vpop.f32.mrf.mxu1  ;;  %v14738_v34 = vld [vmem:[%s22269_s2 + $0x38] ss:$12 sps:$4 sm:$0xff]   ;;  %v22305_v6 = vmov 0.0  }
 0x1d6   : > { %v1858_v22 = vpop.f32.mrf.mxu0  ;;  %3586 = vmatprep.subr.bf16.mxu0 %v15345_v21 }
 0x1d7   : > { %v14035_v9 = vpack.c.bf16 %v1857_v37, %v1857_v37  ;;  %v1660_v20 = vpop.f32.mrf.mxu1  ;;  %3456 = vmatmul.mubr.bf16.gmra.mxu1 %v14752_v13 }
 0x1d8   : > { %v1859_v61 = vpop.f32.mrf.mxu0  ;;  %3465 = vmatprep.mubr.bf16.mxu1 %v14758_v27  ;;  %v14744_v20 = vld [vmem:[%s22269_s2 + $0x50] ss:$12 sps:$4 sm:$0xff]  }
 0x1d9   : > { %2461 = vst.msk [vmem:[#allocation2 + $0x50] sm:$0xf] %vm2448_vm9, %v14035_v9  ;;  %v1860_v58 = vadd.f32 %v1859_v61, %v1650_v30  ;;  %3587 = vmatpush1.bf16.msra.mxu0 %v15346_v40  ;;  %v1663_v3 = vpop.f32.mrf.mxu1  ;;  %v14764_v30 = vld [vmem:[%s22269_s2 + $0xc0] ss:$12 sps:$4 sm:$0xff]   ;;  %v14769_v9 = vld [vmem:[%s22269_s2 + $0xd8] ss:$12 sps:$4 sm:$0xff]  }
 0x1da   : > { %v1861_v41 = vpop.f32.mrf.mxu0  ;;  %3588 = vmatprep.subr.bf16.mxu0 %v15347_v2 }
 0x1db   : > { %v14037_v38 = vpack.c.bf16 %v1860_v58, %v1860_v58  ;;  %v1665_v44 = vpop.f32.mrf.mxu1 }
 0x1dc   : > { %v1864_v32 = vpop.f32.mrf.mxu0 }
 0x1dd   : > { %2463 = vst.msk [vmem:[#allocation2 + $0x5c] sm:$0xf] %vm2448_vm9, %v14037_v38  ;;  %v1865_v45 = vadd.f32 %v1864_v32, %v1655_v14  ;;  %3589 = vmatpush1.bf16.msra.mxu0 %v15348_v15  ;;  %v1666_v35 = vpop.f32.mrf.mxu1 }
 0x1de   : > { %v1866_v0 = vpop.f32.mrf.mxu0  ;;  %3590 = vmatprep.subr.bf16.mxu0 %v15333_v47 }
 0x1df   : > { %v14039_v28 = vpack.c.bf16 %v1865_v45, %v1865_v45  ;;  %v1668_v5 = vpop.f32.mrf.mxu1  ;;  %3466 = vmatmul.mubr.bf16.gmra.mxu1 %v14756_v24  ;;  %v14775_v0 = vld [vmem:[%s22269_s2 + $0xf0] ss:$12 sps:$4 sm:$0xff]  }
 0x1e0   : > { %v1867_v42 = vpop.f32.mrf.mxu0  ;;  %3475 = vmatprep.mubr.bf16.mxu1 %v14762_v49 }
 0x1e1   : > { %2465 = vst.msk [vmem:[#allocation2 + $0x68] sm:$0xf] %vm2448_vm9, %v14039_v28  ;;  %v1868_v48 = vadd.f32 %v1867_v42, %v1658_v23  ;;  %3591 = vmatpush1.bf16.msra.mxu0 %v15332_v57  ;;  %v1671_v43 = vpop.f32.mrf.mxu1  ;;  %v14766_v57 = vld [vmem:[%s22269_s2 + $0xc4] ss:$12 sps:$4 sm:$0xff]   ;;  %v14777_v23 = vld [vmem:[%s22269_s2 + $0xf4] ss:$12 sps:$4 sm:$0xff]  }
 0x1e2   : > { %v1869_v36 = vpop.f32.mrf.mxu0  ;;  %14355 = vmatprep.subr.bf16.mxu0 %v22305_v6  ;;  %v14783_v28 = vld [vmem:[%s22269_s2 + $0x10c] ss:$12 sps:$4 sm:$0xff]  }
 0x1e3   : > { %v14041_v47 = vpack.c.bf16 %v1868_v48, %v1868_v48  ;;  %v1673_v50 = vpop.f32.mrf.mxu1  ;;  %v14750_v48 = vld [vmem:[%s22269_s2 + $0x68] ss:$12 sps:$4 sm:$0xff]  }
 0x1e4   : > { %v1872_v4 = vpop.f32.mrf.mxu0  ;;  %12688 = vmatmul.mubr.msk.bf16.vlgmr.msra.gmra.mxu0 %vm3309_vm11, %v14727_v39 }
 0x1e5   : > { %2467 = vst.msk [vmem:[#allocation2 + $0x74] sm:$0xf] %vm2448_vm9, %v14041_v47  ;;  %v1873_v55 = vadd.f32 %v1872_v4, %v1663_v3  ;;  %3618 = vmatprep.mubr.bf16.mxu0 %v22489_v19  ;;  %v1674_v60 = vpop.f32.mrf.mxu1 }
 0x1e6   : > { %v1874_v11 = vpop.f32.mrf.mxu0 }
 0x1e7   : > { %v14043_v46 = vpack.c.bf16 %v1873_v55, %v1873_v55  ;;  %v1676_v7 = vpop.f32.mrf.mxu1  ;;  %3476 = vmatmul.mubr.bf16.gmra.mxu1 %v14760_v33 }
 0x1e8   : > { %v1875_v12 = vpop.f32.mrf.mxu0  ;;  %3485 = vmatprep.mubr.bf16.mxu1 %v14766_v57  ;;  %v14781_v57 = vld [vmem:[%s22269_s2 + $0x108] ss:$12 sps:$4 sm:$0xff]  }
 0x1e9   : > { %2469 = vst.msk [vmem:[#allocation2 + $0x80] sm:$0xf] %vm2448_vm9, %v14043_v46  ;;  %v1876_v25 = vadd.f32 %v1875_v12, %v1666_v35  ;;  %v1679_v54 = vpop.f32.mrf.mxu1 }
 0x1ea   : > { %v1877_v10 = vpop.f32.mrf.mxu0 }
 0x1eb   : > { %v14045_v59 = vpack.c.bf16 %v1876_v25, %v1876_v25  ;;  %v1681_v31 = vpop.f32.mrf.mxu1  ;;  %v14755_v10 = vld [vmem:[%s22269_s2 + $0x80] ss:$12 sps:$4 sm:$0xff]  }
 0x1ec   : > { %v1880_v26 = vpop.f32.mrf.mxu0  ;;  %12689 = vmatmul.mubr.msk.bf16.gmra.mxu0 %vm3309_vm11, %v14732_v18 }
 0x1ed   : > { %2471 = vst.msk [vmem:[#allocation2 + $0x8c] sm:$0xf] %vm2448_vm9, %v14045_v59  ;;  %v1881_v8 = vadd.f32 %v1880_v26, %v1671_v43  ;;  %3628 = vmatprep.mubr.bf16.mxu0 %v22489_v19  ;;  %v1682_v53 = vpop.f32.mrf.mxu1 }
 0x1ee   : > { %v1882_v63 = vpop.f32.mrf.mxu0 }
 0x1ef   : > { %v14047_v51 = vpack.c.bf16 %v1881_v8, %v1881_v8  ;;  %v1684_v29 = vpop.f32.mrf.mxu1  ;;  %3486 = vmatmul.mubr.bf16.gmra.mxu1 %v14764_v30 }
 0x1f0   : > { %v1883_v56 = vpop.f32.mrf.mxu0  ;;  %3495 = vmatprep.mubr.bf16.mxu1 %v14771_v62 }
 0x1f1   : > { %2473 = vst.msk [vmem:[#allocation2 + $0x98] sm:$0xf] %vm2448_vm9, %v14047_v51  ;;  %v1884_v14 = vadd.f32 %v1883_v56, %v1674_v60  ;;  %v1687_v1 = vpop.f32.mrf.mxu1  ;;  %v14789_v60 = vld [vmem:[%s22269_s2 + $0x124] ss:$12 sps:$4 sm:$0xff]  }
 0x1f2   : > { %v1885_v21 = vpop.f32.mrf.mxu0 }
 0x1f3   : > { %v14049_v37 = vpack.c.bf16 %v1884_v14, %v1884_v14  ;;  %v1689_v27 = vpop.f32.mrf.mxu1 }
 0x1f4   : > { %v1888_v13 = vpop.f32.mrf.mxu0  ;;  %12690 = vmatmul.mubr.msk.bf16.gmra.mxu0 %vm3309_vm11, %v14738_v34  ;;  %v14734_v63 = vld [vmem:[#allocation2 + $0x80] ss:$12 sps:$4 sm:$0xff]   ;;  %v14794_v34 = vld [vmem:[%s22269_s2 + $0x13c] ss:$12 sps:$4 sm:$0xff]  }
 0x1f5   : > { %2475 = vst.msk [vmem:[#allocation2 + $0xa4] sm:$0xf] %vm2448_vm9, %v14049_v37  ;;  %v1889_v22 = vadd.f32 %v1888_v13, %v1679_v54  ;;  %3638 = vmatprep.mubr.bf16.mxu0 %v22489_v19  ;;  %v1690_v2 = vpop.f32.mrf.mxu1  ;;  %v14739_v37 = vld [vmem:[#allocation2 + $0x68] ss:$12 sps:$4 sm:$0xff]  }
 0x1f6   : > { %v1890_v40 = vpop.f32.mrf.mxu0 }
 0x1f7   : > { %v14051_v61 = vpack.c.bf16 %v1889_v22, %v1889_v22  ;;  %v1692_v38 = vpop.f32.mrf.mxu1  ;;  %3496 = vmatmul.mubr.bf16.gmra.mxu1 %v14769_v9 }
 0x1f8   : > { %v1891_v58 = vpop.f32.mrf.mxu0  ;;  %3505 = vmatprep.mubr.bf16.mxu1 %v14777_v23  ;;  %v14798_v38 = vld [vmem:[%s22269_s2 + $0x154] ss:$12 sps:$4 sm:$0xff]  }
 0x1f9   : > { %2477 = vst.msk [vmem:[#allocation2 + $0xb0] sm:$0xf] %vm2448_vm9, %v14051_v61  ;;  %v1892_v41 = vadd.f32 %v1891_v58, %v1682_v53  ;;  %v1695_v32 = vpop.f32.mrf.mxu1  ;;  %v14787_v53 = vld [vmem:[%s22269_s2 + $0x120] ss:$12 sps:$4 sm:$0xff]   ;;  %v14740_v61 = vld [vmem:[#allocation2 + $0x50] ss:$12 sps:$4 sm:$0xff]  }
 0x1fa   : > { %v1893_v15 = vpop.f32.mrf.mxu0 }
 0x1fb   : > { %v14053_v3 = vpack.c.bf16 %v1892_v41, %v1892_v41  ;;  %v1697_v24 = vpop.f32.mrf.mxu1 }
 0x1fc   : > { %v1896_v45 = vpop.f32.mrf.mxu0  ;;  %12691 = vmatmul.mubr.msk.bf16.gmra.mxu0 %vm3309_vm11, %v14744_v20  ;;  %v14733_v7 = vld [vmem:[#allocation2 + $0x98] ss:$12 sps:$4 sm:$0xff]  }
 0x1fd   : > { %2479 = vst.msk [vmem:[#allocation2 + $0xbc] sm:$0xf] %vm2448_vm9, %v14053_v3  ;;  %v1897_v44 = vadd.f32 %v1896_v45, %v1687_v1  ;;  %3648 = vmatprep.mubr.bf16.mxu0 %v22489_v19  ;;  %v1698_v42 = vpop.f32.mrf.mxu1  ;;  %v14759_v1 = vld [vmem:[%s22269_s2 + $0x98] ss:$12 sps:$4 sm:$0xff]  }
 0x1fe   : > { %v1898_v49 = vpop.f32.mrf.mxu0  ;;  %v14792_v20 = vld [vmem:[%s22269_s2 + $0x138] ss:$12 sps:$4 sm:$0xff]  }
 0x1ff   : > { %v14055_v35 = vpack.c.bf16 %v1897_v44, %v1897_v44  ;;  %v1700_v36 = vpop.f32.mrf.mxu1  ;;  %3506 = vmatmul.mubr.bf16.gmra.mxu1 %v14775_v0  ;;  %v14745_v45 = vld [vmem:[#allocation2 + $0x38] ss:$12 sps:$4 sm:$0xff]   ;;  %v14763_v44 = vld [vmem:[%s22269_s2 + $0xb0] ss:$12 sps:$4 sm:$0xff]  }
 0x200   : > { %v1899_v39 = vpop.f32.mrf.mxu0  ;;  %3515 = vmatprep.mubr.bf16.mxu1 %v14783_v28  ;;  %v14796_v36 = vld [vmem:[%s22269_s2 + $0x150] ss:$12 sps:$4 sm:$0xff]  }
 0x201   : > { %2481 = vst.msk [vmem:[#allocation2 + $0xc8] sm:$0xf] %vm2448_vm9, %v14055_v35  ;;  %v1900_v5 = vadd.f32 %v1899_v39, %v1690_v2  ;;  %v1703_v4 = vpop.f32.mrf.mxu1  ;;  %v14746_v39 = vld [vmem:[#allocation2 + $0x20] ss:$12 sps:$4 sm:$0xff]  }
 0x202   : > { %v1901_v47 = vpop.f32.mrf.mxu0 }
 0x203   : > { %v14057_v43 = vpack.c.bf16 %v1900_v5, %v1900_v5  ;;  %v1705_v11 = vpop.f32.mrf.mxu1 }
 0x204   : > { %v1904_v55 = vpop.f32.mrf.mxu0  ;;  %v14728_v50 = vld [vmem:[#allocation2 + $0xb0] ss:$12 sps:$4 sm:$0xff]   ;;  %12692 = vmatmul.mubr.msk.bf16.gmra.mxu0 %vm3309_vm11, %v14750_v48  ;;  %v14767_v11 = vld [vmem:[%s22269_s2 + $0xc8] ss:$12 sps:$4 sm:$0xff]  }
 0x205   : > { %2483 = vst.msk [vmem:[#allocation2 + $0xd4] sm:$0xf] %vm2448_vm9, %v14057_v43  ;;  %v1905_v33 = vadd.f32 %v1904_v55, %v1695_v32  ;;  %3658 = vmatprep.mubr.bf16.mxu0 %v22489_v19  ;;  %3780 = vmatpush1.bf16.msra.mxu1 %v14728_v50  ;;  %v1706_v18 = vpop.f32.mrf.mxu1  ;;  %v14802_v43 = vld [vmem:[%s22269_s2 + $0x16c] ss:$12 sps:$4 sm:$0xff]  }
 0x206   : > { %v1906_v46 = vpop.f32.mrf.mxu0  ;;  %3781 = vmatprep.subr.bf16.mxu1 %v22489_v19 }
 0x207   : > { %v14059_v12 = vpack.c.bf16 %v1905_v33, %v1905_v33  ;;  %v1708_v54 = vpop.f32.mrf.mxu1  ;;  %3516 = vmatmul.mubr.bf16.gmra.mxu1 %v14781_v57  ;;  %v14751_v33 = vld [vmem:[#allocation2 + $0x8] ss:$12 sps:$4 sm:$0xff]  }
 0x208   : > { %v1907_v25 = vpop.f32.mrf.mxu0  ;;  %3525 = vmatprep.mubr.bf16.mxu1 %v14789_v60 }
 0x209   : > { %2485 = vst.msk [vmem:[#allocation2 + $0xe0] sm:$0xf] %vm2448_vm9, %v14059_v12  ;;  %v1908_v59 = vadd.f32 %v1907_v25, %v1698_v42  ;;  %3782 = vmatpush1.bf16.msra.mxu1 %v14733_v7  ;;  %v1711_v31 = vpop.f32.mrf.mxu1 }
 0x20a   : > { %v1909_v26 = vpop.f32.mrf.mxu0  ;;  %3783 = vmatprep.subr.bf16.mxu1 %v22489_v19 }
 0x20b   : > { %v14061_v8 = vpack.c.bf16 %v1908_v59, %v1908_v59  ;;  %v1713_v51 = vpop.f32.mrf.mxu1  ;;  %v14800_v59 = vld [vmem:[%s22269_s2 + $0x168] ss:$12 sps:$4 sm:$0xff]   ;;  %v14808_v26 = vld [vmem:[%s22269_s2 + $0x184] ss:$12 sps:$4 sm:$0x7f]  }
 0x20c   : > { %v1912_v30 = vpop.f32.mrf.mxu0  ;;  %12693 = vmatmul.mubr.msk.bf16.gmra.mxu0 %vm3309_vm11, %v14755_v10 }
 0x20d   : > { %2487 = vst.msk [vmem:[#allocation2 + $0xec] sm:$0xf] %vm2448_vm9, %v14061_v8  ;;  %v1913_v62 = vadd.f32 %v1912_v30, %v1703_v4  ;;  %3668 = vmatprep.mubr.bf16.mxu0 %v22489_v19  ;;  %3784 = vmatpush1.bf16.msra.mxu1 %v14734_v63  ;;  %v1714_v29 = vpop.f32.mrf.mxu1  ;;  %v16780_v63 = vld [vmem:[%s22269_s2 + $0xe0] ss:$12 sps:$4 sm:$0xff]  }
 0x20e   : > { %v1914_v56 = vpop.f32.mrf.mxu0  ;;  %3785 = vmatprep.subr.bf16.mxu1 %v22489_v19 }
 0x20f   : > { %v14063_v14 = vpack.c.bf16 %v1913_v62, %v1913_v62  ;;  %v1716_v22 = vpop.f32.mrf.mxu1  ;;  %3526 = vmatmul.mubr.bf16.gmra.mxu1 %v14787_v53 }
 0x210   : > { %v1915_v21 = vpop.f32.mrf.mxu0  ;;  %3535 = vmatprep.mubr.bf16.mxu1 %v14794_v34 }
 0x211   : > { %2489 = vst.msk [vmem:[#allocation2 + $0xf8] sm:$0xf] %vm2448_vm9, %v14063_v14  ;;  %v1916_v13 = vadd.f32 %v1915_v21, %v1706_v18  ;;  %3786 = vmatpush1.bf16.msra.mxu1 %v14739_v37  ;;  %v1719_v40 = vpop.f32.mrf.mxu1  ;;  %v14806_v37 = vld [vmem:[%s22269_s2 + $0x180] ss:$12 sps:$4 sm:$0x7f]  }
 0x212   : > { %v1917_v27 = vpop.f32.mrf.mxu0  ;;  %3787 = vmatprep.subr.bf16.mxu1 %v22489_v19 }
 0x213   : > { %v14065_v9 = vpack.c.bf16 %v1916_v13, %v1916_v13  ;;  %v1721_v58 = vpop.f32.mrf.mxu1 }
 0x214   : > { %v1920_v23 = vpop.f32.mrf.mxu0  ;;  %12694 = vmatmul.mubr.msk.bf16.gmra.mxu0 %vm3309_vm11, %v14759_v1 }
 0x215   : > { %2491 = vst.msk [vmem:[#allocation2 + $0x104] sm:$0xf] %vm2448_vm9, %v14065_v9  ;;  %v1921_v2 = vadd.f32 %v1920_v23, %v1711_v31  ;;  %3678 = vmatprep.mubr.bf16.mxu0 %v22489_v19  ;;  %3788 = vmatpush1.bf16.msra.mxu1 %v14740_v61  ;;  %v1722_v3 = vpop.f32.mrf.mxu1  ;;  %v16793_v9 = vld [vmem:[%s22269_s2 + $0xf8] ss:$12 sps:$4 sm:$0xff]  }
 0x216   : > { %v1922_v41 = vpop.f32.mrf.mxu0  ;;  %3789 = vmatprep.subr.bf16.mxu1 %v22489_v19 }
 0x217   : > { %v14067_v15 = vpack.c.bf16 %v1921_v2, %v1921_v2  ;;  %v1724_v0 = vpop.f32.mrf.mxu1  ;;  %3536 = vmatmul.mubr.bf16.gmra.mxu1 %v14792_v20 }
 0x218   : > { %v1923_v32 = vpop.f32.mrf.mxu0  ;;  %3545 = vmatprep.mubr.bf16.mxu1 %v14798_v38 }
 0x219   : > { %2493 = vst.msk [vmem:[#allocation2 + $0x110] sm:$0xf] %vm2448_vm9, %v14067_v15  ;;  %v1924_v24 = vadd.f32 %v1923_v32, %v1714_v29  ;;  %3790 = vmatpush1.bf16.msra.mxu1 %v14745_v45  ;;  %v1727_v35 = vpop.f32.mrf.mxu1 }
 0x21a   : > { %v1925_v49 = vpop.f32.mrf.mxu0  ;;  %3791 = vmatprep.subr.bf16.mxu1 %v22489_v19 }
 0x21b   : > { %v14069_v28 = vpack.c.bf16 %v1924_v24, %v1924_v24  ;;  %v1729_v5 = vpop.f32.mrf.mxu1 }
 0x21c   : > { %v1928_v42 = vpop.f32.mrf.mxu0  ;;  %12695 = vmatmul.mubr.msk.bf16.gmra.mxu0 %vm3309_vm11, %v14763_v44 }
 0x21d   : > { %2495 = vst.msk [vmem:[#allocation2 + $0x11c] sm:$0xf] %vm2448_vm9, %v14069_v28  ;;  %v1929_v48 = vadd.f32 %v1928_v42, %v1719_v40  ;;  %3688 = vmatprep.mubr.bf16.mxu0 %v22489_v19  ;;  %3792 = vmatpush1.bf16.msra.mxu1 %v14746_v39  ;;  %v1730_v55 = vpop.f32.mrf.mxu1 }
 0x21e   : > { %v1930_v47 = vpop.f32.mrf.mxu0  ;;  %3793 = vmatprep.subr.bf16.mxu1 %v22489_v19 }
 0x21f   : > { %v14071_v4 = vpack.c.bf16 %v1929_v48, %v1929_v48  ;;  %v1732_v46 = vpop.f32.mrf.mxu1  ;;  %3546 = vmatmul.mubr.bf16.gmra.mxu1 %v14796_v36 }
 0x220   : > { %v1931_v50 = vpop.f32.mrf.mxu0  ;;  %3555 = vmatprep.mubr.bf16.mxu1 %v14802_v43  ;;  %v16814_v43 = vld [vmem:[%s22269_s2 + $0x128] ss:$12 sps:$4 sm:$0xff]  }
 0x221   : > { %2497 = vst.msk [vmem:[#allocation2 + $0x128] sm:$0xf] %vm2448_vm9, %v14071_v4  ;;  %v1932_v57 = vadd.f32 %v1931_v50, %v1722_v3  ;;  %3794 = vmatpush1.bf16.msra.mxu1 %v14751_v33  ;;  %v1735_v18 = vpop.f32.mrf.mxu1 }
 0x222   : > { %v1933_v60 = vpop.f32.mrf.mxu0  ;;  %3795 = vmatprep.subr.bf16.mxu1 %v22489_v19 }
 0x223   : > { %v14073_v12 = vpack.c.bf16 %v1932_v57, %v1932_v57  ;;  %v1737_v10 = vpop.f32.mrf.mxu1 }
 0x224   : > { %v1936_v25 = vpop.f32.mrf.mxu0  ;;  %12696 = vmatmul.mubr.msk.bf16.gmra.mxu0 %vm3309_vm11, %v14767_v11 }
 0x225   : > { %2499 = vst.msk [vmem:[#allocation2 + $0x134] sm:$0xf] %vm2448_vm9, %v14073_v12  ;;  %v1937_v7 = vadd.f32 %v1936_v25, %v1727_v35  ;;  %3698 = vmatprep.mubr.bf16.mxu0 %v22489_v19  ;;  %v1738_v31 = vpop.f32.mrf.mxu1 }
 0x226   : > { %v1938_v54 = vpop.f32.mrf.mxu0 }
 0x227   : > { %v14075_v8 = vpack.c.bf16 %v1937_v7, %v1937_v7  ;;  %v1740_v51 = vpop.f32.mrf.mxu1  ;;  %3556 = vmatmul.mubr.bf16.gmra.mxu1 %v14800_v59  ;;  %v16825_v54 = vld [vmem:[%s22269_s2 + $0x140] ss:$12 sps:$4 sm:$0xff]  }
 0x228   : > { %v1939_v30 = vpop.f32.mrf.mxu0  ;;  %3565 = vmatprep.mubr.bf16.mxu1 %v14808_v26 }
 0x229   : > { %2501 = vst.msk [vmem:[#allocation2 + $0x140] sm:$0xf] %vm2448_vm9, %v14075_v8  ;;  %v1940_v62 = vadd.f32 %v1939_v30, %v1730_v55  ;;  %v1743_v34 = vpop.f32.mrf.mxu1 }
 0x22a   : > { %v1941_v53 = vpop.f32.mrf.mxu0 }
 0x22b   : > { %v14077_v56 = vpack.c.bf16 %v1940_v62, %v1940_v62  ;;  %v1745_v21 = vpop.f32.mrf.mxu1 }
 0x22c   : > { %v1944_v14 = vpop.f32.mrf.mxu0  ;;  %12697 = vmatmul.mubr.msk.bf16.gmra.mxu0 %vm3309_vm11, %v16780_v63 }
 0x22d   : > { %2503 = vst.msk [vmem:[#allocation2 + $0x14c] sm:$0xf] %vm2448_vm9, %v14077_v56  ;;  %v1945_v29 = vadd.f32 %v1944_v14, %v1735_v18  ;;  %3708 = vmatprep.mubr.bf16.mxu0 %v22489_v19  ;;  %v1746_v22 = vpop.f32.mrf.mxu1 }
 0x22e   : > { %v1946_v1 = vpop.f32.mrf.mxu0 }
 0x22f   : > { %v14079_v13 = vpack.c.bf16 %v1945_v29, %v1945_v29  ;;  %v1748_v23 = vpop.f32.mrf.mxu1  ;;  %3566 = vmatmul.mubr.bf16.gmra.mxu1 %v14806_v37  ;;  %v14779_v1 = vld [vmem:[#allocation2 + $0x128] ss:$12 sps:$4 sm:$0xff]  }
 0x230   : > { %v1947_v27 = vpop.f32.mrf.mxu0  ;;  %3811 = vmatprep.mubr.bf16.mxu1 %v16505_v17  ;;  %v16804_v17 = vld [vmem:[%s22269_s2 + $0x110] ss:$12 sps:$4 sm:$0xff]  }
 0x231   : > { %2505 = vst.msk [vmem:[#allocation2 + $0x158] sm:$0xf] %vm2448_vm9, %v14079_v13  ;;  %v1948_v40 = vadd.f32 %v1947_v27, %v1738_v31  ;;  %v1751_v58 = vpop.f32.mrf.mxu1  ;;  %v16837_v13 = vld [vmem:[%s22269_s2 + $0x158] ss:$12 sps:$4 sm:$0xff]  }
 0x232   : > { %v1949_v61 = vpop.f32.mrf.mxu0 }
 0x233   : > { %v14081_v2 = vpack.c.bf16 %v1948_v40, %v1948_v40  ;;  %v1753_v38 = vpop.f32.mrf.mxu1 }
 0x234   : > { %v1952_v20 = vpop.f32.mrf.mxu0  ;;  %12698 = vmatmul.mubr.msk.bf16.gmra.mxu0 %vm3309_vm11, %v16793_v9  ;;  %v14774_v53 = vld [vmem:[#allocation2 + $0x140] ss:$12 sps:$4 sm:$0xff]  }
 0x235   : > { %2507 = vst.msk [vmem:[#allocation2 + $0x164] sm:$0xf] %vm2448_vm9, %v14081_v2  ;;  %v1953_v41 = vadd.f32 %v1952_v20, %v1743_v34  ;;  %3718 = vmatprep.mubr.bf16.mxu0 %v22489_v19  ;;  %v1754_v32 = vpop.f32.mrf.mxu1 }
 0x236   : > { %v1954_v15 = vpop.f32.mrf.mxu0 }
 0x237   : > { %v14083_v3 = vpack.c.bf16 %v1953_v41, %v1953_v41  ;;  %v1756_v24 = vpop.f32.mrf.mxu1 }
 0x238   : > { %v1955_v45 = vpop.f32.mrf.mxu0 }
 0x239   : > { %2509 = vst.msk [vmem:[#allocation2 + $0x170] sm:$0xf] %vm2448_vm9, %v14083_v3  ;;  %v1956_v44 = vadd.f32 %v1955_v45, %v1746_v22  ;;  %v1759_v28 = vpop.f32.mrf.mxu1  ;;  %v14785_v45 = vld [vmem:[#allocation2 + $0xf8] ss:$12 sps:$4 sm:$0xff]  }
 0x23a   : > { %v1957_v0 = vpop.f32.mrf.mxu0 }
 0x23b   : > { %v14085_v49 = vpack.c.bf16 %v1956_v44, %v1956_v44  ;;  %v1761_v39 = vpop.f32.mrf.mxu1  ;;  %v14804_v44 = vld [vmem:[%s22269_s2 + $0x170] ss:$12 sps:$4 sm:$0xff]  }
 0x23c   : > { %v1960_v35 = vpop.f32.mrf.mxu0  ;;  %12699 = vmatmul.mubr.msk.bf16.gmra.mxu0 %vm3309_vm11, %v16804_v17  ;;  %v14773_v59 = vld [vmem:[#allocation2 + $0x158] ss:$12 sps:$4 sm:$0xff]   ;;  %v14786_v39 = vld [vmem:[#allocation2 + $0xe0] ss:$12 sps:$4 sm:$0xff]  }
 0x23d   : > { %2511 = vst.msk [vmem:[#allocation2 + $0x17c] sm:$0xf] %vm2448_vm9, %v14085_v49  ;;  %v1961_v42 = vadd.f32 %v1960_v35, %v1751_v58  ;;  %3728 = vmatprep.mubr.bf16.mxu0 %v22489_v19  ;;  %v1762_v36 = vpop.f32.mrf.mxu1  ;;  %v14780_v58 = vld [vmem:[#allocation2 + $0x110] ss:$12 sps:$4 sm:$0xff]  }
 0x23e   : > { %v1962_v48 = vpop.f32.mrf.mxu0 }
 0x23f   : > { %v14087_v5 = vpack.c.bf16 %v1961_v42, %v1961_v42  ;;  %v1764_v55 = vpop.f32.mrf.mxu1 }
 0x240   : > { %v1963_v47 = vpop.f32.mrf.mxu0  ;;  %v14810_v55 = vld [vmem:[%s22269_s2 + $0x188] ss:$12 sps:$4 sm:$0x7f]  }
 0x241   : > { %2513 = vst.msk [vmem:[#allocation2 + $0x188] sm:$0xf] %vm2448_vm9, %v14087_v5  ;;  %v1964_v4 = vadd.f32 %v1963_v47, %v1754_v32  ;;  %v1767_v11 = vpop.f32.mrf.mxu1 }
 0x242   : > { %v1965_v50 = vpop.f32.mrf.mxu0 }
 0x243   : > { %v14089_v33 = vpack.c.bf16 %v1964_v4, %v1964_v4  ;;  %v1769_v12 = vpop.f32.mrf.mxu1  ;;  %v14816_v50 = vld [vmem:[%s22268_s1 + $0xac] ss:$12 sps:$4 sm:$0xff]  }
 0x244   : > { %v1968_v57 = vpop.f32.mrf.mxu0  ;;  %v14768_v46 = vld [vmem:[#allocation2 + $0x170] ss:$12 sps:$4 sm:$0xff]   ;;  %12700 = vmatmul.mubr.msk.bf16.gmra.mxu0 %vm3309_vm11, %v16814_v43  ;;  %v14814_v12 = vld [vmem:[%s22268_s1 + $0xa8] ss:$12 sps:$4 sm:$0xff]  }
 0x245   : > { %2515 = vst.msk [vmem:[#allocation2 + $0x194] sm:$0xf] %vm2448_vm9, %v14089_v33  ;;  %v1969_v60 = vadd.f32 %v1968_v57, %v1759_v28  ;;  %3738 = vmatprep.mubr.bf16.mxu0 %v22489_v19  ;;  %3796 = vmatpush2.bf16.msra.mxu1 %v14768_v46  ;;  %v1770_v7 = vpop.f32.mrf.mxu1 }
 0x246   : > { %v1970_v18 = vpop.f32.mrf.mxu0  ;;  %3797 = vmatprep.subr.bf16.mxu1 %v22489_v19 }
 0x247   : > { %v14091_v25 = vpack.c.bf16 %v1969_v60, %v1969_v60  ;;  %v1772_v8 = vpop.f32.mrf.mxu1 }
 0x248   : > { %v1971_v10 = vpop.f32.mrf.mxu0  ;;  %v15225_v8 = vld [vmem:[%s22269_s2 + $0x1c] ss:$12 sps:$4 sm:$0xff]  }
 0x249   : > { %2517 = vst.msk [vmem:[#allocation2 + $0x1a0] sm:$0xf] %vm2448_vm9, %v14091_v25  ;;  %v1972_v26 = vadd.f32 %v1971_v10, %v1762_v36  ;;  %3798 = vmatpush2.bf16.msra.mxu1 %v14773_v59  ;;  %v1775_v62 = vpop.f32.mrf.mxu1  ;;  %v14819_v25 = vld [vmem:[%s22268_s1 + $0x94] ss:$12 sps:$4 sm:$0xff]  }
 0x24a   : > { %v1973_v31 = vpop.f32.mrf.mxu0  ;;  %3799 = vmatprep.subr.bf16.mxu1 %v22489_v19  ;;  %v15224_v59 = vld [vmem:[%s22269_s2] ss:$12 sps:$4 sm:$0xff]  }
 0x24b   : > { %v14093_v30 = vpack.c.bf16 %v1972_v26, %v1972_v26  ;;  %v1777_v34 = vpop.f32.mrf.mxu1  ;;  %v14817_v31 = vld [vmem:[%s22268_s1 + $0x90] ss:$12 sps:$4 sm:$0xff]  }
 0x24c   : > { %v1976_v51 = vpop.f32.mrf.mxu0  ;;  %12701 = vmatmul.mubr.msk.bf16.gmra.mxu0 %vm3309_vm11, %v16825_v54  ;;  %v2546_v34 = vld [vmem:[#allocation2 + $0x20c] sm:$0x1] }
 0x24d   : > { %2519 = vst.msk [vmem:[#allocation2 + $0x1ac] sm:$0xf] %vm2448_vm9, %v14093_v30  ;;  %v1977_v56 = vadd.f32 %v1976_v51, %v1767_v11  ;;  %3748 = vmatprep.mubr.bf16.mxu0 %v22489_v19  ;;  %3800 = vmatpush2.bf16.msra.mxu1 %v14774_v53  ;;  %v1778_v21 = vpop.f32.mrf.mxu1  ;;  %v14791_v11 = vld [vmem:[#allocation2 + $0xc8] ss:$12 sps:$4 sm:$0xff]  }
 0x24e   : > { %v1978_v14 = vpop.f32.mrf.mxu0  ;;  %3801 = vmatprep.subr.bf16.mxu1 %v22489_v19 }
 0x24f   : > { %v14095_v29 = vpack.c.bf16 %v1977_v56, %v1977_v56  ;;  %v1780_v27 = vpop.f32.mrf.mxu1  ;;  %v22494_v56 = vmov 0 }
 0x250   : > { %v1979_v37 = vpop.f32.mrf.mxu0  ;;  %v22495_v56 = vsel %vm16886_vm14, 4294967295, %v22494_v56  ;;  %v15227_v27 = vld [vmem:[%s22269_s2 + $0x34] ss:$12 sps:$4 sm:$0xff]  }
 0x251   : > { %2521 = vst.msk [vmem:[#allocation2 + $0x1b8] sm:$0xf] %vm2448_vm9, %v14095_v29  ;;  %v1980_v22 = vadd.f32 %v1979_v37, %v1770_v7  ;;  %3802 = vmatpush2.bf16.msra.mxu1 %v14779_v1  ;;  %v1783_v61 = vpop.f32.mrf.mxu1  ;;  %22496 = vst [vmem:[#allocation10_spill] sm:$0xff] %v22495_v56  ;;  %v14820_v29 = vld [vmem:[%s22268_s1 + $0x78] ss:$12 sps:$4 sm:$0xff]  }
 0x252   : > { %v1981_v40 = vpop.f32.mrf.mxu0  ;;  %3803 = vmatprep.subr.bf16.mxu1 %v22489_v19  ;;  %v14825_v37 = vld [vmem:[%s22268_s1 + $0x64] ss:$12 sps:$4 sm:$0xff]  }
 0x253   : > { %v14097_v23 = vpack.c.bf16 %v1980_v22, %v1980_v22  ;;  %v1785_v41 = vpop.f32.mrf.mxu1  ;;  %v15226_v22 = vld [vmem:[%s22269_s2 + $0x18] ss:$12 sps:$4 sm:$0xff]   ;;  %v14823_v40 = vld [vmem:[%s22268_s1 + $0x60] ss:$12 sps:$4 sm:$0xff]  }
 0x254   : > { %v1984_v2 = vpop.f32.mrf.mxu0  ;;  %12702 = vmatmul.mubr.msk.bf16.gmra.mxu0 %vm3309_vm11, %v16837_v13 }
 0x255   : > { %2523 = vst.msk [vmem:[#allocation2 + $0x1c4] sm:$0xf] %vm2448_vm9, %v14097_v23  ;;  %v1985_v20 = vadd.f32 %v1984_v2, %v1775_v62  ;;  %3758 = vmatprep.mubr.bf16.mxu0 %v22489_v19  ;;  %3804 = vmatpush2.bf16.msra.mxu1 %v14780_v58  ;;  %v1786_v3 = vpop.f32.mrf.mxu1  ;;  %v14822_v62 = vld [vmem:[%s22268_s1 + $0x7c] ss:$12 sps:$4 sm:$0xff]   ;;  %v14828_v23 = vld [vmem:[%s22268_s1 + $0x4c] ss:$12 sps:$4 sm:$0xff]  }
 0x256   : > { %v1986_v38 = vpop.f32.mrf.mxu0  ;;  %3805 = vmatprep.subr.bf16.mxu1 %v22489_v19  ;;  %v14826_v2 = vld [vmem:[%s22268_s1 + $0x48] ss:$12 sps:$4 sm:$0xff]  }
 0x257   : > { %v14099_v15 = vpack.c.bf16 %v1985_v20, %v1985_v20  ;;  %v1788_v0 = vpop.f32.mrf.mxu1  ;;  %v14834_v20 = vld [vmem:[%s22268_s1 + $0x34] ss:$12 sps:$4 sm:$0xff]   ;;  %v15228_v38 = vld [vmem:[%s22269_s2 + $0x30] ss:$12 sps:$4 sm:$0xff]  }
 0x258   : > { %v1987_v32 = vpop.f32.mrf.mxu0 }
 0x259   : > { %2525 = vst.msk [vmem:[#allocation2 + $0x1d0] sm:$0xf] %vm2448_vm9, %v14099_v15  ;;  %v1988_v24 = vadd.f32 %v1987_v32, %v1778_v21  ;;  %3806 = vmatpush2.bf16.msra.mxu1 %v14785_v45  ;;  %v1791_v35 = vpop.f32.mrf.mxu1  ;;  %v14832_v32 = vld [vmem:[%s22268_s1 + $0x30] ss:$12 sps:$4 sm:$0xff]  }
 0x25a   : > { %v1989_v49 = vpop.f32.mrf.mxu0  ;;  %3807 = vmatprep.subr.bf16.mxu1 %v22489_v19 }
 0x25b   : > { %v14101_v28 = vpack.c.bf16 %v1988_v24, %v1988_v24  ;;  %v1793_v5 = vpop.f32.mrf.mxu1  ;;  %v14840_v24 = vld [vmem:[%s22268_s1 + $0x1c] ss:$12 sps:$4 sm:$0xff]  }
 0x25c   : > { %v1992_v42 = vpop.f32.mrf.mxu0  ;;  %12703 = vmatmul.mubr.msk.bf16.gmra.mxu0 %vm3309_vm11, %v14804_v44  ;;  %v15231_v5 = vld [vmem:[%s22269_s2 + $0x64] ss:$12 sps:$4 sm:$0xff]  }
 0x25d   : > { %2527 = vst.msk [vmem:[#allocation2 + $0x1dc] sm:$0xf] %vm2448_vm9, %v14101_v28  ;;  %v1993_v48 = vadd.f32 %v1992_v42, %v1783_v61  ;;  %3768 = vmatprep.mubr.bf16.mxu0 %v22489_v19  ;;  %3808 = vmatpush2.bf16.msra.mxu1 %v14786_v39  ;;  %v1794_v4 = vpop.f32.mrf.mxu1  ;;  %v14846_v42 = vld [vmem:[%s22268_s1 + $0x4] ss:$12 sps:$4 sm:$0xff]   ;;  %v15230_v39 = vld [vmem:[%s22269_s2 + $0x48] ss:$12 sps:$4 sm:$0xff]  }
 0x25e   : > { %v1994_v36 = vpop.f32.mrf.mxu0  ;;  %3809 = vmatprep.subr.bf16.mxu1 %v22489_v19 }
 0x25f   : > { %v14103_v47 = vpack.c.bf16 %v1993_v48, %v1993_v48  ;;  %v1796_v46 = vpop.f32.mrf.mxu1 }
 0x260   : > { %v1995_v33 = vpop.f32.mrf.mxu0  ;;  %v14858_v46 = vld [vmem:[%s22268_s1 + $0x154] ss:$12 sps:$4 sm:$0xff]  }
 0x261   : > { %2529 = vst.msk [vmem:[#allocation2 + $0x1e8] sm:$0xf] %vm2448_vm9, %v14103_v47  ;;  %v1996_v57 = vadd.f32 %v1995_v33, %v1786_v3  ;;  %3810 = vmatpush2.bf16.msra.mxu1 %v14791_v11  ;;  %v15229_v3 = vld [vmem:[%s22269_s2 + $0x4c] ss:$12 sps:$4 sm:$0xff]  }
 0x262   : > { %v1997_v60 = vpop.f32.mrf.mxu0  ;;  %5131 = vmatprep.subr.bf16.mxu1 %v14816_v50  ;;  %v14811_v33 = vld [vmem:[#allocation2 + $0x1b8] ss:$12 sps:$4 sm:$0xff]  }
 0x263   : > { %v14105_v18 = vpack.c.bf16 %v1996_v57, %v1996_v57  ;;  %v14850_v57 = vld [vmem:[%s22268_s1 + $0x168] ss:$12 sps:$4 sm:$0xff]   ;;  %v15232_v60 = vld [vmem:[%s22269_s2 + $0x60] ss:$12 sps:$4 sm:$0xff]  }
 0x264   : > { %v2000_v7 = vpop.f32.mrf.mxu0  ;;  %12704 = vmatmul.mubr.msk.bf16.gmra.mxu0 %vm3309_vm11, %v14810_v55  ;;  %3812 = vmatmul.mubr.bf16.vlgmr.msra.gmra.mxu1 %v15224_v59  ;;  %v14809_v36 = vld [vmem:[#allocation2 + $0x1d0] ss:$12 sps:$4 sm:$0xff]   ;;  %v14852_v55 = vld [vmem:[%s22268_s1 + $0x16c] ss:$12 sps:$4 sm:$0xff]  }
 0x265   : > { %2531 = vst.msk [vmem:[#allocation2 + $0x1f4] sm:$0xf] %vm2448_vm9, %v14105_v18  ;;  %v2001_v10 = vadd.f32 %v2000_v7, %v1791_v35  ;;  %14367 = vmatprep.mubr.msk.bf16.mxu0 %vm15444_vm12, %v22305_v6  ;;  %3819 = vmatprep.mubr.bf16.mxu1 %v15225_v8  ;;  %v14838_v35 = vld [vmem:[%s22268_s1 + $0x18] ss:$12 sps:$4 sm:$0xff]   ;;  %v15233_v18 = vld [vmem:[%s22269_s2 + $0x7c] ss:$12 sps:$4 sm:$0xff]  }
 0x266   : > { %v2002_v26 = vpop.f32.mrf.mxu0  ;;  %5132 = vmatpush1.bf16.msra.mxu1 %v14814_v12  ;;  %v14864_v59 = vld [vmem:[%s22268_s1 + $0x13c] ss:$12 sps:$4 sm:$0xff]   ;;  %v14831_v8 = vld [vmem:[%s22268_s1 + $0x22c] ss:$12 sps:$4 sm:$0xff]  }
 0x267   : > { %v14107_v30 = vpack.c.bf16 %v2001_v10, %v2001_v10  ;;  %5133 = vmatprep.subr.bf16.mxu1 %v14819_v25  ;;  %v14812_v25 = vld [vmem:[#allocation2 + $0x1a0] ss:$12 sps:$4 sm:$0xff]   ;;  %v14856_v10 = vld [vmem:[%s22268_s1 + $0x150] ss:$12 sps:$4 sm:$0xff]  }
 0x268   : > { %v2003_v51 = vpop.f32.mrf.mxu0 }
 0x269   : > { %2533 = vst.msk [vmem:[#allocation2 + $0x200] sm:$0xf] %vm2448_vm9, %v14107_v30  ;;  %v2004_v53 = vadd.f32 %v2003_v51, %v1794_v4  ;;  %v14844_v4 = vld [vmem:[%s22268_s1] ss:$12 sps:$4 sm:$0xff]   ;;  %v14870_v51 = vld [vmem:[%s22268_s1 + $0x124] ss:$12 sps:$4 sm:$0xff]  }
 0x26a   : > { %v2005_v14 = vpop.f32.mrf.mxu0  ;;  %5134 = vmatpush1.bf16.msra.mxu1 %v14817_v31  ;;  %v14813_v31 = vld [vmem:[#allocation2 + $0x188] ss:$12 sps:$4 sm:$0xff]  }
 0x26b   : > { %v14109_v21 = vpack.c.bf16 %v2004_v53, %v2004_v53  ;;  %5135 = vmatprep.subr.bf16.mxu1 %v14822_v62  ;;  %v14862_v62 = vld [vmem:[%s22268_s1 + $0x138] ss:$12 sps:$4 sm:$0xff]   ;;  %v14829_v14 = vld [vmem:[%s22268_s1 + $0x228] ss:$12 sps:$4 sm:$0xff]  }
 0x26c   : > { %3820 = vmatmul.mubr.bf16.gmra.mxu1 %v15226_v22  ;;  %v14805_v49 = vld [vmem:[#allocation2 + $0x1e8] ss:$12 sps:$4 sm:$0xff]   ;;  %v15234_v53 = vld [vmem:[%s22269_s2 + $0x78] ss:$12 sps:$4 sm:$0xff]  }
 0x26d   : > { %v2547_v1 = vsel %vm16886_vm14, %v14109_v21, %v2546_v34  ;;  %3827 = vmatprep.mubr.bf16.mxu1 %v15227_v27  ;;  %v14837_v21 = vld [vmem:[%s22268_s1 + $0x214] ss:$12 sps:$4 sm:$0xff]   ;;  %v14876_v27 = vld [vmem:[%s22268_s1 + $0x10c] ss:$12 sps:$4 sm:$0xff]  }
 0x26e   : > { %2548 = vst [vmem:[#allocation2 + $0x20c] sm:$0x1] %v2547_v1  ;;  %5136 = vmatpush1.bf16.msra.mxu1 %v14820_v29  ;;  %v15235_v29 = vld [vmem:[%s22269_s2 + $0x94] ss:$12 sps:$4 sm:$0xff]  }
 0x26f   : > { %5137 = vmatprep.subr.bf16.mxu1 %v14825_v37  ;;  %v16910_v61 = vpop.f32.mrf.mxu1  ;;  %v14868_v1 = vld [vmem:[%s22268_s1 + $0x120] ss:$12 sps:$4 sm:$0xff]   ;;  %v15236_v22 = vld [vmem:[%s22269_s2 + $0x8] ss:$12 sps:$4 sm:$0xff]  }
 0x271   : > { %v16915_v58 = vpop.f32.mrf.mxu1 }
 0x272   : > { %5138 = vmatpush1.bf16.msra.mxu1 %v14823_v40 }
 0x273   : > { %5139 = vmatprep.subr.bf16.mxu1 %v14828_v23  ;;  %v16923_v15 = vpop.f32.mrf.mxu1  ;;  %v14835_v23 = vld [vmem:[%s22268_s1 + $0x210] ss:$12 sps:$4 sm:$0xff]  }
 0x274   : > { %3828 = vmatmul.mubr.bf16.gmra.mxu1 %v15228_v38  ;;  %v14881_v38 = vld [vmem:[%s22268_s1 + $0xf4] ss:$12 sps:$4 sm:$0xff]  }
 0x275   : > { %v14803_v41 = vld [vmem:[#allocation2 + $0x200] ss:$12 sps:$4 sm:$0x1f]   ;;  %3835 = vmatprep.mubr.bf16.mxu1 %v15229_v3  ;;  %v16932_v44 = vpop.f32.mrf.mxu1  ;;  %v15237_v3 = vld [vmem:[%s22269_s2 + $0x90] ss:$12 sps:$4 sm:$0xff]  }
 0x276   : > { %5140 = vmatpush1.bf16.msra.mxu1 %v14826_v2  ;;  %v3371_v45 = vand.u32 %v14803_v41, %v16601_v52  ;;  %v14843_v2 = vld [vmem:[%s22268_s1 + $0x1fc] ss:$12 sps:$4 sm:$0xff]  }
 0x277   : > { %5141 = vmatprep.subr.bf16.mxu1 %v14834_v20  ;;  %v16937_v0 = vpop.f32.mrf.mxu1  ;;  %v14874_v41 = vld [vmem:[%s22268_s1 + $0x108] ss:$12 sps:$4 sm:$0xff]  }
 0x278   : > { %14356 = vmatpush3.bf16.msra.mxu0 %v3371_v45  ;;  %v14841_v45 = vld [vmem:[%s22268_s1 + $0x1f8] ss:$12 sps:$4 sm:$0xff]  }
 0x279   : > { %14357 = vmatprep.subr.bf16.mxu0 %v22305_v6  ;;  %v16940_v28 = vpop.f32.mrf.mxu1 }
 0x27a   : > { %5142 = vmatpush1.bf16.msra.mxu1 %v14832_v32 }
 0x27b   : > { %5143 = vmatprep.subr.bf16.mxu1 %v14840_v24  ;;  %v16951_v48 = vpop.f32.mrf.mxu1  ;;  %v15238_v24 = vld [vmem:[%s22269_s2 + $0xac] ss:$12 sps:$4 sm:$0xff]  }
 0x27c   : > { %14358 = vmatpush3.bf16.msra.mxu0 %v14805_v49  ;;  %3836 = vmatmul.mubr.bf16.gmra.mxu1 %v15230_v39  ;;  %v14849_v49 = vld [vmem:[%s22268_s1 + $0x1e4] ss:$12 sps:$4 sm:$0xff]   ;;  %v15239_v39 = vld [vmem:[%s22269_s2 + $0x20] ss:$12 sps:$4 sm:$0xff]  }
 0x27d   : > { %14359 = vmatprep.subr.bf16.mxu0 %v22305_v6  ;;  %3843 = vmatprep.mubr.bf16.mxu1 %v15231_v5  ;;  %v16957_v47 = vpop.f32.mrf.mxu1  ;;  %v14887_v5 = vld [vmem:[%s22268_s1 + $0xdc] ss:$12 sps:$4 sm:$0xff]  }
 0x27e   : > { %5144 = vmatpush1.bf16.msra.mxu1 %v14838_v35 }
 0x27f   : > { %5145 = vmatprep.subr.bf16.mxu1 %v14846_v42  ;;  %v16965_v50 = vpop.f32.mrf.mxu1  ;;  %v14879_v42 = vld [vmem:[%s22268_s1 + $0xf0] ss:$12 sps:$4 sm:$0xff]  }
 0x280   : > { %14360 = vmatpush3.bf16.msra.mxu0 %v14809_v36 }
 0x281   : > { %14361 = vmatprep.subr.bf16.mxu0 %v22305_v6  ;;  %v16968_v11 = vpop.f32.mrf.mxu1 }
 0x282   : > { %5146 = vmatpush1.bf16.msra.mxu1 %v14844_v4  ;;  %v14847_v4 = vld [vmem:[%s22268_s1 + $0x1e0] ss:$12 sps:$4 sm:$0xff]  }
 0x283   : > { %5147 = vmatprep.subr.bf16.mxu1 %v14852_v55  ;;  %v16979_v12 = vpop.f32.mrf.mxu1  ;;  %v14855_v55 = vld [vmem:[%s22268_s1 + $0x1cc] ss:$12 sps:$4 sm:$0xff]  }
 0x284   : > { %14362 = vmatpush3.bf16.msra.mxu0 %v14811_v33  ;;  %3844 = vmatmul.mubr.bf16.gmra.mxu1 %v15232_v60  ;;  %v15240_v60 = vld [vmem:[%s22269_s2 + $0xa8] ss:$12 sps:$4 sm:$0xff]  }
 0x285   : > { %14363 = vmatprep.subr.bf16.mxu0 %v22305_v6  ;;  %3851 = vmatprep.mubr.bf16.mxu1 %v15233_v18  ;;  %v16985_v7 = vpop.f32.mrf.mxu1 }
 0x286   : > { %5148 = vmatpush2.bf16.msra.mxu1 %v14850_v57  ;;  %v14885_v57 = vld [vmem:[%s22268_s1 + $0xd8] ss:$12 sps:$4 sm:$0xff]  }
 0x287   : > { %5149 = vmatprep.subr.bf16.mxu1 %v14858_v46  ;;  %v16993_v26 = vpop.f32.mrf.mxu1  ;;  %v14893_v46 = vld [vmem:[%s22268_s1 + $0xc4] ss:$12 sps:$4 sm:$0xff]  }
 0x288   : > { %14364 = vmatpush3.bf16.msra.mxu0 %v14812_v25  ;;  %v14853_v25 = vld [vmem:[%s22268_s1 + $0x1c8] ss:$12 sps:$4 sm:$0xff]  }
 0x289   : > { %14365 = vmatprep.subr.bf16.mxu0 %v22305_v6  ;;  %v16999_v30 = vpop.f32.mrf.mxu1 }
 0x28a   : > { %5150 = vmatpush2.bf16.msra.mxu1 %v14856_v10  ;;  %v15241_v10 = vld [vmem:[%s22269_s2 + $0xc4] ss:$12 sps:$4 sm:$0xff]  }
 0x28b   : > { %5151 = vmatprep.subr.bf16.mxu1 %v14864_v59  ;;  %v17010_v34 = vpop.f32.mrf.mxu1  ;;  %v14861_v59 = vld [vmem:[%s22268_s1 + $0x1b4] ss:$12 sps:$4 sm:$0xff]  }
 0x28c   : > { %14366 = vmatpush3.bf16.msra.mxu0 %v14813_v31  ;;  %3852 = vmatmul.mubr.bf16.gmra.mxu1 %v15234_v53  ;;  %v14891_v31 = vld [vmem:[%s22268_s1 + $0xc0] ss:$12 sps:$4 sm:$0xff]   ;;  %v14859_v53 = vld [vmem:[%s22268_s1 + $0x1b0] ss:$12 sps:$4 sm:$0xff]  }
 0x28d   : > { %3859 = vmatprep.mubr.bf16.mxu1 %v15235_v29  ;;  %5384 = vmatprep.subr.bf16.mxu0 %v14831_v8  ;;  %v17021_v37 = vpop.f32.mrf.mxu1 }
 0x28e   : > { %5152 = vmatpush2.bf16.msra.mxu1 %v14862_v62  ;;  %v15242_v62 = vld [vmem:[%s22269_s2 + $0x38] ss:$12 sps:$4 sm:$0xff]  }
 0x28f   : > { %14368 = vmatmul.mubr.msk.bf16.vlgmr.msra.gmra.mxu0 %vm3309_vm11, %v15236_v22  ;;  %5153 = vmatprep.subr.bf16.mxu1 %v14870_v51  ;;  %v17035_v40 = vpop.f32.mrf.mxu1  ;;  %v15243_v22 = vld [vmem:[%s22269_s2 + $0xc0] ss:$12 sps:$4 sm:$0xff]  }
 0x290   : > { %14371 = vmatprep.mubr.msk.bf16.mxu0 %vm15444_vm12, %v22305_v6  ;;  %5385 = vmatpush1.bf16.msra.mxu0 %v14829_v14  ;;  %v14867_v14 = vld [vmem:[%s22268_s1 + $0x19c] ss:$12 sps:$4 sm:$0xff]  }
 0x291   : > { %5386 = vmatprep.subr.bf16.mxu0 %v14837_v21  ;;  %v17043_v20 = vpop.f32.mrf.mxu1 }
 0x292   : > { %5154 = vmatpush2.bf16.msra.mxu1 %v14868_v1 }
 0x293   : > { %5155 = vmatprep.subr.bf16.mxu1 %v14876_v27  ;;  %v17054_v32 = vpop.f32.mrf.mxu1 }
 0x294   : > { %3860 = vmatmul.mubr.bf16.gmra.mxu1 %v15237_v3  ;;  %5387 = vmatpush1.bf16.msra.mxu0 %v14835_v23  ;;  %v14865_v23 = vld [vmem:[%s22268_s1 + $0x198] ss:$12 sps:$4 sm:$0xff]  }
 0x295   : > { %3867 = vmatprep.mubr.bf16.mxu1 %v15238_v24  ;;  %5388 = vmatprep.subr.bf16.mxu0 %v14843_v2  ;;  %v17065_v35 = vpop.f32.mrf.mxu1  ;;  %v15245_v24 = vld [vmem:[%s22269_s2 + $0x50] ss:$12 sps:$4 sm:$0xff]  }
 0x296   : > { %5156 = vmatpush2.bf16.msra.mxu1 %v14874_v41  ;;  %v15244_v41 = vld [vmem:[%s22269_s2 + $0xdc] ss:$12 sps:$4 sm:$0xff]  }
 0x297   : > { %14372 = vmatmul.mubr.msk.bf16.gmra.mxu0 %vm3309_vm11, %v15239_v39  ;;  %5157 = vmatprep.subr.bf16.mxu1 %v14881_v38  ;;  %v17079_v36 = vpop.f32.mrf.mxu1  ;;  %v14871_v39 = vld [vmem:[%s22268_s1 + $0x180] ss:$12 sps:$4 sm:$0xff]  }
 0x298   : > { %14375 = vmatprep.mubr.msk.bf16.mxu0 %vm15444_vm12, %v22305_v6  ;;  %5389 = vmatpush1.bf16.msra.mxu0 %v14841_v45  ;;  %v4598_v45 = vld [vmem:[%s22268_s1 + $0x2a0] sm:$0xff] }
 0x299   : > { %5390 = vmatprep.subr.bf16.mxu0 %v14849_v49  ;;  %v17087_v33 = vpop.f32.mrf.mxu1 }
 0x29a   : > { %5158 = vmatpush2.bf16.msra.mxu1 %v14879_v42 }
 0x29b   : > { %5159 = vmatprep.subr.bf16.mxu1 %v14887_v5  ;;  %v17098_v18 = vpop.f32.mrf.mxu1 }
 0x29c   : > { %3868 = vmatmul.mubr.bf16.gmra.mxu1 %v15240_v60  ;;  %5391 = vmatpush1.bf16.msra.mxu0 %v14847_v4  ;;  %v12983_v4 = vcombine.high %v4598_v45, %v4598_v45 }
 0x29d   : > { %3875 = vmatprep.mubr.bf16.mxu1 %v15241_v10  ;;  %5392 = vmatprep.subr.bf16.mxu0 %v14855_v55  ;;  %v17109_v8 = vpop.f32.mrf.mxu1  ;;  %v12982_v55 = vcombine.low %v4598_v45, %v4598_v45  ;;  %v15249_v45 = vld [vmem:[%s22269_s2 + $0xf0] ss:$12 sps:$4 sm:$0xff]  }
 0x29e   : > { %5160 = vmatpush2.bf16.msra.mxu1 %v14885_v57 }
 0x29f   : > { %14376 = vmatmul.mubr.msk.bf16.gmra.mxu0 %vm3309_vm11, %v15242_v62  ;;  %5161 = vmatprep.subr.bf16.mxu1 %v14893_v46  ;;  %v17121_v51 = vpop.f32.mrf.mxu1 }
 0x2a0   : > { %14379 = vmatprep.mubr.msk.bf16.mxu0 %vm15444_vm12, %v22305_v6  ;;  %5393 = vmatpush1.bf16.msra.mxu0 %v14853_v25  ;;  %v15246_v25 = vld [vmem:[%s22269_s2 + $0xd8] ss:$12 sps:$4 sm:$0xff]  }
 0x2a1   : > { %5394 = vmatprep.subr.bf16.mxu0 %v14861_v59  ;;  %v17129_v29 = vpop.f32.mrf.mxu1 }
 0x2a2   : > { %5162 = vmatpush2.bf16.msra.mxu1 %v14891_v31  ;;  %v5123_v31 = vsel %vm1073_vm0, %v12982_v55, 0 }
 0x2a3   : > { %5637 = vmatprep.subr.bf16.mxu1 %v22489_v19  ;;  %v17141_v27 = vpop.f32.mrf.mxu1 }
 0x2a4   : > { %v3610_v21 = vpop.f32.mrf.mxu0  ;;  %3876 = vmatmul.mubr.bf16.gmra.mxu1 %v15243_v22  ;;  %5395 = vmatpush1.bf16.msra.mxu0 %v14859_v53 }
 0x2a5   : > { %v3611_v1 = vadd.f32 %v3610_v21, %v16910_v61  ;;  %3883 = vmatprep.mubr.bf16.mxu1 %v15244_v41  ;;  %5396 = vmatprep.subr.bf16.mxu0 %v14867_v14  ;;  %v14873_v61 = vld [vmem:[%s22268_s1 + $0x184] ss:$12 sps:$4 sm:$0xff]   ;;  %v17154_v3 = vpop.f32.mrf.mxu1  ;;  %v15248_v14 = vld [vmem:[%s22269_s2 + $0x68] ss:$12 sps:$4 sm:$0xff]  }
 0x2a6   : > { %v3612_v2 = vpop.f32.mrf.mxu0 }
 0x2a7   : > { %4117 = vst [vmem:[%s17134_s8] sm:$0xff] %v3611_v1  ;;  %v3613_v38 = vadd.f32 %v3612_v2, %v16915_v58  ;;  %14380 = vmatmul.mubr.msk.bf16.gmra.mxu0 %vm3309_vm11, %v15245_v24  ;;  %v17167_v42 = vpop.f32.mrf.mxu1  ;;  %v14890_v2 = vld [vmem:[%s22268_s1 + $0x274] ss:$12 sps:$4 sm:$0xff]  }
 0x2a8   : > { %v3614_v49 = vpop.f32.mrf.mxu0  ;;  %14383 = vmatprep.mubr.msk.bf16.mxu0 %vm15444_vm12, %v22305_v6  ;;  %5397 = vmatpush1.bf16.msra.mxu0 %v14865_v23 }
 0x2a9   : > { %4118 = vst [vmem:[%s17134_s8 + $0x8] sm:$0xff] %v3613_v38  ;;  %v3615_v58 = vadd.f32 %v3614_v49, %v16923_v15  ;;  %5398 = vmatprep.subr.bf16.mxu0 %v14873_v61  ;;  %v17174_v46 = vpop.f32.mrf.mxu1  ;;  %v14888_v49 = vld [vmem:[%s22268_s1 + $0x270] ss:$12 sps:$4 sm:$0xff]  }
 0x2aa   : > { %v3616_v5 = vpop.f32.mrf.mxu0 }
 0x2ab   : > { %4121 = vst [vmem:[%s17134_s8 + $0x18] sm:$0xff] %v3615_v58  ;;  %v3617_v57 = vadd.f32 %v3616_v5, %v16932_v44  ;;  %v17181_v10 = vpop.f32.mrf.mxu1  ;;  %v15247_v44 = vld [vmem:[%s22269_s2 + $0xf4] ss:$12 sps:$4 sm:$0xff]   ;;  %v15250_v58 = vld [vmem:[%s22269_s2 + $0x10c] ss:$12 sps:$4 sm:$0xff]  }
 0x2ac   : > { %v3620_v60 = vpop.f32.mrf.mxu0  ;;  %3884 = vmatmul.mubr.bf16.gmra.mxu1 %v15246_v25  ;;  %5399 = vmatpush1.bf16.msra.mxu0 %v14871_v39  ;;  %v14899_v25 = vld [vmem:[%s22268_s1 + $0x244] ss:$12 sps:$4 sm:$0xff]  }
 0x2ad   : > { %4122 = vst [vmem:[%s17134_s8 + $0x20] sm:$0xff] %v3617_v57  ;;  %v3621_v15 = vadd.f32 %v3620_v60, %v16937_v0  ;;  %3891 = vmatprep.mubr.bf16.mxu1 %v15247_v44  ;;  %12985 = vmatprep.subr.msk.bf16.mxu0 %vm1073_vm0, %v12983_v4  ;;  %v14884_v0 = vld [vmem:[%s22268_s1 + $0x28c] ss:$12 sps:$4 sm:$0xff]   ;;  %v17193_v53 = vpop.f32.mrf.mxu1 }
 0x2ae   : > { %v3622_v59 = vpop.f32.mrf.mxu0  ;;  %v15251_v4 = vld [vmem:[%s22269_s2 + $0x80] ss:$12 sps:$4 sm:$0xff]  }
 0x2af   : > { %4124 = vst [vmem:[%s17134_s8 + $0x30] sm:$0xff] %v3621_v15  ;;  %v3623_v62 = vadd.f32 %v3622_v59, %v16940_v28  ;;  %14384 = vmatmul.mubr.msk.bf16.gmra.mxu0 %vm3309_vm11, %v15248_v14  ;;  %v17203_v22 = vpop.f32.mrf.mxu1  ;;  %v14882_v28 = vld [vmem:[%s22268_s1 + $0x288] ss:$12 sps:$4 sm:$0xff]   ;;  %v14897_v14 = vld [vmem:[%s22268_s1 + $0x240] ss:$12 sps:$4 sm:$0xff]  }
 0x2b0   : > { %v3624_v21 = vpop.f32.mrf.mxu0  ;;  %14387 = vmatprep.mubr.msk.bf16.mxu0 %vm15444_vm12, %v22305_v6  ;;  %5407 = vmatpush2.bf16.msra.mxu0 %v5123_v31 }
 0x2b1   : > { %4125 = vst [vmem:[%s17134_s8 + $0x38] sm:$0xff] %v3623_v62  ;;  %v3625_v1 = vadd.f32 %v3624_v21, %v16951_v48  ;;  %5408 = vmatprep.subr.bf16.mxu0 %v14884_v0  ;;  %v17213_v61 = vpop.f32.mrf.mxu1  ;;  %v15252_v0 = vld [vmem:[%s22269_s2 + $0x108] ss:$12 sps:$4 sm:$0xff]   ;;  %v15253_v21 = vld [vmem:[%s22269_s2 + $0x124] ss:$12 sps:$4 sm:$0xff]  }
 0x2b2   : > { %v3626_v23 = vpop.f32.mrf.mxu0 }
 0x2b3   : > { %4127 = vst [vmem:[%s17134_s8 + $0x48] sm:$0xff] %v3625_v1  ;;  %v3627_v41 = vadd.f32 %v3626_v23, %v16957_v47  ;;  %v17220_v24 = vpop.f32.mrf.mxu1 }
 0x2b4   : > { %v3630_v48 = vpop.f32.mrf.mxu0  ;;  %3892 = vmatmul.mubr.bf16.gmra.mxu1 %v15249_v45  ;;  %5409 = vmatpush2.bf16.msra.mxu0 %v14882_v28  ;;  %v15254_v28 = vld [vmem:[%s22269_s2 + $0x98] ss:$12 sps:$4 sm:$0xff]  }
 0x2b5   : > { %4128 = vst [vmem:[%s17134_s8 + $0x50] sm:$0xff] %v3627_v41  ;;  %v3631_v38 = vadd.f32 %v3630_v48, %v16965_v50  ;;  %3899 = vmatprep.mubr.bf16.mxu1 %v15250_v58  ;;  %5410 = vmatprep.subr.bf16.mxu0 %v14890_v2  ;;  %v14896_v50 = vld [vmem:[%s22268_s1 + $0x25c] ss:$12 sps:$4 sm:$0xff]   ;;  %v17233_v5 = vpop.f32.mrf.mxu1 }
 0x2b6   : > { %v3632_v47 = vpop.f32.mrf.mxu0 }
 0x2b7   : > { %4130 = vst [vmem:[%s17134_s8 + $0x60] sm:$0xff] %v3631_v38  ;;  %v3633_v39 = vadd.f32 %v3632_v47, %v16968_v11  ;;  %14388 = vmatmul.mubr.msk.bf16.gmra.mxu0 %vm3309_vm11, %v15251_v4  ;;  %v17243_v60 = vpop.f32.mrf.mxu1  ;;  %v14894_v11 = vld [vmem:[%s22268_s1 + $0x258] ss:$12 sps:$4 sm:$0xff]  }
 0x2b8   : > { %v3634_v55 = vpop.f32.mrf.mxu0  ;;  %14391 = vmatprep.mubr.msk.bf16.mxu0 %vm15444_vm12, %v22305_v6  ;;  %5411 = vmatpush2.bf16.msra.mxu0 %v14888_v49 }
 0x2b9   : > { %4131 = vst [vmem:[%s17134_s8 + $0x68] sm:$0xff] %v3633_v39  ;;  %v3635_v57 = vadd.f32 %v3634_v55, %v16979_v12  ;;  %5412 = vmatprep.subr.bf16.mxu0 %v14896_v50  ;;  %v17253_v44 = vpop.f32.mrf.mxu1 }
 0x2ba   : > { %v3636_v15 = vpop.f32.mrf.mxu0 }
 0x2bb   : > { %4133 = vst [vmem:[%s17134_s8 + $0x78] sm:$0xff] %v3635_v57  ;;  %v3637_v59 = vadd.f32 %v3636_v15, %v16985_v7  ;;  %v17260_v62 = vpop.f32.mrf.mxu1 }
 0x2bc   : > { %v3640_v12 = vpop.f32.mrf.mxu0  ;;  %3900 = vmatmul.mubr.bf16.gmra.mxu1 %v15252_v0  ;;  %5413 = vmatpush2.bf16.msra.mxu0 %v14894_v11 }
 0x2bd   : > { %4134 = vst [vmem:[%s17134_s8 + $0x80] sm:$0xff] %v3637_v59  ;;  %v3641_v31 = vadd.f32 %v3640_v12, %v16993_v26  ;;  %3907 = vmatprep.mubr.bf16.mxu1 %v15253_v21  ;;  %5414 = vmatprep.subr.bf16.mxu0 %v14899_v25  ;;  %v17270_v1 = vpop.f32.mrf.mxu1  ;;  %v15258_v12 = vld [vmem:[%s22269_s2 + $0x138] ss:$12 sps:$4 sm:$0xff]  }
 0x2be   : > { %v3642_v7 = vpop.f32.mrf.mxu0 }
 0x2bf   : > { %4136 = vst [vmem:[%s17134_s8 + $0x90] sm:$0xff] %v3641_v31  ;;  %v3643_v26 = vadd.f32 %v3642_v7, %v16999_v30  ;;  %14392 = vmatmul.mubr.msk.bf16.gmra.mxu0 %vm3309_vm11, %v15254_v28  ;;  %v17280_v41 = vpop.f32.mrf.mxu1 }
 0x2c0   : > { %v3644_v23 = vpop.f32.mrf.mxu0  ;;  %14395 = vmatprep.mubr.msk.bf16.mxu0 %vm15444_vm12, %v22305_v6  ;;  %5415 = vmatpush2.bf16.msra.mxu0 %v14897_v14 }
 0x2c1   : > { %4137 = vst [vmem:[%s17134_s8 + $0x98] sm:$0xff] %v3643_v26  ;;  %v3645_v2 = vadd.f32 %v3644_v23, %v17010_v34  ;;  %5846 = vmatprep.subr.bf16.mxu0 %v22489_v19  ;;  %v17285_v38 = vpop.f32.mrf.mxu1  ;;  %v15255_v34 = vld [vmem:[%s22269_s2 + $0x120] ss:$12 sps:$4 sm:$0xff]  }
 0x2c2   : > { %v3646_v30 = vpop.f32.mrf.mxu0 }
 0x2c3   : > { %4139 = vst [vmem:[%s17134_s8 + $0xa8] sm:$0xff] %v3645_v2  ;;  %v3647_v48 = vadd.f32 %v3646_v30, %v17021_v37  ;;  %v17292_v47 = vpop.f32.mrf.mxu1  ;;  %v15256_v37 = vld [vmem:[%s22269_s2 + $0x13c] ss:$12 sps:$4 sm:$0xff]  }
 0x2c4   : > { %v3650_v45 = vpop.f32.mrf.mxu0  ;;  %3908 = vmatmul.mubr.bf16.gmra.mxu1 %v15255_v34  ;;  %v15261_v2 = vld [vmem:[%s22269_s2 + $0x150] ss:$12 sps:$4 sm:$0xff]  }
 0x2c5   : > { %4140 = vst [vmem:[%s17134_s8 + $0xb0] sm:$0xff] %v3647_v48  ;;  %v3651_v49 = vadd.f32 %v3650_v45, %v17035_v40  ;;  %3915 = vmatprep.mubr.bf16.mxu1 %v15256_v37  ;;  %v17299_v39 = vpop.f32.mrf.mxu1  ;;  %v15257_v40 = vld [vmem:[%s22269_s2 + $0xb0] ss:$12 sps:$4 sm:$0xff]   ;;  %v15262_v48 = vld [vmem:[%s22269_s2 + $0x16c] ss:$12 sps:$4 sm:$0xff]  }
 0x2c6   : > { %v3652_v58 = vpop.f32.mrf.mxu0  ;;  %v15263_v37 = vld [vmem:[%s22269_s2 + $0x168] ss:$12 sps:$4 sm:$0xff]  }
 0x2c7   : > { %4142 = vst [vmem:[%s17134_s8 + $0xc0] sm:$0xff] %v3651_v49  ;;  %v3653_v50 = vadd.f32 %v3652_v58, %v17043_v20  ;;  %14396 = vmatmul.mubr.msk.bf16.gmra.mxu0 %vm3309_vm11, %v15257_v40  ;;  %v17309_v57 = vpop.f32.mrf.mxu1  ;;  %v15264_v40 = vld [vmem:[%s22269_s2 + $0x184] ss:$12 sps:$4 sm:$0x7f]  }
 0x2c8   : > { %v3654_v4 = vpop.f32.mrf.mxu0  ;;  %14399 = vmatprep.mubr.msk.bf16.mxu0 %vm15444_vm12, %v22305_v6 }
 0x2c9   : > { %4143 = vst [vmem:[%s17134_s8 + $0xc8] sm:$0xff] %v3653_v50  ;;  %v3655_v55 = vadd.f32 %v3654_v4, %v17054_v32  ;;  %v17313_v15 = vpop.f32.mrf.mxu1  ;;  %v12723_v4 = vld [vmem:[%s15591_s14 + $0x588] sm:$0xff] }
 0x2ca   : > { %v3656_v11 = vpop.f32.mrf.mxu0 }
 0x2cb   : > { %4145 = vst [vmem:[%s17134_s8 + $0xd8] sm:$0xff] %v3655_v55  ;;  %v3657_v20 = vadd.f32 %v3656_v11, %v17065_v35  ;;  %v17320_v32 = vpop.f32.mrf.mxu1  ;;  %v15259_v35 = vld [vmem:[%s22269_s2 + $0x154] ss:$12 sps:$4 sm:$0xff]  }
 0x2cc   : > { %v3660_v25 = vpop.f32.mrf.mxu0  ;;  %3916 = vmatmul.mubr.bf16.gmra.mxu1 %v15258_v12 }
 0x2cd   : > { %4146 = vst [vmem:[%s17134_s8 + $0xe0] sm:$0xff] %v3657_v20  ;;  %v3661_v59 = vadd.f32 %v3660_v25, %v17079_v36  ;;  %3923 = vmatprep.mubr.bf16.mxu1 %v15259_v35  ;;  %v15260_v36 = vld [vmem:[%s22269_s2 + $0xc8] ss:$12 sps:$4 sm:$0xff]   ;;  %v17335_v21 = vpop.f32.mrf.mxu1 }
 0x2ce   : > { %v3662_v31 = vpop.f32.mrf.mxu0 }
 0x2cf   : > { %4148 = vst [vmem:[%s17134_s8 + $0xf0] sm:$0xff] %v3661_v59  ;;  %v3663_v0 = vadd.f32 %v3662_v31, %v17087_v33  ;;  %14400 = vmatmul.mubr.msk.bf16.gmra.mxu0 %vm3309_vm11, %v15260_v36  ;;  %v17344_v30 = vpop.f32.mrf.mxu1  ;;  %v12726_v36 = vld [vmem:[%s15591_s14 + $0x5a0] sm:$0xff] }
 0x2d0   : > { %v3664_v14 = vpop.f32.mrf.mxu0  ;;  %14403 = vmatprep.mubr.msk.bf16.mxu0 %vm15444_vm12, %v22305_v6 }
 0x2d1   : > { %4149 = vst [vmem:[%s17134_s8 + $0xf8] sm:$0xff] %v3663_v0  ;;  %v3665_v7 = vadd.f32 %v3664_v14, %v17098_v18  ;;  %v17357_v49 = vpop.f32.mrf.mxu1  ;;  %v12722_v0 = vld [vmem:[%s15591_s14 + $0x580] sm:$0xff]  ;;  %v12731_v14 = vld [vmem:[%s15591_s14 + $0x5c8] sm:$0xff] }
 0x2d2   : > { %v3666_v26 = vpop.f32.mrf.mxu0 }
 0x2d3   : > { %4151 = vst [vmem:[%s17134_s8 + $0x108] sm:$0xff] %v3665_v7  ;;  %v3667_v33 = vadd.f32 %v3666_v26, %v17109_v8  ;;  %v17366_v50 = vpop.f32.mrf.mxu1  ;;  %v12735_v7 = vld [vmem:[%s15591_s14 + $0x5e8] sm:$0xff] }
 0x2d4   : > { %v3670_v28 = vpop.f32.mrf.mxu0  ;;  %3924 = vmatmul.mubr.bf16.gmra.mxu1 %v15261_v2 }
 0x2d5   : > { %4152 = vst [vmem:[%s17134_s8 + $0x110] sm:$0xff] %v3667_v33  ;;  %v3671_v23 = vadd.f32 %v3670_v28, %v17121_v51  ;;  %3931 = vmatprep.mubr.bf16.mxu1 %v15262_v48  ;;  %v17381_v20 = vpop.f32.mrf.mxu1  ;;  %v17407_v33 = vpack.c.bf16 %v12726_v36, %v12722_v0  ;;  %v12746_v36 = vld [vmem:[%s15591_s14 + $0x640] sm:$0xff] }
 0x2d6   : > { %v3672_v18 = vpop.f32.mrf.mxu0 }
 0x2d7   : > { %4154 = vst [vmem:[%s17134_s8 + $0x120] sm:$0xff] %v3671_v23  ;;  %v3673_v8 = vadd.f32 %v3672_v18, %v17129_v29  ;;  %14404 = vmatmul.mubr.msk.bf16.gmra.mxu0 %vm3309_vm11, %v16780_v63  ;;  %v17392_v31 = vpop.f32.mrf.mxu1  ;;  %v17411_v23 = vpack.c.bf16 %v12735_v7, %v12731_v14  ;;  %v12755_v7 = vld [vmem:[%s15591_s14 + $0x688] sm:$0xff] }
 0x2d8   : > { %v3674_v51 = vpop.f32.mrf.mxu0  ;;  %14407 = vmatprep.mubr.msk.bf16.mxu0 %vm15444_vm12, %v22305_v6 }
 0x2d9   : > { %4155 = vst [vmem:[%s17134_s8 + $0x128] sm:$0xff] %v3673_v8  ;;  %v3675_v45 = vadd.f32 %v3674_v51, %v17141_v27  ;;  %v17409_v28 = vpop.f32.mrf.mxu1  ;;  %v12730_v8 = vld [vmem:[%s15591_s14 + $0x5c0] sm:$0xff] }
 0x2da   : > { %v3676_v34 = vpop.f32.mrf.mxu0  ;;  %v12734_v51 = vld [vmem:[%s15591_s14 + $0x5e0] sm:$0xff] }
 0x2db   : > { %4157 = vst [vmem:[%s17134_s8 + $0x138] sm:$0xff] %v3675_v45  ;;  %v3677_v58 = vadd.f32 %v3676_v34, %v17154_v3  ;;  %v12743_v34 = vld [vmem:[%s15591_s14 + $0x628] sm:$0xff] }
 0x2dc   : > { %v3680_v29 = vpop.f32.mrf.mxu0  ;;  %3932 = vmatmul.mubr.bf16.gmra.mxu1 %v15263_v37 }
 0x2dd   : > { %4158 = vst [vmem:[%s17134_s8 + $0x140] sm:$0xff] %v3677_v58  ;;  %v3681_v63 = vadd.f32 %v3680_v29, %v17167_v42  ;;  %3939 = vmatprep.mubr.bf16.mxu1 %v15264_v40  ;;  %v12727_v42 = vld [vmem:[%s15591_s14 + $0x5a8] sm:$0xff]  ;;  %v17433_v29 = vpack.c.bf16 %v12734_v51, %v12730_v8  ;;  %v14901_v8 = vld [vmem:[%s22268_s1 + $0x98] ss:$12 sps:$4 sm:$0xff]  }
 0x2de   : > { %v3682_v27 = vpop.f32.mrf.mxu0 }
 0x2df   : > { %4160 = vst [vmem:[%s17134_s8 + $0x150] sm:$0xff] %v3681_v63  ;;  %v3683_v3 = vadd.f32 %v3682_v27, %v17174_v46  ;;  %14408 = vmatmul.mubr.msk.bf16.gmra.mxu0 %vm3309_vm11, %v16793_v9  ;;  %v17383_v46 = vpack.c.bf16 %v12727_v42, %v12723_v4  ;;  %v12738_v4 = vld [vmem:[%s15591_s14 + $0x600] sm:$0xff] }
 0x2e0   : > { %v3684_v55 = vpop.f32.mrf.mxu0  ;;  %14411 = vmatprep.mubr.msk.bf16.mxu0 %vm15444_vm12, %v22305_v6  ;;  %v12742_v42 = vld [vmem:[%s15591_s14 + $0x620] sm:$0xff] }
 0x2e1   : > { %4161 = vst [vmem:[%s17134_s8 + $0x158] sm:$0xff] %v3683_v3  ;;  %v3685_v11 = vadd.f32 %v3684_v55, %v17181_v10  ;;  %v15265_v10 = vld [vmem:[%s22269_s2 + $0x180] ss:$12 sps:$4 sm:$0x7f]  }
 0x2e2   : > { %v3686_v25 = vpop.f32.mrf.mxu0 }
 0x2e3   : > { %4163 = vst [vmem:[%s17134_s8 + $0x168] sm:$0xff] %v3685_v11  ;;  %v3687_v9 = vadd.f32 %v3686_v25, %v17193_v53  ;;  %v12751_v11 = vld [vmem:[%s15591_s14 + $0x668] sm:$0xff] }
 0x2e4   : > { %v3690_v59 = vpop.f32.mrf.mxu0  ;;  %3940 = vmatmul.mubr.bf16.gmra.mxu1 %v15265_v10 }
 0x2e5   : > { %4164 = vst [vmem:[%s17134_s8 + $0x170] sm:$0xff] %v3687_v9  ;;  %v3691_v12 = vadd.f32 %v3690_v59, %v17203_v22  ;;  %5163 = vmatprep.mubr.bf16.mxu1 %v17383_v46  ;;  %v17459_v9 = vpack.c.bf16 %v12742_v42, %v12738_v4 }
 0x2e6   : > { %v3692_v35 = vpop.f32.mrf.mxu0 }
 0x2e7   : > { %4166 = vst [vmem:[%s17134_s8 + $0x180] sm:$0xff] %v3691_v12  ;;  %v3693_v53 = vadd.f32 %v3692_v35, %v17213_v61  ;;  %14412 = vmatmul.mubr.msk.bf16.gmra.mxu0 %vm3309_vm11, %v16804_v17 }
 0x2e8   : > { %v3694_v22 = vpop.f32.mrf.mxu0  ;;  %14415 = vmatprep.mubr.msk.bf16.mxu0 %vm15444_vm12, %v22305_v6 }
 0x2e9   : > { %4167 = vst [vmem:[%s17134_s8 + $0x188] sm:$0xff] %v3693_v53  ;;  %v3695_v26 = vadd.f32 %v3694_v22, %v17220_v24  ;;  %v17418_v24 = vpop.f32.mrf.mxu1  ;;  %v12750_v53 = vld [vmem:[%s15591_s14 + $0x660] sm:$0xff] }
 0x2ea   : > { %v3696_v61 = vpop.f32.mrf.mxu0 }
 0x2eb   : > { %4169 = vst [vmem:[%s17134_s8 + $0x198] sm:$0xff] %v3695_v26  ;;  %v3697_v17 = vadd.f32 %v3696_v61, %v17233_v5  ;;  %v12739_v5 = vld [vmem:[%s15591_s14 + $0x608] sm:$0xff]  ;;  %v17435_v63 = vpop.f32.mrf.mxu1  ;;  %v17485_v26 = vpack.c.bf16 %v12750_v53, %v12746_v36  ;;  %v12724_v53 = vld [vmem:[%s15591_s14 + $0x590] sm:$0xff] }
 0x2ec   : > { %v3700_v2 = vpop.f32.mrf.mxu0  ;;  %5164 = vmatmul.mubr.bf16.vlgmr.msra.gmra.mxu1 %v17407_v33  ;;  %v17437_v37 = vpack.c.bf16 %v12743_v34, %v12739_v5  ;;  %v12767_v34 = vld [vmem:[%s15591_s14 + $0x6e8] sm:$0xff] }
 0x2ed   : > { %4170 = vst [vmem:[%s17134_s8 + $0x1a0] sm:$0xff] %v3697_v17  ;;  %v3701_v18 = vadd.f32 %v3700_v2, %v17243_v60  ;;  %5173 = vmatprep.mubr.bf16.mxu1 %v17411_v23 }
 0x2ee   : > { %v3702_v48 = vpop.f32.mrf.mxu0 }
 0x2ef   : > { %4172 = vst [vmem:[%s17134_s8 + $0x1b0] sm:$0xff] %v3701_v18  ;;  %v3703_v45 = vadd.f32 %v3702_v48, %v17253_v44  ;;  %14416 = vmatmul.mubr.msk.bf16.gmra.mxu0 %vm3309_vm11, %v16814_v43 }
 0x2f0   : > { %v3704_v60 = vpop.f32.mrf.mxu0  ;;  %14419 = vmatprep.mubr.msk.bf16.mxu0 %vm15444_vm12, %v22305_v6 }
 0x2f1   : > { %4173 = vst [vmem:[%s17134_s8 + $0x1b8] sm:$0xff] %v3703_v45  ;;  %v3705_v58 = vadd.f32 %v3704_v60, %v17260_v62  ;;  %v17444_v62 = vpop.f32.mrf.mxu1  ;;  %v12758_v45 = vld [vmem:[%s15591_s14 + $0x6a0] sm:$0xff]  ;;  %v15266_v60 = vld [vmem:[%s22269_s2 + $0x170] ss:$12 sps:$4 sm:$0xff]  }
 0x2f2   : > { %v3706_v44 = vpop.f32.mrf.mxu0 }
 0x2f3   : > { %4175 = vst [vmem:[%s17134_s8 + $0x1c8] sm:$0xff] %v3705_v58  ;;  %v3707_v43 = vadd.f32 %v3706_v44, %v17270_v1  ;;  %v12747_v1 = vld [vmem:[%s15591_s14 + $0x648] sm:$0xff]  ;;  %v17461_v59 = vpop.f32.mrf.mxu1 }
 0x2f4   : > { %v3710_v27 = vpop.f32.mrf.mxu0  ;;  %5174 = vmatmul.mubr.bf16.gmra.mxu1 %v17433_v29  ;;  %v17463_v12 = vpack.c.bf16 %v12751_v11, %v12747_v1 }
 0x2f5   : > { %4176 = vst [vmem:[%s17134_s8 + $0x1d0] sm:$0xff] %v3707_v43  ;;  %v3711_v40 = vadd.f32 %v3710_v27, %v17280_v41  ;;  %5183 = vmatprep.mubr.bf16.mxu1 %v17437_v37  ;;  %v14902_v27 = vld [vmem:[%s22268_s1 + $0x80] ss:$12 sps:$4 sm:$0xff]  }
 0x2f6   : > { %v3712_v3 = vpop.f32.mrf.mxu0 }
 0x2f7   : > { %4178 = vst [vmem:[%s17134_s8 + $0x1e0] sm:$0xff] %v3711_v40  ;;  %v3713_v55 = vadd.f32 %v3712_v3, %v17285_v38  ;;  %14420 = vmatmul.mubr.msk.bf16.gmra.mxu0 %vm3309_vm11, %v16825_v54  ;;  %v12725_v40 = vld [vmem:[%s15591_s14 + $0x598] sm:$0xff] }
 0x2f8   : > { %v3714_v41 = vpop.f32.mrf.mxu0  ;;  %14423 = vmatprep.mubr.msk.bf16.mxu0 %vm15444_vm12, %v22305_v6  ;;  %v12729_v3 = vld [vmem:[%s15591_s14 + $0x5b8] sm:$0xff] }
 0x2f9   : > { %4179 = vst [vmem:[%s17134_s8 + $0x1e8] sm:$0xff] %v3713_v55  ;;  %v3715_v25 = vadd.f32 %v3714_v41, %v17292_v47  ;;  %v17470_v47 = vpop.f32.mrf.mxu1  ;;  %v17535_v1 = vpack.c.bf16 %v12729_v3, %v12725_v40  ;;  %v12736_v40 = vld [vmem:[%s15591_s14 + $0x5f0] sm:$0xff] }
 0x2fa   : > { %v3716_v38 = vpop.f32.mrf.mxu0 }
 0x2fb   : > { %4181 = vst [vmem:[%s17134_s8 + $0x1f8] sm:$0xff] %v3715_v25  ;;  %v3717_v54 = vadd.f32 %v3716_v38, %v17299_v39  ;;  %v12759_v39 = vld [vmem:[%s15591_s14 + $0x6a8] sm:$0xff]  ;;  %v17487_v61 = vpop.f32.mrf.mxu1  ;;  %v12762_v38 = vld [vmem:[%s15591_s14 + $0x6c0] sm:$0xff] }
 0x2fc   : > { %v3720_v10 = vpop.f32.mrf.mxu0  ;;  %5184 = vmatmul.mubr.bf16.gmra.mxu1 %v17459_v9 }
 0x2fd   : > { %4182 = vst [vmem:[%s17134_s8 + $0x200] sm:$0xff] %v3717_v54  ;;  %v3721_v35 = vadd.f32 %v3720_v10, %v17309_v57  ;;  %5193 = vmatprep.mubr.bf16.mxu1 %v17463_v12  ;;  %v17500_v48 = vpop.f32.mrf.mxu1  ;;  %v12766_v54 = vld [vmem:[%s15591_s14 + $0x6e0] sm:$0xff] }
 0x2fe   : > { %v3722_v0 = vpop.f32.mrf.mxu0 }
 0x2ff   : > { %4184 = vst [vmem:[%s17134_s8 + $0x210] sm:$0xff] %v3721_v35  ;;  %v3723_v14 = vadd.f32 %v3722_v0, %v17313_v15  ;;  %14424 = vmatmul.mubr.msk.bf16.gmra.mxu0 %vm3309_vm11, %v16837_v13  ;;  %v14900_v15 = vld [vmem:[%s22268_s1 + $0xb0] ss:$12 sps:$4 sm:$0xff]   ;;  %v17492_v13 = vpack.c.bf16 %v12759_v39, %v12755_v7  ;;  %v17523_v43 = vpop.f32.mrf.mxu1  ;;  %v12775_v35 = vld [vmem:[%s15591_s14 + $0x728] sm:$0xff]  ;;  %v17563_v7 = vpack.c.bf16 %v12766_v54, %v12762_v38 }
 0x300   : > { %v3724_v57 = vpop.f32.mrf.mxu0  ;;  %14427 = vmatprep.mubr.msk.bf16.mxu0 %vm15444_vm12, %v22305_v6  ;;  %5638 = vmatpush1.bf16.msra.mxu1 %v14900_v15  ;;  %v15267_v0 = vld [vmem:[%s22269_s2 + $0x188] ss:$12 sps:$4 sm:$0x7f]   ;;  %v12737_v15 = vld [vmem:[%s15591_s14 + $0x5f8] sm:$0xff] }
 0x301   : > { %4185 = vst [vmem:[%s17134_s8 + $0x218] sm:$0xff] %v3723_v14  ;;  %v3725_v22 = vadd.f32 %v3724_v57, %v17320_v32  ;;  %5639 = vmatprep.subr.bf16.mxu1 %v22489_v19  ;;  %v17540_v41 = vpop.f32.mrf.mxu1  ;;  %v14905_v57 = vld [vmem:[%s22268_s1 + $0x50] ss:$12 sps:$4 sm:$0xff]  }
 0x302   : > { %v3726_v17 = vpop.f32.mrf.mxu0 }
 0x303   : > { %4187 = vst [vmem:[%s17134_s8 + $0x228] sm:$0xff] %v3725_v22  ;;  %v3727_v2 = vadd.f32 %v3726_v17, %v17335_v21  ;;  %v12754_v21 = vld [vmem:[%s15591_s14 + $0x680] sm:$0xff]  ;;  %v17565_v39 = vpop.f32.mrf.mxu1  ;;  %v12733_v22 = vld [vmem:[%s15591_s14 + $0x5d8] sm:$0xff] }
 0x304   : > { %v3730_v32 = vpop.f32.mrf.mxu0  ;;  %5194 = vmatmul.mubr.bf16.gmra.mxu1 %v17485_v26  ;;  %v17521_v44 = vpack.c.bf16 %v12758_v45, %v12754_v21  ;;  %v14906_v45 = vld [vmem:[%s22268_s1 + $0x38] ss:$12 sps:$4 sm:$0xff]  }
 0x305   : > { %4188 = vst [vmem:[%s17134_s8 + $0x230] sm:$0xff] %v3727_v2  ;;  %v3731_v18 = vadd.f32 %v3730_v32, %v17344_v30  ;;  %5203 = vmatprep.mubr.bf16.mxu1 %v17492_v13  ;;  %v12763_v30 = vld [vmem:[%s15591_s14 + $0x6c8] sm:$0xff]  ;;  %5640 = vmatpush1.bf16.msra.mxu1 %v14901_v8  ;;  %v17579_v8 = vpack.c.bf16 %v12737_v15, %v12733_v22  ;;  %v17584_v21 = vpop.f32.mrf.mxu1  ;;  %v12740_v15 = vld [vmem:[%s15591_s14 + $0x610] sm:$0xff] }
 0x306   : > { %v3732_v51 = vpop.f32.mrf.mxu0  ;;  %5641 = vmatprep.subr.bf16.mxu1 %v22489_v19  ;;  %v17530_v42 = vpack.c.bf16 %v12767_v34, %v12763_v30  ;;  %v12770_v30 = vld [vmem:[%s15591_s14 + $0x700] sm:$0xff]  ;;  %v12791_v22 = vld [vmem:[%s15591_s14 + $0x7a8] sm:$0xff] }
 0x307   : > { %4190 = vst [vmem:[%s17134_s8 + $0x240] sm:$0xff] %v3731_v18  ;;  %v3733_v5 = vadd.f32 %v3732_v51, %v17357_v49  ;;  %14428 = vmatmul.mubr.msk.bf16.gmra.mxu0 %vm3309_vm11, %v15266_v60  ;;  %v12774_v34 = vld [vmem:[%s15591_s14 + $0x720] sm:$0xff]  ;;  %v12779_v60 = vld [vmem:[%s15591_s14 + $0x748] sm:$0xff] }
 0x308   : > { %v3734_v58 = vpop.f32.mrf.mxu0  ;;  %14431 = vmatprep.mubr.msk.bf16.mxu0 %vm15444_vm12, %v22305_v6  ;;  %v12789_v6 = vld [vmem:[%s15591_s14 + $0x798] sm:$0xff] }
 0x309   : > { %4191 = vst [vmem:[%s17134_s8 + $0x248] sm:$0xff] %v3733_v5  ;;  %v3735_v49 = vadd.f32 %v3734_v58, %v17366_v50  ;;  %5642 = vmatpush1.bf16.msra.mxu1 %v14902_v27  ;;  %v12783_v58 = vld [vmem:[%s15591_s14 + $0x768] sm:$0xff] }
 0x30a   : > { %v3736_v4 = vpop.f32.mrf.mxu0  ;;  %5643 = vmatprep.subr.bf16.mxu1 %v22489_v19  ;;  %v17619_v38 = vpack.c.bf16 %v12783_v58, %v12779_v60 }
 0x30b   : > { %4193 = vst [vmem:[%s17134_s8 + $0x258] sm:$0xff] %v3735_v49  ;;  %v3737_v55 = vadd.f32 %v3736_v4, %v17381_v20  ;;  %v14904_v20 = vld [vmem:[%s22268_s1 + $0x68] ss:$12 sps:$4 sm:$0xff]   ;;  %v17609_v4 = vpop.f32.mrf.mxu1 }
 0x30c   : > { %v3740_v50 = vpop.f32.mrf.mxu0  ;;  %5204 = vmatmul.mubr.bf16.gmra.mxu1 %v17521_v44  ;;  %v12732_v49 = vld [vmem:[%s15591_s14 + $0x5d0] sm:$0xff] }
 0x30d   : > { %4194 = vst [vmem:[%s17134_s8 + $0x260] sm:$0xff] %v3737_v55  ;;  %v3741_v11 = vadd.f32 %v3740_v50, %v17392_v31  ;;  %5213 = vmatprep.mubr.bf16.mxu1 %v17530_v42  ;;  %v12771_v31 = vld [vmem:[%s15591_s14 + $0x708] sm:$0xff]  ;;  %5644 = vmatpush1.bf16.msra.mxu1 %v14904_v20  ;;  %v14907_v55 = vld [vmem:[%s22268_s1 + $0x218] ss:$12 sps:$4 sm:$0xff]   ;;  %v17624_v54 = vpack.c.bf16 %v12736_v40, %v12732_v49 }
 0x30e   : > { %v3742_v25 = vpop.f32.mrf.mxu0  ;;  %5645 = vmatprep.subr.bf16.mxu1 %v22489_v19  ;;  %v17572_v2 = vpack.c.bf16 %v12775_v35, %v12771_v31  ;;  %v14908_v50 = vld [vmem:[%s22268_s1 + $0x20] ss:$12 sps:$4 sm:$0xff]   ;;  %v12745_v20 = vld [vmem:[%s15591_s14 + $0x638] sm:$0xff] }
 0x30f   : > { %4196 = vst [vmem:[%s17134_s8 + $0x270] sm:$0xff] %v3741_v11  ;;  %v3743_v10 = vadd.f32 %v3742_v25, %v17409_v28  ;;  %14432 = vmatmul.mubr.msk.bf16.gmra.mxu0 %vm3309_vm11, %v15267_v0  ;;  %v12728_v28 = vld [vmem:[%s15591_s14 + $0x5b0] sm:$0xff]  ;;  %v12741_v11 = vld [vmem:[%s15591_s14 + $0x618] sm:$0xff]  ;;  %v17632_v0 = vpop.f32.mrf.mxu1 }
 0x310   : > { %v3744_v36 = vpop.f32.mrf.mxu0  ;;  %12986 = vmatprep.mubr.msk.bf16.mxu0 %vm1006_vm1, %v17535_v1  ;;  %v17627_v31 = vpack.c.bf16 %v12745_v20, %v12741_v11 }
 0x311   : > { %4197 = vst [vmem:[%s17134_s8 + $0x278] sm:$0xff] %v3743_v10  ;;  %v3745_v14 = vadd.f32 %v3744_v36, %v17418_v24  ;;  %5646 = vmatpush1.bf16.msra.mxu1 %v14905_v57  ;;  %v17576_v24 = vpack.c.bf16 %v12728_v28, %v12724_v53  ;;  %v14910_v36 = vld [vmem:[%s22268_s1 + $0x8] ss:$12 sps:$4 sm:$0xff]   ;;  %v12782_v28 = vld [vmem:[%s15591_s14 + $0x760] sm:$0xff] }
 0x312   : > { %v3746_v17 = vpop.f32.mrf.mxu0  ;;  %5647 = vmatprep.subr.bf16.mxu1 %v22489_v19  ;;  %v12787_v57 = vld [vmem:[%s15591_s14 + $0x788] sm:$0xff] }
 0x313   : > { %4199 = vst [vmem:[%s17134_s8 + $0x288] sm:$0xff] %v3745_v14  ;;  %v3747_v32 = vadd.f32 %v3746_v17, %v17435_v63  ;;  %v14903_v63 = vld [vmem:[%s22268_s1 + $0x230] ss:$12 sps:$4 sm:$0xff]  }
 0x314   : > { %v3750_v18 = vpop.f32.mrf.mxu0  ;;  %5214 = vmatmul.mubr.bf16.gmra.mxu1 %v17563_v7 }
 0x315   : > { %4200 = vst [vmem:[%s17134_s8 + $0x290] sm:$0xff] %v3747_v32  ;;  %v3751_v51 = vadd.f32 %v3750_v18, %v17444_v62  ;;  %5223 = vmatprep.mubr.bf16.mxu1 %v17572_v2  ;;  %5648 = vmatpush1.bf16.msra.mxu1 %v14906_v45  ;;  %v12744_v32 = vld [vmem:[%s15591_s14 + $0x630] sm:$0xff] }
 0x316   : > { %v3752_v5 = vpop.f32.mrf.mxu0  ;;  %5649 = vmatprep.subr.bf16.mxu1 %v22489_v19  ;;  %v14912_v45 = vld [vmem:[%s22268_s1 + $0x170] ss:$12 sps:$4 sm:$0xff]   ;;  %v17671_v60 = vpack.c.bf16 %v12744_v32, %v12740_v15 }
 0x317   : > { %4202 = vst [vmem:[%s17134_s8 + $0x2a0] sm:$0xff] %v3751_v51  ;;  %v3753_v62 = vadd.f32 %v3752_v5, %v17461_v59  ;;  %5417 = vmatmul.mubr.bf16.vlgmr.msra.gmra.mxu0 %v17576_v24  ;;  %v17607_v59 = vpack.c.bf16 %v12774_v34, %v12770_v30  ;;  %v12749_v5 = vld [vmem:[%s15591_s14 + $0x658] sm:$0xff] }
 0x318   : > { %v3754_v27 = vpop.f32.mrf.mxu0  ;;  %12987 = vmatprep.mubr.msk.bf16.mxu0 %vm1006_vm1, %v17579_v8  ;;  %5847 = vmatpush1.bf16.msra.mxu0 %v14903_v63  ;;  %v14911_v63 = vld [vmem:[%s22268_s1 + $0x1e8] ss:$12 sps:$4 sm:$0xff]   ;;  %v12753_v30 = vld [vmem:[%s15591_s14 + $0x678] sm:$0xff] }
 0x319   : > { %4203 = vst [vmem:[%s17134_s8 + $0x2a8] sm:$0xff] %v3753_v62  ;;  %v3755_v3 = vadd.f32 %v3754_v27, %v17470_v47  ;;  %5848 = vmatprep.subr.bf16.mxu0 %v22489_v19  ;;  %5650 = vmatpush1.bf16.msra.mxu1 %v14908_v50  ;;  %v17666_v62 = vpack.c.bf16 %v12791_v22, %v12787_v57  ;;  %v12790_v50 = vld [vmem:[%s15591_s14 + $0x7a0] sm:$0xff]  ;;  %v12761_v57 = vld [vmem:[%s15591_s14 + $0x6b8] sm:$0xff] }
 0x31a   : > { %v3756_v25 = vpop.f32.mrf.mxu0  ;;  %5651 = vmatprep.subr.bf16.mxu1 %v22489_v19  ;;  %v17674_v49 = vpack.c.bf16 %v12753_v30, %v12749_v5  ;;  %v12794_v5 = vld [vmem:[%s15591_s14 + $0x7c0] sm:$0xff] }
 0x31b   : > { %4205 = vst [vmem:[%s17134_s8 + $0x2b8] sm:$0xff] %v3755_v3  ;;  %v3757_v47 = vadd.f32 %v3756_v25, %v17487_v61  ;;  %v14909_v61 = vld [vmem:[%s22268_s1 + $0x200] ss:$12 sps:$4 sm:$0xff]   ;;  %v14914_v3 = vld [vmem:[%s22268_s1 + $0x158] ss:$12 sps:$4 sm:$0xff]  }
 0x31c   : > { %v3760_v10 = vpop.f32.mrf.mxu0  ;;  %5224 = vmatmul.mubr.bf16.gmra.mxu1 %v17607_v59  ;;  %5849 = vmatpush1.bf16.msra.mxu0 %v14907_v55  ;;  %v12795_v25 = vld [vmem:[%s15591_s14 + $0x7c8] sm:$0xff]  ;;  %v12798_v30 = vld [vmem:[%s15591_s14 + $0x7e0] sm:$0xff] }
 0x31d   : > { %4206 = vst [vmem:[%s17134_s8 + $0x2c0] sm:$0xff] %v3757_v47  ;;  %v3761_v35 = vadd.f32 %v3760_v10, %v17500_v48  ;;  %5233 = vmatprep.mubr.bf16.mxu1 %v17619_v38  ;;  %v12778_v48 = vld [vmem:[%s15591_s14 + $0x740] sm:$0xff]  ;;  %5850 = vmatprep.subr.bf16.mxu0 %v22489_v19  ;;  %v12799_v47 = vld [vmem:[%s15591_s14 + $0x7e8] sm:$0xff]  ;;  %v12748_v10 = vld [vmem:[%s15591_s14 + $0x650] sm:$0xff] }
 0x31e   : > { %v3762_v53 = vpop.f32.mrf.mxu0  ;;  %5652 = vmatpush1.bf16.msra.mxu1 %v14910_v36  ;;  %v17656_v51 = vpack.c.bf16 %v12782_v28, %v12778_v48  ;;  %v14915_v48 = vld [vmem:[%s22268_s1 + $0x1b8] ss:$12 sps:$4 sm:$0xff]   ;;  %v14916_v28 = vld [vmem:[%s22268_s1 + $0x140] ss:$12 sps:$4 sm:$0xff]   ;;  %v17715_v15 = vpack.c.bf16 %v12799_v47, %v12795_v25  ;;  %v14921_v47 = vld [vmem:[%s22268_s1 + $0x2a8] ss:$0 sps:$4 sm:$0xff]  }
 0x31f   : > { %4208 = vst [vmem:[%s17134_s8 + $0x2d0] sm:$0xff] %v3761_v35  ;;  %v3763_v14 = vadd.f32 %v3762_v53, %v17523_v43  ;;  %5427 = vmatmul.mubr.bf16.gmra.mxu0 %v17624_v54  ;;  %5653 = vmatprep.subr.bf16.mxu1 %v22489_v19  ;;  %v3573_v43 = vpop.f32.mrf.mxu1 }
 0x320   : > { %v3764_v17 = vpop.f32.mrf.mxu0  ;;  %12988 = vmatprep.mubr.msk.bf16.mxu0 %vm1006_vm1, %v17627_v31  ;;  %5851 = vmatpush1.bf16.msra.mxu0 %v14909_v61  ;;  %v12752_v61 = vld [vmem:[%s15591_s14 + $0x670] sm:$0xff] }
 0x321   : > { %4209 = vst [vmem:[%s17134_s8 + $0x2d8] sm:$0xff] %v3763_v14  ;;  %v3765_v18 = vadd.f32 %v3764_v17, %v17540_v41  ;;  %5852 = vmatprep.subr.bf16.mxu0 %v22489_v19  ;;  %v12757_v14 = vld [vmem:[%s15591_s14 + $0x698] sm:$0xff]  ;;  %v17719_v32 = vpack.c.bf16 %v12752_v61, %v12748_v10 }
 0x322   : > { %v3766_v34 = vpop.f32.mrf.mxu0  ;;  %5654 = vmatpush2.bf16.msra.mxu1 %v14912_v45  ;;  %v14918_v45 = vld [vmem:[%s22268_s1 + $0x128] ss:$12 sps:$4 sm:$0xff]  }
 0x323   : > { %4211 = vst [vmem:[%s17134_s8 + $0x2e8] sm:$0xff] %v3765_v18  ;;  %v3767_v41 = vadd.f32 %v3766_v34, %v17565_v39  ;;  %5655 = vmatprep.subr.bf16.mxu1 %v22489_v19  ;;  %v14913_v39 = vld [vmem:[%s22268_s1 + $0x1d0] ss:$12 sps:$4 sm:$0xff]   ;;  %v17722_v18 = vpack.c.bf16 %v12761_v57, %v12757_v14  ;;  %v12806_v14 = vld [vmem:[%s15591_s14 + $0x820] sm:$0xff]  ;;  %v5129_v57 = vsel %vm1073_vm0, %v14921_v47, 0 }
 0x324   : > { %v3770_v58 = vpop.f32.mrf.mxu0  ;;  %v17678_v40 = vpop.f32.mrf.mxu1  ;;  %5234 = vmatmul.mubr.bf16.gmra.mxu1 %v17656_v51  ;;  %5853 = vmatpush1.bf16.msra.mxu0 %v14911_v63  ;;  %v14925_v47 = vld [vmem:[%s22268_s1 + $0x278] ss:$12 sps:$4 sm:$0xff]  }
 0x325   : > { %4212 = vst [vmem:[%s17134_s8 + $0x2f0] sm:$0xff] %v3767_v41  ;;  %v3771_v27 = vadd.f32 %v3770_v58, %v17584_v21  ;;  %5243 = vmatprep.mubr.bf16.mxu1 %v17666_v62  ;;  %v12786_v21 = vld [vmem:[%s15591_s14 + $0x780] sm:$0xff]  ;;  %5854 = vmatprep.subr.bf16.mxu0 %v22489_v19  ;;  %v12803_v41 = vld [vmem:[%s15591_s14 + $0x808] sm:$0xff] }
 0x326   : > { %v3772_v55 = vpop.f32.mrf.mxu0  ;;  %v3815_v20 = vpop.f32.mrf.mxu1  ;;  %5656 = vmatpush2.bf16.msra.mxu1 %v14914_v3  ;;  %v17705_v53 = vpack.c.bf16 %v12790_v50, %v12786_v21  ;;  %v12807_v58 = vld [vmem:[%s15591_s14 + $0x828] sm:$0xff]  ;;  %v14920_v50 = vld [vmem:[%s22268_s1 + $0x110] ss:$12 sps:$4 sm:$0xff]  }
 0x327   : > { %4214 = vst [vmem:[%s17134_s8 + $0x300] sm:$0xff] %v3771_v27  ;;  %v3773_v11 = vadd.f32 %v3772_v55, %v17609_v4  ;;  %5437 = vmatmul.mubr.bf16.gmra.mxu0 %v17671_v60  ;;  %5657 = vmatprep.subr.bf16.mxu1 %v22489_v19  ;;  %v12756_v27 = vld [vmem:[%s15591_s14 + $0x690] sm:$0xff]  ;;  %v17748_v55 = vpack.c.bf16 %v12798_v30, %v12794_v5  ;;  %v12769_v20 = vld [vmem:[%s15591_s14 + $0x6f8] sm:$0xff] }
 0x328   : > { %v3774_v35 = vpop.f32.mrf.mxu0  ;;  %12989 = vmatprep.mubr.msk.bf16.mxu0 %vm1006_vm1, %v17674_v49  ;;  %v17703_v36 = vpop.f32.mrf.mxu1  ;;  %5855 = vmatpush1.bf16.msra.mxu0 %v14913_v39  ;;  %v12760_v39 = vld [vmem:[%s15591_s14 + $0x6b0] sm:$0xff]  ;;  %v17758_v25 = vpack.c.bf16 %v12807_v58, %v12803_v41  ;;  %v14924_v41 = vld [vmem:[%s22268_s1 + $0xe0] ss:$12 sps:$4 sm:$0xff]   ;;  %v12773_v58 = vld [vmem:[%s15591_s14 + $0x718] sm:$0xff] }
 0x329   : > { %4215 = vst [vmem:[%s17134_s8 + $0x308] sm:$0xff] %v3773_v11  ;;  %v3775_v4 = vadd.f32 %v3774_v35, %v17632_v0  ;;  %5856 = vmatprep.subr.bf16.mxu0 %v22489_v19  ;;  %v14919_v21 = vld [vmem:[%s22268_s1 + $0x188] ss:$12 sps:$4 sm:$0xff]   ;;  %v12765_v11 = vld [vmem:[%s15591_s14 + $0x6d8] sm:$0xff]  ;;  %v17764_v35 = vpack.c.bf16 %v12760_v39, %v12756_v27 }
 0x32a   : > { %v3776_v22 = vpop.f32.mrf.mxu0  ;;  %v3818_v17 = vpop.f32.mrf.mxu1  ;;  %5658 = vmatpush2.bf16.msra.mxu1 %v14916_v28  ;;  %v17767_v61 = vpack.c.bf16 %v12769_v20, %v12765_v11  ;;  %v12802_v28 = vld [vmem:[%s15591_s14 + $0x800] sm:$0xff]  ;;  %v12777_v27 = vld [vmem:[%s15591_s14 + $0x738] sm:$0xff] }
 0x32b   : > { %4217 = vst [vmem:[%s17134_s8 + $0x318] sm:$0x3f] %v3775_v4  ;;  %v3777_v0 = vadd.f32 %v3776_v22, %v3573_v43  ;;  %5659 = vmatprep.subr.bf16.mxu1 %v22489_v19  ;;  %v14917_v43 = vld [vmem:[%s22268_s1 + $0x1a0] ss:$12 sps:$4 sm:$0xff]   ;;  %v17790_v30 = vpack.c.bf16 %v12806_v14, %v12802_v28  ;;  %v17806_v11 = vpack.c.bf16 %v12777_v27, %v12773_v58  ;;  %v12785_v58 = vld [vmem:[%s15591_s14 + $0x778] sm:$0xff] }
 0x32c   : > { %v17725_v63 = vpop.f32.mrf.mxu1  ;;  %5244 = vmatmul.mubr.bf16.gmra.mxu1 %v17705_v53  ;;  %5857 = vmatpush1.bf16.msra.mxu0 %v14915_v48  ;;  %v14922_v48 = vld [vmem:[%s22268_s1 + $0xf8] ss:$12 sps:$4 sm:$0xff]   ;;  %v12815_v17 = vld [vmem:[%s15591_s14 + $0x868] sm:$0xff] }
 0x32d   : > { %4218 = vst [vmem:[%s17134_s8 + $0x320] sm:$0x3f] %v3777_v0  ;;  %5253 = vmatprep.mubr.bf16.mxu1 %v17715_v15  ;;  %5858 = vmatprep.subr.bf16.mxu0 %v22489_v19  ;;  %v12811_v0 = vld [vmem:[%s15591_s14 + $0x848] sm:$0xff]  ;;  %v12814_v28 = vld [vmem:[%s15591_s14 + $0x860] sm:$0xff] }
 0x32e   : > { %v3823_v34 = vpop.f32.mrf.mxu1  ;;  %5660 = vmatpush2.bf16.msra.mxu1 %v14918_v45  ;;  %v12768_v45 = vld [vmem:[%s15591_s14 + $0x6f0] sm:$0xff]  ;;  %v17800_v39 = vpack.c.bf16 %v12815_v17, %v12811_v0 }
 0x32f   : > { %5447 = vmatmul.mubr.bf16.gmra.mxu0 %v17719_v32  ;;  %5661 = vmatprep.subr.bf16.mxu1 %v22489_v19  ;;  %v14923_v34 = vld [vmem:[%s22268_s1 + $0x290] ss:$12 sps:$4 sm:$0xff]  }
 0x330   : > { %12990 = vmatprep.mubr.msk.bf16.mxu0 %vm1006_vm1, %v17722_v18  ;;  %v17746_v3 = vpop.f32.mrf.mxu1  ;;  %5859 = vmatpush1.bf16.msra.mxu0 %v14917_v43  ;;  %v12764_v43 = vld [vmem:[%s15591_s14 + $0x6d0] sm:$0xff] }
 0x331   : > { %5860 = vmatprep.subr.bf16.mxu0 %v22489_v19  ;;  %v12772_v0 = vld [vmem:[%s15591_s14 + $0x710] sm:$0xff] }
 0x332   : > { %v3826_v10 = vpop.f32.mrf.mxu1  ;;  %5662 = vmatpush2.bf16.msra.mxu1 %v14920_v50  ;;  %v17803_v50 = vpack.c.bf16 %v12768_v45, %v12764_v43  ;;  %v12776_v17 = vld [vmem:[%s15591_s14 + $0x730] sm:$0xff] }
 0x333   : > { %5663 = vmatprep.subr.bf16.mxu1 %v22489_v19  ;;  %v14926_v10 = vld [vmem:[%s22268_s1 + $0xc8] ss:$12 sps:$4 sm:$0xff]  }
 0x334   : > { %v17769_v4 = vpop.f32.mrf.mxu1  ;;  %5254 = vmatmul.mubr.bf16.gmra.mxu1 %v17748_v55  ;;  %5861 = vmatpush1.bf16.msra.mxu0 %v14919_v21 }
 0x335   : > { %5263 = vmatprep.mubr.bf16.mxu1 %v17758_v25  ;;  %5868 = vmatprep.subr.bf16.mxu0 %v22489_v19 }
 0x336   : > { %v3831_v22 = vpop.f32.mrf.mxu1  ;;  %5664 = vmatpush2.bf16.msra.mxu1 %v14922_v48  ;;  %v12810_v48 = vld [vmem:[%s15591_s14 + $0x840] sm:$0xff] }
 0x337   : > { %5457 = vmatmul.mubr.bf16.gmra.mxu0 %v17764_v35  ;;  %5665 = vmatprep.subr.bf16.mxu1 %v22489_v19  ;;  %v12823_v22 = vld [vmem:[%s15591_s14 + $0x8a8] sm:$0xff]  ;;  %v17830_v45 = vpack.c.bf16 %v12814_v28, %v12810_v48 }
 0x338   : > { %12991 = vmatprep.mubr.msk.bf16.mxu0 %vm1006_vm1, %v17767_v61  ;;  %v17788_v5 = vpop.f32.mrf.mxu1  ;;  %5869 = vmatpush2.bf16.msra.mxu0 %v5129_v57  ;;  %v12819_v57 = vld [vmem:[%s15591_s14 + $0x888] sm:$0xff] }
 0x339   : > { %5870 = vmatprep.subr.bf16.mxu0 %v22489_v19  ;;  %22497 = vst [vmem:[#allocation4_spill] sm:$0xff] %v17830_v45  ;;  %v17837_v27 = vpack.c.bf16 %v12823_v22, %v12819_v57  ;;  %v14928_v28 = vld [vmem:[%s22268_s1 + $0x248] ss:$12 sps:$4 sm:$0xff]   ;;  %v12822_v57 = vld [vmem:[%s15591_s14 + $0x8a0] sm:$0xff] }
 0x33a   : > { %v3834_v21 = vpop.f32.mrf.mxu1  ;;  %5666 = vmatpush2.bf16.msra.mxu1 %v14924_v41  ;;  %v12781_v41 = vld [vmem:[%s15591_s14 + $0x758] sm:$0xff] }
 0x33b   : > { %5667 = vmatprep.subr.bf16.mxu1 %v22489_v19  ;;  %22498 = vst [vmem:[#allocation12_spill] sm:$0xff] %v17837_v27  ;;  %v17842_v48 = vpack.c.bf16 %v12785_v58, %v12781_v41  ;;  %v12784_v41 = vld [vmem:[%s15591_s14 + $0x770] sm:$0xff] }
 0x33c   : > { %v17808_v20 = vpop.f32.mrf.mxu1  ;;  %5264 = vmatmul.mubr.bf16.gmra.mxu1 %v17790_v30  ;;  %5871 = vmatpush2.bf16.msra.mxu0 %v14923_v34  ;;  %v14927_v34 = vld [vmem:[%s22268_s1 + $0x260] ss:$12 sps:$4 sm:$0xff]  }
 0x33d   : > { %5273 = vmatprep.mubr.bf16.mxu1 %v17800_v39  ;;  %5872 = vmatprep.subr.bf16.mxu0 %v22489_v19  ;;  %22500 = vst [vmem:[#allocation14_spill] sm:$0xff] %v17842_v48 }
 0x33e   : > { %v3839_v14 = vpop.f32.mrf.mxu1  ;;  %5668 = vmatpush2.bf16.msra.mxu1 %v14926_v10  ;;  %v17840_v10 = vpack.c.bf16 %v12776_v17, %v12772_v0  ;;  %v12827_v0 = vld [vmem:[%s15591_s14 + $0x8c8] sm:$0xff] }
 0x33f   : > { %5467 = vmatmul.mubr.bf16.gmra.mxu0 %v17803_v50  ;;  %v12818_v14 = vld [vmem:[%s15591_s14 + $0x880] sm:$0xff]  ;;  %v12831_v17 = vld [vmem:[%s15591_s14 + $0x8e8] sm:$0xff] }
 0x340   : > { %12992 = vmatprep.mubr.msk.bf16.mxu0 %vm1006_vm1, %v17806_v11  ;;  %v17828_v43 = vpop.f32.mrf.mxu1  ;;  %5873 = vmatpush2.bf16.msra.mxu0 %v14925_v47  ;;  %22499 = vst [vmem:[#allocation5_spill] sm:$0xff] %v17840_v10  ;;  %v17867_v56 = vpack.c.bf16 %v12831_v17, %v12827_v0  ;;  %v12835_v0 = vld [vmem:[%s15591_s14 + $0x908] sm:$0xff] }
 0x341   : > { %5874 = vmatprep.subr.bf16.mxu0 %v22489_v19 }
 0x342   : > { %v3842_v21 = vpop.f32.mrf.mxu1  ;;  %22502 = vst [vmem:[#allocation16_spill] sm:$0xff] %v17867_v56 }
 0x343   : > { %v17863_v21 = vpack.c.bf16 %v12822_v57, %v12818_v14  ;;  %v12826_v14 = vld [vmem:[%s15591_s14 + $0x8c0] sm:$0xff] }
 0x344   : > { %v17844_v47 = vpop.f32.mrf.mxu1  ;;  %5274 = vmatmul.mubr.bf16.gmra.mxu1 %v17830_v45  ;;  %5875 = vmatpush2.bf16.msra.mxu0 %v14927_v34  ;;  %v12780_v34 = vld [vmem:[%s15591_s14 + $0x750] sm:$0xff] }
 0x345   : > { %5283 = vmatprep.mubr.bf16.mxu1 %v17837_v27  ;;  %5876 = vmatprep.subr.bf16.mxu0 %v22489_v19  ;;  %22501 = vst [vmem:[#allocation6_spill] sm:$0xff] %v17863_v21  ;;  %v17869_v16 = vpack.c.bf16 %v12784_v41, %v12780_v34  ;;  %v12788_v34 = vld [vmem:[%s15591_s14 + $0x790] sm:$0xff] }
 0x346   : > { %v3847_v22 = vpop.f32.mrf.mxu1  ;;  %v12792_v41 = vld [vmem:[%s15591_s14 + $0x7b0] sm:$0xff] }
 0x347   : > { %5477 = vmatmul.mubr.bf16.gmra.mxu0 %v17840_v10  ;;  %v12793_v22 = vld [vmem:[%s15591_s14 + $0x7b8] sm:$0xff]  ;;  %22503 = vst [vmem:[#allocation7_spill] sm:$0xff] %v17869_v16 }
 0x348   : > { %12993 = vmatprep.mubr.msk.bf16.mxu0 %vm1006_vm1, %v17842_v48  ;;  %v17861_v58 = vpop.f32.mrf.mxu1  ;;  %5877 = vmatpush2.bf16.msra.mxu0 %v14928_v28  ;;  %v17871_v19 = vpack.c.bf16 %v12793_v22, %v12789_v6  ;;  %v12830_v28 = vld [vmem:[%s15591_s14 + $0x8e0] sm:$0xff]  ;;  %v12801_v10 = vld [vmem:[%s15591_s14 + $0x7f8] sm:$0xff] }
 0x34a   : > { %v3850_v52 = vpop.f32.mrf.mxu1  ;;  %22504 = vst [vmem:[#allocation18_spill] sm:$0xff] %v17871_v19 }
 0x34b   : > { %v12839_v52 = vld [vmem:[%s15591_s14 + $0x928] sm:$0xff] }
 0x34c   : > { %v17873_v48 = vpop.f32.mrf.mxu1  ;;  %5284 = vmatmul.mubr.bf16.gmra.mxu1 %v17863_v21  ;;  %v12797_v21 = vld [vmem:[%s15591_s14 + $0x7d8] sm:$0xff]  ;;  %v17893_v27 = vpack.c.bf16 %v12839_v52, %v12835_v0  ;;  %v12834_v0 = vld [vmem:[%s15591_s14 + $0x900] sm:$0xff] }
 0x34d   : > { %5293 = vmatprep.mubr.bf16.mxu1 %v17867_v56  ;;  %v17889_v56 = vpack.c.bf16 %v12830_v28, %v12826_v14  ;;  %v17900_v14 = vpack.c.bf16 %v12801_v10, %v12797_v21  ;;  %v12838_v52 = vld [vmem:[%s15591_s14 + $0x920] sm:$0xff] }
 0x34e   : > { %v3855_v57 = vpop.f32.mrf.mxu1  ;;  %22506 = vst [vmem:[#allocation20_spill] sm:$0xff] %v17893_v27 }
 0x34f   : > { %v3982_v17 = vpop.f32.mrf.mxu0  ;;  %5487 = vmatmul.mubr.bf16.gmra.mxu0 %v17869_v16  ;;  %22505 = vst [vmem:[#allocation9_spill] sm:$0xff] %v17889_v56  ;;  %22508 = vst [vmem:[#allocation22_spill] sm:$0xff] %v17900_v14 }
 0x350   : > { %v3983_v6 = vadd.f32 %v3982_v17, %v17678_v40  ;;  %12994 = vmatprep.mubr.msk.bf16.mxu0 %vm1006_vm1, %v17871_v19  ;;  %v17887_v22 = vpop.f32.mrf.mxu1  ;;  %v17897_v19 = vpack.c.bf16 %v12792_v41, %v12788_v34  ;;  %v12847_v34 = vld [vmem:[%s15591_s14 + $0x968] sm:$0xff]  ;;  %v12796_v41 = vld [vmem:[%s15591_s14 + $0x7d0] sm:$0xff] }
 0x351   : > { %v14369_v57 = vpop.f32.mrf.mxu0 }
 0x352   : > { %4120 = vst.msk [vmem:[%s17134_s8 + $0x10] sm:$0xff] %vm4119_vm15, %v3983_v6  ;;  %v3858_v40 = vpop.f32.mrf.mxu1  ;;  %22507 = vst [vmem:[#allocation11_spill] sm:$0xff] %v17897_v19 }
 0x353   : > { %v3985_v17 = vpop.f32.mrf.mxu0  ;;  %v12800_v40 = vld [vmem:[%s15591_s14 + $0x7f0] sm:$0xff] }
 0x354   : > { %v3986_v16 = vadd.f32 %v3985_v17, %v17703_v36  ;;  %v17902_v28 = vpop.f32.mrf.mxu1  ;;  %5294 = vmatmul.mubr.bf16.gmra.mxu1 %v17889_v56  ;;  %v12843_v36 = vld [vmem:[%s15591_s14 + $0x948] sm:$0xff] }
 0x355   : > { %v14370_v57 = vpop.f32.mrf.mxu0  ;;  %5303 = vmatprep.mubr.bf16.mxu1 %v17893_v27  ;;  %v12809_v27 = vld [vmem:[%s15591_s14 + $0x838] sm:$0xff]  ;;  %v17924_v56 = vpack.c.bf16 %v12847_v34, %v12843_v36  ;;  %v12842_v36 = vld [vmem:[%s15591_s14 + $0x940] sm:$0xff] }
 0x356   : > { %4123 = vst.msk [vmem:[%s17134_s8 + $0x28] sm:$0xff] %vm4119_vm15, %v3986_v16  ;;  %v3863_v6 = vpop.f32.mrf.mxu1  ;;  %v17920_v57 = vpack.c.bf16 %v12838_v52, %v12834_v0  ;;  %v12846_v34 = vld [vmem:[%s15591_s14 + $0x960] sm:$0xff] }
 0x357   : > { %v3990_v10 = vpop.f32.mrf.mxu0  ;;  %5497 = vmatmul.mubr.bf16.gmra.mxu0 %v17897_v19  ;;  %v12805_v6 = vld [vmem:[%s15591_s14 + $0x818] sm:$0xff]  ;;  %22510 = vst [vmem:[#allocation24_spill] sm:$0xff] %v17924_v56 }
 0x358   : > { %v3991_v21 = vadd.f32 %v3990_v10, %v17725_v63  ;;  %12995 = vmatprep.mubr.msk.bf16.mxu0 %vm1006_vm1, %v17900_v14  ;;  %v17918_v17 = vpop.f32.mrf.mxu1  ;;  %22509 = vst [vmem:[#allocation13_spill] sm:$0xff] %v17920_v57  ;;  %v17928_v14 = vpack.c.bf16 %v12800_v40, %v12796_v41  ;;  %v17931_v0 = vpack.c.bf16 %v12809_v27, %v12805_v6  ;;  %v12855_v41 = vld [vmem:[%s15591_s14 + $0x9a8] sm:$0xff]  ;;  %v12804_v6 = vld [vmem:[%s15591_s14 + $0x810] sm:$0xff] }
 0x359   : > { %v14373_v16 = vpop.f32.mrf.mxu0 }
 0x35a   : > { %4126 = vst.msk [vmem:[%s17134_s8 + $0x40] sm:$0xff] %vm4119_vm15, %v3991_v21  ;;  %v3866_v63 = vpop.f32.mrf.mxu1  ;;  %22511 = vst [vmem:[#allocation15_spill] sm:$0xff] %v17928_v14 }
 0x35b   : > { %v3993_v10 = vpop.f32.mrf.mxu0  ;;  %22512 = vst [vmem:[#allocation26_spill] sm:$0xff] %v17931_v0  ;;  %v12808_v63 = vld [vmem:[%s15591_s14 + $0x830] sm:$0xff] }
 0x35c   : > { %v3994_v19 = vadd.f32 %v3993_v10, %v17746_v3  ;;  %v17933_v52 = vpop.f32.mrf.mxu1  ;;  %5304 = vmatmul.mubr.bf16.gmra.mxu1 %v17920_v57  ;;  %v12851_v3 = vld [vmem:[%s15591_s14 + $0x988] sm:$0xff] }
 0x35d   : > { %v14374_v16 = vpop.f32.mrf.mxu0  ;;  %5313 = vmatprep.mubr.bf16.mxu1 %v17924_v56  ;;  %v12817_v56 = vld [vmem:[%s15591_s14 + $0x878] sm:$0xff]  ;;  %v17955_v57 = vpack.c.bf16 %v12855_v41, %v12851_v3  ;;  %v12850_v3 = vld [vmem:[%s15591_s14 + $0x980] sm:$0xff] }
 0x35e   : > { %4129 = vst.msk [vmem:[%s17134_s8 + $0x58] sm:$0xff] %vm4119_vm15, %v3994_v19  ;;  %v3871_v21 = vpop.f32.mrf.mxu1  ;;  %v17951_v16 = vpack.c.bf16 %v12846_v34, %v12842_v36  ;;  %v12854_v41 = vld [vmem:[%s15591_s14 + $0x9a0] sm:$0xff] }
 0x35f   : > { %v3998_v27 = vpop.f32.mrf.mxu0  ;;  %5507 = vmatmul.mubr.bf16.gmra.mxu0 %v17928_v14  ;;  %v12813_v21 = vld [vmem:[%s15591_s14 + $0x858] sm:$0xff]  ;;  %22514 = vst [vmem:[#allocation28_spill] sm:$0xff] %v17955_v57 }
 0x360   : > { %v3999_v40 = vadd.f32 %v3998_v27, %v17769_v4  ;;  %12996 = vmatprep.mubr.msk.bf16.mxu0 %vm1006_vm1, %v17931_v0  ;;  %v17949_v10 = vpop.f32.mrf.mxu1  ;;  %22513 = vst [vmem:[#allocation17_spill] sm:$0xff] %v17951_v16  ;;  %v17959_v0 = vpack.c.bf16 %v12808_v63, %v12804_v6  ;;  %v17962_v36 = vpack.c.bf16 %v12817_v56, %v12813_v21  ;;  %v12863_v6 = vld [vmem:[%s15591_s14 + $0x9e8] sm:$0xff]  ;;  %v12812_v21 = vld [vmem:[%s15591_s14 + $0x850] sm:$0xff] }
 0x361   : > { %v14377_v19 = vpop.f32.mrf.mxu0 }
 0x362   : > { %4132 = vst.msk [vmem:[%s17134_s8 + $0x70] sm:$0xff] %vm4119_vm15, %v3999_v40  ;;  %v3874_v4 = vpop.f32.mrf.mxu1  ;;  %22515 = vst [vmem:[#allocation19_spill] sm:$0xff] %v17959_v0 }
 0x363   : > { %v4001_v27 = vpop.f32.mrf.mxu0  ;;  %22516 = vst [vmem:[#allocation30_spill] sm:$0xff] %v17962_v36  ;;  %v12816_v4 = vld [vmem:[%s15591_s14 + $0x870] sm:$0xff] }
 0x364   : > { %v4002_v14 = vadd.f32 %v4001_v27, %v17788_v5  ;;  %v17964_v34 = vpop.f32.mrf.mxu1  ;;  %5314 = vmatmul.mubr.bf16.gmra.mxu1 %v17951_v16  ;;  %v12859_v5 = vld [vmem:[%s15591_s14 + $0x9c8] sm:$0xff] }
 0x365   : > { %v14378_v19 = vpop.f32.mrf.mxu0  ;;  %5323 = vmatprep.mubr.bf16.mxu1 %v17955_v57  ;;  %v12825_v57 = vld [vmem:[%s15591_s14 + $0x8b8] sm:$0xff]  ;;  %v17986_v16 = vpack.c.bf16 %v12863_v6, %v12859_v5  ;;  %v12858_v5 = vld [vmem:[%s15591_s14 + $0x9c0] sm:$0xff] }
 0x366   : > { %4135 = vst.msk [vmem:[%s17134_s8 + $0x88] sm:$0xff] %vm4119_vm15, %v4002_v14  ;;  %v3879_v40 = vpop.f32.mrf.mxu1  ;;  %v17982_v19 = vpack.c.bf16 %v12854_v41, %v12850_v3  ;;  %v12862_v6 = vld [vmem:[%s15591_s14 + $0x9e0] sm:$0xff] }
 0x367   : > { %v4006_v56 = vpop.f32.mrf.mxu0  ;;  %5517 = vmatmul.mubr.bf16.gmra.mxu0 %v17959_v0  ;;  %v12821_v40 = vld [vmem:[%s15591_s14 + $0x898] sm:$0xff]  ;;  %22518 = vst [vmem:[#allocation32_spill] sm:$0xff] %v17986_v16 }
 0x368   : > { %v4007_v63 = vadd.f32 %v4006_v56, %v17808_v20  ;;  %12997 = vmatprep.mubr.msk.bf16.mxu0 %vm1006_vm1, %v17962_v36  ;;  %v17980_v27 = vpop.f32.mrf.mxu1  ;;  %22517 = vst [vmem:[#allocation21_spill] sm:$0xff] %v17982_v19  ;;  %v17990_v36 = vpack.c.bf16 %v12816_v4, %v12812_v21  ;;  %v17993_v3 = vpack.c.bf16 %v12825_v57, %v12821_v40  ;;  %v12871_v21 = vld [vmem:[%s15591_s14 + $0xa28] sm:$0xff]  ;;  %v12820_v40 = vld [vmem:[%s15591_s14 + $0x890] sm:$0xff] }
 0x369   : > { %v14381_v14 = vpop.f32.mrf.mxu0 }
 0x36a   : > { %4138 = vst.msk [vmem:[%s17134_s8 + $0xa0] sm:$0xff] %vm4119_vm15, %v4007_v63  ;;  %v3882_v20 = vpop.f32.mrf.mxu1  ;;  %22519 = vst [vmem:[#allocation23_spill] sm:$0xff] %v17990_v36 }
 0x36b   : > { %v4009_v56 = vpop.f32.mrf.mxu0  ;;  %22520 = vst [vmem:[#allocation25_spill] sm:$0xff] %v17993_v3  ;;  %v12824_v20 = vld [vmem:[%s15591_s14 + $0x8b0] sm:$0xff] }
 0x36c   : > { %v4010_v0 = vadd.f32 %v4009_v56, %v17828_v43  ;;  %v17995_v41 = vpop.f32.mrf.mxu1  ;;  %5324 = vmatmul.mubr.bf16.gmra.mxu1 %v17982_v19  ;;  %v12867_v43 = vld [vmem:[%s15591_s14 + $0xa08] sm:$0xff] }
 0x36d   : > { %v14382_v14 = vpop.f32.mrf.mxu0  ;;  %5333 = vmatprep.mubr.bf16.mxu1 %v17986_v16  ;;  %v12833_v16 = vld [vmem:[%s15591_s14 + $0x8f8] sm:$0xff]  ;;  %v18017_v19 = vpack.c.bf16 %v12871_v21, %v12867_v43  ;;  %v12866_v43 = vld [vmem:[%s15591_s14 + $0xa00] sm:$0xff] }
 0x36e   : > { %4141 = vst.msk [vmem:[%s17134_s8 + $0xb8] sm:$0xff] %vm4119_vm15, %v4010_v0  ;;  %v3887_v63 = vpop.f32.mrf.mxu1  ;;  %v18013_v14 = vpack.c.bf16 %v12862_v6, %v12858_v5  ;;  %v12870_v21 = vld [vmem:[%s15591_s14 + $0xa20] sm:$0xff] }
 0x36f   : > { %v4014_v57 = vpop.f32.mrf.mxu0  ;;  %5527 = vmatmul.mubr.bf16.gmra.mxu0 %v17990_v36  ;;  %v12829_v63 = vld [vmem:[%s15591_s14 + $0x8d8] sm:$0xff]  ;;  %22522 = vst [vmem:[#allocation29_spill] sm:$0xff] %v18017_v19 }
 0x370   : > { %v4015_v4 = vadd.f32 %v4014_v57, %v17844_v47  ;;  %12998 = vmatprep.mubr.msk.bf16.mxu0 %vm1006_vm1, %v17993_v3  ;;  %v18011_v56 = vpop.f32.mrf.mxu1  ;;  %22521 = vst [vmem:[#allocation27_spill] sm:$0xff] %v18013_v14  ;;  %v18021_v3 = vpack.c.bf16 %v12824_v20, %v12820_v40  ;;  %v18024_v5 = vpack.c.bf16 %v12833_v16, %v12829_v63  ;;  %v12879_v40 = vld [vmem:[%s15591_s14 + $0xa68] sm:$0xff]  ;;  %v12828_v63 = vld [vmem:[%s15591_s14 + $0x8d0] sm:$0xff] }
 0x371   : > { %v14385_v0 = vpop.f32.mrf.mxu0 }
 0x372   : > { %4144 = vst.msk [vmem:[%s17134_s8 + $0xd0] sm:$0xff] %vm4119_vm15, %v4015_v4  ;;  %v3890_v47 = vpop.f32.mrf.mxu1  ;;  %22523 = vst [vmem:[#allocation31_spill] sm:$0xff] %v18021_v3 }
 0x373   : > { %v4017_v57 = vpop.f32.mrf.mxu0  ;;  %22524 = vst [vmem:[#allocation33_spill] sm:$0xff] %v18024_v5  ;;  %v12832_v47 = vld [vmem:[%s15591_s14 + $0x8f0] sm:$0xff] }
 0x374   : > { %v4018_v36 = vadd.f32 %v4017_v57, %v17861_v58  ;;  %v18026_v6 = vpop.f32.mrf.mxu1  ;;  %5334 = vmatmul.mubr.bf16.gmra.mxu1 %v18013_v14  ;;  %v12875_v58 = vld [vmem:[%s15591_s14 + $0xa48] sm:$0xff] }
 0x375   : > { %v14386_v0 = vpop.f32.mrf.mxu0  ;;  %5343 = vmatprep.mubr.bf16.mxu1 %v18017_v19  ;;  %v12841_v19 = vld [vmem:[%s15591_s14 + $0x938] sm:$0xff]  ;;  %v18048_v14 = vpack.c.bf16 %v12879_v40, %v12875_v58  ;;  %v12874_v58 = vld [vmem:[%s15591_s14 + $0xa40] sm:$0xff] }
 0x376   : > { %4147 = vst.msk [vmem:[%s17134_s8 + $0xe8] sm:$0xff] %vm4119_vm15, %v4018_v36  ;;  %v3895_v4 = vpop.f32.mrf.mxu1  ;;  %v18044_v0 = vpack.c.bf16 %v12870_v21, %v12866_v43  ;;  %v12878_v40 = vld [vmem:[%s15591_s14 + $0xa60] sm:$0xff] }
 0x377   : > { %v4022_v16 = vpop.f32.mrf.mxu0  ;;  %5537 = vmatmul.mubr.bf16.gmra.mxu0 %v18021_v3  ;;  %v12837_v4 = vld [vmem:[%s15591_s14 + $0x918] sm:$0xff]  ;;  %22526 = vst [vmem:[#allocation35_spill] sm:$0xff] %v18048_v14 }
 0x378   : > { %v4023_v20 = vadd.f32 %v4022_v16, %v17873_v48  ;;  %12999 = vmatprep.mubr.msk.bf16.mxu0 %vm1006_vm1, %v18024_v5  ;;  %v18042_v57 = vpop.f32.mrf.mxu1  ;;  %22525 = vst [vmem:[#allocation34_spill] sm:$0xff] %v18044_v0  ;;  %v18052_v5 = vpack.c.bf16 %v12832_v47, %v12828_v63  ;;  %v18055_v43 = vpack.c.bf16 %v12841_v19, %v12837_v4  ;;  %v12887_v63 = vld [vmem:[%s15591_s14 + $0xaa8] sm:$0xff]  ;;  %v12836_v4 = vld [vmem:[%s15591_s14 + $0x910] sm:$0xff] }
 0x379   : > { %v14389_v36 = vpop.f32.mrf.mxu0 }
 0x37a   : > { %4150 = vst.msk [vmem:[%s17134_s8 + $0x100] sm:$0xff] %vm4119_vm15, %v4023_v20  ;;  %v3898_v48 = vpop.f32.mrf.mxu1  ;;  %22527 = vst [vmem:[#allocation36_spill] sm:$0xff] %v18052_v5 }
 0x37b   : > { %v4025_v16 = vpop.f32.mrf.mxu0  ;;  %22528 = vst [vmem:[#allocation37_spill] sm:$0xff] %v18055_v43  ;;  %v12840_v48 = vld [vmem:[%s15591_s14 + $0x930] sm:$0xff] }
 0x37c   : > { %v4026_v3 = vadd.f32 %v4025_v16, %v17887_v22  ;;  %v18057_v21 = vpop.f32.mrf.mxu1  ;;  %5344 = vmatmul.mubr.bf16.gmra.mxu1 %v18044_v0  ;;  %v12883_v22 = vld [vmem:[%s15591_s14 + $0xa88] sm:$0xff] }
 0x37d   : > { %v14390_v36 = vpop.f32.mrf.mxu0  ;;  %5353 = vmatprep.mubr.bf16.mxu1 %v18048_v14  ;;  %v12849_v14 = vld [vmem:[%s15591_s14 + $0x978] sm:$0xff]  ;;  %v18079_v0 = vpack.c.bf16 %v12887_v63, %v12883_v22  ;;  %v12882_v22 = vld [vmem:[%s15591_s14 + $0xa80] sm:$0xff] }
 0x37e   : > { %4153 = vst.msk [vmem:[%s17134_s8 + $0x118] sm:$0xff] %vm4119_vm15, %v4026_v3  ;;  %v3903_v20 = vpop.f32.mrf.mxu1  ;;  %v18075_v36 = vpack.c.bf16 %v12878_v40, %v12874_v58  ;;  %v12886_v63 = vld [vmem:[%s15591_s14 + $0xaa0] sm:$0xff] }
 0x37f   : > { %v4030_v19 = vpop.f32.mrf.mxu0  ;;  %5547 = vmatmul.mubr.bf16.gmra.mxu0 %v18052_v5  ;;  %v12845_v20 = vld [vmem:[%s15591_s14 + $0x958] sm:$0xff]  ;;  %22530 = vst [vmem:[#allocation39_spill] sm:$0xff] %v18079_v0 }
 0x380   : > { %v4031_v47 = vadd.f32 %v4030_v19, %v17902_v28  ;;  %13000 = vmatprep.mubr.msk.bf16.mxu0 %vm1006_vm1, %v18055_v43  ;;  %v18073_v16 = vpop.f32.mrf.mxu1  ;;  %22529 = vst [vmem:[#allocation38_spill] sm:$0xff] %v18075_v36  ;;  %v18083_v43 = vpack.c.bf16 %v12840_v48, %v12836_v4  ;;  %v18086_v58 = vpack.c.bf16 %v12849_v14, %v12845_v20  ;;  %v12895_v4 = vld [vmem:[%s15591_s14 + $0xae8] sm:$0x1]  ;;  %v12844_v20 = vld [vmem:[%s15591_s14 + $0x950] sm:$0xff] }
 0x381   : > { %v14393_v3 = vpop.f32.mrf.mxu0 }
 0x382   : > { %4156 = vst.msk [vmem:[%s17134_s8 + $0x130] sm:$0xff] %vm4119_vm15, %v4031_v47  ;;  %v3906_v28 = vpop.f32.mrf.mxu1  ;;  %22531 = vst [vmem:[#allocation40_spill] sm:$0xff] %v18083_v43 }
 0x383   : > { %v4033_v19 = vpop.f32.mrf.mxu0  ;;  %22532 = vst [vmem:[#allocation41_spill] sm:$0xff] %v18086_v58  ;;  %v12848_v28 = vld [vmem:[%s15591_s14 + $0x970] sm:$0xff] }
 0x384   : > { %v4034_v5 = vadd.f32 %v4033_v19, %v17918_v17  ;;  %v18088_v40 = vpop.f32.mrf.mxu1  ;;  %5354 = vmatmul.mubr.bf16.gmra.mxu1 %v18075_v36  ;;  %v12891_v17 = vld [vmem:[%s15591_s14 + $0xac8] sm:$0xff] }
 0x385   : > { %v14394_v3 = vpop.f32.mrf.mxu0  ;;  %5363 = vmatprep.mubr.bf16.mxu1 %v18079_v0  ;;  %v12857_v0 = vld [vmem:[%s15591_s14 + $0x9b8] sm:$0xff]  ;;  %v18110_v36 = vpack.c.bf16 %v12895_v4, %v12891_v17  ;;  %v12890_v17 = vld [vmem:[%s15591_s14 + $0xac0] sm:$0xff] }
 0x386   : > { %4159 = vst.msk [vmem:[%s17134_s8 + $0x148] sm:$0xff] %vm4119_vm15, %v4034_v5  ;;  %v3911_v47 = vpop.f32.mrf.mxu1  ;;  %v18106_v3 = vpack.c.bf16 %v12886_v63, %v12882_v22  ;;  %v12894_v4 = vld [vmem:[%s15591_s14 + $0xae0] sm:$0x1] }
 0x387   : > { %v4038_v14 = vpop.f32.mrf.mxu0  ;;  %5557 = vmatmul.mubr.bf16.gmra.mxu0 %v18083_v43  ;;  %v12853_v47 = vld [vmem:[%s15591_s14 + $0x998] sm:$0xff]  ;;  %22534 = vst [vmem:[#allocation43_spill] sm:$0xff] %v18110_v36 }
 0x388   : > { %v4039_v48 = vadd.f32 %v4038_v14, %v17933_v52  ;;  %13001 = vmatprep.mubr.msk.bf16.mxu0 %vm1006_vm1, %v18086_v58  ;;  %v18104_v19 = vpop.f32.mrf.mxu1  ;;  %22533 = vst [vmem:[#allocation42_spill] sm:$0xff] %v18106_v3  ;;  %v18114_v58 = vpack.c.bf16 %v12848_v28, %v12844_v20  ;;  %v18117_v45 = vpack.c.bf16 %v12857_v0, %v12853_v47  ;;  %v12852_v0 = vld [vmem:[%s15591_s14 + $0x990] sm:$0xff] }
 0x389   : > { %v14397_v5 = vpop.f32.mrf.mxu0  ;;  %v12856_v28 = vld [vmem:[%s15591_s14 + $0x9b0] sm:$0xff]  ;;  %v18135_v47 = vpack.c.bf16 %v12894_v4, %v12890_v17 }
 0x38a   : > { %4162 = vst.msk [vmem:[%s17134_s8 + $0x160] sm:$0xff] %vm4119_vm15, %v4039_v48  ;;  %v3914_v52 = vpop.f32.mrf.mxu1  ;;  %22535 = vst [vmem:[#allocation44_spill] sm:$0xff] %v18114_v58 }
 0x38b   : > { %v4041_v14 = vpop.f32.mrf.mxu0  ;;  %22536 = vst [vmem:[#allocation45_spill] sm:$0xff] %v18117_v45  ;;  %22537 = vst [vmem:[#allocation46_spill] sm:$0xff] %v18135_v47 }
 0x38c   : > { %v4042_v43 = vadd.f32 %v4041_v14, %v17949_v10  ;;  %v18119_v22 = vpop.f32.mrf.mxu1  ;;  %5364 = vmatmul.mubr.bf16.gmra.mxu1 %v18106_v3  ;;  %v12861_v14 = vld [vmem:[%s15591_s14 + $0x9d8] sm:$0xff] }
 0x38d   : > { %v14398_v63 = vpop.f32.mrf.mxu0  ;;  %5373 = vmatprep.mubr.bf16.mxu1 %v18110_v36  ;;  %v22568_v36 = vld [vmem:[#allocation28_spill] sm:$0xff] }
 0x38e   : > { %4165 = vst.msk [vmem:[%s17134_s8 + $0x178] sm:$0xff] %vm4119_vm15, %v4042_v43  ;;  %v3919_v48 = vpop.f32.mrf.mxu1  ;;  %v12865_v63 = vld [vmem:[%s15591_s14 + $0x9f8] sm:$0xff] }
 0x38f   : > { %v4046_v20 = vpop.f32.mrf.mxu0  ;;  %5567 = vmatmul.mubr.bf16.gmra.mxu0 %v18114_v58 }
 0x390   : > { %v4047_v10 = vadd.f32 %v4046_v20, %v17964_v34  ;;  %13002 = vmatprep.mubr.msk.bf16.mxu0 %vm1006_vm1, %v18117_v45  ;;  %v18133_v5 = vpop.f32.mrf.mxu1  ;;  %v18141_v34 = vpack.c.bf16 %v12856_v28, %v12852_v0  ;;  %v18144_v45 = vpack.c.bf16 %v12865_v63, %v12861_v14  ;;  %v12860_v0 = vld [vmem:[%s15591_s14 + $0x9d0] sm:$0xff]  ;;  %v12869_v63 = vld [vmem:[%s15591_s14 + $0xa18] sm:$0xff] }
 0x391   : > { %v14401_v52 = vpop.f32.mrf.mxu0  ;;  %v12864_v28 = vld [vmem:[%s15591_s14 + $0x9f0] sm:$0xff] }
 0x392   : > { %4168 = vst.msk [vmem:[%s17134_s8 + $0x190] sm:$0xff] %vm4119_vm15, %v4047_v10  ;;  %v3922_v43 = vpop.f32.mrf.mxu1  ;;  %22538 = vst [vmem:[#allocation47_spill] sm:$0xff] %v18141_v34 }
 0x393   : > { %v4049_v48 = vpop.f32.mrf.mxu0  ;;  %22539 = vst [vmem:[#allocation48_spill] sm:$0xff] %v18144_v45  ;;  %v12873_v43 = vld [vmem:[%s15591_s14 + $0xa38] sm:$0xff] }
 0x394   : > { %v4050_v20 = vadd.f32 %v4049_v48, %v17980_v27  ;;  %v18146_v58 = vpop.f32.mrf.mxu1  ;;  %5374 = vmatmul.mubr.bf16.gmra.mxu1 %v18135_v47 }
 0x395   : > { %v14402_v17 = vpop.f32.mrf.mxu0  ;;  %5669 = vmatprep.mubr.bf16.mxu1 %v17383_v46 }
 0x396   : > { %4171 = vst.msk [vmem:[%s17134_s8 + $0x1a8] sm:$0xff] %vm4119_vm15, %v4050_v20  ;;  %v3927_v4 = vpop.f32.mrf.mxu1  ;;  %v18164_v20 = vpack.c.bf16 %v12864_v28, %v12860_v0  ;;  %v18167_v17 = vpack.c.bf16 %v12873_v43, %v12869_v63  ;;  %v12868_v0 = vld [vmem:[%s15591_s14 + $0xa10] sm:$0xff]  ;;  %v12877_v43 = vld [vmem:[%s15591_s14 + $0xa58] sm:$0xff] }
 0x397   : > { %v4054_v10 = vpop.f32.mrf.mxu0  ;;  %5577 = vmatmul.mubr.bf16.gmra.mxu0 %v18141_v34  ;;  %v12872_v28 = vld [vmem:[%s15591_s14 + $0xa30] sm:$0xff] }
 0x398   : > { %v4055_v27 = vadd.f32 %v4054_v10, %v17995_v41  ;;  %13003 = vmatprep.mubr.msk.bf16.mxu0 %vm1006_vm1, %v18144_v45  ;;  %v18158_v52 = vpop.f32.mrf.mxu1  ;;  %22540 = vst [vmem:[#allocation49_spill] sm:$0xff] %v18164_v20  ;;  %22541 = vst [vmem:[#allocation50_spill] sm:$0xff] %v18167_v17 }
 0x399   : > { %v14405_v14 = vpop.f32.mrf.mxu0 }
 0x39a   : > { %4174 = vst.msk [vmem:[%s17134_s8 + $0x1c0] sm:$0xff] %vm4119_vm15, %v4055_v27  ;;  %v3930_v46 = vpop.f32.mrf.mxu1 }
 0x39b   : > { %v4057_v48 = vpop.f32.mrf.mxu0  ;;  %v12881_v46 = vld [vmem:[%s15591_s14 + $0xa78] sm:$0xff] }
 0x39c   : > { %v4058_v41 = vadd.f32 %v4057_v48, %v18011_v56  ;;  %v18169_v4 = vpop.f32.mrf.mxu1  ;;  %5670 = vmatmul.mubr.bf16.vlgmr.msra.gmra.mxu1 %v17407_v33 }
 0x39d   : > { %v14406_v10 = vpop.f32.mrf.mxu0  ;;  %5677 = vmatprep.mubr.bf16.mxu1 %v17411_v23 }
 0x39e   : > { %4177 = vst.msk [vmem:[%s17134_s8 + $0x1d8] sm:$0xff] %vm4119_vm15, %v4058_v41  ;;  %v3935_v27 = vpop.f32.mrf.mxu1  ;;  %v18187_v41 = vpack.c.bf16 %v12872_v28, %v12868_v0  ;;  %v18190_v10 = vpack.c.bf16 %v12881_v46, %v12877_v43  ;;  %v12876_v0 = vld [vmem:[%s15591_s14 + $0xa50] sm:$0xff]  ;;  %v12885_v46 = vld [vmem:[%s15591_s14 + $0xa98] sm:$0xff] }
 0x39f   : > { %v4062_v14 = vpop.f32.mrf.mxu0  ;;  %5587 = vmatmul.mubr.bf16.gmra.mxu0 %v18164_v20  ;;  %v12880_v28 = vld [vmem:[%s15591_s14 + $0xa70] sm:$0xff]  ;;  %v22562_v20 = vld [vmem:[#allocation24_spill] sm:$0xff] }
 0x3a0   : > { %v4063_v56 = vadd.f32 %v4062_v14, %v18026_v6  ;;  %13004 = vmatprep.mubr.msk.bf16.mxu0 %vm1006_vm1, %v18167_v17  ;;  %v18181_v63 = vpop.f32.mrf.mxu1  ;;  %22542 = vst [vmem:[#allocation51_spill] sm:$0xff] %v18187_v41  ;;  %22543 = vst [vmem:[#allocation52_spill] sm:$0xff] %v18190_v10 }
 0x3a1   : > { %v14409_v33 = vpop.f32.mrf.mxu0 }
 0x3a2   : > { %4180 = vst.msk [vmem:[%s17134_s8 + $0x1f0] sm:$0xff] %vm4119_vm15, %v4063_v56  ;;  %v3938_v23 = vpop.f32.mrf.mxu1 }
 0x3a3   : > { %v4065_v48 = vpop.f32.mrf.mxu0  ;;  %v12889_v23 = vld [vmem:[%s15591_s14 + $0xab8] sm:$0xff] }
 0x3a4   : > { %v4066_v6 = vadd.f32 %v4065_v48, %v18042_v57  ;;  %v18192_v27 = vpop.f32.mrf.mxu1  ;;  %5678 = vmatmul.mubr.bf16.gmra.mxu1 %v17433_v29 }
 0x3a5   : > { %v14410_v14 = vpop.f32.mrf.mxu0  ;;  %5685 = vmatprep.mubr.bf16.mxu1 %v17437_v37 }
 0x3a6   : > { %4183 = vst.msk [vmem:[%s17134_s8 + $0x208] sm:$0xff] %vm4119_vm15, %v4066_v6  ;;  %v3943_v56 = vpop.f32.mrf.mxu1  ;;  %v18210_v6 = vpack.c.bf16 %v12880_v28, %v12876_v0  ;;  %v18213_v14 = vpack.c.bf16 %v12889_v23, %v12885_v46  ;;  %v12884_v28 = vld [vmem:[%s15591_s14 + $0xa90] sm:$0xff]  ;;  %v12893_v23 = vld [vmem:[%s15591_s14 + $0xad8] sm:$0xff] }
 0x3a7   : > { %v4070_v33 = vpop.f32.mrf.mxu0  ;;  %5597 = vmatmul.mubr.bf16.gmra.mxu0 %v18187_v41 }
 0x3a8   : > { %v4071_v57 = vadd.f32 %v4070_v33, %v18057_v21  ;;  %13005 = vmatprep.mubr.msk.bf16.mxu0 %vm1006_vm1, %v18190_v10  ;;  %v18204_v43 = vpop.f32.mrf.mxu1  ;;  %22544 = vst [vmem:[#allocation53_spill] sm:$0xff] %v18210_v6  ;;  %22545 = vst [vmem:[#allocation54_spill] sm:$0xff] %v18213_v14 }
 0x3a9   : > { %v14413_v29 = vpop.f32.mrf.mxu0 }
 0x3aa   : > { %4186 = vst.msk [vmem:[%s17134_s8 + $0x220] sm:$0xff] %vm4119_vm15, %v4071_v57  ;;  %v3946_v37 = vpop.f32.mrf.mxu1  ;;  %v12888_v29 = vld [vmem:[%s15591_s14 + $0xab0] sm:$0xff] }
 0x3ab   : > { %v4073_v48 = vpop.f32.mrf.mxu0 }
 0x3ac   : > { %v4074_v21 = vadd.f32 %v4073_v48, %v18073_v16  ;;  %v18215_v56 = vpop.f32.mrf.mxu1  ;;  %5686 = vmatmul.mubr.bf16.gmra.mxu1 %v17459_v9 }
 0x3ad   : > { %v14414_v33 = vpop.f32.mrf.mxu0  ;;  %5693 = vmatprep.mubr.bf16.mxu1 %v17463_v12  ;;  %v12897_v12 = vld [vmem:[%s15591_s14 + $0xaf8] sm:$0x1] }
 0x3ae   : > { %4189 = vst.msk [vmem:[%s17134_s8 + $0x238] sm:$0xff] %vm4119_vm15, %v4074_v21  ;;  %v18221_v57 = vpop.f32.mrf.mxu1  ;;  %v18237_v21 = vpack.c.bf16 %v12888_v29, %v12884_v28  ;;  %v18240_v33 = vpack.c.bf16 %v12897_v12, %v12893_v23  ;;  %v12892_v28 = vld [vmem:[%s15591_s14 + $0xad0] sm:$0xff] }
 0x3af   : > { %v4078_v0 = vpop.f32.mrf.mxu0  ;;  %5607 = vmatmul.mubr.bf16.gmra.mxu0 %v18210_v6  ;;  %v12896_v29 = vld [vmem:[%s15591_s14 + $0xaf0] sm:$0x1] }
 0x3b0   : > { %v4079_v16 = vadd.f32 %v4078_v0, %v18088_v40  ;;  %13006 = vmatprep.mubr.msk.bf16.mxu0 %vm1006_vm1, %v18213_v14  ;;  %v18229_v46 = vpop.f32.mrf.mxu1  ;;  %22546 = vst [vmem:[#allocation55_spill] sm:$0xff] %v18237_v21  ;;  %22547 = vst [vmem:[#allocation56_spill] sm:$0xff] %v18240_v33 }
 0x3b1   : > { %v14417_v9 = vpop.f32.mrf.mxu0 }
 0x3b2   : > { %4192 = vst.msk [vmem:[%s17134_s8 + $0x250] sm:$0xff] %vm4119_vm15, %v4079_v16  ;;  %v18235_v37 = vpop.f32.mrf.mxu1 }
 0x3b3   : > { %v4081_v48 = vpop.f32.mrf.mxu0 }
 0x3b4   : > { %v4082_v40 = vadd.f32 %v4081_v48, %v18104_v19  ;;  %v18242_v0 = vpop.f32.mrf.mxu1  ;;  %5694 = vmatmul.mubr.bf16.gmra.mxu1 %v17485_v26  ;;  %v18262_v48 = vpack.c.bf16 %v12896_v29, %v12892_v28 }
 0x3b5   : > { %v14418_v9 = vpop.f32.mrf.mxu0  ;;  %5701 = vmatprep.mubr.bf16.mxu1 %v17492_v13 }
 0x3b6   : > { %4195 = vst.msk [vmem:[%s17134_s8 + $0x268] sm:$0xff] %vm4119_vm15, %v4082_v40  ;;  %v18248_v16 = vpop.f32.mrf.mxu1  ;;  %22548 = vst [vmem:[#allocation57_spill] sm:$0xff] %v18262_v48 }
 0x3b7   : > { %v4086_v14 = vpop.f32.mrf.mxu0  ;;  %5617 = vmatmul.mubr.bf16.gmra.mxu0 %v18237_v21  ;;  %v22558_v21 = vld [vmem:[#allocation20_spill] sm:$0xff] }
 0x3b8   : > { %v4087_v19 = vadd.f32 %v4086_v14, %v18119_v22  ;;  %13007 = vmatprep.mubr.msk.bf16.mxu0 %vm1006_vm1, %v18240_v33  ;;  %v18256_v23 = vpop.f32.mrf.mxu1 }
 0x3b9   : > { %v14421_v26 = vpop.f32.mrf.mxu0 }
 0x3ba   : > { %4198 = vst.msk [vmem:[%s17134_s8 + $0x280] sm:$0xff] %vm4119_vm15, %v4087_v19  ;;  %v18260_v13 = vpop.f32.mrf.mxu1 }
 0x3bb   : > { %v4089_v12 = vpop.f32.mrf.mxu0 }
 0x3bc   : > { %v4090_v40 = vadd.f32 %v4089_v12, %v18133_v5  ;;  %v18265_v9 = vpop.f32.mrf.mxu1  ;;  %5702 = vmatmul.mubr.bf16.gmra.mxu1 %v17521_v44 }
 0x3bd   : > { %v14422_v22 = vpop.f32.mrf.mxu0  ;;  %5709 = vmatprep.mubr.bf16.mxu1 %v17530_v42 }
 0x3be   : > { %4201 = vst.msk [vmem:[%s17134_s8 + $0x298] sm:$0xff] %vm4119_vm15, %v4090_v40  ;;  %v18271_v14 = vpop.f32.mrf.mxu1 }
 0x3bf   : > { %v4094_v19 = vpop.f32.mrf.mxu0  ;;  %5627 = vmatmul.mubr.bf16.gmra.mxu0 %v18262_v48 }
 0x3c0   : > { %v4095_v28 = vadd.f32 %v4094_v19, %v18146_v58  ;;  %13008 = vmatprep.mubr.msk.bf16.mxu0 %vm1006_vm1, %v17535_v1  ;;  %v18277_v5 = vpop.f32.mrf.mxu1 }
 0x3c1   : > { %v14425_v29 = vpop.f32.mrf.mxu0 }
 0x3c2   : > { %4204 = vst.msk [vmem:[%s17134_s8 + $0x2b0] sm:$0xff] %vm4119_vm15, %v4095_v28  ;;  %v18281_v44 = vpop.f32.mrf.mxu1 }
 0x3c3   : > { %v4097_v42 = vpop.f32.mrf.mxu0 }
 0x3c4   : > { %v4098_v26 = vadd.f32 %v4097_v42, %v18158_v52  ;;  %v18284_v12 = vpop.f32.mrf.mxu1  ;;  %5710 = vmatmul.mubr.bf16.gmra.mxu1 %v17563_v7 }
 0x3c5   : > { %v14426_v40 = vpop.f32.mrf.mxu0  ;;  %5717 = vmatprep.mubr.bf16.mxu1 %v17572_v2 }
 0x3c6   : > { %4207 = vst.msk [vmem:[%s17134_s8 + $0x2c8] sm:$0xff] %vm4119_vm15, %v4098_v26  ;;  %v18290_v1 = vpop.f32.mrf.mxu1 }
 0x3c7   : > { %v4102_v58 = vpop.f32.mrf.mxu0  ;;  %5879 = vmatmul.mubr.bf16.vlgmr.msra.gmra.mxu0 %v17576_v24 }
 0x3c8   : > { %v4103_v22 = vadd.f32 %v4102_v58, %v18169_v4  ;;  %13009 = vmatprep.mubr.msk.bf16.mxu0 %vm1006_vm1, %v17579_v8  ;;  %v18296_v52 = vpop.f32.mrf.mxu1 }
 0x3c9   : > { %v14429_v19 = vpop.f32.mrf.mxu0 }
 0x3ca   : > { %4210 = vst.msk [vmem:[%s17134_s8 + $0x2e0] sm:$0xff] %vm4119_vm15, %v4103_v22  ;;  %v18300_v7 = vpop.f32.mrf.mxu1 }
 0x3cb   : > { %v4105_v2 = vpop.f32.mrf.mxu0 }
 0x3cc   : > { %v4106_v28 = vadd.f32 %v4105_v2, %v18181_v63  ;;  %v18303_v29 = vpop.f32.mrf.mxu1  ;;  %5718 = vmatmul.mubr.bf16.gmra.mxu1 %v17607_v59 }
 0x3cd   : > { %v14430_v24 = vpop.f32.mrf.mxu0  ;;  %5725 = vmatprep.mubr.bf16.mxu1 %v17619_v38 }
 0x3ce   : > { %4213 = vst.msk [vmem:[%s17134_s8 + $0x2f8] sm:$0xff] %vm4119_vm15, %v4106_v28  ;;  %v18309_v8 = vpop.f32.mrf.mxu1 }
 0x3cf   : > { %v4110_v4 = vpop.f32.mrf.mxu0  ;;  %5887 = vmatmul.mubr.bf16.gmra.mxu0 %v17624_v54 }
 0x3d0   : > { %v4111_v42 = vadd.f32 %v4110_v4, %v18192_v27  ;;  %13010 = vmatprep.mubr.msk.bf16.mxu0 %vm1006_vm1, %v17627_v31  ;;  %v18315_v63 = vpop.f32.mrf.mxu1 }
 0x3d1   : > { %v14433_v26 = vpop.f32.mrf.mxu0 }
 0x3d2   : > { %4216 = vst.msk [vmem:[%s17134_s8 + $0x310] sm:$0xff] %vm4119_vm15, %v4111_v42  ;;  %v18319_v59 = vpop.f32.mrf.mxu1 }
 0x3d3   : > { %v4113_v38 = vpop.f32.mrf.mxu0 }
 0x3d4   : > { %v4114_v40 = vadd.f32 %v4113_v38, %v18204_v43  ;;  %v18322_v58 = vpop.f32.mrf.mxu1  ;;  %5726 = vmatmul.mubr.bf16.gmra.mxu1 %v17656_v51 }
 0x3d5   : > { %v14434_v54 = vpop.f32.mrf.mxu0  ;;  %5733 = vmatprep.mubr.bf16.mxu1 %v17666_v62 }
 0x3d6   : > { %4220 = vst.msk [vmem:[%s17134_s8 + $0x328] sm:$0x3f] %vm4219_vm2, %v4114_v40  ;;  %v18328_v31 = vpop.f32.mrf.mxu1 }
 0x3d7   : > { %v5418_v27 = vpop.f32.mrf.mxu0  ;;  %5895 = vmatmul.mubr.bf16.gmra.mxu0 %v17671_v60 }
 0x3d8   : > { %13011 = vmatprep.mubr.msk.bf16.mxu0 %vm1006_vm1, %v17674_v49  ;;  %v18333_v22 = vpop.f32.mrf.mxu1  ;;  %v18336_v19 = vadd.f32 %v5418_v27, %v18215_v56 }
 0x3d9   : > { %v5420_v43 = vpop.f32.mrf.mxu0 }
 0x3da   : > { %v18339_v51 = vadd.f32 %v5420_v43, %v18221_v57  ;;  %v18341_v62 = vpop.f32.mrf.mxu1 }
 0x3db   : > { %v5422_v2 = vpop.f32.mrf.mxu0 }
 0x3dc   : > { %v18343_v28 = vpop.f32.mrf.mxu1  ;;  %5734 = vmatmul.mubr.bf16.gmra.mxu1 %v17705_v53  ;;  %v18348_v49 = vadd.f32 %v5422_v2, %v18229_v46 }
 0x3dd   : > { %v5424_v60 = vpop.f32.mrf.mxu0  ;;  %5741 = vmatprep.mubr.bf16.mxu1 %v17715_v15 }
 0x3de   : > { %v18351_v24 = vadd.f32 %v5424_v60, %v18235_v37  ;;  %v18353_v56 = vpop.f32.mrf.mxu1 }
 0x3df   : > { %v5428_v57 = vpop.f32.mrf.mxu0  ;;  %5903 = vmatmul.mubr.bf16.gmra.mxu0 %v17719_v32 }
 0x3e0   : > { %13012 = vmatprep.mubr.msk.bf16.mxu0 %vm1006_vm1, %v17722_v18  ;;  %v18358_v4 = vpop.f32.mrf.mxu1  ;;  %v18361_v42 = vadd.f32 %v5428_v57, %v18242_v0 }
 0x3e1   : > { %v5430_v53 = vpop.f32.mrf.mxu0 }
 0x3e2   : > { %v18364_v15 = vadd.f32 %v5430_v53, %v18248_v16  ;;  %v18366_v46 = vpop.f32.mrf.mxu1 }
 0x3e3   : > { %v5432_v26 = vpop.f32.mrf.mxu0 }
 0x3e4   : > { %v18372_v38 = vpop.f32.mrf.mxu1  ;;  %5742 = vmatmul.mubr.bf16.gmra.mxu1 %v17748_v55  ;;  %v18377_v0 = vadd.f32 %v5432_v26, %v18256_v23 }
 0x3e5   : > { %v5434_v18 = vpop.f32.mrf.mxu0  ;;  %5749 = vmatprep.mubr.bf16.mxu1 %v17758_v25 }
 0x3e6   : > { %v18380_v16 = vadd.f32 %v5434_v18, %v18260_v13  ;;  %v18382_v40 = vpop.f32.mrf.mxu1  ;;  %v22554_v13 = vld [vmem:[#allocation16_spill] sm:$0xff] }
 0x3e7   : > { %v5438_v54 = vpop.f32.mrf.mxu0  ;;  %5911 = vmatmul.mubr.bf16.gmra.mxu0 %v17764_v35 }
 0x3e8   : > { %13013 = vmatprep.mubr.msk.bf16.mxu0 %vm1006_vm1, %v17767_v61  ;;  %v18387_v27 = vpop.f32.mrf.mxu1  ;;  %v18390_v43 = vadd.f32 %v5438_v54, %v18265_v9 }
 0x3e9   : > { %v5440_v55 = vpop.f32.mrf.mxu0 }
 0x3ea   : > { %v18393_v25 = vadd.f32 %v5440_v55, %v18271_v14  ;;  %v18395_v23 = vpop.f32.mrf.mxu1  ;;  %v22549_v55 = vld [vmem:[#allocation4_spill] sm:$0xff] }
 0x3eb   : > { %v5442_v2 = vpop.f32.mrf.mxu0 }
 0x3ec   : > { %v18401_v60 = vpop.f32.mrf.mxu1  ;;  %5750 = vmatmul.mubr.bf16.gmra.mxu1 %v17790_v30  ;;  %v18406_v9 = vadd.f32 %v5442_v2, %v18277_v5  ;;  %v22550_v2 = vld [vmem:[#allocation12_spill] sm:$0xff] }
 0x3ed   : > { %v5444_v61 = vpop.f32.mrf.mxu0  ;;  %5757 = vmatprep.mubr.bf16.mxu1 %v17800_v39 }
 0x3ee   : > { %v18409_v14 = vadd.f32 %v5444_v61, %v18281_v44  ;;  %v18411_v57 = vpop.f32.mrf.mxu1 }
 0x3ef   : > { %v5448_v53 = vpop.f32.mrf.mxu0  ;;  %5919 = vmatmul.mubr.bf16.gmra.mxu0 %v17803_v50 }
 0x3f0   : > { %13014 = vmatprep.mubr.msk.bf16.mxu0 %vm1006_vm1, %v17806_v11  ;;  %v18416_v26 = vpop.f32.mrf.mxu1  ;;  %v18419_v18 = vadd.f32 %v5448_v53, %v18284_v12  ;;  %v22551_v53 = vld [vmem:[#allocation5_spill] sm:$0xff] }
 0x3f1   : > { %v5450_v30 = vpop.f32.mrf.mxu0 }
 0x3f2   : > { %v18422_v39 = vadd.f32 %v5450_v30, %v18290_v1  ;;  %v18424_v5 = vpop.f32.mrf.mxu1  ;;  %v22552_v30 = vld [vmem:[#allocation14_spill] sm:$0xff] }
 0x3f3   : > { %v5452_v44 = vpop.f32.mrf.mxu0 }
 0x3f4   : > { %v18426_v54 = vpop.f32.mrf.mxu1  ;;  %5758 = vmatmul.mubr.bf16.gmra.mxu1 %v22549_v55  ;;  %v18431_v11 = vadd.f32 %v5452_v44, %v18296_v52 }
 0x3f5   : > { %v5454_v50 = vpop.f32.mrf.mxu0  ;;  %5765 = vmatprep.mubr.bf16.mxu1 %v22550_v2  ;;  %v22553_v2 = vld [vmem:[#allocation6_spill] sm:$0xff] }
 0x3f6   : > { %v18434_v61 = vadd.f32 %v5454_v50, %v18300_v7  ;;  %v18436_v12 = vpop.f32.mrf.mxu1 }
 0x3f7   : > { %v5458_v1 = vpop.f32.mrf.mxu0  ;;  %5927 = vmatmul.mubr.bf16.gmra.mxu0 %v22551_v53 }
 0x3f8   : > { %13015 = vmatprep.mubr.msk.bf16.mxu0 %vm1006_vm1, %v22552_v30  ;;  %v18441_v37 = vpop.f32.mrf.mxu1  ;;  %v18444_v32 = vadd.f32 %v5458_v1, %v18303_v29  ;;  %v22555_v1 = vld [vmem:[#allocation7_spill] sm:$0xff] }
 0x3f9   : > { %v5460_v55 = vpop.f32.mrf.mxu0 }
 0x3fa   : > { %v18447_v52 = vadd.f32 %v5460_v55, %v18309_v8  ;;  %v18449_v44 = vpop.f32.mrf.mxu1  ;;  %v22556_v55 = vld [vmem:[#allocation18_spill] sm:$0xff] }
 0x3fb   : > { %v5462_v7 = vpop.f32.mrf.mxu0 }
 0x3fc   : > { %v18451_v50 = vpop.f32.mrf.mxu1  ;;  %5766 = vmatmul.mubr.bf16.gmra.mxu1 %v22553_v2  ;;  %v18456_v30 = vadd.f32 %v5462_v7, %v18315_v63 }
 0x3fd   : > { %v5464_v53 = vpop.f32.mrf.mxu0  ;;  %5773 = vmatprep.mubr.bf16.mxu1 %v22554_v13 }
 0x3fe   : > { %v18459_v35 = vadd.f32 %v5464_v53, %v18319_v59  ;;  %v18461_v29 = vpop.f32.mrf.mxu1  ;;  %v22557_v53 = vld [vmem:[#allocation9_spill] sm:$0xff] }
 0x3ff   : > { %v5468_v8 = vpop.f32.mrf.mxu0  ;;  %5935 = vmatmul.mubr.bf16.gmra.mxu0 %v22555_v1 }
 0x400   : > { %13016 = vmatprep.mubr.msk.bf16.mxu0 %vm1006_vm1, %v22556_v55  ;;  %v18466_v48 = vpop.f32.mrf.mxu1  ;;  %v18469_v33 = vadd.f32 %v5468_v8, %v18322_v58  ;;  %v22559_v8 = vld [vmem:[#allocation11_spill] sm:$0xff] }
 0x401   : > { %v5470_v2 = vpop.f32.mrf.mxu0 }
 0x402   : > { %v18472_v63 = vadd.f32 %v5470_v2, %v18328_v31  ;;  %v18474_v13 = vpop.f32.mrf.mxu1  ;;  %v22560_v2 = vld [vmem:[#allocation22_spill] sm:$0xff] }
 0x403   : > { %v5472_v59 = vpop.f32.mrf.mxu0 }
 0x404   : > { %v18476_v7 = vpop.f32.mrf.mxu1  ;;  %5774 = vmatmul.mubr.bf16.gmra.mxu1 %v22557_v53  ;;  %v18481_v55 = vadd.f32 %v5472_v59, %v18333_v22 }
 0x405   : > { %v5474_v1 = vpop.f32.mrf.mxu0  ;;  %5781 = vmatprep.mubr.bf16.mxu1 %v22558_v21 }
 0x406   : > { %v18484_v6 = vadd.f32 %v5474_v1, %v18341_v62  ;;  %v18486_v58 = vpop.f32.mrf.mxu1  ;;  %v22561_v1 = vld [vmem:[#allocation13_spill] sm:$0xff] }
 0x407   : > { %v5478_v31 = vpop.f32.mrf.mxu0  ;;  %5943 = vmatmul.mubr.bf16.gmra.mxu0 %v22559_v8 }
 0x408   : > { %13017 = vmatprep.mubr.msk.bf16.mxu0 %vm1006_vm1, %v22560_v2  ;;  %v18491_v10 = vpop.f32.mrf.mxu1  ;;  %v5479_v41 = vadd.f32 %v5478_v31, %v18343_v28  ;;  %v22563_v28 = vld [vmem:[#allocation15_spill] sm:$0xff] }
 0x409   : > { %v5480_v53 = vpop.f32.mrf.mxu0 }
 0x40a   : > { %v5481_v21 = vadd.f32 %v5480_v53, %v18353_v56  ;;  %v18495_v22 = vpop.f32.mrf.mxu1  ;;  %v22564_v56 = vld [vmem:[#allocation26_spill] sm:$0xff] }
 0x40b   : > { %v5482_v59 = vpop.f32.mrf.mxu0 }
 0x40c   : > { %v18497_v62 = vpop.f32.mrf.mxu1  ;;  %5782 = vmatmul.mubr.bf16.gmra.mxu1 %v22561_v1  ;;  %v5483_v8 = vadd.f32 %v5482_v59, %v18358_v4 }
 0x40d   : > { %v5484_v17 = vpop.f32.mrf.mxu0  ;;  %5789 = vmatprep.mubr.bf16.mxu1 %v22562_v20 }
 0x40e   : > { %v5485_v2 = vadd.f32 %v5484_v17, %v18366_v46  ;;  %v18503_v45 = vpop.f32.mrf.mxu1  ;;  %v22567_v17 = vld [vmem:[#allocation17_spill] sm:$0xff] }
 0x40f   : > { %v5488_v34 = vpop.f32.mrf.mxu0  ;;  %5951 = vmatmul.mubr.bf16.gmra.mxu0 %v22563_v28 }
 0x410   : > { %13018 = vmatprep.mubr.msk.bf16.mxu0 %vm1006_vm1, %v22564_v56  ;;  %v18508_v31 = vpop.f32.mrf.mxu1  ;;  %v5489_v1 = vadd.f32 %v5488_v34, %v18372_v38  ;;  %v22570_v34 = vld [vmem:[#allocation19_spill] sm:$0xff]  ;;  %v22571_v38 = vld [vmem:[#allocation30_spill] sm:$0xff] }
 0x411   : > { %22565 = vst [vmem:[#allocation4_spill] sm:$0xff] %v18508_v31  ;;  %v5490_v53 = vpop.f32.mrf.mxu0 }
 0x412   : > { %v5491_v47 = vadd.f32 %v5490_v53, %v18382_v40  ;;  %v18512_v20 = vpop.f32.mrf.mxu1 }
 0x413   : > { %v5492_v4 = vpop.f32.mrf.mxu0 }
 0x414   : > { %v18514_v59 = vpop.f32.mrf.mxu1  ;;  %5790 = vmatmul.mubr.bf16.gmra.mxu1 %v22567_v17  ;;  %v5493_v28 = vadd.f32 %v5492_v4, %v18387_v27 }
 0x415   : > { %22566 = vst [vmem:[#allocation12_spill] sm:$0xff] %v18514_v59  ;;  %v5494_v46 = vpop.f32.mrf.mxu0  ;;  %5797 = vmatprep.mubr.bf16.mxu1 %v22568_v36  ;;  %v22573_v59 = vld [vmem:[#allocation21_spill] sm:$0xff] }
 0x416   : > { %v5495_v56 = vadd.f32 %v5494_v46, %v18395_v23  ;;  %v18520_v31 = vpop.f32.mrf.mxu1  ;;  %v15353_v27 = vpack.c.bf16 %v5493_v28, %v5489_v1  ;;  %v22575_v1 = vld [vmem:[#allocation23_spill] sm:$0xff] }
 0x417   : > { %22569 = vst [vmem:[#allocation5_spill] sm:$0xff] %v18520_v31  ;;  %v5498_v3 = vpop.f32.mrf.mxu0  ;;  %5959 = vmatmul.mubr.bf16.gmra.mxu0 %v22570_v34  ;;  %v15355_v31 = vpack.c.bf16 %v5485_v2, %v5481_v21  ;;  %v15356_v21 = vpack.c.bf16 %v5483_v8, %v5479_v41  ;;  %v22576_v2 = vld [vmem:[#allocation25_spill] sm:$0xff] }
 0x418   : > { %13019 = vmatprep.mubr.msk.bf16.mxu0 %vm1006_vm1, %v22571_v38  ;;  %v18525_v40 = vpop.f32.mrf.mxu1  ;;  %v18528_v17 = vadd.f32 %v5498_v3, %v18401_v60  ;;  %v15354_v4 = vpack.c.bf16 %v5495_v56, %v5491_v47 }
 0x419   : > { %22572 = vst [vmem:[#allocation14_spill] sm:$0xff] %v18525_v40  ;;  %v5500_v53 = vpop.f32.mrf.mxu0  ;;  %v22574_v40 = vld [vmem:[#allocation32_spill] sm:$0xff] }
 0x41a   : > { %v18531_v36 = vadd.f32 %v5500_v53, %v18411_v57  ;;  %v18533_v23 = vpop.f32.mrf.mxu1  ;;  %7408 = vmatprep.subr.bf16.mxu1 %v15354_v4 }
 0x41b   : > { %v5502_v46 = vpop.f32.mrf.mxu0  ;;  %7409 = vmatpush1.bf16.msra.mxu1 %v15353_v27  ;;  %v22578_v27 = vld [vmem:[#allocation29_spill] sm:$0xff] }
 0x41c   : > { %v18535_v34 = vpop.f32.mrf.mxu1  ;;  %5798 = vmatmul.mubr.bf16.gmra.mxu1 %v22573_v59  ;;  %v18540_v3 = vadd.f32 %v5502_v46, %v18416_v26  ;;  %7410 = vmatprep.subr.bf16.mxu1 %v15355_v31  ;;  %v15357_v59 = vpack.c.bf16 %v18484_v6, %v18472_v63  ;;  %v15360_v63 = vpack.c.bf16 %v18481_v55, %v18469_v33  ;;  %v22579_v55 = vld [vmem:[#allocation31_spill] sm:$0xff] }
 0x41d   : > { %v5504_v38 = vpop.f32.mrf.mxu0  ;;  %5805 = vmatprep.mubr.bf16.mxu1 %v22574_v40 }
 0x41e   : > { %v18543_v60 = vadd.f32 %v5504_v38, %v18424_v5  ;;  %v18545_v47 = vpop.f32.mrf.mxu1 }
 0x41f   : > { %v5508_v57 = vpop.f32.mrf.mxu0  ;;  %5967 = vmatmul.mubr.bf16.gmra.mxu0 %v22575_v1  ;;  %7411 = vmatpush1.bf16.msra.mxu1 %v15356_v21 }
 0x420   : > { %13020 = vmatprep.mubr.msk.bf16.mxu0 %vm1006_vm1, %v22576_v2  ;;  %v18552_v28 = vpop.f32.mrf.mxu1  ;;  %v18555_v5 = vadd.f32 %v5508_v57, %v18426_v54  ;;  %7412 = vmatprep.subr.bf16.mxu1 %v15357_v59  ;;  %v15361_v54 = vpack.c.bf16 %v18459_v35, %v18447_v52  ;;  %v15362_v35 = vpack.c.bf16 %v18456_v30, %v18444_v32  ;;  %v22580_v52 = vld [vmem:[#allocation33_spill] sm:$0xff]  ;;  %v22609_v30 = vld [vmem:[#allocation51_spill] sm:$0xff] }
 0x421   : > { %v5510_v26 = vpop.f32.mrf.mxu0  ;;  %v15363_v57 = vpack.c.bf16 %v18434_v61, %v18422_v39  ;;  %v15366_v61 = vpack.c.bf16 %v18431_v11, %v18419_v18  ;;  %v22583_v11 = vld [vmem:[#allocation36_spill] sm:$0xff] }
 0x422   : > { %v18558_v31 = vadd.f32 %v5510_v26, %v18436_v12  ;;  %v18560_v56 = vpop.f32.mrf.mxu1  ;;  %v22577_v12 = vld [vmem:[#allocation27_spill] sm:$0xff] }
 0x423   : > { %v5512_v6 = vpop.f32.mrf.mxu0  ;;  %7413 = vmatpush1.bf16.msra.mxu1 %v15360_v63 }
 0x424   : > { %v18570_v40 = vpop.f32.mrf.mxu1  ;;  %5806 = vmatmul.mubr.bf16.gmra.mxu1 %v22577_v12  ;;  %v18575_v4 = vadd.f32 %v5512_v6, %v18441_v37  ;;  %7414 = vmatprep.subr.bf16.mxu1 %v15361_v54  ;;  %v22582_v6 = vld [vmem:[#allocation35_spill] sm:$0xff] }
 0x425   : > { %v5514_v53 = vpop.f32.mrf.mxu0  ;;  %5813 = vmatprep.mubr.bf16.mxu1 %v22578_v27 }
 0x426   : > { %v18578_v46 = vadd.f32 %v5514_v53, %v18449_v44  ;;  %v18580_v38 = vpop.f32.mrf.mxu1 }
 0x427   : > { %v5518_v33 = vpop.f32.mrf.mxu0  ;;  %5975 = vmatmul.mubr.bf16.gmra.mxu0 %v22579_v55  ;;  %7415 = vmatpush1.bf16.msra.mxu1 %v15362_v35  ;;  %v22586_v35 = vld [vmem:[#allocation38_spill] sm:$0xff] }
 0x428   : > { %13021 = vmatprep.mubr.msk.bf16.mxu0 %vm1006_vm1, %v22580_v52  ;;  %v18589_v37 = vpop.f32.mrf.mxu1  ;;  %v18592_v44 = vadd.f32 %v5518_v33, %v18451_v50  ;;  %7416 = vmatprep.subr.bf16.mxu1 %v15363_v57  ;;  %v15367_v50 = vpack.c.bf16 %v18409_v14, %v18393_v25  ;;  %v15368_v25 = vpack.c.bf16 %v18406_v9, %v18390_v43  ;;  %v22584_v14 = vld [vmem:[#allocation37_spill] sm:$0xff] }
 0x429   : > { %v5520_v1 = vpop.f32.mrf.mxu0  ;;  %v22585_v33 = vpack.c.bf16 %v18380_v16, %v18364_v15  ;;  %v22587_v57 = vpack.c.bf16 %v18377_v0, %v18361_v42  ;;  %v22589_v16 = vpack.c.bf16 %v18351_v24, %v18339_v51 }
 0x42a   : > { %v18595_v21 = vadd.f32 %v5520_v1, %v18461_v29  ;;  %v18597_v2 = vpop.f32.mrf.mxu1  ;;  %v22581_v29 = vld [vmem:[#allocation34_spill] sm:$0xff] }
 0x42b   : > { %v5522_v39 = vpop.f32.mrf.mxu0  ;;  %7417 = vmatpush1.bf16.msra.mxu1 %v15366_v61  ;;  %v22590_v61 = vld [vmem:[#allocation40_spill] sm:$0xff] }
 0x42c   : > { %v18607_v59 = vpop.f32.mrf.mxu1  ;;  %5814 = vmatmul.mubr.bf16.gmra.mxu1 %v22581_v29  ;;  %v18612_v63 = vadd.f32 %v5522_v39, %v18466_v48  ;;  %7418 = vmatprep.subr.bf16.mxu1 %v15367_v50  ;;  %v22591_v50 = vld [vmem:[#allocation41_spill] sm:$0xff] }
 0x42d   : > { %v5524_v26 = vpop.f32.mrf.mxu0  ;;  %5821 = vmatprep.mubr.bf16.mxu1 %v22582_v6  ;;  %v22593_v6 = vld [vmem:[#allocation42_spill] sm:$0xff] }
 0x42e   : > { %v18615_v54 = vadd.f32 %v5524_v26, %v18474_v13  ;;  %v18617_v12 = vpop.f32.mrf.mxu1 }
 0x42f   : > { %v5528_v18 = vpop.f32.mrf.mxu0  ;;  %5983 = vmatmul.mubr.bf16.gmra.mxu0 %v22583_v11  ;;  %7419 = vmatpush1.bf16.msra.mxu1 %v15368_v25  ;;  %v22594_v11 = vld [vmem:[#allocation43_spill] sm:$0xff]  ;;  %v22595_v25 = vld [vmem:[#allocation4_spill] sm:$0xff] }
 0x430   : > { %13022 = vmatprep.mubr.msk.bf16.mxu0 %vm1006_vm1, %v22584_v14  ;;  %v18624_v53 = vpop.f32.mrf.mxu1  ;;  %v18627_v48 = vadd.f32 %v5528_v18, %v18476_v7  ;;  %7420 = vmatprep.subr.bf16.mxu1 %v22585_v33  ;;  %v22588_v7 = vld [vmem:[#allocation39_spill] sm:$0xff] }
 0x431   : > { %v5530_v27 = vpop.f32.mrf.mxu0 }
 0x432   : > { %v18630_v13 = vadd.f32 %v5530_v27, %v18486_v58  ;;  %v18635_v55 = vpop.f32.mrf.mxu1  ;;  %v22597_v27 = vld [vmem:[#allocation45_spill] sm:$0xff] }
 0x433   : > { %v5532_v43 = vpop.f32.mrf.mxu0  ;;  %7421 = vmatpush1.bf16.msra.mxu1 %v22587_v57  ;;  %v22599_v57 = vld [vmem:[#allocation5_spill] sm:$0xff] }
 0x434   : > { %v18637_v9 = vpop.f32.mrf.mxu1  ;;  %5822 = vmatmul.mubr.bf16.gmra.mxu1 %v22586_v35  ;;  %v18645_v58 = vadd.f32 %v5532_v43, %v18491_v10  ;;  %7422 = vmatprep.subr.bf16.mxu1 %v22589_v16  ;;  %v22592_v10 = vpack.c.bf16 %v18348_v49, %v18336_v19  ;;  %v22598_v35 = vld [vmem:[#allocation12_spill] sm:$0xff] }
 0x435   : > { %v5534_v52 = vpop.f32.mrf.mxu0  ;;  %5829 = vmatprep.mubr.bf16.mxu1 %v22588_v7 }
 0x436   : > { %v18648_v15 = vadd.f32 %v5534_v52, %v18495_v22  ;;  %v18653_v1 = vpop.f32.mrf.mxu1 }
 0x437   : > { %v5538_v39 = vpop.f32.mrf.mxu0  ;;  %5991 = vmatmul.mubr.bf16.gmra.mxu0 %v22590_v61  ;;  %7423 = vmatpush1.bf16.msra.mxu1 %v22592_v10  ;;  %v22600_v61 = vld [vmem:[#allocation46_spill] sm:$0xff] }
 0x438   : > { %13023 = vmatprep.mubr.msk.bf16.mxu0 %vm1006_vm1, %v22591_v50  ;;  %v18658_v42 = vpop.f32.mrf.mxu1  ;;  %v18664_v22 = vadd.f32 %v5538_v39, %v18497_v62  ;;  %v22596_v62 = vld [vmem:[#allocation44_spill] sm:$0xff] }
 0x439   : > { %v5540_v0 = vpop.f32.mrf.mxu0 }
 0x43a   : > { %v18667_v51 = vadd.f32 %v5540_v0, %v18503_v45  ;;  %v18669_v24 = vpop.f32.mrf.mxu1  ;;  %v22601_v0 = vld [vmem:[#allocation14_spill] sm:$0xff] }
 0x43b   : > { %v5542_v29 = vpop.f32.mrf.mxu0 }
 0x43c   : > { %v18671_v26 = vpop.f32.mrf.mxu1  ;;  %5830 = vmatmul.mubr.bf16.gmra.mxu1 %v22593_v6  ;;  %v18676_v14 = vadd.f32 %v5542_v29, %v22595_v25  ;;  %v22603_v25 = vld [vmem:[#allocation48_spill] sm:$0xff] }
 0x43d   : > { %v5544_v18 = vpop.f32.mrf.mxu0  ;;  %5837 = vmatprep.mubr.bf16.mxu1 %v22594_v11  ;;  %v22602_v11 = vld [vmem:[#allocation47_spill] sm:$0xff] }
 0x43e   : > { %v18679_v19 = vadd.f32 %v5544_v18, %v18512_v20  ;;  %v18681_v49 = vpop.f32.mrf.mxu1 }
 0x43f   : > { %v5548_v45 = vpop.f32.mrf.mxu0  ;;  %5999 = vmatmul.mubr.bf16.gmra.mxu0 %v22596_v62 }
 0x440   : > { %13024 = vmatprep.mubr.msk.bf16.mxu0 %vm1006_vm1, %v22597_v27  ;;  %v18686_v33 = vpop.f32.mrf.mxu1  ;;  %v18689_v52 = vadd.f32 %v5548_v45, %v22598_v35 }
 0x441   : > { %v5550_v43 = vpop.f32.mrf.mxu0 }
 0x442   : > { %v18692_v7 = vadd.f32 %v5550_v43, %v22599_v57  ;;  %v18694_v16 = vpop.f32.mrf.mxu1 }
 0x443   : > { %v5552_v20 = vpop.f32.mrf.mxu0 }
 0x444   : > { %v18696_v39 = vpop.f32.mrf.mxu1  ;;  %5838 = vmatmul.mubr.bf16.gmra.mxu1 %v22600_v61  ;;  %v18700_v10 = vadd.f32 %v5552_v20, %v22601_v0 }
 0x445   : > { %v5554_v50 = vpop.f32.mrf.mxu0 }
 0x446   : > { %v5555_v29 = vadd.f32 %v5554_v50, %v18533_v23  ;;  %v18703_v6 = vpop.f32.mrf.mxu1  ;;  %v14931_v23 = vld [vmem:[%s22269_s2 + $0x4] ss:$12 sps:$4 sm:$0xff]  }
 0x447   : > { %v5558_v18 = vpop.f32.mrf.mxu0  ;;  %6007 = vmatmul.mubr.bf16.gmra.mxu0 %v22602_v11  ;;  %7440 = vmatprep.mubr.bf16.mxu1 %v14931_v23 }
 0x448   : > { %13025 = vmatprep.mubr.msk.bf16.mxu0 %vm1006_vm1, %v22603_v25  ;;  %v18708_v45 = vpop.f32.mrf.mxu1  ;;  %v5559_v27 = vadd.f32 %v5558_v18, %v18535_v34  ;;  %v22604_v18 = vld [vmem:[#allocation49_spill] sm:$0xff] }
 0x449   : > { %v5560_v62 = vpop.f32.mrf.mxu0 }
 0x44a   : > { %v5561_v43 = vadd.f32 %v5560_v62, %v18545_v47  ;;  %v18712_v35 = vpop.f32.mrf.mxu1  ;;  %v22605_v47 = vld [vmem:[#allocation50_spill] sm:$0xff] }
 0x44b   : > { %v5562_v57 = vpop.f32.mrf.mxu0 }
 0x44c   : > { %v18717_v20 = vpop.f32.mrf.mxu1  ;;  %v5563_v50 = vadd.f32 %v5562_v57, %v18552_v28 }
 0x44d   : > { %v5564_v61 = vpop.f32.mrf.mxu0 }
 0x44e   : > { %v5565_v0 = vadd.f32 %v5564_v61, %v18560_v56  ;;  %v18721_v11 = vpop.f32.mrf.mxu1 }
 0x44f   : > { %v5568_v34 = vpop.f32.mrf.mxu0  ;;  %6015 = vmatmul.mubr.bf16.gmra.mxu0 %v22604_v18 }
 0x450   : > { %13026 = vmatprep.mubr.msk.bf16.mxu0 %vm1006_vm1, %v22605_v47  ;;  %v18726_v25 = vpop.f32.mrf.mxu1  ;;  %v5569_v41 = vadd.f32 %v5568_v34, %v18570_v40 }
 0x451   : > { %22606 = vst [vmem:[#allocation6_spill] sm:$0xff] %v18726_v25  ;;  %v5570_v62 = vpop.f32.mrf.mxu0  ;;  %v22610_v25 = vld [vmem:[#allocation52_spill] sm:$0xff] }
 0x452   : > { %v5571_v23 = vadd.f32 %v5570_v62, %v18580_v38  ;;  %v18730_v8 = vpop.f32.mrf.mxu1 }
 0x453   : > { %v5572_v28 = vpop.f32.mrf.mxu0 }
 0x454   : > { %v18732_v57 = vpop.f32.mrf.mxu1  ;;  %v5573_v61 = vadd.f32 %v5572_v28, %v18589_v37 }
 0x455   : > { %22607 = vst [vmem:[#allocation16_spill] sm:$0xff] %v18732_v57  ;;  %v5574_v56 = vpop.f32.mrf.mxu0 }
 0x456   : > { %v5575_v18 = vadd.f32 %v5574_v56, %v18597_v2  ;;  %v18736_v32 = vpop.f32.mrf.mxu1  ;;  %v15369_v37 = vpack.c.bf16 %v5573_v61, %v5569_v41  ;;  %v22611_v41 = vld [vmem:[#allocation53_spill] sm:$0xff]  ;;  %v22612_v61 = vld [vmem:[#allocation54_spill] sm:$0xff] }
 0x457   : > { %22608 = vst [vmem:[#allocation7_spill] sm:$0xff] %v18736_v32  ;;  %v5578_v47 = vpop.f32.mrf.mxu0  ;;  %6023 = vmatmul.mubr.bf16.gmra.mxu0 %v22609_v30  ;;  %v15371_v32 = vpack.c.bf16 %v5565_v0, %v5561_v43  ;;  %v15373_v43 = vpack.c.bf16 %v5555_v29, %v18692_v7  ;;  %v15376_v7 = vpack.c.bf16 %v18700_v10, %v18689_v52  ;;  %v22614_v10 = vld [vmem:[#allocation56_spill] sm:$0xff] }
 0x458   : > { %13027 = vmatprep.mubr.msk.bf16.mxu0 %vm1006_vm1, %v22610_v25  ;;  %v18741_v40 = vpop.f32.mrf.mxu1  ;;  %v18744_v34 = vadd.f32 %v5578_v47, %v18607_v59  ;;  %v15370_v28 = vpack.c.bf16 %v5575_v18, %v5571_v23  ;;  %v15372_v23 = vpack.c.bf16 %v5563_v50, %v5559_v27  ;;  %v15377_v29 = vpack.c.bf16 %v18679_v19, %v18667_v51 }
 0x459   : > { %v5580_v38 = vpop.f32.mrf.mxu0  ;;  %v15378_v52 = vpack.c.bf16 %v18676_v14, %v18664_v22  ;;  %v15379_v51 = vpack.c.bf16 %v18648_v15, %v18630_v13  ;;  %v15380_v22 = vpack.c.bf16 %v18645_v58, %v18627_v48  ;;  %v15381_v14 = vpack.c.bf16 %v18615_v54, %v18595_v21 }
 0x45a   : > { %v18747_v62 = vadd.f32 %v5580_v38, %v18617_v12  ;;  %v18749_v2 = vpop.f32.mrf.mxu1  ;;  %7424 = vmatprep.subr.bf16.mxu1 %v15370_v28  ;;  %v15382_v48 = vpack.c.bf16 %v18612_v63, %v18592_v44  ;;  %v22616_v21 = vmov 0   ;;  %v22618_v63 = vpack.c.bf16 %v18575_v4, %v18555_v5 }
 0x45b   : > { %v5582_v56 = vpop.f32.mrf.mxu0  ;;  %7425 = vmatpush2.bf16.msra.mxu1 %v15369_v37  ;;  %v22620_v4 = vpack.c.bf16 %v18540_v3, %v18528_v17  ;;  %v22621_v17 = vld [vmem:[#allocation6_spill] sm:$0xff] }
 0x45c   : > { %v18751_v30 = vpop.f32.mrf.mxu1  ;;  %v18754_v25 = vadd.f32 %v5582_v56, %v18624_v53  ;;  %7426 = vmatprep.subr.bf16.mxu1 %v15371_v32 }
 0x45d   : > { %v5584_v57 = vpop.f32.mrf.mxu0 }
 0x45e   : > { %v18757_v59 = vadd.f32 %v5584_v57, %v18635_v55  ;;  %v5673_v12 = vpop.f32.mrf.mxu1  ;;  %v15374_v27 = vpack.c.bf16 %v18754_v25, %v18744_v34  ;;  %v14965_v34 = vld [vmem:[%s22269_s2 + $0xa8] ss:$12 sps:$4 sm:$0xff]  }
 0x45f   : > { %v5588_v47 = vpop.f32.mrf.mxu0  ;;  %6031 = vmatmul.mubr.bf16.gmra.mxu0 %v22611_v41  ;;  %7427 = vmatpush2.bf16.msra.mxu1 %v15372_v23  ;;  %v22613_v12 = vld [vmem:[#allocation55_spill] sm:$0xff] }
 0x460   : > { %13028 = vmatprep.mubr.msk.bf16.mxu0 %vm1006_vm1, %v22612_v61  ;;  %v18763_v0 = vpop.f32.mrf.mxu1  ;;  %v18766_v53 = vadd.f32 %v5588_v47, %v18637_v9  ;;  %7428 = vmatprep.subr.bf16.mxu1 %v15373_v43  ;;  %v15375_v50 = vpack.c.bf16 %v18757_v59, %v18747_v62 }
 0x461   : > { %v5590_v18 = vpop.f32.mrf.mxu0 }
 0x462   : > { %v18769_v55 = vadd.f32 %v5590_v18, %v18653_v1  ;;  %v5676_v32 = vpop.f32.mrf.mxu1  ;;  %v22615_v18 = vld [vmem:[#allocation57_spill] sm:$0xff] }
 0x463   : > { %v5592_v57 = vpop.f32.mrf.mxu0  ;;  %7429 = vmatpush2.bf16.msra.mxu1 %v15376_v7  ;;  %v22617_v32 = vpack.c.bf16 %v18578_v46, %v18558_v31 }
 0x464   : > { %v18779_v9 = vpop.f32.mrf.mxu1  ;;  %v18782_v1 = vadd.f32 %v5592_v57, %v18658_v42  ;;  %7430 = vmatprep.subr.bf16.mxu1 %v15377_v29 }
 0x465   : > { %v5594_v38 = vpop.f32.mrf.mxu0 }
 0x466   : > { %v18785_v37 = vadd.f32 %v5594_v38, %v18669_v24  ;;  %v5681_v28 = vpop.f32.mrf.mxu1 }
 0x467   : > { %v5598_v56 = vpop.f32.mrf.mxu0  ;;  %6039 = vmatmul.mubr.bf16.gmra.mxu0 %v22613_v12  ;;  %7431 = vmatpush2.bf16.msra.mxu1 %v15378_v52 }
 0x468   : > { %13029 = vmatprep.mubr.msk.bf16.mxu0 %vm1006_vm1, %v22614_v10  ;;  %v18794_v19 = vpop.f32.mrf.mxu1  ;;  %v18797_v24 = vadd.f32 %v5598_v56, %v18671_v26  ;;  %7432 = vmatprep.subr.bf16.mxu1 %v15379_v51  ;;  %v14929_v56 = vld [vmem:[%s22269_s2] ss:$12 sps:$4 sm:$0xff]  }
 0x469   : > { %v5600_v42 = vpop.f32.mrf.mxu0 }
 0x46a   : > { %v18800_v47 = vadd.f32 %v5600_v42, %v18681_v49  ;;  %v5684_v41 = vpop.f32.mrf.mxu1 }
 0x46b   : > { %v5602_v23 = vpop.f32.mrf.mxu0  ;;  %7433 = vmatpush2.bf16.msra.mxu1 %v15380_v22  ;;  %v14942_v22 = vld [vmem:[%s22269_s2 + $0x34] ss:$12 sps:$4 sm:$0xff]  }
 0x46c   : > { %v18806_v13 = vpop.f32.mrf.mxu1  ;;  %v18809_v61 = vadd.f32 %v5602_v23, %v18686_v33  ;;  %7434 = vmatprep.subr.bf16.mxu1 %v15381_v14  ;;  %v22622_v14 = vld [vmem:[#allocation16_spill] sm:$0xff] }
 0x46d   : > { %v5604_v15 = vpop.f32.mrf.mxu0 }
 0x46e   : > { %v18812_v26 = vadd.f32 %v5604_v15, %v18694_v16  ;;  %v5689_v49 = vpop.f32.mrf.mxu1 }
 0x46f   : > { %v5608_v43 = vpop.f32.mrf.mxu0  ;;  %6047 = vmatmul.mubr.bf16.gmra.mxu0 %v22615_v18  ;;  %7435 = vmatpush2.bf16.msra.mxu1 %v15382_v48  ;;  %v22623_v49 = vld [vmem:[#allocation7_spill] sm:$0xff] }
 0x470   : > { %v18817_v58 = vpop.f32.mrf.mxu1  ;;  %7643 = vmatprep.mubr.bf16.mxu0 %v22616_v21  ;;  %v18821_v33 = vadd.f32 %v5608_v43, %v18696_v39  ;;  %7436 = vmatprep.subr.bf16.mxu1 %v22617_v32 }
 0x471   : > { %v5610_v54 = vpop.f32.mrf.mxu0 }
 0x472   : > { %v18824_v16 = vadd.f32 %v5610_v54, %v18703_v6  ;;  %v5692_v57 = vpop.f32.mrf.mxu1  ;;  %v22619_v6 = vpack.c.bf16 %v18543_v60, %v18531_v36 }
 0x473   : > { %v5612_v7 = vpop.f32.mrf.mxu0  ;;  %7437 = vmatpush2.bf16.msra.mxu1 %v22618_v63  ;;  %v6582_v63 = vld [vmem:[#allocation2 + $0x414] sm:$0x11] }
 0x474   : > { %v18829_v29 = vpop.f32.mrf.mxu1  ;;  %v18835_v38 = vadd.f32 %v5612_v7, %v18708_v45  ;;  %7438 = vmatprep.subr.bf16.mxu1 %v22619_v6  ;;  %v14936_v45 = vld [vmem:[%s22269_s2 + $0x1c] ss:$12 sps:$4 sm:$0xff]  }
 0x475   : > { %v5614_v44 = vpop.f32.mrf.mxu0 }
 0x476   : > { %v18838_v39 = vadd.f32 %v5614_v44, %v18712_v35  ;;  %v5697_v31 = vpop.f32.mrf.mxu1 }
 0x477   : > { %v5618_v46 = vpop.f32.mrf.mxu0  ;;  %7439 = vmatpush2.bf16.msra.mxu1 %v22620_v4 }
 0x478   : > { %v18843_v28 = vpop.f32.mrf.mxu1  ;;  %v18855_v36 = vadd.f32 %v5618_v46, %v18717_v20  ;;  %7814 = vmatprep.subr.bf16.mxu1 %v22616_v21 }
 0x479   : > { %v5620_v5 = vpop.f32.mrf.mxu0 }
 0x47a   : > { %v18858_v60 = vadd.f32 %v5620_v5, %v18721_v11  ;;  %v5700_v35 = vpop.f32.mrf.mxu1  ;;  %7441 = vmatmul.mubr.bf16.vlgmr.msra.gmra.mxu1 %v14929_v56  ;;  %v14934_v11 = vld [vmem:[%s22269_s2 + $0x18] ss:$12 sps:$4 sm:$0xff]   ;;  %v14940_v5 = vld [vmem:[%s22269_s2 + $0x30] ss:$12 sps:$4 sm:$0xff]  }
 0x47b   : > { %v5622_v12 = vpop.f32.mrf.mxu0  ;;  %7450 = vmatprep.mubr.bf16.mxu1 %v14936_v45  ;;  %v14948_v45 = vld [vmem:[%s22269_s2 + $0x4c] ss:$12 sps:$4 sm:$0xff]  }
 0x47c   : > { %v18861_v52 = vpop.f32.mrf.mxu1  ;;  %v18864_v3 = vadd.f32 %v5622_v12, %v22621_v17 }
 0x47d   : > { %v5624_v10 = vpop.f32.mrf.mxu0 }
 0x47e   : > { %v18867_v51 = vadd.f32 %v5624_v10, %v18730_v8  ;;  %v5705_v20 = vpop.f32.mrf.mxu1 }
 0x47f   : > { %v5628_v42 = vpop.f32.mrf.mxu0 }
 0x480   : > { %v18869_v41 = vpop.f32.mrf.mxu1  ;;  %v5629_v15 = vadd.f32 %v5628_v42, %v22622_v14 }
 0x481   : > { %v5630_v23 = vpop.f32.mrf.mxu0 }
 0x482   : > { %v5631_v43 = vadd.f32 %v5630_v23, %v22623_v49  ;;  %v5708_v18 = vpop.f32.mrf.mxu1  ;;  %7451 = vmatmul.mubr.bf16.gmra.mxu1 %v14934_v11 }
 0x483   : > { %v5632_v8 = vpop.f32.mrf.mxu0  ;;  %7460 = vmatprep.mubr.bf16.mxu1 %v14942_v22 }
 0x484   : > { %v14194_v48 = vpack.c.bf16 %v5631_v43, %v5629_v15  ;;  %v18879_v54 = vpop.f32.mrf.mxu1  ;;  %v5633_v57 = vadd.f32 %v5632_v8, %v18741_v40  ;;  %v14946_v15 = vld [vmem:[%s22269_s2 + $0x48] ss:$12 sps:$4 sm:$0xff]  }
 0x485   : > { %v5634_v32 = vpop.f32.mrf.mxu0 }
 0x486   : > { %v5635_v7 = vadd.f32 %v5634_v32, %v18749_v2  ;;  %v5713_v44 = vpop.f32.mrf.mxu1 }
 0x487   : > { %v5880_v6 = vpop.f32.mrf.mxu0 }
 0x488   : > { %v14196_v31 = vpack.c.bf16 %v5635_v7, %v5633_v57  ;;  %v5881_v46 = vadd.f32 %v5880_v6, %v18751_v30  ;;  %v18884_v56 = vpop.f32.mrf.mxu1  ;;  %v22625_v6 = vld [vmem:[#allocation3_spill] sm:$0xff] }
 0x489   : > { %v5882_v4 = vpop.f32.mrf.mxu0 }
 0x48a   : > { %v6583_v2 = vsel %vm16580_vm8, %v14196_v31, %v6582_v63  ;;  %v14111_v35 = vpack.c.bf16 %v5881_v46, %v5881_v46  ;;  %v5716_v12 = vpop.f32.mrf.mxu1  ;;  %7461 = vmatmul.mubr.bf16.gmra.mxu1 %v14940_v5 }
 0x48b   : > { %6584 = vst [vmem:[#allocation2 + $0x414] sm:$0x11] %v6583_v2  ;;  %v5883_v10 = vpop.f32.mrf.mxu0  ;;  %7470 = vmatprep.mubr.bf16.mxu1 %v14948_v45 }
 0x48c   : > { %6497 = vst.msk [vmem:[#allocation2 + $0x218] sm:$0xf] %vm2448_vm9, %v14111_v35  ;;  %v5884_v30 = vadd.f32 %v5883_v10, %v18763_v0  ;;  %v18896_v17 = vpop.f32.mrf.mxu1  ;;  %v14954_v0 = vld [vmem:[%s22269_s2 + $0x64] ss:$12 sps:$4 sm:$0xff]   ;;  %v14952_v35 = vld [vmem:[%s22269_s2 + $0x60] ss:$12 sps:$4 sm:$0xff]  }
 0x48d   : > { %v5885_v20 = vpop.f32.mrf.mxu0  ;;  %v14959_v10 = vld [vmem:[%s22269_s2 + $0x7c] ss:$12 sps:$4 sm:$0xff]  }
 0x48e   : > { %v14113_v42 = vpack.c.bf16 %v5884_v30, %v5884_v30  ;;  %v5721_v11 = vpop.f32.mrf.mxu1 }
 0x48f   : > { %v5888_v23 = vpop.f32.mrf.mxu0 }
 0x490   : > { %6499 = vst.msk [vmem:[#allocation2 + $0x224] sm:$0xf] %vm2448_vm9, %v14113_v42  ;;  %v5889_v22 = vadd.f32 %v5888_v23, %v18779_v9  ;;  %v18900_v14 = vpop.f32.mrf.mxu1 }
 0x491   : > { %v5890_v49 = vpop.f32.mrf.mxu0 }
 0x492   : > { %v14115_v43 = vpack.c.bf16 %v5889_v22, %v5889_v22  ;;  %v6742_v18 = vld [vmem:[#allocation2 + $0x414] sm:$0x11]  ;;  %v5724_v8 = vpop.f32.mrf.mxu1  ;;  %7471 = vmatmul.mubr.bf16.gmra.mxu1 %v14946_v15 }
 0x493   : > { %v5891_v32 = vpop.f32.mrf.mxu0  ;;  %v13232_v57 = vcombine.low %v14194_v48, %v6742_v18  ;;  %v13233_v7 = vcombine.high %v14194_v48, %v6742_v18  ;;  %7480 = vmatprep.mubr.bf16.mxu1 %v14954_v0  ;;  %v15383_v48 = vpack.c.bf16 %v18867_v51, %v18858_v60  ;;  %v15384_v60 = vpack.c.bf16 %v18864_v3, %v18855_v36  ;;  %v14957_v49 = vld [vmem:[%s22269_s2 + $0x78] ss:$12 sps:$4 sm:$0xff]  }
 0x494   : > { %6501 = vst.msk [vmem:[#allocation2 + $0x230] sm:$0xf] %vm2448_vm9, %v14115_v43  ;;  %v5892_v9 = vadd.f32 %v5891_v32, %v18794_v19  ;;  %v18910_v44 = vpop.f32.mrf.mxu1  ;;  %v15386_v36 = vpack.c.bf16 %v18835_v38, %v18821_v33  ;;  %v14963_v33 = vld [vmem:[%s22269_s2 + $0x94] ss:$12 sps:$4 sm:$0xff]  }
 0x495   : > { %v5893_v63 = vpop.f32.mrf.mxu0  ;;  %v7403_v31 = vand.u32 %v13233_v7, %v22625_v6  ;;  %v7400_v46 = vand.u32 %v13232_v57, %v22625_v6 }
 0x496   : > { %v14117_v5 = vpack.c.bf16 %v5892_v9, %v5892_v9  ;;  %v5729_v4 = vpop.f32.mrf.mxu1 }
 0x497   : > { %v5896_v45 = vpop.f32.mrf.mxu0  ;;  %7615 = vmatprep.subr.bf16.mxu0 %v7403_v31 }
 0x498   : > { %6503 = vst.msk [vmem:[#allocation2 + $0x23c] sm:$0xf] %vm2448_vm9, %v14117_v5  ;;  %v5897_v19 = vadd.f32 %v5896_v45, %v18806_v13  ;;  %7616 = vmatpush1.bf16.msra.mxu0 %v7400_v46  ;;  %v18918_v2 = vpop.f32.mrf.mxu1  ;;  %v15385_v13 = vpack.c.bf16 %v18838_v39, %v18824_v16  ;;  %v15387_v16 = vpack.c.bf16 %v18812_v26, %v18800_v47 }
 0x499   : > { %v5898_v12 = vpop.f32.mrf.mxu0  ;;  %7617 = vmatprep.subr.bf16.mxu0 %v15383_v48  ;;  %v15388_v47 = vpack.c.bf16 %v18809_v61, %v18797_v24  ;;  %v15390_v24 = vpack.c.bf16 %v18782_v1, %v18766_v53  ;;  %v14967_v53 = vld [vmem:[%s22269_s2 + $0xac] ss:$12 sps:$4 sm:$0xff]  }
 0x49a   : > { %v14119_v30 = vpack.c.bf16 %v5897_v19, %v5897_v19  ;;  %v5732_v51 = vpop.f32.mrf.mxu1  ;;  %7481 = vmatmul.mubr.bf16.gmra.mxu1 %v14952_v35 }
 0x49b   : > { %v5899_v20 = vpop.f32.mrf.mxu0  ;;  %7490 = vmatprep.mubr.bf16.mxu1 %v14959_v10 }
 0x49c   : > { %6505 = vst.msk [vmem:[#allocation2 + $0x248] sm:$0xf] %vm2448_vm9, %v14119_v30  ;;  %v5900_v42 = vadd.f32 %v5899_v20, %v18817_v58  ;;  %7618 = vmatpush1.bf16.msra.mxu0 %v15384_v60  ;;  %v18932_v11 = vpop.f32.mrf.mxu1 }
 0x49d   : > { %v5901_v23 = vpop.f32.mrf.mxu0  ;;  %7619 = vmatprep.subr.bf16.mxu0 %v15385_v13 }
 0x49e   : > { %v14121_v22 = vpack.c.bf16 %v5900_v42, %v5900_v42  ;;  %v5737_v3 = vpop.f32.mrf.mxu1 }
 0x49f   : > { %v5904_v15 = vpop.f32.mrf.mxu0 }
 0x4a0   : > { %6507 = vst.msk [vmem:[#allocation2 + $0x254] sm:$0xf] %vm2448_vm9, %v14121_v22  ;;  %v5905_v58 = vadd.f32 %v5904_v15, %v18829_v29  ;;  %7620 = vmatpush1.bf16.msra.mxu0 %v15386_v36  ;;  %v18940_v39 = vpop.f32.mrf.mxu1  ;;  %v15389_v29 = vpack.c.bf16 %v18785_v37, %v18769_v55  ;;  %v14976_v36 = vld [vmem:[%s22269_s2 + $0xdc] ss:$12 sps:$4 sm:$0xff]  }
 0x4a1   : > { %v5906_v0 = vpop.f32.mrf.mxu0  ;;  %7621 = vmatprep.subr.bf16.mxu0 %v15387_v16 }
 0x4a2   : > { %v14123_v38 = vpack.c.bf16 %v5905_v58, %v5905_v58  ;;  %v5740_v26 = vpop.f32.mrf.mxu1  ;;  %7491 = vmatmul.mubr.bf16.gmra.mxu1 %v14957_v49 }
 0x4a3   : > { %v5907_v43 = vpop.f32.mrf.mxu0  ;;  %7500 = vmatprep.mubr.bf16.mxu1 %v14963_v33 }
 0x4a4   : > { %6509 = vst.msk [vmem:[#allocation2 + $0x260] sm:$0xf] %vm2448_vm9, %v14123_v38  ;;  %v5908_v18 = vadd.f32 %v5907_v43, %v18843_v28  ;;  %7622 = vmatpush1.bf16.msra.mxu0 %v15388_v47  ;;  %v18954_v8 = vpop.f32.mrf.mxu1  ;;  %v14961_v28 = vld [vmem:[%s22269_s2 + $0x90] ss:$12 sps:$4 sm:$0xff]  }
 0x4a5   : > { %v5909_v32 = vpop.f32.mrf.mxu0  ;;  %7623 = vmatprep.subr.bf16.mxu0 %v15389_v29 }
 0x4a6   : > { %v14125_v57 = vpack.c.bf16 %v5908_v18, %v5908_v18  ;;  %v5745_v61 = vpop.f32.mrf.mxu1  ;;  %v14982_v18 = vld [vmem:[%s22269_s2 + $0xf4] ss:$12 sps:$4 sm:$0xff]  }
 0x4a7   : > { %v5912_v7 = vpop.f32.mrf.mxu0 }
 0x4a8   : > { %6511 = vst.msk [vmem:[#allocation2 + $0x26c] sm:$0xf] %vm2448_vm9, %v14125_v57  ;;  %v5913_v55 = vadd.f32 %v5912_v7, %v18861_v52  ;;  %7624 = vmatpush1.bf16.msra.mxu0 %v15390_v24  ;;  %v18960_v37 = vpop.f32.mrf.mxu1  ;;  %v18974_v52 = vld [vmem:[%s22269_s2 + $0x8] ss:$12 sps:$4 sm:$0xff]  }
 0x4a9   : > { %v5914_v9 = vpop.f32.mrf.mxu0  ;;  %7625 = vmatprep.subr.bf16.mxu0 %v15375_v50  ;;  %v22626_v50 = vmov 0.0  }
 0x4aa   : > { %v14127_v1 = vpack.c.bf16 %v5913_v55, %v5913_v55  ;;  %v5748_v63 = vpop.f32.mrf.mxu1  ;;  %7501 = vmatmul.mubr.bf16.gmra.mxu1 %v14961_v28 }
 0x4ab   : > { %v5915_v31 = vpop.f32.mrf.mxu0  ;;  %7510 = vmatprep.mubr.bf16.mxu1 %v14967_v53 }
 0x4ac   : > { %6513 = vst.msk [vmem:[#allocation2 + $0x278] sm:$0xf] %vm2448_vm9, %v14127_v1  ;;  %v5916_v46 = vadd.f32 %v5915_v31, %v18869_v41  ;;  %7626 = vmatpush1.bf16.msra.mxu0 %v15374_v27  ;;  %v18981_v62 = vpop.f32.mrf.mxu1  ;;  %v14971_v27 = vld [vmem:[%s22269_s2 + $0xc4] ss:$12 sps:$4 sm:$0xff]  }
 0x4ad   : > { %v5917_v59 = vpop.f32.mrf.mxu0  ;;  %14435 = vmatprep.subr.bf16.mxu0 %v22626_v50 }
 0x4ae   : > { %v14129_v5 = vpack.c.bf16 %v5916_v46, %v5916_v46  ;;  %v5753_v4 = vpop.f32.mrf.mxu1  ;;  %v14988_v46 = vld [vmem:[%s22269_s2 + $0x10c] ss:$12 sps:$4 sm:$0xff]  }
 0x4af   : > { %v5920_v45 = vpop.f32.mrf.mxu0  ;;  %13235 = vmatmul.mubr.msk.bf16.vlgmr.msra.gmra.mxu0 %vm3309_vm11, %v18974_v52 }
 0x4b0   : > { %6515 = vst.msk [vmem:[#allocation2 + $0x284] sm:$0xf] %vm2448_vm9, %v14129_v5  ;;  %v5921_v41 = vadd.f32 %v5920_v45, %v18879_v54  ;;  %v18988_v48 = vpop.f32.mrf.mxu1  ;;  %7653 = vmatprep.mubr.bf16.mxu0 %v22616_v21  ;;  %v19000_v54 = vld [vmem:[%s22269_s2 + $0x20] ss:$12 sps:$4 sm:$0xff]  }
 0x4b1   : > { %v5922_v25 = vpop.f32.mrf.mxu0 }
 0x4b2   : > { %v14131_v19 = vpack.c.bf16 %v5921_v41, %v5921_v41  ;;  %v5756_v35 = vpop.f32.mrf.mxu1  ;;  %7511 = vmatmul.mubr.bf16.gmra.mxu1 %v14965_v34 }
 0x4b3   : > { %v5923_v12 = vpop.f32.mrf.mxu0  ;;  %7520 = vmatprep.mubr.bf16.mxu1 %v14971_v27 }
 0x4b4   : > { %6517 = vst.msk [vmem:[#allocation2 + $0x290] sm:$0xf] %vm2448_vm9, %v14131_v19  ;;  %v5924_v10 = vadd.f32 %v5923_v12, %v18884_v56  ;;  %v19004_v30 = vpop.f32.mrf.mxu1  ;;  %v14969_v56 = vld [vmem:[%s22269_s2 + $0xc0] ss:$12 sps:$4 sm:$0xff]  }
 0x4b5   : > { %v5925_v60 = vpop.f32.mrf.mxu0 }
 0x4b6   : > { %v14133_v51 = vpack.c.bf16 %v5924_v10, %v5924_v10  ;;  %v5761_v20 = vpop.f32.mrf.mxu1 }
 0x4b7   : > { %v5928_v13 = vpop.f32.mrf.mxu0  ;;  %13236 = vmatmul.mubr.msk.bf16.gmra.mxu0 %vm3309_vm11, %v19000_v54 }
 0x4b8   : > { %6519 = vst.msk [vmem:[#allocation2 + $0x29c] sm:$0xf] %vm2448_vm9, %v14133_v51  ;;  %v5929_v42 = vadd.f32 %v5928_v13, %v18896_v17  ;;  %v19010_v23 = vpop.f32.mrf.mxu1  ;;  %7663 = vmatprep.mubr.bf16.mxu0 %v22616_v21  ;;  %v19022_v17 = vld [vmem:[%s22269_s2 + $0x38] ss:$12 sps:$4 sm:$0xff]  }
 0x4b9   : > { %v5930_v22 = vpop.f32.mrf.mxu0  ;;  %v14994_v51 = vld [vmem:[%s22269_s2 + $0x124] ss:$12 sps:$4 sm:$0xff]  }
 0x4ba   : > { %v14135_v3 = vpack.c.bf16 %v5929_v42, %v5929_v42  ;;  %v5764_v15 = vpop.f32.mrf.mxu1  ;;  %7521 = vmatmul.mubr.bf16.gmra.mxu1 %v14969_v56  ;;  %v19089_v56 = vld [vmem:[%s22269_s2 + $0x80] ss:$12 sps:$4 sm:$0xff]  }
 0x4bb   : > { %v5931_v16 = vpop.f32.mrf.mxu0  ;;  %7530 = vmatprep.mubr.bf16.mxu1 %v14976_v36 }
 0x4bc   : > { %6521 = vst.msk [vmem:[#allocation2 + $0x2a8] sm:$0xf] %vm2448_vm9, %v14135_v3  ;;  %v5932_v58 = vadd.f32 %v5931_v16, %v18900_v14  ;;  %v19026_v49 = vpop.f32.mrf.mxu1  ;;  %v14974_v14 = vld [vmem:[%s22269_s2 + $0xd8] ss:$12 sps:$4 sm:$0xff]  }
 0x4bd   : > { %v5933_v0 = vpop.f32.mrf.mxu0 }
 0x4be   : > { %v14137_v33 = vpack.c.bf16 %v5932_v58, %v5932_v58  ;;  %v5769_v38 = vpop.f32.mrf.mxu1 }
 0x4bf   : > { %v5936_v47 = vpop.f32.mrf.mxu0  ;;  %13237 = vmatmul.mubr.msk.bf16.gmra.mxu0 %vm3309_vm11, %v19022_v17  ;;  %v14939_v0 = vld [vmem:[#allocation2 + $0x290] ss:$12 sps:$4 sm:$0xff]   ;;  %v14992_v38 = vld [vmem:[%s22269_s2 + $0x120] ss:$12 sps:$4 sm:$0xff]  }
 0x4c0   : > { %6523 = vst.msk [vmem:[#allocation2 + $0x2b4] sm:$0xf] %vm2448_vm9, %v14137_v33  ;;  %v5937_v26 = vadd.f32 %v5936_v47, %v18910_v44  ;;  %v19032_v43 = vpop.f32.mrf.mxu1  ;;  %7673 = vmatprep.mubr.bf16.mxu0 %v22616_v21  ;;  %v19044_v44 = vld [vmem:[%s22269_s2 + $0x50] ss:$12 sps:$4 sm:$0xff]  }
 0x4c1   : > { %v5938_v29 = vpop.f32.mrf.mxu0 }
 0x4c2   : > { %v14139_v32 = vpack.c.bf16 %v5937_v26, %v5937_v26  ;;  %v5772_v57 = vpop.f32.mrf.mxu1  ;;  %7531 = vmatmul.mubr.bf16.gmra.mxu1 %v14974_v14  ;;  %v14999_v26 = vld [vmem:[%s22269_s2 + $0x13c] ss:$12 sps:$4 sm:$0xff]  }
 0x4c3   : > { %v5939_v24 = vpop.f32.mrf.mxu0  ;;  %7540 = vmatprep.mubr.bf16.mxu1 %v14982_v18 }
 0x4c4   : > { %6525 = vst.msk [vmem:[#allocation2 + $0x2c0] sm:$0xf] %vm2448_vm9, %v14139_v32  ;;  %v5940_v61 = vadd.f32 %v5939_v24, %v18918_v2  ;;  %v19048_v7 = vpop.f32.mrf.mxu1  ;;  %v14980_v2 = vld [vmem:[%s22269_s2 + $0xf0] ss:$12 sps:$4 sm:$0xff]   ;;  %v19113_v32 = vld [vmem:[%s22269_s2 + $0x98] ss:$12 sps:$4 sm:$0xff]  }
 0x4c5   : > { %v5941_v55 = vpop.f32.mrf.mxu0 }
 0x4c6   : > { %v14141_v28 = vpack.c.bf16 %v5940_v61, %v5940_v61  ;;  %v5777_v9 = vpop.f32.mrf.mxu1 }
 0x4c7   : > { %v5944_v53 = vpop.f32.mrf.mxu0  ;;  %13238 = vmatmul.mubr.msk.bf16.gmra.mxu0 %vm3309_vm11, %v19044_v44 }
 0x4c8   : > { %6527 = vst.msk [vmem:[#allocation2 + $0x2cc] sm:$0xf] %vm2448_vm9, %v14141_v28  ;;  %v5945_v1 = vadd.f32 %v5944_v53, %v18932_v11  ;;  %v19054_v63 = vpop.f32.mrf.mxu1  ;;  %7683 = vmatprep.mubr.bf16.mxu0 %v22616_v21  ;;  %v19066_v11 = vld [vmem:[%s22269_s2 + $0x68] ss:$12 sps:$4 sm:$0xff]   ;;  %v14945_v53 = vld [vmem:[#allocation2 + $0x260] ss:$12 sps:$4 sm:$0xff]  }
 0x4c9   : > { %v5946_v31 = vpop.f32.mrf.mxu0 }
 0x4ca   : > { %v14143_v59 = vpack.c.bf16 %v5945_v1, %v5945_v1  ;;  %v5780_v5 = vpop.f32.mrf.mxu1  ;;  %7541 = vmatmul.mubr.bf16.gmra.mxu1 %v14980_v2  ;;  %v14997_v2 = vld [vmem:[%s22269_s2 + $0x138] ss:$12 sps:$4 sm:$0xff]  }
 0x4cb   : > { %v5947_v4 = vpop.f32.mrf.mxu0  ;;  %7550 = vmatprep.mubr.bf16.mxu1 %v14988_v46  ;;  %v15003_v46 = vld [vmem:[%s22269_s2 + $0x154] ss:$12 sps:$4 sm:$0xff]  }
 0x4cc   : > { %6529 = vst.msk [vmem:[#allocation2 + $0x2d8] sm:$0xf] %vm2448_vm9, %v14143_v59  ;;  %v5948_v45 = vadd.f32 %v5947_v4, %v18940_v39  ;;  %v19070_v41 = vpop.f32.mrf.mxu1  ;;  %v14986_v39 = vld [vmem:[%s22269_s2 + $0x108] ss:$12 sps:$4 sm:$0xff]  }
 0x4cd   : > { %v5949_v34 = vpop.f32.mrf.mxu0 }
 0x4ce   : > { %v14145_v25 = vpack.c.bf16 %v5948_v45, %v5948_v45  ;;  %v5785_v27 = vpop.f32.mrf.mxu1  ;;  %v19137_v45 = vld [vmem:[%s22269_s2 + $0xb0] ss:$12 sps:$4 sm:$0xff]  }
 0x4cf   : > { %v5952_v19 = vpop.f32.mrf.mxu0  ;;  %v14933_v35 = vld [vmem:[#allocation2 + $0x2c0] ss:$12 sps:$4 sm:$0xff]   ;;  %13239 = vmatmul.mubr.msk.bf16.gmra.mxu0 %vm3309_vm11, %v19066_v11 }
 0x4d0   : > { %6531 = vst.msk [vmem:[#allocation2 + $0x2e4] sm:$0xf] %vm2448_vm9, %v14145_v25  ;;  %v5953_v12 = vadd.f32 %v5952_v19, %v18954_v8  ;;  %v19076_v10 = vpop.f32.mrf.mxu1  ;;  %7693 = vmatprep.mubr.bf16.mxu0 %v22616_v21  ;;  %7815 = vmatpush1.bf16.msra.mxu1 %v14933_v35  ;;  %v14938_v8 = vld [vmem:[#allocation2 + $0x2a8] ss:$12 sps:$4 sm:$0xff]  }
 0x4d1   : > { %v5954_v60 = vpop.f32.mrf.mxu0  ;;  %7816 = vmatprep.subr.bf16.mxu1 %v22616_v21 }
 0x4d2   : > { %v14147_v20 = vpack.c.bf16 %v5953_v12, %v5953_v12  ;;  %v5788_v13 = vpop.f32.mrf.mxu1  ;;  %7551 = vmatmul.mubr.bf16.gmra.mxu1 %v14986_v39  ;;  %v14951_v39 = vld [vmem:[#allocation2 + $0x230] ss:$12 sps:$4 sm:$0xff]  }
 0x4d3   : > { %v5955_v42 = vpop.f32.mrf.mxu0  ;;  %7560 = vmatprep.mubr.bf16.mxu1 %v14994_v51  ;;  %v19154_v51 = vld [vmem:[%s22269_s2 + $0x150] ss:$12 sps:$4 sm:$0xff]   ;;  %v19159_v13 = vld [vmem:[%s22269_s2 + $0x16c] ss:$12 sps:$4 sm:$0xff]  }
 0x4d4   : > { %6533 = vst.msk [vmem:[#allocation2 + $0x2f0] sm:$0xf] %vm2448_vm9, %v14147_v20  ;;  %v5956_v22 = vadd.f32 %v5955_v42, %v18960_v37  ;;  %v19093_v36 = vpop.f32.mrf.mxu1  ;;  %7817 = vmatpush1.bf16.msra.mxu1 %v14938_v8 }
 0x4d5   : > { %v5957_v3 = vpop.f32.mrf.mxu0  ;;  %7818 = vmatprep.subr.bf16.mxu1 %v22616_v21 }
 0x4d6   : > { %v14149_v15 = vpack.c.bf16 %v5956_v22, %v5956_v22  ;;  %v5793_v16 = vpop.f32.mrf.mxu1  ;;  %v14956_v22 = vld [vmem:[#allocation2 + $0x218] ss:$12 sps:$4 sm:$0xff]   ;;  %v19165_v3 = vld [vmem:[%s22269_s2 + $0xc8] ss:$12 sps:$4 sm:$0xff]  }
 0x4d7   : > { %v5960_v58 = vpop.f32.mrf.mxu0  ;;  %13240 = vmatmul.mubr.msk.bf16.gmra.mxu0 %vm3309_vm11, %v19089_v56 }
 0x4d8   : > { %6535 = vst.msk [vmem:[#allocation2 + $0x2fc] sm:$0xf] %vm2448_vm9, %v14149_v15  ;;  %v5961_v33 = vadd.f32 %v5960_v58, %v18981_v62  ;;  %v19100_v37 = vpop.f32.mrf.mxu1  ;;  %7703 = vmatprep.mubr.bf16.mxu0 %v22616_v21  ;;  %7819 = vmatpush1.bf16.msra.mxu1 %v14939_v0  ;;  %v14944_v62 = vld [vmem:[#allocation2 + $0x278] ss:$12 sps:$4 sm:$0xff]  }
 0x4d9   : > { %v5962_v47 = vpop.f32.mrf.mxu0  ;;  %7820 = vmatprep.subr.bf16.mxu1 %v22616_v21 }
 0x4da   : > { %v14151_v14 = vpack.c.bf16 %v5961_v33, %v5961_v33  ;;  %v5796_v29 = vpop.f32.mrf.mxu1  ;;  %7561 = vmatmul.mubr.bf16.gmra.mxu1 %v14992_v38 }
 0x4db   : > { %v5963_v18 = vpop.f32.mrf.mxu0  ;;  %7570 = vmatprep.mubr.bf16.mxu1 %v14999_v26  ;;  %v19184_v26 = vld [vmem:[%s22269_s2 + $0x168] ss:$12 sps:$4 sm:$0xff]   ;;  %v19189_v29 = vld [vmem:[%s22269_s2 + $0x184] ss:$12 sps:$4 sm:$0x7f]  }
 0x4dc   : > { %6537 = vst.msk [vmem:[#allocation2 + $0x308] sm:$0xf] %vm2448_vm9, %v14151_v14  ;;  %v5964_v57 = vadd.f32 %v5963_v18, %v18988_v48  ;;  %v19117_v24 = vpop.f32.mrf.mxu1  ;;  %7821 = vmatpush1.bf16.msra.mxu1 %v14944_v62 }
 0x4dd   : > { %v5965_v61 = vpop.f32.mrf.mxu0  ;;  %7822 = vmatprep.subr.bf16.mxu1 %v22616_v21 }
 0x4de   : > { %v14153_v55 = vpack.c.bf16 %v5964_v57, %v5964_v57  ;;  %v5801_v28 = vpop.f32.mrf.mxu1 }
 0x4df   : > { %v5968_v9 = vpop.f32.mrf.mxu0  ;;  %13241 = vmatmul.mubr.msk.bf16.gmra.mxu0 %vm3309_vm11, %v19113_v32 }
 0x4e0   : > { %6539 = vst.msk [vmem:[#allocation2 + $0x314] sm:$0xf] %vm2448_vm9, %v14153_v55  ;;  %v5969_v1 = vadd.f32 %v5968_v9, %v19004_v30  ;;  %v19124_v48 = vpop.f32.mrf.mxu1  ;;  %7713 = vmatprep.mubr.bf16.mxu0 %v22616_v21  ;;  %7823 = vmatpush1.bf16.msra.mxu1 %v14945_v53  ;;  %v14950_v30 = vld [vmem:[#allocation2 + $0x248] ss:$12 sps:$4 sm:$0xff]  }
 0x4e1   : > { %v5970_v31 = vpop.f32.mrf.mxu0  ;;  %7824 = vmatprep.subr.bf16.mxu1 %v22616_v21 }
 0x4e2   : > { %v14155_v59 = vpack.c.bf16 %v5969_v1, %v5969_v1  ;;  %v5804_v5 = vpop.f32.mrf.mxu1  ;;  %7571 = vmatmul.mubr.bf16.gmra.mxu1 %v14997_v2 }
 0x4e3   : > { %v5971_v4 = vpop.f32.mrf.mxu0  ;;  %7580 = vmatprep.mubr.bf16.mxu1 %v15003_v46 }
 0x4e4   : > { %6541 = vst.msk [vmem:[#allocation2 + $0x320] sm:$0xf] %vm2448_vm9, %v14155_v59  ;;  %v5972_v34 = vadd.f32 %v5971_v4, %v19010_v23  ;;  %v19141_v25 = vpop.f32.mrf.mxu1  ;;  %7825 = vmatpush1.bf16.msra.mxu1 %v14950_v30  ;;  %v19217_v30 = vld [vmem:[%s22269_s2 + $0xf8] ss:$12 sps:$4 sm:$0xff]  }
 0x4e5   : > { %v5973_v27 = vpop.f32.mrf.mxu0  ;;  %7826 = vmatprep.subr.bf16.mxu1 %v22616_v21 }
 0x4e6   : > { %v14157_v19 = vpack.c.bf16 %v5972_v34, %v5972_v34  ;;  %v5809_v35 = vpop.f32.mrf.mxu1 }
 0x4e7   : > { %v5976_v12 = vpop.f32.mrf.mxu0  ;;  %13242 = vmatmul.mubr.msk.bf16.gmra.mxu0 %vm3309_vm11, %v19137_v45 }
 0x4e8   : > { %6543 = vst.msk [vmem:[#allocation2 + $0x32c] sm:$0xf] %vm2448_vm9, %v14157_v19  ;;  %v5977_v60 = vadd.f32 %v5976_v12, %v19026_v49  ;;  %v19148_v23 = vpop.f32.mrf.mxu1  ;;  %7723 = vmatprep.mubr.bf16.mxu0 %v22616_v21  ;;  %7827 = vmatpush1.bf16.msra.mxu1 %v14951_v39  ;;  %v15268_v19 = vld [vmem:[%s22269_s2 + $0x4] ss:$12 sps:$4 sm:$0xff]  }
 0x4e9   : > { %v5978_v20 = vpop.f32.mrf.mxu0  ;;  %7828 = vmatprep.subr.bf16.mxu1 %v22616_v21 }
 0x4ea   : > { %v14159_v42 = vpack.c.bf16 %v5977_v60, %v5977_v60  ;;  %v5812_v49 = vpop.f32.mrf.mxu1  ;;  %7581 = vmatmul.mubr.bf16.gmra.mxu1 %v19154_v51 }
 0x4eb   : > { %v5979_v8 = vpop.f32.mrf.mxu0  ;;  %7590 = vmatprep.mubr.bf16.mxu1 %v19159_v13 }
 0x4ec   : > { %6545 = vst.msk [vmem:[#allocation2 + $0x338] sm:$0xf] %vm2448_vm9, %v14159_v42  ;;  %v5980_v15 = vadd.f32 %v5979_v8, %v19032_v43  ;;  %v19169_v16 = vpop.f32.mrf.mxu1  ;;  %7829 = vmatpush1.bf16.msra.mxu1 %v14956_v22  ;;  %v19237_v22 = vld [vmem:[%s22269_s2 + $0x110] ss:$12 sps:$4 sm:$0xff]  }
 0x4ed   : > { %v5981_v58 = vpop.f32.mrf.mxu0  ;;  %7830 = vmatprep.subr.bf16.mxu1 %v22616_v21 }
 0x4ee   : > { %v14161_v0 = vpack.c.bf16 %v5980_v15, %v5980_v15  ;;  %v5817_v33 = vpop.f32.mrf.mxu1 }
 0x4ef   : > { %v5984_v38 = vpop.f32.mrf.mxu0  ;;  %13243 = vmatmul.mubr.msk.bf16.gmra.mxu0 %vm3309_vm11, %v19165_v3 }
 0x4f0   : > { %6547 = vst.msk [vmem:[#allocation2 + $0x344] sm:$0xf] %vm2448_vm9, %v14161_v0  ;;  %v5985_v43 = vadd.f32 %v5984_v38, %v19048_v7  ;;  %v19178_v47 = vpop.f32.mrf.mxu1  ;;  %7733 = vmatprep.mubr.bf16.mxu0 %v22616_v21  ;;  %v19194_v7 = vld [vmem:[%s22269_s2 + $0xe0] ss:$12 sps:$4 sm:$0xff]  }
 0x4f1   : > { %v5986_v14 = vpop.f32.mrf.mxu0 }
 0x4f2   : > { %v14163_v18 = vpack.c.bf16 %v5985_v43, %v5985_v43  ;;  %v5820_v62 = vpop.f32.mrf.mxu1  ;;  %7591 = vmatmul.mubr.bf16.gmra.mxu1 %v19184_v26 }
 0x4f3   : > { %v5987_v57 = vpop.f32.mrf.mxu0  ;;  %7600 = vmatprep.mubr.bf16.mxu1 %v19189_v29 }
 0x4f4   : > { %6549 = vst.msk [vmem:[#allocation2 + $0x350] sm:$0xf] %vm2448_vm9, %v14163_v18  ;;  %v5988_v61 = vadd.f32 %v5987_v57, %v19054_v63  ;;  %v19198_v55 = vpop.f32.mrf.mxu1  ;;  %v19212_v63 = vld [vmem:[%s22269_s2 + $0x180] ss:$12 sps:$4 sm:$0x7f]  }
 0x4f5   : > { %v5989_v28 = vpop.f32.mrf.mxu0 }
 0x4f6   : > { %v14165_v9 = vpack.c.bf16 %v5988_v61, %v5988_v61  ;;  %v5825_v53 = vpop.f32.mrf.mxu1  ;;  %v19253_v61 = vld [vmem:[%s22269_s2 + $0x128] ss:$12 sps:$4 sm:$0xff]  }
 0x4f7   : > { %v5992_v1 = vpop.f32.mrf.mxu0  ;;  %13244 = vmatmul.mubr.msk.bf16.gmra.mxu0 %vm3309_vm11, %v19194_v7 }
 0x4f8   : > { %6551 = vst.msk [vmem:[#allocation2 + $0x35c] sm:$0xf] %vm2448_vm9, %v14165_v9  ;;  %v5993_v2 = vadd.f32 %v5992_v1, %v19070_v41  ;;  %v19206_v31 = vpop.f32.mrf.mxu1  ;;  %7743 = vmatprep.mubr.bf16.mxu0 %v22616_v21 }
 0x4f9   : > { %v5994_v46 = vpop.f32.mrf.mxu0 }
 0x4fa   : > { %v14167_v59 = vpack.c.bf16 %v5993_v2, %v5993_v2  ;;  %v5828_v5 = vpop.f32.mrf.mxu1  ;;  %7601 = vmatmul.mubr.bf16.gmra.mxu1 %v19212_v63 }
 0x4fb   : > { %v5995_v4 = vpop.f32.mrf.mxu0  ;;  %7846 = vmatprep.mubr.bf16.mxu1 %v15268_v19 }
 0x4fc   : > { %6553 = vst.msk [vmem:[#allocation2 + $0x368] sm:$0xf] %vm2448_vm9, %v14167_v59  ;;  %v5996_v41 = vadd.f32 %v5995_v4, %v19076_v10  ;;  %v19221_v34 = vpop.f32.mrf.mxu1  ;;  %v19266_v4 = vld [vmem:[%s22269_s2 + $0x140] ss:$12 sps:$4 sm:$0xff]  }
 0x4fd   : > { %v5997_v27 = vpop.f32.mrf.mxu0 }
 0x4fe   : > { %v14169_v35 = vpack.c.bf16 %v5996_v41, %v5996_v41  ;;  %v5833_v12 = vpop.f32.mrf.mxu1 }
 0x4ff   : > { %v6000_v39 = vpop.f32.mrf.mxu0  ;;  %13245 = vmatmul.mubr.msk.bf16.gmra.mxu0 %vm3309_vm11, %v19217_v30 }
 0x500   : > { %6555 = vst.msk [vmem:[#allocation2 + $0x374] sm:$0xf] %vm2448_vm9, %v14169_v35  ;;  %v6001_v10 = vadd.f32 %v6000_v39, %v19093_v36  ;;  %v19231_v60 = vpop.f32.mrf.mxu1  ;;  %7753 = vmatprep.mubr.bf16.mxu0 %v22616_v21  ;;  %v14979_v35 = vld [vmem:[#allocation2 + $0x350] ss:$12 sps:$4 sm:$0xff]  }
 0x501   : > { %v6002_v20 = vpop.f32.mrf.mxu0 }
 0x502   : > { %v14171_v42 = vpack.c.bf16 %v6001_v10, %v6001_v10  ;;  %v5836_v49 = vpop.f32.mrf.mxu1  ;;  %v14984_v20 = vld [vmem:[#allocation2 + $0x338] ss:$12 sps:$4 sm:$0xff]  }
 0x503   : > { %v6003_v8 = vpop.f32.mrf.mxu0 }
 0x504   : > { %6557 = vst.msk [vmem:[#allocation2 + $0x380] sm:$0xf] %vm2448_vm9, %v14171_v42  ;;  %v6004_v15 = vadd.f32 %v6003_v8, %v19100_v37  ;;  %v19241_v58 = vpop.f32.mrf.mxu1  ;;  %v19280_v42 = vld [vmem:[%s22269_s2 + $0x158] ss:$12 sps:$4 sm:$0xff]  }
 0x505   : > { %v6005_v36 = vpop.f32.mrf.mxu0 }
 0x506   : > { %v14173_v0 = vpack.c.bf16 %v6004_v15, %v6004_v15  ;;  %v5841_v33 = vpop.f32.mrf.mxu1  ;;  %v14985_v36 = vld [vmem:[#allocation2 + $0x320] ss:$12 sps:$4 sm:$0xff]  }
 0x507   : > { %v6008_v38 = vpop.f32.mrf.mxu0  ;;  %13246 = vmatmul.mubr.msk.bf16.gmra.mxu0 %vm3309_vm11, %v19237_v22 }
 0x508   : > { %6559 = vst.msk [vmem:[#allocation2 + $0x38c] sm:$0xf] %vm2448_vm9, %v14173_v0  ;;  %v6009_v43 = vadd.f32 %v6008_v38, %v19117_v24  ;;  %v19247_v14 = vpop.f32.mrf.mxu1  ;;  %7763 = vmatprep.mubr.bf16.mxu0 %v22616_v21 }
 0x509   : > { %v6010_v18 = vpop.f32.mrf.mxu0 }
 0x50a   : > { %v14175_v62 = vpack.c.bf16 %v6009_v43, %v6009_v43  ;;  %v5844_v37 = vpop.f32.mrf.mxu1  ;;  %v14990_v43 = vld [vmem:[#allocation2 + $0x308] ss:$12 sps:$4 sm:$0xff]   ;;  %v19294_v18 = vld [vmem:[%s22269_s2 + $0x170] ss:$12 sps:$4 sm:$0xff]  }
 0x50b   : > { %v6011_v57 = vpop.f32.mrf.mxu0 }
 0x50c   : > { %6561 = vst.msk [vmem:[#allocation2 + $0x398] sm:$0xf] %vm2448_vm9, %v14175_v62  ;;  %v6012_v28 = vadd.f32 %v6011_v57, %v19124_v48  ;;  %v14978_v48 = vld [vmem:[#allocation2 + $0x368] ss:$12 sps:$4 sm:$0xff]  }
 0x50d   : > { %v6013_v9 = vpop.f32.mrf.mxu0 }
 0x50e   : > { %v14177_v53 = vpack.c.bf16 %v6012_v28, %v6012_v28  ;;  %v14991_v28 = vld [vmem:[#allocation2 + $0x2f0] ss:$12 sps:$4 sm:$0xff]  }
 0x50f   : > { %v6016_v24 = vpop.f32.mrf.mxu0  ;;  %v14973_v1 = vld [vmem:[#allocation2 + $0x380] ss:$12 sps:$4 sm:$0xff]   ;;  %13247 = vmatmul.mubr.msk.bf16.gmra.mxu0 %vm3309_vm11, %v19253_v61 }
 0x510   : > { %6563 = vst.msk [vmem:[#allocation2 + $0x3a4] sm:$0xf] %vm2448_vm9, %v14177_v53  ;;  %v6017_v2 = vadd.f32 %v6016_v24, %v19141_v25  ;;  %7773 = vmatprep.mubr.bf16.mxu0 %v22616_v21  ;;  %7831 = vmatpush2.bf16.msra.mxu1 %v14973_v1  ;;  %v15021_v1 = vld [vmem:[%s22268_s1 + $0xac] ss:$12 sps:$4 sm:$0xff]  }
 0x511   : > { %v6018_v46 = vpop.f32.mrf.mxu0  ;;  %7832 = vmatprep.subr.bf16.mxu1 %v22616_v21 }
 0x512   : > { %v14179_v59 = vpack.c.bf16 %v6017_v2, %v6017_v2  ;;  %v14996_v46 = vld [vmem:[#allocation2 + $0x2d8] ss:$12 sps:$4 sm:$0xff]  }
 0x513   : > { %v6019_v5 = vpop.f32.mrf.mxu0 }
 0x514   : > { %6565 = vst.msk [vmem:[#allocation2 + $0x3b0] sm:$0xf] %vm2448_vm9, %v14179_v59  ;;  %v6020_v41 = vadd.f32 %v6019_v5, %v19148_v23  ;;  %7833 = vmatpush2.bf16.msra.mxu1 %v14978_v48  ;;  %v15019_v5 = vld [vmem:[%s22268_s1 + $0xa8] ss:$12 sps:$4 sm:$0xff]  }
 0x515   : > { %v6021_v27 = vpop.f32.mrf.mxu0  ;;  %7834 = vmatprep.subr.bf16.mxu1 %v22616_v21 }
 0x516   : > { %v14181_v25 = vpack.c.bf16 %v6020_v41, %v6020_v41  ;;  %v15024_v41 = vld [vmem:[%s22268_s1 + $0x94] ss:$12 sps:$4 sm:$0xff]  }
 0x517   : > { %v6024_v19 = vpop.f32.mrf.mxu0  ;;  %13248 = vmatmul.mubr.msk.bf16.gmra.mxu0 %vm3309_vm11, %v19266_v4 }
 0x518   : > { %6567 = vst.msk [vmem:[#allocation2 + $0x3bc] sm:$0xf] %vm2448_vm9, %v14181_v25  ;;  %v6025_v12 = vadd.f32 %v6024_v19, %v19169_v16  ;;  %7783 = vmatprep.mubr.bf16.mxu0 %v22616_v21  ;;  %7835 = vmatpush2.bf16.msra.mxu1 %v14979_v35  ;;  %v15270_v35 = vld [vmem:[%s22269_s2 + $0x1c] ss:$12 sps:$4 sm:$0xff]  }
 0x519   : > { %v6026_v39 = vpop.f32.mrf.mxu0  ;;  %7836 = vmatprep.subr.bf16.mxu1 %v22616_v21 }
 0x51a   : > { %v14183_v10 = vpack.c.bf16 %v6025_v12, %v6025_v12  ;;  %v15022_v12 = vld [vmem:[%s22268_s1 + $0x90] ss:$12 sps:$4 sm:$0xff]  }
 0x51b   : > { %v6027_v23 = vpop.f32.mrf.mxu0  ;;  %v15027_v39 = vld [vmem:[%s22268_s1 + $0x7c] ss:$12 sps:$4 sm:$0xff]  }
 0x51c   : > { %6569 = vst.msk [vmem:[#allocation2 + $0x3c8] sm:$0xf] %vm2448_vm9, %v14183_v10  ;;  %v6028_v49 = vadd.f32 %v6027_v23, %v19178_v47  ;;  %7837 = vmatpush2.bf16.msra.mxu1 %v14984_v20  ;;  %v6585_v20 = vld [vmem:[#allocation2 + $0x41c] sm:$0x1] }
 0x51d   : > { %v6029_v8 = vpop.f32.mrf.mxu0  ;;  %7838 = vmatprep.subr.bf16.mxu1 %v22616_v21 }
 0x51e   : > { %v14185_v16 = vpack.c.bf16 %v6028_v49, %v6028_v49  ;;  %v15025_v8 = vld [vmem:[%s22268_s1 + $0x78] ss:$12 sps:$4 sm:$0xff]  }
 0x51f   : > { %v6032_v15 = vpop.f32.mrf.mxu0  ;;  %13249 = vmatmul.mubr.msk.bf16.gmra.mxu0 %vm3309_vm11, %v19280_v42 }
 0x520   : > { %6571 = vst.msk [vmem:[#allocation2 + $0x3d4] sm:$0xf] %vm2448_vm9, %v14185_v16  ;;  %v6033_v0 = vadd.f32 %v6032_v15, %v19198_v55  ;;  %7793 = vmatprep.mubr.bf16.mxu0 %v22616_v21  ;;  %7839 = vmatpush2.bf16.msra.mxu1 %v14985_v36  ;;  %v15030_v15 = vld [vmem:[%s22268_s1 + $0x64] ss:$12 sps:$4 sm:$0xff]   ;;  %v13438_v36 = vld [vmem:[%s15591_s14 + $0xd18] sm:$0xff] }
 0x521   : > { %v6034_v33 = vpop.f32.mrf.mxu0  ;;  %7840 = vmatprep.subr.bf16.mxu1 %v22616_v21 }
 0x522   : > { %v14187_v38 = vpack.c.bf16 %v6033_v0, %v6033_v0  ;;  %v15272_v33 = vld [vmem:[%s22269_s2 + $0x34] ss:$12 sps:$4 sm:$0xff]  }
 0x523   : > { %v6035_v47 = vpop.f32.mrf.mxu0 }
 0x524   : > { %6573 = vst.msk [vmem:[#allocation2 + $0x3e0] sm:$0xf] %vm2448_vm9, %v14187_v38  ;;  %v6036_v62 = vadd.f32 %v6035_v47, %v19206_v31  ;;  %7841 = vmatpush2.bf16.msra.mxu1 %v14990_v43  ;;  %v15015_v31 = vld [vmem:[%s22269_s2 + $0x188] ss:$12 sps:$4 sm:$0x7f]  }
 0x525   : > { %v6037_v37 = vpop.f32.mrf.mxu0  ;;  %7842 = vmatprep.subr.bf16.mxu1 %v22616_v21  ;;  %v15028_v38 = vld [vmem:[%s22268_s1 + $0x60] ss:$12 sps:$4 sm:$0xff]  }
 0x526   : > { %v14189_v55 = vpack.c.bf16 %v6036_v62, %v6036_v62  ;;  %v15033_v47 = vld [vmem:[%s22268_s1 + $0x4c] ss:$12 sps:$4 sm:$0xff]   ;;  %v15031_v62 = vld [vmem:[%s22268_s1 + $0x48] ss:$12 sps:$4 sm:$0xff]  }
 0x527   : > { %v6040_v57 = vpop.f32.mrf.mxu0  ;;  %13250 = vmatmul.mubr.msk.bf16.gmra.mxu0 %vm3309_vm11, %v19294_v18 }
 0x528   : > { %6575 = vst.msk [vmem:[#allocation2 + $0x3ec] sm:$0xf] %vm2448_vm9, %v14189_v55  ;;  %v6041_v9 = vadd.f32 %v6040_v57, %v19221_v34  ;;  %7803 = vmatprep.mubr.bf16.mxu0 %v22616_v21  ;;  %7843 = vmatpush2.bf16.msra.mxu1 %v14991_v28  ;;  %v15039_v55 = vld [vmem:[%s22268_s1 + $0x34] ss:$12 sps:$4 sm:$0xff]   ;;  %v15273_v28 = vld [vmem:[%s22269_s2 + $0x30] ss:$12 sps:$4 sm:$0xff]  }
 0x529   : > { %v6042_v53 = vpop.f32.mrf.mxu0  ;;  %7844 = vmatprep.subr.bf16.mxu1 %v22616_v21 }
 0x52a   : > { %v14191_v24 = vpack.c.bf16 %v6041_v9, %v6041_v9  ;;  %v15274_v53 = vld [vmem:[%s22269_s2 + $0x4c] ss:$12 sps:$4 sm:$0xff]  }
 0x52b   : > { %v6043_v2 = vpop.f32.mrf.mxu0 }
 0x52c   : > { %6577 = vst.msk [vmem:[#allocation2 + $0x3f8] sm:$0xf] %vm2448_vm9, %v14191_v24  ;;  %v6044_v34 = vadd.f32 %v6043_v2, %v19231_v60  ;;  %7845 = vmatpush2.bf16.msra.mxu1 %v14996_v46  ;;  %v15269_v60 = vld [vmem:[%s22269_s2] ss:$12 sps:$4 sm:$0xff]   ;;  %v15037_v24 = vld [vmem:[%s22268_s1 + $0x30] ss:$12 sps:$4 sm:$0xff]  }
 0x52d   : > { %v6045_v59 = vpop.f32.mrf.mxu0  ;;  %9165 = vmatprep.subr.bf16.mxu1 %v15021_v1  ;;  %v15045_v2 = vld [vmem:[%s22268_s1 + $0x1c] ss:$12 sps:$4 sm:$0xff]  }
 0x52e   : > { %v14193_v48 = vpack.c.bf16 %v6044_v34, %v6044_v34 }
 0x52f   : > { %v6048_v27 = vpop.f32.mrf.mxu0  ;;  %13251 = vmatmul.mubr.msk.bf16.gmra.mxu0 %vm3309_vm11, %v15015_v31  ;;  %7847 = vmatmul.mubr.bf16.vlgmr.msra.gmra.mxu1 %v15269_v60  ;;  %v15014_v60 = vld [vmem:[#allocation2 + $0x3e0] ss:$12 sps:$4 sm:$0xff]  }
 0x530   : > { %6579 = vst.msk [vmem:[#allocation2 + $0x404] sm:$0xf] %vm2448_vm9, %v14193_v48  ;;  %v6049_v25 = vadd.f32 %v6048_v27, %v19241_v58  ;;  %14447 = vmatprep.mubr.msk.bf16.mxu0 %vm15444_vm12, %v22626_v50  ;;  %7854 = vmatprep.mubr.bf16.mxu1 %v15270_v35  ;;  %v15051_v48 = vld [vmem:[%s22268_s1 + $0x4] ss:$12 sps:$4 sm:$0xff]   ;;  %v15049_v35 = vld [vmem:[%s22268_s1] ss:$12 sps:$4 sm:$0xff]  }
 0x531   : > { %v6050_v19 = vpop.f32.mrf.mxu0  ;;  %9166 = vmatpush1.bf16.msra.mxu1 %v15019_v5  ;;  %v15043_v5 = vld [vmem:[%s22268_s1 + $0x18] ss:$12 sps:$4 sm:$0xff]  }
 0x532   : > { %v14195_v58 = vpack.c.bf16 %v6049_v25, %v6049_v25  ;;  %9167 = vmatprep.subr.bf16.mxu1 %v15024_v41  ;;  %v15275_v41 = vld [vmem:[%s22269_s2 + $0x48] ss:$12 sps:$4 sm:$0xff]   ;;  %v15276_v25 = vld [vmem:[%s22269_s2 + $0x64] ss:$12 sps:$4 sm:$0xff]  }
 0x533   : > { %v6051_v10 = vpop.f32.mrf.mxu0 }
 0x534   : > { %6581 = vst.msk [vmem:[#allocation2 + $0x410] sm:$0xf] %vm2448_vm9, %v14195_v58  ;;  %v6052_v23 = vadd.f32 %v6051_v10, %v19247_v14  ;;  %v15271_v14 = vld [vmem:[%s22269_s2 + $0x18] ss:$12 sps:$4 sm:$0xff]  }
 0x535   : > { %v6053_v49 = vpop.f32.mrf.mxu0  ;;  %9168 = vmatpush1.bf16.msra.mxu1 %v15022_v12  ;;  %v15057_v12 = vld [vmem:[%s22268_s1 + $0x16c] ss:$12 sps:$4 sm:$0xff]  }
 0x536   : > { %v14197_v16 = vpack.c.bf16 %v6052_v23, %v6052_v23  ;;  %9169 = vmatprep.subr.bf16.mxu1 %v15027_v39  ;;  %v15016_v39 = vld [vmem:[#allocation2 + $0x3c8] ss:$12 sps:$4 sm:$0xff]   ;;  %v15277_v49 = vld [vmem:[%s22269_s2 + $0x60] ss:$12 sps:$4 sm:$0xff]  }
 0x537   : > { %7855 = vmatmul.mubr.bf16.gmra.mxu1 %v15271_v14  ;;  %v15010_v34 = vld [vmem:[#allocation2 + $0x3f8] ss:$12 sps:$4 sm:$0xff]   ;;  %v15055_v23 = vld [vmem:[%s22268_s1 + $0x168] ss:$12 sps:$4 sm:$0xff]   ;;  %v15061_v14 = vld [vmem:[%s22268_s1 + $0x150] ss:$12 sps:$4 sm:$0xff]  }
 0x538   : > { %v6586_v0 = vsel %vm16886_vm14, %v14197_v16, %v6585_v20  ;;  %7862 = vmatprep.mubr.bf16.mxu1 %v15272_v33  ;;  %v15063_v20 = vld [vmem:[%s22268_s1 + $0x154] ss:$12 sps:$4 sm:$0xff]   ;;  %v15278_v16 = vld [vmem:[%s22269_s2 + $0x7c] ss:$12 sps:$4 sm:$0xff]  }
 0x539   : > { %6587 = vst [vmem:[#allocation2 + $0x41c] sm:$0x1] %v6586_v0  ;;  %9170 = vmatpush1.bf16.msra.mxu1 %v15025_v8  ;;  %v15069_v33 = vld [vmem:[%s22268_s1 + $0x13c] ss:$12 sps:$4 sm:$0xff]  }
 0x53a   : > { %9171 = vmatprep.subr.bf16.mxu1 %v15030_v15  ;;  %v19358_v43 = vpop.f32.mrf.mxu1  ;;  %v15017_v15 = vld [vmem:[#allocation2 + $0x3b0] ss:$12 sps:$4 sm:$0xff]  }
 0x53c   : > { %v19363_v37 = vpop.f32.mrf.mxu1 }
 0x53d   : > { %9172 = vmatpush1.bf16.msra.mxu1 %v15028_v38 }
 0x53e   : > { %9173 = vmatprep.subr.bf16.mxu1 %v15033_v47  ;;  %v19371_v9 = vpop.f32.mrf.mxu1  ;;  %v15036_v47 = vld [vmem:[%s22268_s1 + $0x22c] ss:$12 sps:$4 sm:$0xff]  }
 0x53f   : > { %7863 = vmatmul.mubr.bf16.gmra.mxu1 %v15273_v28  ;;  %v15075_v28 = vld [vmem:[%s22268_s1 + $0x124] ss:$12 sps:$4 sm:$0xff]  }
 0x540   : > { %v15008_v57 = vld [vmem:[#allocation2 + $0x410] ss:$12 sps:$4 sm:$0x1f]   ;;  %7870 = vmatprep.mubr.bf16.mxu1 %v15274_v53  ;;  %v19380_v1 = vpop.f32.mrf.mxu1  ;;  %v15279_v53 = vld [vmem:[%s22269_s2 + $0x78] ss:$12 sps:$4 sm:$0xff]  }
 0x541   : > { %9174 = vmatpush1.bf16.msra.mxu1 %v15031_v62  ;;  %v7406_v31 = vand.u32 %v15008_v57, %v22625_v6  ;;  %v15018_v62 = vld [vmem:[#allocation2 + $0x398] ss:$12 sps:$4 sm:$0xff]  }
 0x542   : > { %9175 = vmatprep.subr.bf16.mxu1 %v15039_v55  ;;  %v19385_v46 = vpop.f32.mrf.mxu1  ;;  %v15067_v57 = vld [vmem:[%s22268_s1 + $0x138] ss:$12 sps:$4 sm:$0xff]  }
 0x543   : > { %14436 = vmatpush3.bf16.msra.mxu0 %v7406_v31  ;;  %v15034_v31 = vld [vmem:[%s22268_s1 + $0x228] ss:$12 sps:$4 sm:$0xff]  }
 0x544   : > { %14437 = vmatprep.subr.bf16.mxu0 %v22626_v50  ;;  %v19388_v59 = vpop.f32.mrf.mxu1 }
 0x545   : > { %9176 = vmatpush1.bf16.msra.mxu1 %v15037_v24 }
 0x546   : > { %9177 = vmatprep.subr.bf16.mxu1 %v15045_v2  ;;  %v19399_v27 = vpop.f32.mrf.mxu1  ;;  %v15280_v2 = vld [vmem:[%s22269_s2 + $0x94] ss:$12 sps:$4 sm:$0xff]  }
 0x547   : > { %14438 = vmatpush3.bf16.msra.mxu0 %v15010_v34  ;;  %7871 = vmatmul.mubr.bf16.gmra.mxu1 %v15275_v41  ;;  %v15042_v34 = vld [vmem:[%s22268_s1 + $0x214] ss:$12 sps:$4 sm:$0xff]   ;;  %v15081_v41 = vld [vmem:[%s22268_s1 + $0x10c] ss:$12 sps:$4 sm:$0xff]  }
 0x548   : > { %14439 = vmatprep.subr.bf16.mxu0 %v22626_v50  ;;  %7878 = vmatprep.mubr.bf16.mxu1 %v15276_v25  ;;  %v19405_v19 = vpop.f32.mrf.mxu1 }
 0x549   : > { %9178 = vmatpush1.bf16.msra.mxu1 %v15043_v5 }
 0x54a   : > { %9179 = vmatprep.subr.bf16.mxu1 %v15051_v48  ;;  %v19413_v58 = vpop.f32.mrf.mxu1  ;;  %v15073_v48 = vld [vmem:[%s22268_s1 + $0x120] ss:$12 sps:$4 sm:$0xff]  }
 0x54b   : > { %14440 = vmatpush3.bf16.msra.mxu0 %v15014_v60  ;;  %v15040_v60 = vld [vmem:[%s22268_s1 + $0x210] ss:$12 sps:$4 sm:$0xff]  }
 0x54c   : > { %14441 = vmatprep.subr.bf16.mxu0 %v22626_v50  ;;  %v19416_v10 = vpop.f32.mrf.mxu1 }
 0x54d   : > { %9180 = vmatpush1.bf16.msra.mxu1 %v15049_v35 }
 0x54e   : > { %9181 = vmatprep.subr.bf16.mxu1 %v15057_v12  ;;  %v19427_v8 = vpop.f32.mrf.mxu1  ;;  %v15079_v12 = vld [vmem:[%s22268_s1 + $0x108] ss:$12 sps:$4 sm:$0xff]  }
 0x54f   : > { %14442 = vmatpush3.bf16.msra.mxu0 %v15016_v39  ;;  %7879 = vmatmul.mubr.bf16.gmra.mxu1 %v15277_v49  ;;  %v15086_v39 = vld [vmem:[%s22268_s1 + $0xf4] ss:$12 sps:$4 sm:$0xff]   ;;  %v15046_v49 = vld [vmem:[%s22268_s1 + $0x1f8] ss:$12 sps:$4 sm:$0xff]  }
 0x550   : > { %14443 = vmatprep.subr.bf16.mxu0 %v22626_v50  ;;  %7886 = vmatprep.mubr.bf16.mxu1 %v15278_v16  ;;  %v19433_v0 = vpop.f32.mrf.mxu1  ;;  %v15282_v16 = vld [vmem:[%s22269_s2 + $0xac] ss:$12 sps:$4 sm:$0xff]  }
 0x551   : > { %9182 = vmatpush2.bf16.msra.mxu1 %v15055_v23  ;;  %v15281_v23 = vld [vmem:[%s22269_s2 + $0x90] ss:$12 sps:$4 sm:$0xff]  }
 0x552   : > { %9183 = vmatprep.subr.bf16.mxu1 %v15063_v20  ;;  %v19441_v38 = vpop.f32.mrf.mxu1 }
 0x553   : > { %14444 = vmatpush3.bf16.msra.mxu0 %v15017_v15  ;;  %v15054_v15 = vld [vmem:[%s22268_s1 + $0x1e4] ss:$12 sps:$4 sm:$0xff]  }
 0x554   : > { %14445 = vmatprep.subr.bf16.mxu0 %v22626_v50  ;;  %v19447_v55 = vpop.f32.mrf.mxu1 }
 0x555   : > { %9184 = vmatpush2.bf16.msra.mxu1 %v15061_v14 }
 0x556   : > { %9185 = vmatprep.subr.bf16.mxu1 %v15069_v33  ;;  %v19458_v24 = vpop.f32.mrf.mxu1  ;;  %v15084_v33 = vld [vmem:[%s22268_s1 + $0xf0] ss:$12 sps:$4 sm:$0xff]  }
 0x557   : > { %14446 = vmatpush3.bf16.msra.mxu0 %v15018_v62  ;;  %7887 = vmatmul.mubr.bf16.gmra.mxu1 %v15279_v53  ;;  %v15090_v53 = vld [vmem:[%s22268_s1 + $0xd8] ss:$12 sps:$4 sm:$0xff]  }
 0x558   : > { %7894 = vmatprep.mubr.bf16.mxu1 %v15280_v2  ;;  %9418 = vmatprep.subr.bf16.mxu0 %v15036_v47  ;;  %v19469_v5 = vpop.f32.mrf.mxu1  ;;  %v15092_v47 = vld [vmem:[%s22268_s1 + $0xdc] ss:$12 sps:$4 sm:$0xff]  }
 0x559   : > { %9186 = vmatpush2.bf16.msra.mxu1 %v15067_v57  ;;  %v15052_v57 = vld [vmem:[%s22268_s1 + $0x1e0] ss:$12 sps:$4 sm:$0xff]   ;;  %v15283_v2 = vld [vmem:[%s22269_s2 + $0xa8] ss:$12 sps:$4 sm:$0xff]  }
 0x55a   : > { %14448 = vmatmul.mubr.msk.bf16.vlgmr.msra.gmra.mxu0 %vm3309_vm11, %v18974_v52  ;;  %9187 = vmatprep.subr.bf16.mxu1 %v15075_v28  ;;  %v19481_v25 = vpop.f32.mrf.mxu1  ;;  %v15048_v52 = vld [vmem:[%s22268_s1 + $0x1fc] ss:$12 sps:$4 sm:$0xff]  }
 0x55b   : > { %14451 = vmatprep.mubr.msk.bf16.mxu0 %vm15444_vm12, %v22626_v50  ;;  %9419 = vmatpush1.bf16.msra.mxu0 %v15034_v31  ;;  %v15098_v31 = vld [vmem:[%s22268_s1 + $0xc4] ss:$12 sps:$4 sm:$0xff]  }
 0x55c   : > { %9420 = vmatprep.subr.bf16.mxu0 %v15042_v34  ;;  %v19489_v35 = vpop.f32.mrf.mxu1 }
 0x55d   : > { %9188 = vmatpush2.bf16.msra.mxu1 %v15073_v48  ;;  %v15058_v48 = vld [vmem:[%s22268_s1 + $0x1c8] ss:$12 sps:$4 sm:$0xff]  }
 0x55e   : > { %9189 = vmatprep.subr.bf16.mxu1 %v15081_v41  ;;  %v19500_v20 = vpop.f32.mrf.mxu1  ;;  %v15284_v41 = vld [vmem:[%s22269_s2 + $0xc4] ss:$12 sps:$4 sm:$0xff]  }
 0x55f   : > { %7895 = vmatmul.mubr.bf16.gmra.mxu1 %v15281_v23  ;;  %9421 = vmatpush1.bf16.msra.mxu0 %v15040_v60  ;;  %v15066_v60 = vld [vmem:[%s22268_s1 + $0x1b4] ss:$12 sps:$4 sm:$0xff]   ;;  %v15064_v23 = vld [vmem:[%s22268_s1 + $0x1b0] ss:$12 sps:$4 sm:$0xff]  }
 0x560   : > { %7902 = vmatprep.mubr.bf16.mxu1 %v15282_v16  ;;  %9422 = vmatprep.subr.bf16.mxu0 %v15048_v52  ;;  %v19511_v14 = vpop.f32.mrf.mxu1 }
 0x561   : > { %9190 = vmatpush2.bf16.msra.mxu1 %v15079_v12  ;;  %v15096_v12 = vld [vmem:[%s22268_s1 + $0xc0] ss:$12 sps:$4 sm:$0xff]  }
 0x562   : > { %14452 = vmatmul.mubr.msk.bf16.gmra.mxu0 %vm3309_vm11, %v19000_v54  ;;  %9191 = vmatprep.subr.bf16.mxu1 %v15086_v39  ;;  %v19523_v62 = vpop.f32.mrf.mxu1  ;;  %v15060_v54 = vld [vmem:[%s22268_s1 + $0x1cc] ss:$12 sps:$4 sm:$0xff]  }
 0x563   : > { %14455 = vmatprep.mubr.msk.bf16.mxu0 %vm15444_vm12, %v22626_v50  ;;  %9423 = vmatpush1.bf16.msra.mxu0 %v15046_v49  ;;  %v15072_v49 = vld [vmem:[%s22268_s1 + $0x19c] ss:$12 sps:$4 sm:$0xff]  }
 0x564   : > { %9424 = vmatprep.subr.bf16.mxu0 %v15054_v15  ;;  %v19531_v28 = vpop.f32.mrf.mxu1 }
 0x565   : > { %9192 = vmatpush2.bf16.msra.mxu1 %v15084_v33  ;;  %v15285_v33 = vld [vmem:[%s22269_s2 + $0xc0] ss:$12 sps:$4 sm:$0xff]  }
 0x566   : > { %9193 = vmatprep.subr.bf16.mxu1 %v15092_v47  ;;  %v19542_v34 = vpop.f32.mrf.mxu1 }
 0x567   : > { %7903 = vmatmul.mubr.bf16.gmra.mxu1 %v15283_v2  ;;  %9425 = vmatpush1.bf16.msra.mxu0 %v15052_v57  ;;  %v15070_v57 = vld [vmem:[%s22268_s1 + $0x198] ss:$12 sps:$4 sm:$0xff]  }
 0x568   : > { %7910 = vmatprep.mubr.bf16.mxu1 %v15284_v41  ;;  %9426 = vmatprep.subr.bf16.mxu0 %v15060_v54  ;;  %v19553_v52 = vpop.f32.mrf.mxu1 }
 0x569   : > { %9194 = vmatpush2.bf16.msra.mxu1 %v15090_v53  ;;  %v15286_v53 = vld [vmem:[%s22269_s2 + $0xdc] ss:$12 sps:$4 sm:$0xff]  }
 0x56a   : > { %14456 = vmatmul.mubr.msk.bf16.gmra.mxu0 %vm3309_vm11, %v19022_v17  ;;  %9195 = vmatprep.subr.bf16.mxu1 %v15098_v31  ;;  %v19562_v39 = vpop.f32.mrf.mxu1 }
 0x56b   : > { %14459 = vmatprep.mubr.msk.bf16.mxu0 %vm15444_vm12, %v22626_v50  ;;  %9427 = vmatpush1.bf16.msra.mxu0 %v15058_v48  ;;  %v8632_v48 = vld [vmem:[%s22268_s1 + $0x2a0] sm:$0xff] }
 0x56c   : > { %9428 = vmatprep.subr.bf16.mxu0 %v15066_v60  ;;  %v19570_v16 = vpop.f32.mrf.mxu1 }
 0x56d   : > { %9196 = vmatpush2.bf16.msra.mxu1 %v15096_v12 }
 0x56e   : > { %9671 = vmatprep.subr.bf16.mxu1 %v22616_v21  ;;  %v19577_v47 = vpop.f32.mrf.mxu1 }
 0x56f   : > { %v7645_v17 = vpop.f32.mrf.mxu0  ;;  %7911 = vmatmul.mubr.bf16.gmra.mxu1 %v15285_v33  ;;  %9429 = vmatpush1.bf16.msra.mxu0 %v15064_v23 }
 0x570   : > { %v7646_v15 = vadd.f32 %v7645_v17, %v19358_v43  ;;  %7918 = vmatprep.mubr.bf16.mxu1 %v15286_v53  ;;  %9430 = vmatprep.subr.bf16.mxu0 %v15072_v49  ;;  %v15078_v43 = vld [vmem:[%s22268_s1 + $0x184] ss:$12 sps:$4 sm:$0xff]   ;;  %v19590_v2 = vpop.f32.mrf.mxu1  ;;  %v13632_v49 = vcombine.high %v8632_v48, %v8632_v48  ;;  %v13631_v17 = vcombine.low %v8632_v48, %v8632_v48 }
 0x571   : > { %v7647_v54 = vpop.f32.mrf.mxu0 }
 0x572   : > { %13269 = vst [vmem:[%s17134_s8 + $0x330] sm:$0xff] %v7646_v15  ;;  %v7648_v31 = vadd.f32 %v7647_v54, %v19363_v37  ;;  %14460 = vmatmul.mubr.msk.bf16.gmra.mxu0 %vm3309_vm11, %v19044_v44  ;;  %v19601_v12 = vpop.f32.mrf.mxu1  ;;  %v15076_v37 = vld [vmem:[%s22268_s1 + $0x180] ss:$12 sps:$4 sm:$0xff]  }
 0x573   : > { %v7649_v41 = vpop.f32.mrf.mxu0  ;;  %14463 = vmatprep.mubr.msk.bf16.mxu0 %vm15444_vm12, %v22626_v50  ;;  %9431 = vmatpush1.bf16.msra.mxu0 %v15070_v57  ;;  %v15287_v57 = vld [vmem:[%s22269_s2 + $0xd8] ss:$12 sps:$4 sm:$0xff]  }
 0x574   : > { %13270 = vst [vmem:[%s17134_s8 + $0x338] sm:$0xff] %v7648_v31  ;;  %v7650_v60 = vadd.f32 %v7649_v41, %v19371_v9  ;;  %9432 = vmatprep.subr.bf16.mxu0 %v15078_v43  ;;  %v19608_v15 = vpop.f32.mrf.mxu1  ;;  %v9157_v43 = vsel %vm1073_vm0, %v13631_v17, 0 }
 0x575   : > { %v7651_v23 = vpop.f32.mrf.mxu0 }
 0x576   : > { %13272 = vst [vmem:[%s17134_s8 + $0x348] sm:$0xff] %v7650_v60  ;;  %v7652_v44 = vadd.f32 %v7651_v23, %v19380_v1  ;;  %v19615_v54 = vpop.f32.mrf.mxu1  ;;  %v15288_v1 = vld [vmem:[%s22269_s2 + $0xf4] ss:$12 sps:$4 sm:$0xff]  }
 0x577   : > { %v7655_v33 = vpop.f32.mrf.mxu0  ;;  %7919 = vmatmul.mubr.bf16.gmra.mxu1 %v15287_v57  ;;  %9433 = vmatpush1.bf16.msra.mxu0 %v15076_v37  ;;  %v15093_v57 = vld [vmem:[%s22268_s1 + $0x270] ss:$12 sps:$4 sm:$0xff]  }
 0x578   : > { %13273 = vst [vmem:[%s17134_s8 + $0x350] sm:$0xff] %v7652_v44  ;;  %v7656_v9 = vadd.f32 %v7655_v33, %v19385_v46  ;;  %7926 = vmatprep.mubr.bf16.mxu1 %v15288_v1  ;;  %13634 = vmatprep.subr.msk.bf16.mxu0 %vm1073_vm0, %v13632_v49  ;;  %v15089_v46 = vld [vmem:[%s22268_s1 + $0x28c] ss:$12 sps:$4 sm:$0xff]   ;;  %v19627_v48 = vpop.f32.mrf.mxu1  ;;  %v15289_v33 = vld [vmem:[%s22269_s2 + $0xf0] ss:$12 sps:$4 sm:$0xff]  }
 0x579   : > { %v7657_v53 = vpop.f32.mrf.mxu0 }
 0x57a   : > { %13275 = vst [vmem:[%s17134_s8 + $0x360] sm:$0xff] %v7656_v9  ;;  %v7658_v31 = vadd.f32 %v7657_v53, %v19388_v59  ;;  %14464 = vmatmul.mubr.msk.bf16.gmra.mxu0 %vm3309_vm11, %v19066_v11  ;;  %v19635_v37 = vpop.f32.mrf.mxu1  ;;  %v15087_v59 = vld [vmem:[%s22268_s1 + $0x288] ss:$12 sps:$4 sm:$0xff]   ;;  %v15290_v53 = vld [vmem:[%s22269_s2 + $0x10c] ss:$12 sps:$4 sm:$0xff]  }
 0x57b   : > { %v7659_v41 = vpop.f32.mrf.mxu0  ;;  %14467 = vmatprep.mubr.msk.bf16.mxu0 %vm15444_vm12, %v22626_v50  ;;  %9441 = vmatpush2.bf16.msra.mxu0 %v9157_v43  ;;  %v15095_v11 = vld [vmem:[%s22268_s1 + $0x274] ss:$12 sps:$4 sm:$0xff]  }
 0x57c   : > { %13276 = vst [vmem:[%s17134_s8 + $0x368] sm:$0xff] %v7658_v31  ;;  %v7660_v60 = vadd.f32 %v7659_v41, %v19399_v27  ;;  %9442 = vmatprep.subr.bf16.mxu0 %v15089_v46  ;;  %v19645_v17 = vpop.f32.mrf.mxu1 }
 0x57d   : > { %v7661_v23 = vpop.f32.mrf.mxu0 }
 0x57e   : > { %13278 = vst [vmem:[%s17134_s8 + $0x378] sm:$0xff] %v7660_v60  ;;  %v7662_v49 = vadd.f32 %v7661_v23, %v19405_v19  ;;  %v19652_v9 = vpop.f32.mrf.mxu1 }
 0x57f   : > { %v7665_v27 = vpop.f32.mrf.mxu0  ;;  %7927 = vmatmul.mubr.bf16.gmra.mxu1 %v15289_v33  ;;  %9443 = vmatpush2.bf16.msra.mxu0 %v15087_v59  ;;  %v15292_v33 = vld [vmem:[%s22269_s2 + $0x124] ss:$12 sps:$4 sm:$0xff]  }
 0x580   : > { %13279 = vst [vmem:[%s17134_s8 + $0x380] sm:$0xff] %v7662_v49  ;;  %v7666_v44 = vadd.f32 %v7665_v27, %v19413_v58  ;;  %7934 = vmatprep.mubr.bf16.mxu1 %v15290_v53  ;;  %9444 = vmatprep.subr.bf16.mxu0 %v15095_v11  ;;  %v15101_v58 = vld [vmem:[%s22268_s1 + $0x25c] ss:$12 sps:$4 sm:$0xff]   ;;  %v19665_v43 = vpop.f32.mrf.mxu1 }
 0x581   : > { %v7667_v19 = vpop.f32.mrf.mxu0  ;;  %v15291_v49 = vld [vmem:[%s22269_s2 + $0x108] ss:$12 sps:$4 sm:$0xff]  }
 0x582   : > { %13281 = vst [vmem:[%s17134_s8 + $0x390] sm:$0xff] %v7666_v44  ;;  %v7668_v1 = vadd.f32 %v7667_v19, %v19416_v10  ;;  %14468 = vmatmul.mubr.msk.bf16.gmra.mxu0 %vm3309_vm11, %v19089_v56  ;;  %v19673_v41 = vpop.f32.mrf.mxu1  ;;  %v15099_v10 = vld [vmem:[%s22268_s1 + $0x258] ss:$12 sps:$4 sm:$0xff]   ;;  %v15102_v44 = vld [vmem:[%s22268_s1 + $0x240] ss:$12 sps:$4 sm:$0xff]  }
 0x583   : > { %v7669_v46 = vpop.f32.mrf.mxu0  ;;  %14471 = vmatprep.mubr.msk.bf16.mxu0 %vm15444_vm12, %v22626_v50  ;;  %9445 = vmatpush2.bf16.msra.mxu0 %v15093_v57  ;;  %v15104_v56 = vld [vmem:[%s22268_s1 + $0x244] ss:$12 sps:$4 sm:$0xff]  }
 0x584   : > { %13282 = vst [vmem:[%s17134_s8 + $0x398] sm:$0xff] %v7668_v1  ;;  %v7670_v31 = vadd.f32 %v7669_v46, %v19427_v8  ;;  %9446 = vmatprep.subr.bf16.mxu0 %v15101_v58  ;;  %v19683_v23 = vpop.f32.mrf.mxu1 }
 0x585   : > { %v7671_v60 = vpop.f32.mrf.mxu0 }
 0x586   : > { %13284 = vst [vmem:[%s17134_s8 + $0x3a8] sm:$0xff] %v7670_v31  ;;  %v7672_v59 = vadd.f32 %v7671_v60, %v19433_v0  ;;  %v19690_v27 = vpop.f32.mrf.mxu1 }
 0x587   : > { %v7675_v8 = vpop.f32.mrf.mxu0  ;;  %7935 = vmatmul.mubr.bf16.gmra.mxu1 %v15291_v49  ;;  %9447 = vmatpush2.bf16.msra.mxu0 %v15099_v10 }
 0x588   : > { %13285 = vst [vmem:[%s17134_s8 + $0x3b0] sm:$0xff] %v7672_v59  ;;  %v7676_v11 = vadd.f32 %v7675_v8, %v19441_v38  ;;  %7942 = vmatprep.mubr.bf16.mxu1 %v15292_v33  ;;  %9448 = vmatprep.subr.bf16.mxu0 %v15104_v56  ;;  %v19700_v57 = vpop.f32.mrf.mxu1  ;;  %v15295_v33 = vld [vmem:[%s22269_s2 + $0x138] ss:$12 sps:$4 sm:$0xff]  }
 0x589   : > { %v7677_v0 = vpop.f32.mrf.mxu0 }
 0x58a   : > { %13287 = vst [vmem:[%s17134_s8 + $0x3c0] sm:$0xff] %v7676_v11  ;;  %v7678_v38 = vadd.f32 %v7677_v0, %v19447_v55  ;;  %14472 = vmatmul.mubr.msk.bf16.gmra.mxu0 %vm3309_vm11, %v19113_v32  ;;  %v19708_v58 = vpop.f32.mrf.mxu1 }
 0x58b   : > { %v7679_v19 = vpop.f32.mrf.mxu0  ;;  %14475 = vmatprep.mubr.msk.bf16.mxu0 %vm15444_vm12, %v22626_v50  ;;  %9449 = vmatpush2.bf16.msra.mxu0 %v15102_v44 }
 0x58c   : > { %13288 = vst [vmem:[%s17134_s8 + $0x3c8] sm:$0xff] %v7678_v38  ;;  %v7680_v53 = vadd.f32 %v7679_v19, %v19458_v24  ;;  %9880 = vmatprep.subr.bf16.mxu0 %v22616_v21  ;;  %v19713_v46 = vpop.f32.mrf.mxu1  ;;  %v15293_v24 = vld [vmem:[%s22269_s2 + $0x120] ss:$12 sps:$4 sm:$0xff]  }
 0x58d   : > { %v7681_v1 = vpop.f32.mrf.mxu0 }
 0x58e   : > { %13290 = vst [vmem:[%s17134_s8 + $0x3d8] sm:$0xff] %v7680_v53  ;;  %v7682_v55 = vadd.f32 %v7681_v1, %v19469_v5  ;;  %v19720_v10 = vpop.f32.mrf.mxu1  ;;  %v15294_v5 = vld [vmem:[%s22269_s2 + $0x13c] ss:$12 sps:$4 sm:$0xff]  }
 0x58f   : > { %v7685_v32 = vpop.f32.mrf.mxu0  ;;  %7943 = vmatmul.mubr.bf16.gmra.mxu1 %v15293_v24 }
 0x590   : > { %13291 = vst [vmem:[%s17134_s8 + $0x3e0] sm:$0xff] %v7682_v55  ;;  %v7686_v31 = vadd.f32 %v7685_v32, %v19481_v25  ;;  %7950 = vmatprep.mubr.bf16.mxu1 %v15294_v5  ;;  %v19727_v59 = vpop.f32.mrf.mxu1 }
 0x591   : > { %v7687_v60 = vpop.f32.mrf.mxu0 }
 0x592   : > { %13293 = vst [vmem:[%s17134_s8 + $0x3f0] sm:$0xff] %v7686_v31  ;;  %v7688_v56 = vadd.f32 %v7687_v60, %v19489_v35  ;;  %14476 = vmatmul.mubr.msk.bf16.gmra.mxu0 %vm3309_vm11, %v19137_v45  ;;  %v19735_v11 = vpop.f32.mrf.mxu1 }
 0x593   : > { %v7689_v25 = vpop.f32.mrf.mxu0  ;;  %14479 = vmatprep.mubr.msk.bf16.mxu0 %vm15444_vm12, %v22626_v50 }
 0x594   : > { %13294 = vst [vmem:[%s17134_s8 + $0x3f8] sm:$0xff] %v7688_v56  ;;  %v7690_v8 = vadd.f32 %v7689_v25, %v19500_v20  ;;  %v19739_v35 = vpop.f32.mrf.mxu1  ;;  %v13372_v25 = vld [vmem:[%s15591_s14 + $0xb08] sm:$0xff] }
 0x595   : > { %v7691_v49 = vpop.f32.mrf.mxu0 }
 0x596   : > { %13296 = vst [vmem:[%s17134_s8 + $0x408] sm:$0xff] %v7690_v8  ;;  %v7692_v44 = vadd.f32 %v7691_v49, %v19511_v14  ;;  %v19746_v20 = vpop.f32.mrf.mxu1  ;;  %v15296_v14 = vld [vmem:[%s22269_s2 + $0x154] ss:$12 sps:$4 sm:$0xff]   ;;  %v13376_v8 = vld [vmem:[%s15591_s14 + $0xb28] sm:$0xff] }
 0x597   : > { %v7695_v0 = vpop.f32.mrf.mxu0  ;;  %7951 = vmatmul.mubr.bf16.gmra.mxu1 %v15295_v33  ;;  %v13375_v33 = vld [vmem:[%s15591_s14 + $0xb20] sm:$0xff] }
 0x598   : > { %13297 = vst [vmem:[%s17134_s8 + $0x410] sm:$0xff] %v7692_v44  ;;  %v7696_v45 = vadd.f32 %v7695_v0, %v19523_v62  ;;  %7958 = vmatprep.mubr.bf16.mxu1 %v15296_v14  ;;  %v19759_v1 = vpop.f32.mrf.mxu1  ;;  %v13384_v14 = vld [vmem:[%s15591_s14 + $0xb68] sm:$0xff] }
 0x599   : > { %v7697_v38 = vpop.f32.mrf.mxu0 }
 0x59a   : > { %13299 = vst [vmem:[%s17134_s8 + $0x420] sm:$0xff] %v7696_v45  ;;  %v7698_v19 = vadd.f32 %v7697_v38, %v19531_v28  ;;  %14480 = vmatmul.mubr.msk.bf16.gmra.mxu0 %vm3309_vm11, %v19165_v3  ;;  %v19766_v28 = vpop.f32.mrf.mxu1  ;;  %v13371_v45 = vld [vmem:[%s15591_s14 + $0xb00] sm:$0xff] }
 0x59b   : > { %v7699_v62 = vpop.f32.mrf.mxu0  ;;  %14483 = vmatprep.mubr.msk.bf16.mxu0 %vm15444_vm12, %v22626_v50 }
 0x59c   : > { %13300 = vst [vmem:[%s17134_s8 + $0x428] sm:$0xff] %v7698_v19  ;;  %v7700_v53 = vadd.f32 %v7699_v62, %v19542_v34  ;;  %v19821_v19 = vpack.c.bf16 %v13375_v33, %v13371_v45 }
 0x59d   : > { %v7701_v55 = vpop.f32.mrf.mxu0 }
 0x59e   : > { %13302 = vst [vmem:[%s17134_s8 + $0x438] sm:$0xff] %v7700_v53  ;;  %v7702_v32 = vadd.f32 %v7701_v55, %v19553_v52 }
 0x59f   : > { %v7705_v31 = vpop.f32.mrf.mxu0  ;;  %7959 = vmatmul.mubr.bf16.gmra.mxu1 %v19154_v51 }
 0x5a0   : > { %13303 = vst [vmem:[%s17134_s8 + $0x440] sm:$0xff] %v7702_v32  ;;  %v7706_v3 = vadd.f32 %v7705_v31, %v19562_v39  ;;  %7966 = vmatprep.mubr.bf16.mxu1 %v19159_v13  ;;  %v19777_v39 = vpop.f32.mrf.mxu1 }
 0x5a1   : > { %v7707_v24 = vpop.f32.mrf.mxu0 }
 0x5a2   : > { %13305 = vst [vmem:[%s17134_s8 + $0x450] sm:$0xff] %v7706_v3  ;;  %v7708_v34 = vadd.f32 %v7707_v24, %v19570_v16  ;;  %14484 = vmatmul.mubr.msk.bf16.gmra.mxu0 %vm3309_vm11, %v19194_v7  ;;  %v19784_v5 = vpop.f32.mrf.mxu1  ;;  %v13379_v3 = vld [vmem:[%s15591_s14 + $0xb40] sm:$0xff] }
 0x5a3   : > { %v7709_v52 = vpop.f32.mrf.mxu0  ;;  %14487 = vmatprep.mubr.msk.bf16.mxu0 %vm15444_vm12, %v22626_v50  ;;  %v13383_v24 = vld [vmem:[%s15591_s14 + $0xb60] sm:$0xff] }
 0x5a4   : > { %13306 = vst [vmem:[%s17134_s8 + $0x458] sm:$0xff] %v7708_v34  ;;  %v7710_v51 = vadd.f32 %v7709_v52, %v19577_v47  ;;  %v13392_v52 = vld [vmem:[%s15591_s14 + $0xba8] sm:$0xff] }
 0x5a5   : > { %v7711_v60 = vpop.f32.mrf.mxu0 }
 0x5a6   : > { %13308 = vst [vmem:[%s17134_s8 + $0x468] sm:$0xff] %v7710_v51  ;;  %v7712_v13 = vadd.f32 %v7711_v60, %v19590_v2  ;;  %v19847_v60 = vpack.c.bf16 %v13383_v24, %v13379_v3  ;;  %v15106_v24 = vld [vmem:[%s22268_s1 + $0x98] ss:$12 sps:$4 sm:$0xff]  }
 0x5a7   : > { %v7715_v16 = vpop.f32.mrf.mxu0  ;;  %7967 = vmatmul.mubr.bf16.gmra.mxu1 %v19184_v26 }
 0x5a8   : > { %13309 = vst [vmem:[%s17134_s8 + $0x470] sm:$0xff] %v7712_v13  ;;  %v7716_v7 = vadd.f32 %v7715_v16, %v19601_v12  ;;  %7974 = vmatprep.mubr.bf16.mxu1 %v19189_v29  ;;  %v19797_v29 = vpop.f32.mrf.mxu1 }
 0x5a9   : > { %v7717_v56 = vpop.f32.mrf.mxu0 }
 0x5aa   : > { %13311 = vst [vmem:[%s17134_s8 + $0x480] sm:$0xff] %v7716_v7  ;;  %v7718_v47 = vadd.f32 %v7717_v56, %v19608_v15  ;;  %14488 = vmatmul.mubr.msk.bf16.gmra.mxu0 %vm3309_vm11, %v19217_v30  ;;  %v19799_v15 = vpack.c.bf16 %v13376_v8, %v13372_v25  ;;  %v19806_v0 = vpop.f32.mrf.mxu1  ;;  %v13387_v25 = vld [vmem:[%s15591_s14 + $0xb80] sm:$0xff] }
 0x5ab   : > { %v7719_v2 = vpop.f32.mrf.mxu0  ;;  %14491 = vmatprep.mubr.msk.bf16.mxu0 %vm15444_vm12, %v22626_v50  ;;  %v13391_v8 = vld [vmem:[%s15591_s14 + $0xba0] sm:$0xff] }
 0x5ac   : > { %13312 = vst [vmem:[%s17134_s8 + $0x488] sm:$0xff] %v7718_v47  ;;  %v7720_v26 = vadd.f32 %v7719_v2, %v19615_v54  ;;  %v19823_v62 = vpop.f32.mrf.mxu1 }
 0x5ad   : > { %v7721_v12 = vpop.f32.mrf.mxu0 }
 0x5ae   : > { %13314 = vst [vmem:[%s17134_s8 + $0x498] sm:$0xff] %v7720_v26  ;;  %v7722_v30 = vadd.f32 %v7721_v12, %v19627_v48  ;;  %v13380_v48 = vld [vmem:[%s15591_s14 + $0xb48] sm:$0xff] }
 0x5af   : > { %v7725_v49 = vpop.f32.mrf.mxu0  ;;  %7975 = vmatmul.mubr.bf16.gmra.mxu1 %v19212_v63  ;;  %v19825_v53 = vpack.c.bf16 %v13384_v14, %v13380_v48  ;;  %v13400_v26 = vld [vmem:[%s15591_s14 + $0xbe8] sm:$0xff]  ;;  %v13399_v48 = vld [vmem:[%s15591_s14 + $0xbe0] sm:$0xff] }
 0x5b0   : > { %13315 = vst [vmem:[%s17134_s8 + $0x4a0] sm:$0xff] %v7722_v30  ;;  %v7726_v44 = vadd.f32 %v7725_v49, %v19635_v37  ;;  %9197 = vmatprep.mubr.bf16.mxu1 %v19799_v15  ;;  %v19873_v30 = vpack.c.bf16 %v13391_v8, %v13387_v25 }
 0x5b1   : > { %v7727_v54 = vpop.f32.mrf.mxu0 }
 0x5b2   : > { %13317 = vst [vmem:[%s17134_s8 + $0x4b0] sm:$0xff] %v7726_v44  ;;  %v7728_v38 = vadd.f32 %v7727_v54, %v19645_v17  ;;  %14492 = vmatmul.mubr.msk.bf16.gmra.mxu0 %vm3309_vm11, %v19237_v22 }
 0x5b3   : > { %v7729_v37 = vpop.f32.mrf.mxu0  ;;  %14495 = vmatprep.mubr.msk.bf16.mxu0 %vm15444_vm12, %v22626_v50 }
 0x5b4   : > { %13318 = vst [vmem:[%s17134_s8 + $0x4b8] sm:$0xff] %v7728_v38  ;;  %v7730_v63 = vadd.f32 %v7729_v37, %v19652_v9  ;;  %v19832_v9 = vpop.f32.mrf.mxu1  ;;  %v13395_v38 = vld [vmem:[%s15591_s14 + $0xbc0] sm:$0xff]  ;;  %v13404_v37 = vld [vmem:[%s15591_s14 + $0xc08] sm:$0xff] }
 0x5b5   : > { %v7731_v17 = vpop.f32.mrf.mxu0 }
 0x5b6   : > { %13320 = vst [vmem:[%s17134_s8 + $0x4c8] sm:$0xff] %v7730_v63  ;;  %v7732_v22 = vadd.f32 %v7731_v17, %v19665_v43  ;;  %v13388_v43 = vld [vmem:[%s15591_s14 + $0xb88] sm:$0xff]  ;;  %v19849_v13 = vpop.f32.mrf.mxu1  ;;  %v19899_v17 = vpack.c.bf16 %v13399_v48, %v13395_v38  ;;  %v13373_v38 = vld [vmem:[%s15591_s14 + $0xb10] sm:$0xff] }
 0x5b7   : > { %v7735_v55 = vpop.f32.mrf.mxu0  ;;  %9198 = vmatmul.mubr.bf16.vlgmr.msra.gmra.mxu1 %v19821_v19  ;;  %v19851_v16 = vpack.c.bf16 %v13392_v52, %v13388_v43  ;;  %v13407_v43 = vld [vmem:[%s15591_s14 + $0xc20] sm:$0xff] }
 0x5b8   : > { %13321 = vst [vmem:[%s17134_s8 + $0x4d0] sm:$0xff] %v7732_v22  ;;  %v7736_v32 = vadd.f32 %v7735_v55, %v19673_v41  ;;  %9207 = vmatprep.mubr.bf16.mxu1 %v19825_v53 }
 0x5b9   : > { %v7737_v31 = vpop.f32.mrf.mxu0 }
 0x5ba   : > { %13323 = vst [vmem:[%s17134_s8 + $0x4e0] sm:$0xff] %v7736_v32  ;;  %v7738_v34 = vadd.f32 %v7737_v31, %v19683_v23  ;;  %14496 = vmatmul.mubr.msk.bf16.gmra.mxu0 %vm3309_vm11, %v19253_v61 }
 0x5bb   : > { %v7739_v41 = vpop.f32.mrf.mxu0  ;;  %14499 = vmatprep.mubr.msk.bf16.mxu0 %vm15444_vm12, %v22626_v50 }
 0x5bc   : > { %13324 = vst [vmem:[%s17134_s8 + $0x4e8] sm:$0xff] %v7738_v34  ;;  %v7740_v51 = vadd.f32 %v7739_v41, %v19690_v27  ;;  %v19858_v27 = vpop.f32.mrf.mxu1  ;;  %v13416_v41 = vld [vmem:[%s15591_s14 + $0xc68] sm:$0xff] }
 0x5bd   : > { %v7741_v23 = vpop.f32.mrf.mxu0 }
 0x5be   : > { %13326 = vst [vmem:[%s17134_s8 + $0x4f8] sm:$0xff] %v7740_v51  ;;  %v7742_v61 = vadd.f32 %v7741_v23, %v19700_v57  ;;  %v13396_v57 = vld [vmem:[%s15591_s14 + $0xbc8] sm:$0xff]  ;;  %v19875_v49 = vpop.f32.mrf.mxu1 }
 0x5bf   : > { %v7745_v7 = vpop.f32.mrf.mxu0  ;;  %9208 = vmatmul.mubr.bf16.gmra.mxu1 %v19847_v60  ;;  %v19877_v44 = vpack.c.bf16 %v13400_v26, %v13396_v57 }
 0x5c0   : > { %13327 = vst [vmem:[%s17134_s8 + $0x500] sm:$0xff] %v7742_v61  ;;  %v7746_v56 = vadd.f32 %v7745_v7, %v19708_v58  ;;  %9217 = vmatprep.mubr.bf16.mxu1 %v19851_v16  ;;  %v15108_v7 = vld [vmem:[%s22268_s1 + $0x80] ss:$12 sps:$4 sm:$0xff]  }
 0x5c1   : > { %v7747_v47 = vpop.f32.mrf.mxu0 }
 0x5c2   : > { %13329 = vst [vmem:[%s17134_s8 + $0x510] sm:$0xff] %v7746_v56  ;;  %v7748_v2 = vadd.f32 %v7747_v47, %v19713_v46  ;;  %14500 = vmatmul.mubr.msk.bf16.gmra.mxu0 %vm3309_vm11, %v19266_v4  ;;  %v13374_v56 = vld [vmem:[%s15591_s14 + $0xb18] sm:$0xff] }
 0x5c3   : > { %v7749_v58 = vpop.f32.mrf.mxu0  ;;  %14503 = vmatprep.mubr.msk.bf16.mxu0 %vm15444_vm12, %v22626_v50 }
 0x5c4   : > { %13330 = vst [vmem:[%s17134_s8 + $0x518] sm:$0xff] %v7748_v2  ;;  %v7750_v12 = vadd.f32 %v7749_v58, %v19720_v10  ;;  %v19884_v10 = vpop.f32.mrf.mxu1 }
 0x5c5   : > { %v7751_v46 = vpop.f32.mrf.mxu0 }
 0x5c6   : > { %13332 = vst [vmem:[%s17134_s8 + $0x528] sm:$0xff] %v7750_v12  ;;  %v7752_v4 = vadd.f32 %v7751_v46, %v19727_v59  ;;  %v13408_v59 = vld [vmem:[%s15591_s14 + $0xc28] sm:$0xff]  ;;  %v19901_v22 = vpop.f32.mrf.mxu1  ;;  %v13411_v12 = vld [vmem:[%s15591_s14 + $0xc40] sm:$0xff] }
 0x5c7   : > { %v7755_v54 = vpop.f32.mrf.mxu0  ;;  %9218 = vmatmul.mubr.bf16.gmra.mxu1 %v19873_v30  ;;  %v13415_v46 = vld [vmem:[%s15591_s14 + $0xc60] sm:$0xff] }
 0x5c8   : > { %13333 = vst [vmem:[%s17134_s8 + $0x530] sm:$0xff] %v7752_v4  ;;  %v7756_v45 = vadd.f32 %v7755_v54, %v19735_v11  ;;  %9227 = vmatprep.mubr.bf16.mxu1 %v19877_v44  ;;  %v19914_v3 = vpop.f32.mrf.mxu1  ;;  %v13424_v54 = vld [vmem:[%s15591_s14 + $0xca8] sm:$0xff] }
 0x5c9   : > { %v7757_v33 = vpop.f32.mrf.mxu0 }
 0x5ca   : > { %13335 = vst [vmem:[%s17134_s8 + $0x540] sm:$0xff] %v7756_v45  ;;  %v7758_v14 = vadd.f32 %v7757_v33, %v19739_v35  ;;  %14504 = vmatmul.mubr.msk.bf16.gmra.mxu0 %vm3309_vm11, %v19280_v42  ;;  %v15105_v35 = vld [vmem:[%s22268_s1 + $0xb0] ss:$12 sps:$4 sm:$0xff]   ;;  %v19906_v42 = vpack.c.bf16 %v13408_v59, %v13404_v37  ;;  %v15297_v45 = vld [vmem:[%s22269_s2 + $0x188] ss:$12 sps:$4 sm:$0x7f]  }
 0x5cb   : > { %v7759_v11 = vpop.f32.mrf.mxu0  ;;  %14507 = vmatprep.mubr.msk.bf16.mxu0 %vm15444_vm12, %v22626_v50  ;;  %9672 = vmatpush1.bf16.msra.mxu1 %v15105_v35  ;;  %v15110_v59 = vld [vmem:[%s22268_s1 + $0x50] ss:$12 sps:$4 sm:$0xff]  }
 0x5cc   : > { %13336 = vst [vmem:[%s17134_s8 + $0x548] sm:$0xff] %v7758_v14  ;;  %v7760_v63 = vadd.f32 %v7759_v11, %v19746_v20  ;;  %9673 = vmatprep.subr.bf16.mxu1 %v22616_v21  ;;  %v19975_v14 = vpack.c.bf16 %v13415_v46, %v13411_v12  ;;  %v13382_v11 = vld [vmem:[%s15591_s14 + $0xb58] sm:$0xff] }
 0x5cd   : > { %v7761_v55 = vpop.f32.mrf.mxu0 }
 0x5ce   : > { %13338 = vst [vmem:[%s17134_s8 + $0x558] sm:$0xff] %v7760_v63  ;;  %v7762_v32 = vadd.f32 %v7761_v55, %v19759_v1  ;;  %v13403_v1 = vld [vmem:[%s15591_s14 + $0xc00] sm:$0xff]  ;;  %v13386_v63 = vld [vmem:[%s15591_s14 + $0xb78] sm:$0xff] }
 0x5cf   : > { %v7765_v20 = vpop.f32.mrf.mxu0  ;;  %9228 = vmatmul.mubr.bf16.gmra.mxu1 %v19899_v17  ;;  %v19933_v61 = vpack.c.bf16 %v13407_v43, %v13403_v1  ;;  %v15112_v1 = vld [vmem:[%s22268_s1 + $0x38] ss:$12 sps:$4 sm:$0xff]  }
 0x5d0   : > { %13339 = vst [vmem:[%s17134_s8 + $0x560] sm:$0xff] %v7762_v32  ;;  %v7766_v31 = vadd.f32 %v7765_v20, %v19766_v28  ;;  %9237 = vmatprep.mubr.bf16.mxu1 %v19906_v42  ;;  %v13412_v28 = vld [vmem:[%s15591_s14 + $0xc48] sm:$0xff]  ;;  %9674 = vmatpush1.bf16.msra.mxu1 %v15106_v24 }
 0x5d1   : > { %v7767_v34 = vpop.f32.mrf.mxu0  ;;  %9675 = vmatprep.subr.bf16.mxu1 %v22616_v21  ;;  %v19942_v25 = vpack.c.bf16 %v13416_v41, %v13412_v28  ;;  %v13423_v28 = vld [vmem:[%s15591_s14 + $0xca0] sm:$0xff]  ;;  %v13428_v41 = vld [vmem:[%s15591_s14 + $0xcc8] sm:$0xff] }
 0x5d2   : > { %13341 = vst [vmem:[%s17134_s8 + $0x570] sm:$0xff] %v7766_v31  ;;  %v7768_v52 = vadd.f32 %v7767_v34, %v19777_v39  ;;  %14508 = vmatmul.mubr.msk.bf16.gmra.mxu0 %vm3309_vm11, %v19294_v18  ;;  %v19935_v39 = vpop.f32.mrf.mxu1  ;;  %v13378_v18 = vld [vmem:[%s15591_s14 + $0xb38] sm:$0xff]  ;;  %v19991_v31 = vpack.c.bf16 %v13386_v63, %v13382_v11  ;;  %v13440_v11 = vld [vmem:[%s15591_s14 + $0xd28] sm:$0xff]  ;;  %v13389_v63 = vld [vmem:[%s15591_s14 + $0xb90] sm:$0xff] }
 0x5d3   : > { %v7769_v51 = vpop.f32.mrf.mxu0  ;;  %14511 = vmatprep.mubr.msk.bf16.mxu0 %vm15444_vm12, %v22626_v50  ;;  %v19947_v2 = vpack.c.bf16 %v13378_v18, %v13374_v56  ;;  %v13385_v56 = vld [vmem:[%s15591_s14 + $0xb70] sm:$0xff] }
 0x5d4   : > { %13342 = vst [vmem:[%s17134_s8 + $0x578] sm:$0xff] %v7768_v52  ;;  %v7770_v23 = vadd.f32 %v7769_v51, %v19784_v5  ;;  %9676 = vmatpush1.bf16.msra.mxu1 %v15108_v7  ;;  %v19952_v26 = vpop.f32.mrf.mxu1  ;;  %v13419_v52 = vld [vmem:[%s15591_s14 + $0xc80] sm:$0xff]  ;;  %v13432_v51 = vld [vmem:[%s15591_s14 + $0xce8] sm:$0xff] }
 0x5d5   : > { %v7771_v47 = vpop.f32.mrf.mxu0  ;;  %9677 = vmatprep.subr.bf16.mxu1 %v22616_v21  ;;  %v20031_v12 = vpack.c.bf16 %v13432_v51, %v13428_v41 }
 0x5d6   : > { %13344 = vst [vmem:[%s17134_s8 + $0x588] sm:$0xff] %v7770_v23  ;;  %v7772_v8 = vadd.f32 %v7771_v47, %v19797_v29  ;;  %v15109_v29 = vld [vmem:[%s22268_s1 + $0x68] ss:$12 sps:$4 sm:$0xff]   ;;  %v19977_v37 = vpop.f32.mrf.mxu1 }
 0x5d7   : > { %v7775_v5 = vpop.f32.mrf.mxu0  ;;  %9238 = vmatmul.mubr.bf16.gmra.mxu1 %v19933_v61  ;;  %v13381_v23 = vld [vmem:[%s15591_s14 + $0xb50] sm:$0xff] }
 0x5d8   : > { %13345 = vst [vmem:[%s17134_s8 + $0x590] sm:$0xff] %v7772_v8  ;;  %v7776_v57 = vadd.f32 %v7775_v5, %v19806_v0  ;;  %9247 = vmatprep.mubr.bf16.mxu1 %v19942_v25  ;;  %v13420_v0 = vld [vmem:[%s15591_s14 + $0xc88] sm:$0xff]  ;;  %9678 = vmatpush1.bf16.msra.mxu1 %v15109_v29  ;;  %v19996_v34 = vpop.f32.mrf.mxu1  ;;  %v15111_v8 = vld [vmem:[%s22268_s1 + $0x218] ss:$12 sps:$4 sm:$0xff]   ;;  %v20036_v46 = vpack.c.bf16 %v13385_v56, %v13381_v23 }
 0x5d9   : > { %v7777_v58 = vpop.f32.mrf.mxu0  ;;  %9679 = vmatprep.subr.bf16.mxu1 %v22616_v21  ;;  %v19984_v55 = vpack.c.bf16 %v13424_v54, %v13420_v0  ;;  %v15114_v5 = vld [vmem:[%s22268_s1 + $0x20] ss:$12 sps:$4 sm:$0xff]   ;;  %v13394_v29 = vld [vmem:[%s15591_s14 + $0xbb8] sm:$0xff] }
 0x5da   : > { %13347 = vst [vmem:[%s17134_s8 + $0x5a0] sm:$0xff] %v7776_v57  ;;  %v7778_v4 = vadd.f32 %v7777_v58, %v19823_v62  ;;  %14512 = vmatmul.mubr.msk.bf16.gmra.mxu0 %vm3309_vm11, %v15297_v45  ;;  %v13377_v62 = vld [vmem:[%s15591_s14 + $0xb30] sm:$0xff]  ;;  %v20021_v47 = vpop.f32.mrf.mxu1  ;;  %v13390_v57 = vld [vmem:[%s15591_s14 + $0xb98] sm:$0xff] }
 0x5db   : > { %v7779_v33 = vpop.f32.mrf.mxu0  ;;  %13635 = vmatprep.mubr.msk.bf16.mxu0 %vm1006_vm1, %v19947_v2  ;;  %v20039_v0 = vpack.c.bf16 %v13394_v29, %v13390_v57 }
 0x5dc   : > { %13348 = vst [vmem:[%s17134_s8 + $0x5a8] sm:$0xff] %v7778_v4  ;;  %v7780_v48 = vadd.f32 %v7779_v33, %v19832_v9  ;;  %9680 = vmatpush1.bf16.msra.mxu1 %v15110_v59  ;;  %v19988_v9 = vpack.c.bf16 %v13377_v62, %v13373_v38  ;;  %v20044_v45 = vpop.f32.mrf.mxu1  ;;  %v15116_v33 = vld [vmem:[%s22268_s1 + $0x8] ss:$12 sps:$4 sm:$0xff]   ;;  %v13431_v62 = vld [vmem:[%s15591_s14 + $0xce0] sm:$0xff] }
 0x5dd   : > { %v7781_v35 = vpop.f32.mrf.mxu0  ;;  %9681 = vmatprep.subr.bf16.mxu1 %v22616_v21  ;;  %v13436_v59 = vld [vmem:[%s15591_s14 + $0xd08] sm:$0xff] }
 0x5de   : > { %13350 = vst [vmem:[%s17134_s8 + $0x5b8] sm:$0xff] %v7780_v48  ;;  %v7782_v32 = vadd.f32 %v7781_v35, %v19849_v13  ;;  %v15107_v13 = vld [vmem:[%s22268_s1 + $0x230] ss:$12 sps:$4 sm:$0xff]  }
 0x5df   : > { %v7785_v20 = vpop.f32.mrf.mxu0  ;;  %9248 = vmatmul.mubr.bf16.gmra.mxu1 %v19975_v14 }
 0x5e0   : > { %13351 = vst [vmem:[%s17134_s8 + $0x5c0] sm:$0xff] %v7782_v32  ;;  %v7786_v24 = vadd.f32 %v7785_v20, %v19858_v27  ;;  %9257 = vmatprep.mubr.bf16.mxu1 %v19984_v55  ;;  %9682 = vmatpush1.bf16.msra.mxu1 %v15112_v1  ;;  %v13393_v32 = vld [vmem:[%s15591_s14 + $0xbb0] sm:$0xff] }
 0x5e1   : > { %v7787_v43 = vpop.f32.mrf.mxu0  ;;  %9683 = vmatprep.subr.bf16.mxu1 %v22616_v21  ;;  %v15118_v1 = vld [vmem:[%s22268_s1 + $0x170] ss:$12 sps:$4 sm:$0xff]   ;;  %v20083_v41 = vpack.c.bf16 %v13393_v32, %v13389_v63 }
 0x5e2   : > { %13353 = vst [vmem:[%s17134_s8 + $0x5d0] sm:$0xff] %v7786_v24  ;;  %v7788_v27 = vadd.f32 %v7787_v43, %v19875_v49  ;;  %9451 = vmatmul.mubr.bf16.vlgmr.msra.gmra.mxu0 %v19988_v9  ;;  %v20019_v49 = vpack.c.bf16 %v13423_v28, %v13419_v52  ;;  %v13398_v43 = vld [vmem:[%s15591_s14 + $0xbd8] sm:$0xff] }
 0x5e3   : > { %v7789_v7 = vpop.f32.mrf.mxu0  ;;  %13636 = vmatprep.mubr.msk.bf16.mxu0 %vm1006_vm1, %v19991_v31  ;;  %9881 = vmatpush1.bf16.msra.mxu0 %v15107_v13  ;;  %v15115_v13 = vld [vmem:[%s22268_s1 + $0x1e8] ss:$12 sps:$4 sm:$0xff]   ;;  %v13402_v52 = vld [vmem:[%s15591_s14 + $0xbf8] sm:$0xff] }
 0x5e4   : > { %13354 = vst [vmem:[%s17134_s8 + $0x5d8] sm:$0xff] %v7788_v27  ;;  %v7790_v18 = vadd.f32 %v7789_v7, %v19884_v10  ;;  %9882 = vmatprep.subr.bf16.mxu0 %v22616_v21  ;;  %9684 = vmatpush1.bf16.msra.mxu1 %v15114_v5  ;;  %v20078_v27 = vpack.c.bf16 %v13440_v11, %v13436_v59  ;;  %v13439_v5 = vld [vmem:[%s15591_s14 + $0xd20] sm:$0xff]  ;;  %v13410_v59 = vld [vmem:[%s15591_s14 + $0xc38] sm:$0xff] }
 0x5e5   : > { %v7791_v58 = vpop.f32.mrf.mxu0  ;;  %9685 = vmatprep.subr.bf16.mxu1 %v22616_v21  ;;  %v20086_v23 = vpack.c.bf16 %v13402_v52, %v13398_v43  ;;  %v13443_v43 = vld [vmem:[%s15591_s14 + $0xd40] sm:$0xff] }
 0x5e6   : > { %13356 = vst [vmem:[%s17134_s8 + $0x5e8] sm:$0xff] %v7790_v18  ;;  %v7792_v10 = vadd.f32 %v7791_v58, %v19901_v22  ;;  %v15113_v22 = vld [vmem:[%s22268_s1 + $0x200] ss:$12 sps:$4 sm:$0xff]   ;;  %v15120_v18 = vld [vmem:[%s22268_s1 + $0x158] ss:$12 sps:$4 sm:$0xff]  }
 0x5e7   : > { %v7795_v4 = vpop.f32.mrf.mxu0  ;;  %9258 = vmatmul.mubr.bf16.gmra.mxu1 %v20019_v49  ;;  %9883 = vmatpush1.bf16.msra.mxu0 %v15111_v8  ;;  %v13444_v58 = vld [vmem:[%s15591_s14 + $0xd48] sm:$0xff]  ;;  %v13447_v52 = vld [vmem:[%s15591_s14 + $0xd60] sm:$0xff] }
 0x5e8   : > { %13357 = vst [vmem:[%s17134_s8 + $0x5f0] sm:$0xff] %v7792_v10  ;;  %v7796_v54 = vadd.f32 %v7795_v4, %v19914_v3  ;;  %9267 = vmatprep.mubr.bf16.mxu1 %v20031_v12  ;;  %v13427_v3 = vld [vmem:[%s15591_s14 + $0xcc0] sm:$0xff]  ;;  %9884 = vmatprep.subr.bf16.mxu0 %v22616_v21  ;;  %v13448_v10 = vld [vmem:[%s15591_s14 + $0xd68] sm:$0xff]  ;;  %v13397_v4 = vld [vmem:[%s15591_s14 + $0xbd0] sm:$0xff] }
 0x5e9   : > { %v7797_v38 = vpop.f32.mrf.mxu0  ;;  %9686 = vmatpush1.bf16.msra.mxu1 %v15116_v33  ;;  %v20068_v24 = vpack.c.bf16 %v13431_v62, %v13427_v3  ;;  %v15119_v3 = vld [vmem:[%s22268_s1 + $0x1b8] ss:$12 sps:$4 sm:$0xff]   ;;  %v15122_v62 = vld [vmem:[%s22268_s1 + $0x140] ss:$12 sps:$4 sm:$0xff]   ;;  %v20127_v63 = vpack.c.bf16 %v13448_v10, %v13444_v58  ;;  %v15125_v10 = vld [vmem:[%s22268_s1 + $0x2a8] ss:$0 sps:$4 sm:$0xff]  }
 0x5ea   : > { %13359 = vst [vmem:[%s17134_s8 + $0x600] sm:$0xff] %v7796_v54  ;;  %v7798_v48 = vadd.f32 %v7797_v38, %v19935_v39  ;;  %9461 = vmatmul.mubr.bf16.gmra.mxu0 %v20036_v46  ;;  %9687 = vmatprep.subr.bf16.mxu1 %v22616_v21  ;;  %v7608_v39 = vpop.f32.mrf.mxu1 }
 0x5eb   : > { %v7799_v35 = vpop.f32.mrf.mxu0  ;;  %13637 = vmatprep.mubr.msk.bf16.mxu0 %vm1006_vm1, %v20039_v0  ;;  %9885 = vmatpush1.bf16.msra.mxu0 %v15113_v22  ;;  %v13401_v22 = vld [vmem:[%s15591_s14 + $0xbf0] sm:$0xff] }
 0x5ec   : > { %13360 = vst [vmem:[%s17134_s8 + $0x608] sm:$0xff] %v7798_v48  ;;  %v7800_v20 = vadd.f32 %v7799_v35, %v19952_v26  ;;  %9886 = vmatprep.subr.bf16.mxu0 %v22616_v21  ;;  %v13406_v48 = vld [vmem:[%s15591_s14 + $0xc18] sm:$0xff]  ;;  %v20131_v32 = vpack.c.bf16 %v13401_v22, %v13397_v4 }
 0x5ed   : > { %v7801_v28 = vpop.f32.mrf.mxu0  ;;  %9688 = vmatpush2.bf16.msra.mxu1 %v15118_v1  ;;  %v15124_v1 = vld [vmem:[%s22268_s1 + $0x128] ss:$12 sps:$4 sm:$0xff]  }
 0x5ee   : > { %13362 = vst [vmem:[%s17134_s8 + $0x618] sm:$0xff] %v7800_v20  ;;  %v7802_v26 = vadd.f32 %v7801_v28, %v19977_v37  ;;  %9689 = vmatprep.subr.bf16.mxu1 %v22616_v21  ;;  %v15117_v37 = vld [vmem:[%s22268_s1 + $0x1d0] ss:$12 sps:$4 sm:$0xff]   ;;  %v20134_v20 = vpack.c.bf16 %v13410_v59, %v13406_v48  ;;  %v13455_v48 = vld [vmem:[%s15591_s14 + $0xda0] sm:$0xff]  ;;  %v9163_v59 = vsel %vm1073_vm0, %v15125_v10, 0 }
 0x5ef   : > { %v7805_v51 = vpop.f32.mrf.mxu0  ;;  %v20090_v56 = vpop.f32.mrf.mxu1  ;;  %9268 = vmatmul.mubr.bf16.gmra.mxu1 %v20068_v24  ;;  %9887 = vmatpush1.bf16.msra.mxu0 %v15115_v13  ;;  %v15129_v10 = vld [vmem:[%s22268_s1 + $0x278] ss:$12 sps:$4 sm:$0xff]  }
 0x5f0   : > { %13363 = vst [vmem:[%s17134_s8 + $0x620] sm:$0xff] %v7802_v26  ;;  %v7806_v7 = vadd.f32 %v7805_v51, %v19996_v34  ;;  %9277 = vmatprep.mubr.bf16.mxu1 %v20078_v27  ;;  %v13435_v34 = vld [vmem:[%s15591_s14 + $0xd00] sm:$0xff]  ;;  %9888 = vmatprep.subr.bf16.mxu0 %v22616_v21  ;;  %v13452_v26 = vld [vmem:[%s15591_s14 + $0xd88] sm:$0xff] }
 0x5f1   : > { %v7807_v8 = vpop.f32.mrf.mxu0  ;;  %v7850_v29 = vpop.f32.mrf.mxu1  ;;  %9690 = vmatpush2.bf16.msra.mxu1 %v15120_v18  ;;  %v20117_v38 = vpack.c.bf16 %v13439_v5, %v13435_v34  ;;  %v13456_v51 = vld [vmem:[%s15591_s14 + $0xda8] sm:$0xff]  ;;  %v15126_v5 = vld [vmem:[%s22268_s1 + $0x110] ss:$12 sps:$4 sm:$0xff]  }
 0x5f2   : > { %13365 = vst [vmem:[%s17134_s8 + $0x630] sm:$0xff] %v7806_v7  ;;  %v7808_v57 = vadd.f32 %v7807_v8, %v20021_v47  ;;  %9471 = vmatmul.mubr.bf16.gmra.mxu0 %v20083_v41  ;;  %9691 = vmatprep.subr.bf16.mxu1 %v22616_v21  ;;  %v13405_v7 = vld [vmem:[%s15591_s14 + $0xc10] sm:$0xff]  ;;  %v20160_v8 = vpack.c.bf16 %v13447_v52, %v13443_v43  ;;  %v13418_v29 = vld [vmem:[%s15591_s14 + $0xc78] sm:$0xff] }
 0x5f3   : > { %v7809_v54 = vpop.f32.mrf.mxu0  ;;  %13638 = vmatprep.mubr.msk.bf16.mxu0 %vm1006_vm1, %v20086_v23  ;;  %v20115_v33 = vpop.f32.mrf.mxu1  ;;  %9889 = vmatpush1.bf16.msra.mxu0 %v15117_v37  ;;  %v13409_v37 = vld [vmem:[%s15591_s14 + $0xc30] sm:$0xff]  ;;  %v20170_v58 = vpack.c.bf16 %v13456_v51, %v13452_v26  ;;  %v15130_v26 = vld [vmem:[%s22268_s1 + $0xe0] ss:$12 sps:$4 sm:$0xff]   ;;  %v13422_v51 = vld [vmem:[%s15591_s14 + $0xc98] sm:$0xff] }
 0x5f4   : > { %13366 = vst [vmem:[%s17134_s8 + $0x638] sm:$0xff] %v7808_v57  ;;  %v7810_v47 = vadd.f32 %v7809_v54, %v20044_v45  ;;  %9890 = vmatprep.subr.bf16.mxu0 %v22616_v21  ;;  %v15123_v34 = vld [vmem:[%s22268_s1 + $0x188] ss:$12 sps:$4 sm:$0xff]   ;;  %v13414_v57 = vld [vmem:[%s15591_s14 + $0xc58] sm:$0xff]  ;;  %v20176_v54 = vpack.c.bf16 %v13409_v37, %v13405_v7 }
 0x5f5   : > { %v7811_v11 = vpop.f32.mrf.mxu0  ;;  %v7853_v35 = vpop.f32.mrf.mxu1  ;;  %9692 = vmatpush2.bf16.msra.mxu1 %v15122_v62  ;;  %v20179_v22 = vpack.c.bf16 %v13418_v29, %v13414_v57  ;;  %v13451_v62 = vld [vmem:[%s15591_s14 + $0xd80] sm:$0xff]  ;;  %v13426_v7 = vld [vmem:[%s15591_s14 + $0xcb8] sm:$0xff] }
 0x5f6   : > { %13368 = vst [vmem:[%s17134_s8 + $0x648] sm:$0x3f] %v7810_v47  ;;  %v7812_v45 = vadd.f32 %v7811_v11, %v7608_v39  ;;  %9693 = vmatprep.subr.bf16.mxu1 %v22616_v21  ;;  %v15121_v39 = vld [vmem:[%s22268_s1 + $0x1a0] ss:$12 sps:$4 sm:$0xff]   ;;  %v20202_v52 = vpack.c.bf16 %v13455_v48, %v13451_v62  ;;  %v20218_v57 = vpack.c.bf16 %v13426_v7, %v13422_v51  ;;  %v13434_v51 = vld [vmem:[%s15591_s14 + $0xcf8] sm:$0xff] }
 0x5f7   : > { %v20137_v13 = vpop.f32.mrf.mxu1  ;;  %9278 = vmatmul.mubr.bf16.gmra.mxu1 %v20117_v38  ;;  %9891 = vmatpush1.bf16.msra.mxu0 %v15119_v3  ;;  %v15128_v3 = vld [vmem:[%s22268_s1 + $0xf8] ss:$12 sps:$4 sm:$0xff]   ;;  %v13464_v35 = vld [vmem:[%s15591_s14 + $0xde8] sm:$0xff] }
 0x5f8   : > { %13369 = vst [vmem:[%s17134_s8 + $0x650] sm:$0x3f] %v7812_v45  ;;  %9287 = vmatprep.mubr.bf16.mxu1 %v20127_v63  ;;  %9892 = vmatprep.subr.bf16.mxu0 %v22616_v21  ;;  %v13460_v45 = vld [vmem:[%s15591_s14 + $0xdc8] sm:$0xff]  ;;  %v13463_v62 = vld [vmem:[%s15591_s14 + $0xde0] sm:$0xff] }
 0x5f9   : > { %v7858_v28 = vpop.f32.mrf.mxu1  ;;  %9694 = vmatpush2.bf16.msra.mxu1 %v15124_v1  ;;  %v13417_v1 = vld [vmem:[%s15591_s14 + $0xc70] sm:$0xff]  ;;  %v20212_v37 = vpack.c.bf16 %v13464_v35, %v13460_v45 }
 0x5fa   : > { %9481 = vmatmul.mubr.bf16.gmra.mxu0 %v20131_v32  ;;  %9695 = vmatprep.subr.bf16.mxu1 %v22616_v21  ;;  %v15127_v28 = vld [vmem:[%s22268_s1 + $0x290] ss:$12 sps:$4 sm:$0xff]  }
 0x5fb   : > { %13639 = vmatprep.mubr.msk.bf16.mxu0 %vm1006_vm1, %v20134_v20  ;;  %v20158_v18 = vpop.f32.mrf.mxu1  ;;  %9893 = vmatpush1.bf16.msra.mxu0 %v15121_v39  ;;  %v13413_v39 = vld [vmem:[%s15591_s14 + $0xc50] sm:$0xff] }
 0x5fc   : > { %9894 = vmatprep.subr.bf16.mxu0 %v22616_v21  ;;  %v13421_v45 = vld [vmem:[%s15591_s14 + $0xc90] sm:$0xff] }
 0x5fd   : > { %v7861_v4 = vpop.f32.mrf.mxu1  ;;  %9696 = vmatpush2.bf16.msra.mxu1 %v15126_v5  ;;  %v20215_v5 = vpack.c.bf16 %v13417_v1, %v13413_v39  ;;  %v13425_v35 = vld [vmem:[%s15591_s14 + $0xcb0] sm:$0xff] }
 0x5fe   : > { %9697 = vmatprep.subr.bf16.mxu1 %v22616_v21  ;;  %v15132_v4 = vld [vmem:[%s22268_s1 + $0xc8] ss:$12 sps:$4 sm:$0xff]  }
 0x5ff   : > { %v20181_v47 = vpop.f32.mrf.mxu1  ;;  %9288 = vmatmul.mubr.bf16.gmra.mxu1 %v20160_v8  ;;  %9895 = vmatpush1.bf16.msra.mxu0 %v15123_v34 }
 0x600   : > { %9297 = vmatprep.mubr.bf16.mxu1 %v20170_v58  ;;  %9902 = vmatprep.subr.bf16.mxu0 %v22616_v21 }
 0x601   : > { %v7866_v11 = vpop.f32.mrf.mxu1  ;;  %9698 = vmatpush2.bf16.msra.mxu1 %v15128_v3  ;;  %v13459_v3 = vld [vmem:[%s15591_s14 + $0xdc0] sm:$0xff] }
 0x602   : > { %9491 = vmatmul.mubr.bf16.gmra.mxu0 %v20176_v54  ;;  %9699 = vmatprep.subr.bf16.mxu1 %v22616_v21  ;;  %v13472_v11 = vld [vmem:[%s15591_s14 + $0xe28] sm:$0xff]  ;;  %v20242_v1 = vpack.c.bf16 %v13463_v62, %v13459_v3 }
 0x603   : > { %13640 = vmatprep.mubr.msk.bf16.mxu0 %vm1006_vm1, %v20179_v22  ;;  %v20200_v43 = vpop.f32.mrf.mxu1  ;;  %9903 = vmatpush2.bf16.msra.mxu0 %v9163_v59  ;;  %v13468_v59 = vld [vmem:[%s15591_s14 + $0xe08] sm:$0xff] }
 0x604   : > { %9904 = vmatprep.subr.bf16.mxu0 %v22616_v21  ;;  %22628 = vst [vmem:[#allocation18_spill] sm:$0xff] %v20242_v1  ;;  %v20249_v7 = vpack.c.bf16 %v13472_v11, %v13468_v59  ;;  %v15133_v62 = vld [vmem:[%s22268_s1 + $0x248] ss:$12 sps:$4 sm:$0xff]   ;;  %v13471_v59 = vld [vmem:[%s15591_s14 + $0xe20] sm:$0xff] }
 0x605   : > { %v7869_v34 = vpop.f32.mrf.mxu1  ;;  %9700 = vmatpush2.bf16.msra.mxu1 %v15130_v26  ;;  %v13430_v26 = vld [vmem:[%s15591_s14 + $0xcd8] sm:$0xff] }
 0x606   : > { %9701 = vmatprep.subr.bf16.mxu1 %v22616_v21  ;;  %22629 = vst [vmem:[#allocation9_spill] sm:$0xff] %v20249_v7  ;;  %v20254_v3 = vpack.c.bf16 %v13434_v51, %v13430_v26  ;;  %v13433_v26 = vld [vmem:[%s15591_s14 + $0xcf0] sm:$0xff] }
 0x607   : > { %v20220_v29 = vpop.f32.mrf.mxu1  ;;  %9298 = vmatmul.mubr.bf16.gmra.mxu1 %v20202_v52  ;;  %9905 = vmatpush2.bf16.msra.mxu0 %v15127_v28  ;;  %v15131_v28 = vld [vmem:[%s22268_s1 + $0x260] ss:$12 sps:$4 sm:$0xff]  }
 0x608   : > { %9307 = vmatprep.mubr.bf16.mxu1 %v20212_v37  ;;  %9906 = vmatprep.subr.bf16.mxu0 %v22616_v21  ;;  %22631 = vst [vmem:[#allocation11_spill] sm:$0xff] %v20254_v3 }
 0x609   : > { %v7874_v48 = vpop.f32.mrf.mxu1  ;;  %9702 = vmatpush2.bf16.msra.mxu1 %v15132_v4  ;;  %v20252_v4 = vpack.c.bf16 %v13425_v35, %v13421_v45  ;;  %v13476_v45 = vld [vmem:[%s15591_s14 + $0xe48] sm:$0xff] }
 0x60a   : > { %9501 = vmatmul.mubr.bf16.gmra.mxu0 %v20215_v5  ;;  %v13467_v48 = vld [vmem:[%s15591_s14 + $0xe00] sm:$0xff]  ;;  %v13480_v35 = vld [vmem:[%s15591_s14 + $0xe68] sm:$0xff] }
 0x60b   : > { %13641 = vmatprep.mubr.msk.bf16.mxu0 %vm1006_vm1, %v20218_v57  ;;  %v20240_v39 = vpop.f32.mrf.mxu1  ;;  %9907 = vmatpush2.bf16.msra.mxu0 %v15129_v10  ;;  %22630 = vst [vmem:[#allocation20_spill] sm:$0xff] %v20252_v4  ;;  %v20279_v50 = vpack.c.bf16 %v13480_v35, %v13476_v45  ;;  %v13484_v45 = vld [vmem:[%s15591_s14 + $0xe88] sm:$0xff] }
 0x60c   : > { %9908 = vmatprep.subr.bf16.mxu0 %v22616_v21  ;;  %v13488_v35 = vld [vmem:[%s15591_s14 + $0xea8] sm:$0xff] }
 0x60d   : > { %v7877_v34 = vpop.f32.mrf.mxu1  ;;  %22633 = vst [vmem:[#allocation13_spill] sm:$0xff] %v20279_v50 }
 0x60e   : > { %v20275_v34 = vpack.c.bf16 %v13471_v59, %v13467_v48  ;;  %v13479_v48 = vld [vmem:[%s15591_s14 + $0xe60] sm:$0xff] }
 0x60f   : > { %v20256_v10 = vpop.f32.mrf.mxu1  ;;  %9308 = vmatmul.mubr.bf16.gmra.mxu1 %v20242_v1  ;;  %9909 = vmatpush2.bf16.msra.mxu0 %v15131_v28  ;;  %v13429_v28 = vld [vmem:[%s15591_s14 + $0xcd0] sm:$0xff] }
 0x610   : > { %9317 = vmatprep.mubr.bf16.mxu1 %v20249_v7  ;;  %9910 = vmatprep.subr.bf16.mxu0 %v22616_v21  ;;  %22632 = vst [vmem:[#allocation22_spill] sm:$0xff] %v20275_v34  ;;  %v20281_v40 = vpack.c.bf16 %v13433_v26, %v13429_v28  ;;  %v13437_v28 = vld [vmem:[%s15591_s14 + $0xd10] sm:$0xff]  ;;  %v20305_v7 = vpack.c.bf16 %v13488_v35, %v13484_v45  ;;  %v13483_v45 = vld [vmem:[%s15591_s14 + $0xe80] sm:$0xff] }
 0x611   : > { %v7882_v11 = vpop.f32.mrf.mxu1  ;;  %v13441_v26 = vld [vmem:[%s15591_s14 + $0xd30] sm:$0xff]  ;;  %v13487_v35 = vld [vmem:[%s15591_s14 + $0xea0] sm:$0xff] }
 0x612   : > { %9511 = vmatmul.mubr.bf16.gmra.mxu0 %v20252_v4  ;;  %v13442_v11 = vld [vmem:[%s15591_s14 + $0xd38] sm:$0xff]  ;;  %22634 = vst [vmem:[#allocation24_spill] sm:$0xff] %v20281_v40  ;;  %22637 = vst [vmem:[#allocation17_spill] sm:$0xff] %v20305_v7 }
 0x613   : > { %13642 = vmatprep.mubr.msk.bf16.mxu0 %vm1006_vm1, %v20254_v3  ;;  %v20273_v51 = vpop.f32.mrf.mxu1  ;;  %9911 = vmatpush2.bf16.msra.mxu0 %v15133_v62  ;;  %v20283_v21 = vpack.c.bf16 %v13442_v11, %v13438_v36  ;;  %v13475_v62 = vld [vmem:[%s15591_s14 + $0xe40] sm:$0xff]  ;;  %v13450_v4 = vld [vmem:[%s15591_s14 + $0xd78] sm:$0xff] }
 0x615   : > { %v7885_v6 = vpop.f32.mrf.mxu1  ;;  %22635 = vst [vmem:[#allocation15_spill] sm:$0xff] %v20283_v21 }
 0x617   : > { %v20285_v3 = vpop.f32.mrf.mxu1  ;;  %9318 = vmatmul.mubr.bf16.gmra.mxu1 %v20275_v34 }
 0x618   : > { %9327 = vmatprep.mubr.bf16.mxu1 %v20279_v50  ;;  %v20301_v50 = vpack.c.bf16 %v13479_v48, %v13475_v62 }
 0x619   : > { %v7890_v59 = vpop.f32.mrf.mxu1 }
 0x61a   : > { %v8017_v6 = vpop.f32.mrf.mxu0  ;;  %9521 = vmatmul.mubr.bf16.gmra.mxu0 %v20281_v40  ;;  %22636 = vst [vmem:[#allocation26_spill] sm:$0xff] %v20301_v50  ;;  %v13446_v59 = vld [vmem:[%s15591_s14 + $0xd58] sm:$0xff] }
 0x61b   : > { %v8018_v36 = vadd.f32 %v8017_v6, %v20090_v56  ;;  %13643 = vmatprep.mubr.msk.bf16.mxu0 %vm1006_vm1, %v20283_v21  ;;  %v20299_v11 = vpop.f32.mrf.mxu1  ;;  %v20309_v21 = vpack.c.bf16 %v13441_v26, %v13437_v28  ;;  %v20312_v62 = vpack.c.bf16 %v13450_v4, %v13446_v59  ;;  %v13496_v28 = vld [vmem:[%s15591_s14 + $0xee8] sm:$0xff]  ;;  %v13445_v59 = vld [vmem:[%s15591_s14 + $0xd50] sm:$0xff] }
 0x61c   : > { %v14449_v34 = vpop.f32.mrf.mxu0 }
 0x61d   : > { %13271 = vst.msk [vmem:[%s17134_s8 + $0x340] sm:$0xff] %vm4119_vm15, %v8018_v36  ;;  %v7893_v56 = vpop.f32.mrf.mxu1  ;;  %22638 = vst [vmem:[#allocation28_spill] sm:$0xff] %v20309_v21 }
 0x61e   : > { %v8020_v6 = vpop.f32.mrf.mxu0  ;;  %22639 = vst [vmem:[#allocation19_spill] sm:$0xff] %v20312_v62  ;;  %v13449_v56 = vld [vmem:[%s15591_s14 + $0xd70] sm:$0xff] }
 0x61f   : > { %v8021_v40 = vadd.f32 %v8020_v6, %v20115_v33  ;;  %v20314_v34 = vpop.f32.mrf.mxu1  ;;  %9328 = vmatmul.mubr.bf16.gmra.mxu1 %v20301_v50  ;;  %v13492_v33 = vld [vmem:[%s15591_s14 + $0xec8] sm:$0xff] }
 0x620   : > { %v14450_v48 = vpop.f32.mrf.mxu0  ;;  %9337 = vmatprep.mubr.bf16.mxu1 %v20305_v7  ;;  %v13458_v7 = vld [vmem:[%s15591_s14 + $0xdb8] sm:$0xff]  ;;  %v20336_v50 = vpack.c.bf16 %v13496_v28, %v13492_v33  ;;  %v13491_v33 = vld [vmem:[%s15591_s14 + $0xec0] sm:$0xff] }
 0x621   : > { %13274 = vst.msk [vmem:[%s17134_s8 + $0x358] sm:$0xff] %vm4119_vm15, %v8021_v40  ;;  %v7898_v36 = vpop.f32.mrf.mxu1  ;;  %v20332_v48 = vpack.c.bf16 %v13487_v35, %v13483_v45  ;;  %v13495_v28 = vld [vmem:[%s15591_s14 + $0xee0] sm:$0xff] }
 0x622   : > { %v8025_v4 = vpop.f32.mrf.mxu0  ;;  %9531 = vmatmul.mubr.bf16.gmra.mxu0 %v20309_v21  ;;  %v13454_v36 = vld [vmem:[%s15591_s14 + $0xd98] sm:$0xff]  ;;  %22641 = vst [vmem:[#allocation21_spill] sm:$0xff] %v20336_v50 }
 0x623   : > { %v8026_v26 = vadd.f32 %v8025_v4, %v20137_v13  ;;  %13644 = vmatprep.mubr.msk.bf16.mxu0 %vm1006_vm1, %v20312_v62  ;;  %v20330_v6 = vpop.f32.mrf.mxu1  ;;  %22640 = vst [vmem:[#allocation30_spill] sm:$0xff] %v20332_v48  ;;  %v20340_v62 = vpack.c.bf16 %v13449_v56, %v13445_v59  ;;  %v20343_v45 = vpack.c.bf16 %v13458_v7, %v13454_v36  ;;  %v13504_v59 = vld [vmem:[%s15591_s14 + $0xf28] sm:$0xff]  ;;  %v13453_v36 = vld [vmem:[%s15591_s14 + $0xd90] sm:$0xff] }
 0x624   : > { %v14453_v40 = vpop.f32.mrf.mxu0 }
 0x625   : > { %13277 = vst.msk [vmem:[%s17134_s8 + $0x370] sm:$0xff] %vm4119_vm15, %v8026_v26  ;;  %v7901_v13 = vpop.f32.mrf.mxu1  ;;  %22642 = vst [vmem:[#allocation32_spill] sm:$0xff] %v20340_v62 }
 0x626   : > { %v8028_v4 = vpop.f32.mrf.mxu0  ;;  %22643 = vst [vmem:[#allocation23_spill] sm:$0xff] %v20343_v45  ;;  %v13457_v13 = vld [vmem:[%s15591_s14 + $0xdb0] sm:$0xff] }
 0x627   : > { %v8029_v21 = vadd.f32 %v8028_v4, %v20158_v18  ;;  %v20345_v35 = vpop.f32.mrf.mxu1  ;;  %9338 = vmatmul.mubr.bf16.gmra.mxu1 %v20332_v48  ;;  %v13500_v18 = vld [vmem:[%s15591_s14 + $0xf08] sm:$0xff] }
 0x628   : > { %v14454_v40 = vpop.f32.mrf.mxu0  ;;  %9347 = vmatprep.mubr.bf16.mxu1 %v20336_v50  ;;  %v13466_v50 = vld [vmem:[%s15591_s14 + $0xdf8] sm:$0xff]  ;;  %v20367_v48 = vpack.c.bf16 %v13504_v59, %v13500_v18  ;;  %v13499_v18 = vld [vmem:[%s15591_s14 + $0xf00] sm:$0xff] }
 0x629   : > { %13280 = vst.msk [vmem:[%s17134_s8 + $0x388] sm:$0xff] %vm4119_vm15, %v8029_v21  ;;  %v7906_v26 = vpop.f32.mrf.mxu1  ;;  %v20363_v40 = vpack.c.bf16 %v13495_v28, %v13491_v33  ;;  %v13503_v59 = vld [vmem:[%s15591_s14 + $0xf20] sm:$0xff] }
 0x62a   : > { %v8033_v7 = vpop.f32.mrf.mxu0  ;;  %9541 = vmatmul.mubr.bf16.gmra.mxu0 %v20340_v62  ;;  %v13462_v26 = vld [vmem:[%s15591_s14 + $0xdd8] sm:$0xff]  ;;  %22645 = vst [vmem:[#allocation27_spill] sm:$0xff] %v20367_v48 }
 0x62b   : > { %v8034_v56 = vadd.f32 %v8033_v7, %v20181_v47  ;;  %13645 = vmatprep.mubr.msk.bf16.mxu0 %vm1006_vm1, %v20343_v45  ;;  %v20361_v4 = vpop.f32.mrf.mxu1  ;;  %22644 = vst [vmem:[#allocation25_spill] sm:$0xff] %v20363_v40  ;;  %v20371_v45 = vpack.c.bf16 %v13457_v13, %v13453_v36  ;;  %v20374_v33 = vpack.c.bf16 %v13466_v50, %v13462_v26  ;;  %v13512_v36 = vld [vmem:[%s15591_s14 + $0xf68] sm:$0xff]  ;;  %v13461_v26 = vld [vmem:[%s15591_s14 + $0xdd0] sm:$0xff] }
 0x62c   : > { %v14457_v21 = vpop.f32.mrf.mxu0 }
 0x62d   : > { %13283 = vst.msk [vmem:[%s17134_s8 + $0x3a0] sm:$0xff] %vm4119_vm15, %v8034_v56  ;;  %v7909_v47 = vpop.f32.mrf.mxu1  ;;  %22646 = vst [vmem:[#allocation29_spill] sm:$0xff] %v20371_v45 }
 0x62e   : > { %v8036_v7 = vpop.f32.mrf.mxu0  ;;  %22647 = vst [vmem:[#allocation31_spill] sm:$0xff] %v20374_v33  ;;  %v13465_v47 = vld [vmem:[%s15591_s14 + $0xdf0] sm:$0xff] }
 0x62f   : > { %v8037_v62 = vadd.f32 %v8036_v7, %v20200_v43  ;;  %v20376_v28 = vpop.f32.mrf.mxu1  ;;  %9348 = vmatmul.mubr.bf16.gmra.mxu1 %v20363_v40  ;;  %v13508_v43 = vld [vmem:[%s15591_s14 + $0xf48] sm:$0xff] }
 0x630   : > { %v14458_v21 = vpop.f32.mrf.mxu0  ;;  %9357 = vmatprep.mubr.bf16.mxu1 %v20367_v48  ;;  %v13474_v48 = vld [vmem:[%s15591_s14 + $0xe38] sm:$0xff]  ;;  %v20398_v40 = vpack.c.bf16 %v13512_v36, %v13508_v43  ;;  %v13507_v43 = vld [vmem:[%s15591_s14 + $0xf40] sm:$0xff] }
 0x631   : > { %13286 = vst.msk [vmem:[%s17134_s8 + $0x3b8] sm:$0xff] %vm4119_vm15, %v8037_v62  ;;  %v7914_v56 = vpop.f32.mrf.mxu1  ;;  %v20394_v21 = vpack.c.bf16 %v13503_v59, %v13499_v18  ;;  %v13511_v36 = vld [vmem:[%s15591_s14 + $0xf60] sm:$0xff] }
 0x632   : > { %v8041_v50 = vpop.f32.mrf.mxu0  ;;  %9551 = vmatmul.mubr.bf16.gmra.mxu0 %v20371_v45  ;;  %v13470_v56 = vld [vmem:[%s15591_s14 + $0xe18] sm:$0xff]  ;;  %22649 = vst [vmem:[#allocation34_spill] sm:$0xff] %v20398_v40 }
 0x633   : > { %v8042_v13 = vadd.f32 %v8041_v50, %v20220_v29  ;;  %13646 = vmatprep.mubr.msk.bf16.mxu0 %vm1006_vm1, %v20374_v33  ;;  %v20392_v7 = vpop.f32.mrf.mxu1  ;;  %22648 = vst [vmem:[#allocation33_spill] sm:$0xff] %v20394_v21  ;;  %v20402_v33 = vpack.c.bf16 %v13465_v47, %v13461_v26  ;;  %v20405_v18 = vpack.c.bf16 %v13474_v48, %v13470_v56  ;;  %v13520_v26 = vld [vmem:[%s15591_s14 + $0xfa8] sm:$0xff]  ;;  %v13469_v56 = vld [vmem:[%s15591_s14 + $0xe10] sm:$0xff] }
 0x634   : > { %v14461_v62 = vpop.f32.mrf.mxu0 }
 0x635   : > { %13289 = vst.msk [vmem:[%s17134_s8 + $0x3d0] sm:$0xff] %vm4119_vm15, %v8042_v13  ;;  %v7917_v29 = vpop.f32.mrf.mxu1  ;;  %22650 = vst [vmem:[#allocation35_spill] sm:$0xff] %v20402_v33 }
 0x636   : > { %v8044_v50 = vpop.f32.mrf.mxu0  ;;  %22651 = vst [vmem:[#allocation36_spill] sm:$0xff] %v20405_v18  ;;  %v13473_v29 = vld [vmem:[%s15591_s14 + $0xe30] sm:$0xff] }
 0x637   : > { %v8045_v45 = vadd.f32 %v8044_v50, %v20240_v39  ;;  %v20407_v59 = vpop.f32.mrf.mxu1  ;;  %9358 = vmatmul.mubr.bf16.gmra.mxu1 %v20394_v21  ;;  %v13516_v39 = vld [vmem:[%s15591_s14 + $0xf88] sm:$0xff] }
 0x638   : > { %v14462_v62 = vpop.f32.mrf.mxu0  ;;  %9367 = vmatprep.mubr.bf16.mxu1 %v20398_v40  ;;  %v13482_v40 = vld [vmem:[%s15591_s14 + $0xe78] sm:$0xff]  ;;  %v20429_v21 = vpack.c.bf16 %v13520_v26, %v13516_v39  ;;  %v13515_v39 = vld [vmem:[%s15591_s14 + $0xf80] sm:$0xff] }
 0x639   : > { %13292 = vst.msk [vmem:[%s17134_s8 + $0x3e8] sm:$0xff] %vm4119_vm15, %v8045_v45  ;;  %v7922_v13 = vpop.f32.mrf.mxu1  ;;  %v20425_v62 = vpack.c.bf16 %v13511_v36, %v13507_v43  ;;  %v13519_v26 = vld [vmem:[%s15591_s14 + $0xfa0] sm:$0xff] }
 0x63a   : > { %v8049_v48 = vpop.f32.mrf.mxu0  ;;  %9561 = vmatmul.mubr.bf16.gmra.mxu0 %v20402_v33  ;;  %v13478_v13 = vld [vmem:[%s15591_s14 + $0xe58] sm:$0xff]  ;;  %22653 = vst [vmem:[#allocation38_spill] sm:$0xff] %v20429_v21 }
 0x63b   : > { %v8050_v47 = vadd.f32 %v8049_v48, %v20256_v10  ;;  %13647 = vmatprep.mubr.msk.bf16.mxu0 %vm1006_vm1, %v20405_v18  ;;  %v20423_v50 = vpop.f32.mrf.mxu1  ;;  %22652 = vst [vmem:[#allocation37_spill] sm:$0xff] %v20425_v62  ;;  %v20433_v18 = vpack.c.bf16 %v13473_v29, %v13469_v56  ;;  %v20436_v43 = vpack.c.bf16 %v13482_v40, %v13478_v13  ;;  %v13528_v56 = vld [vmem:[%s15591_s14 + $0xfe8] sm:$0xff]  ;;  %v13477_v13 = vld [vmem:[%s15591_s14 + $0xe50] sm:$0xff] }
 0x63c   : > { %v14465_v45 = vpop.f32.mrf.mxu0 }
 0x63d   : > { %13295 = vst.msk [vmem:[%s17134_s8 + $0x400] sm:$0xff] %vm4119_vm15, %v8050_v47  ;;  %v7925_v10 = vpop.f32.mrf.mxu1  ;;  %22654 = vst [vmem:[#allocation39_spill] sm:$0xff] %v20433_v18 }
 0x63e   : > { %v8052_v48 = vpop.f32.mrf.mxu0  ;;  %22655 = vst [vmem:[#allocation40_spill] sm:$0xff] %v20436_v43  ;;  %v13481_v10 = vld [vmem:[%s15591_s14 + $0xe70] sm:$0xff] }
 0x63f   : > { %v8053_v33 = vadd.f32 %v8052_v48, %v20273_v51  ;;  %v20438_v36 = vpop.f32.mrf.mxu1  ;;  %9368 = vmatmul.mubr.bf16.gmra.mxu1 %v20425_v62  ;;  %v13524_v51 = vld [vmem:[%s15591_s14 + $0xfc8] sm:$0xff] }
 0x640   : > { %v14466_v45 = vpop.f32.mrf.mxu0  ;;  %9377 = vmatprep.mubr.bf16.mxu1 %v20429_v21  ;;  %v13490_v21 = vld [vmem:[%s15591_s14 + $0xeb8] sm:$0xff]  ;;  %v20460_v62 = vpack.c.bf16 %v13528_v56, %v13524_v51  ;;  %v13523_v51 = vld [vmem:[%s15591_s14 + $0xfc0] sm:$0xff] }
 0x641   : > { %13298 = vst.msk [vmem:[%s17134_s8 + $0x418] sm:$0xff] %vm4119_vm15, %v8053_v33  ;;  %v7930_v47 = vpop.f32.mrf.mxu1  ;;  %v20456_v45 = vpack.c.bf16 %v13519_v26, %v13515_v39  ;;  %v13527_v56 = vld [vmem:[%s15591_s14 + $0xfe0] sm:$0xff] }
 0x642   : > { %v8057_v40 = vpop.f32.mrf.mxu0  ;;  %9571 = vmatmul.mubr.bf16.gmra.mxu0 %v20433_v18  ;;  %v13486_v47 = vld [vmem:[%s15591_s14 + $0xe98] sm:$0xff]  ;;  %22657 = vst [vmem:[#allocation42_spill] sm:$0xff] %v20460_v62 }
 0x643   : > { %v8058_v29 = vadd.f32 %v8057_v40, %v20285_v3  ;;  %13648 = vmatprep.mubr.msk.bf16.mxu0 %vm1006_vm1, %v20436_v43  ;;  %v20454_v48 = vpop.f32.mrf.mxu1  ;;  %22656 = vst [vmem:[#allocation41_spill] sm:$0xff] %v20456_v45  ;;  %v20464_v43 = vpack.c.bf16 %v13481_v10, %v13477_v13  ;;  %v20467_v39 = vpack.c.bf16 %v13490_v21, %v13486_v47  ;;  %v13536_v13 = vld [vmem:[%s15591_s14 + $0x1028] sm:$0xff]  ;;  %v13485_v47 = vld [vmem:[%s15591_s14 + $0xe90] sm:$0xff] }
 0x644   : > { %v14469_v33 = vpop.f32.mrf.mxu0 }
 0x645   : > { %13301 = vst.msk [vmem:[%s17134_s8 + $0x430] sm:$0xff] %vm4119_vm15, %v8058_v29  ;;  %v7933_v3 = vpop.f32.mrf.mxu1  ;;  %22658 = vst [vmem:[#allocation43_spill] sm:$0xff] %v20464_v43 }
 0x646   : > { %v8060_v40 = vpop.f32.mrf.mxu0  ;;  %22659 = vst [vmem:[#allocation4_spill] sm:$0xff] %v20467_v39  ;;  %v13489_v3 = vld [vmem:[%s15591_s14 + $0xeb0] sm:$0xff] }
 0x647   : > { %v8061_v18 = vadd.f32 %v8060_v40, %v20299_v11  ;;  %v20469_v26 = vpop.f32.mrf.mxu1  ;;  %9378 = vmatmul.mubr.bf16.gmra.mxu1 %v20456_v45  ;;  %v13532_v11 = vld [vmem:[%s15591_s14 + $0x1008] sm:$0xff] }
 0x648   : > { %v14470_v33 = vpop.f32.mrf.mxu0  ;;  %9387 = vmatprep.mubr.bf16.mxu1 %v20460_v62  ;;  %v13498_v62 = vld [vmem:[%s15591_s14 + $0xef8] sm:$0xff]  ;;  %v20491_v45 = vpack.c.bf16 %v13536_v13, %v13532_v11  ;;  %v13531_v11 = vld [vmem:[%s15591_s14 + $0x1000] sm:$0xff] }
 0x649   : > { %13304 = vst.msk [vmem:[%s17134_s8 + $0x448] sm:$0xff] %vm4119_vm15, %v8061_v18  ;;  %v7938_v29 = vpop.f32.mrf.mxu1  ;;  %v20487_v33 = vpack.c.bf16 %v13527_v56, %v13523_v51  ;;  %v13535_v13 = vld [vmem:[%s15591_s14 + $0x1020] sm:$0xff] }
 0x64a   : > { %v8065_v21 = vpop.f32.mrf.mxu0  ;;  %9581 = vmatmul.mubr.bf16.gmra.mxu0 %v20464_v43  ;;  %v13494_v29 = vld [vmem:[%s15591_s14 + $0xed8] sm:$0xff]  ;;  %22661 = vst [vmem:[#allocation45_spill] sm:$0xff] %v20491_v45 }
 0x64b   : > { %v8066_v10 = vadd.f32 %v8065_v21, %v20314_v34  ;;  %13649 = vmatprep.mubr.msk.bf16.mxu0 %vm1006_vm1, %v20467_v39  ;;  %v20485_v40 = vpop.f32.mrf.mxu1  ;;  %22660 = vst [vmem:[#allocation44_spill] sm:$0xff] %v20487_v33  ;;  %v20495_v39 = vpack.c.bf16 %v13489_v3, %v13485_v47  ;;  %v20498_v51 = vpack.c.bf16 %v13498_v62, %v13494_v29  ;;  %v13544_v47 = vld [vmem:[%s15591_s14 + $0x1068] sm:$0x1]  ;;  %v13493_v29 = vld [vmem:[%s15591_s14 + $0xed0] sm:$0xff] }
 0x64c   : > { %v14473_v18 = vpop.f32.mrf.mxu0 }
 0x64d   : > { %13307 = vst.msk [vmem:[%s17134_s8 + $0x460] sm:$0xff] %vm4119_vm15, %v8066_v10  ;;  %v7941_v34 = vpop.f32.mrf.mxu1  ;;  %22662 = vst [vmem:[#allocation12_spill] sm:$0xff] %v20495_v39 }
 0x64e   : > { %v8068_v21 = vpop.f32.mrf.mxu0  ;;  %22663 = vst [vmem:[#allocation5_spill] sm:$0xff] %v20498_v51  ;;  %v13497_v34 = vld [vmem:[%s15591_s14 + $0xef0] sm:$0xff] }
 0x64f   : > { %v8069_v43 = vadd.f32 %v8068_v21, %v20330_v6  ;;  %v20500_v56 = vpop.f32.mrf.mxu1  ;;  %9388 = vmatmul.mubr.bf16.gmra.mxu1 %v20487_v33  ;;  %v13540_v6 = vld [vmem:[%s15591_s14 + $0x1048] sm:$0xff] }
 0x650   : > { %v14474_v18 = vpop.f32.mrf.mxu0  ;;  %9397 = vmatprep.mubr.bf16.mxu1 %v20491_v45  ;;  %v13506_v45 = vld [vmem:[%s15591_s14 + $0xf38] sm:$0xff]  ;;  %v20522_v33 = vpack.c.bf16 %v13544_v47, %v13540_v6  ;;  %v13539_v6 = vld [vmem:[%s15591_s14 + $0x1040] sm:$0xff] }
 0x651   : > { %13310 = vst.msk [vmem:[%s17134_s8 + $0x478] sm:$0xff] %vm4119_vm15, %v8069_v43  ;;  %v7946_v10 = vpop.f32.mrf.mxu1  ;;  %v20518_v18 = vpack.c.bf16 %v13535_v13, %v13531_v11  ;;  %v13543_v47 = vld [vmem:[%s15591_s14 + $0x1060] sm:$0x1] }
 0x652   : > { %v8073_v62 = vpop.f32.mrf.mxu0  ;;  %9591 = vmatmul.mubr.bf16.gmra.mxu0 %v20495_v39  ;;  %v13502_v10 = vld [vmem:[%s15591_s14 + $0xf18] sm:$0xff]  ;;  %22665 = vst [vmem:[#allocation14_spill] sm:$0xff] %v20522_v33 }
 0x653   : > { %v8074_v3 = vadd.f32 %v8073_v62, %v20345_v35  ;;  %13650 = vmatprep.mubr.msk.bf16.mxu0 %vm1006_vm1, %v20498_v51  ;;  %v20516_v21 = vpop.f32.mrf.mxu1  ;;  %22664 = vst [vmem:[#allocation46_spill] sm:$0xff] %v20518_v18  ;;  %v20526_v51 = vpack.c.bf16 %v13497_v34, %v13493_v29  ;;  %v20529_v1 = vpack.c.bf16 %v13506_v45, %v13502_v10  ;;  %v13501_v45 = vld [vmem:[%s15591_s14 + $0xf10] sm:$0xff] }
 0x654   : > { %v14477_v43 = vpop.f32.mrf.mxu0  ;;  %v13505_v34 = vld [vmem:[%s15591_s14 + $0xf30] sm:$0xff]  ;;  %v20547_v10 = vpack.c.bf16 %v13543_v47, %v13539_v6 }
 0x655   : > { %13313 = vst.msk [vmem:[%s17134_s8 + $0x490] sm:$0xff] %vm4119_vm15, %v8074_v3  ;;  %v7949_v35 = vpop.f32.mrf.mxu1  ;;  %22666 = vst [vmem:[#allocation47_spill] sm:$0xff] %v20526_v51 }
 0x656   : > { %v8076_v62 = vpop.f32.mrf.mxu0  ;;  %22667 = vst [vmem:[#allocation48_spill] sm:$0xff] %v20529_v1  ;;  %22668 = vst [vmem:[#allocation49_spill] sm:$0xff] %v20547_v10 }
 0x657   : > { %v8077_v39 = vadd.f32 %v8076_v62, %v20361_v4  ;;  %v20531_v11 = vpop.f32.mrf.mxu1  ;;  %9398 = vmatmul.mubr.bf16.gmra.mxu1 %v20518_v18  ;;  %v13510_v62 = vld [vmem:[%s15591_s14 + $0xf58] sm:$0xff] }
 0x658   : > { %v14478_v13 = vpop.f32.mrf.mxu0  ;;  %9407 = vmatprep.mubr.bf16.mxu1 %v20522_v33  ;;  %v22699_v33 = vld [vmem:[#allocation27_spill] sm:$0xff] }
 0x659   : > { %13316 = vst.msk [vmem:[%s17134_s8 + $0x4a8] sm:$0xff] %vm4119_vm15, %v8077_v39  ;;  %v7954_v3 = vpop.f32.mrf.mxu1  ;;  %v13514_v13 = vld [vmem:[%s15591_s14 + $0xf78] sm:$0xff] }
 0x65a   : > { %v8081_v29 = vpop.f32.mrf.mxu0  ;;  %9601 = vmatmul.mubr.bf16.gmra.mxu0 %v20526_v51 }
 0x65b   : > { %v8082_v4 = vadd.f32 %v8081_v29, %v20376_v28  ;;  %13651 = vmatprep.mubr.msk.bf16.mxu0 %vm1006_vm1, %v20529_v1  ;;  %v20545_v43 = vpop.f32.mrf.mxu1  ;;  %v20553_v28 = vpack.c.bf16 %v13505_v34, %v13501_v45  ;;  %v20556_v1 = vpack.c.bf16 %v13514_v13, %v13510_v62  ;;  %v13509_v45 = vld [vmem:[%s15591_s14 + $0xf50] sm:$0xff]  ;;  %v13518_v13 = vld [vmem:[%s15591_s14 + $0xf98] sm:$0xff] }
 0x65c   : > { %v14481_v35 = vpop.f32.mrf.mxu0  ;;  %v13513_v34 = vld [vmem:[%s15591_s14 + $0xf70] sm:$0xff] }
 0x65d   : > { %13319 = vst.msk [vmem:[%s17134_s8 + $0x4c0] sm:$0xff] %vm4119_vm15, %v8082_v4  ;;  %v7957_v39 = vpop.f32.mrf.mxu1  ;;  %22669 = vst [vmem:[#allocation50_spill] sm:$0xff] %v20553_v28 }
 0x65e   : > { %v8084_v3 = vpop.f32.mrf.mxu0  ;;  %22670 = vst [vmem:[#allocation51_spill] sm:$0xff] %v20556_v1  ;;  %v13522_v39 = vld [vmem:[%s15591_s14 + $0xfb8] sm:$0xff] }
 0x65f   : > { %v8085_v29 = vadd.f32 %v8084_v3, %v20392_v7  ;;  %v20558_v51 = vpop.f32.mrf.mxu1  ;;  %9408 = vmatmul.mubr.bf16.gmra.mxu1 %v20547_v10 }
 0x660   : > { %v14482_v6 = vpop.f32.mrf.mxu0  ;;  %9703 = vmatprep.mubr.bf16.mxu1 %v19799_v15 }
 0x661   : > { %13322 = vst.msk [vmem:[%s17134_s8 + $0x4d8] sm:$0xff] %vm4119_vm15, %v8085_v29  ;;  %v7962_v47 = vpop.f32.mrf.mxu1  ;;  %v20576_v29 = vpack.c.bf16 %v13513_v34, %v13509_v45  ;;  %v20579_v6 = vpack.c.bf16 %v13522_v39, %v13518_v13  ;;  %v13517_v45 = vld [vmem:[%s15591_s14 + $0xf90] sm:$0xff]  ;;  %v13526_v39 = vld [vmem:[%s15591_s14 + $0xfd8] sm:$0xff] }
 0x662   : > { %v8089_v4 = vpop.f32.mrf.mxu0  ;;  %9611 = vmatmul.mubr.bf16.gmra.mxu0 %v20553_v28  ;;  %v13521_v34 = vld [vmem:[%s15591_s14 + $0xfb0] sm:$0xff] }
 0x663   : > { %v8090_v7 = vadd.f32 %v8089_v4, %v20407_v59  ;;  %13652 = vmatprep.mubr.msk.bf16.mxu0 %vm1006_vm1, %v20556_v1  ;;  %v20570_v35 = vpop.f32.mrf.mxu1  ;;  %22671 = vst [vmem:[#allocation52_spill] sm:$0xff] %v20576_v29  ;;  %22672 = vst [vmem:[#allocation53_spill] sm:$0xff] %v20579_v6 }
 0x664   : > { %v14485_v62 = vpop.f32.mrf.mxu0 }
 0x665   : > { %13325 = vst.msk [vmem:[%s17134_s8 + $0x4f0] sm:$0xff] %vm4119_vm15, %v8090_v7  ;;  %v7965_v15 = vpop.f32.mrf.mxu1 }
 0x666   : > { %v8092_v3 = vpop.f32.mrf.mxu0  ;;  %v13530_v15 = vld [vmem:[%s15591_s14 + $0xff8] sm:$0xff] }
 0x667   : > { %v8093_v59 = vadd.f32 %v8092_v3, %v20423_v50  ;;  %v20581_v47 = vpop.f32.mrf.mxu1  ;;  %9704 = vmatmul.mubr.bf16.vlgmr.msra.gmra.mxu1 %v19821_v19 }
 0x668   : > { %v14486_v4 = vpop.f32.mrf.mxu0  ;;  %9711 = vmatprep.mubr.bf16.mxu1 %v19825_v53 }
 0x669   : > { %13328 = vst.msk [vmem:[%s17134_s8 + $0x508] sm:$0xff] %vm4119_vm15, %v8093_v59  ;;  %v7970_v7 = vpop.f32.mrf.mxu1  ;;  %v20599_v59 = vpack.c.bf16 %v13521_v34, %v13517_v45  ;;  %v20602_v4 = vpack.c.bf16 %v13530_v15, %v13526_v39  ;;  %v13525_v45 = vld [vmem:[%s15591_s14 + $0xfd0] sm:$0xff]  ;;  %v13534_v15 = vld [vmem:[%s15591_s14 + $0x1018] sm:$0xff] }
 0x66a   : > { %v8097_v62 = vpop.f32.mrf.mxu0  ;;  %9621 = vmatmul.mubr.bf16.gmra.mxu0 %v20576_v29  ;;  %v13529_v34 = vld [vmem:[%s15591_s14 + $0xff0] sm:$0xff]  ;;  %v22693_v29 = vld [vmem:[#allocation21_spill] sm:$0xff] }
 0x66b   : > { %v8098_v50 = vadd.f32 %v8097_v62, %v20438_v36  ;;  %13653 = vmatprep.mubr.msk.bf16.mxu0 %vm1006_vm1, %v20579_v6  ;;  %v20593_v13 = vpop.f32.mrf.mxu1  ;;  %22673 = vst [vmem:[#allocation54_spill] sm:$0xff] %v20599_v59  ;;  %22674 = vst [vmem:[#allocation55_spill] sm:$0xff] %v20602_v4 }
 0x66c   : > { %v14489_v19 = vpop.f32.mrf.mxu0 }
 0x66d   : > { %13331 = vst.msk [vmem:[%s17134_s8 + $0x520] sm:$0xff] %vm4119_vm15, %v8098_v50  ;;  %v7973_v53 = vpop.f32.mrf.mxu1 }
 0x66e   : > { %v8100_v3 = vpop.f32.mrf.mxu0  ;;  %v13538_v53 = vld [vmem:[%s15591_s14 + $0x1038] sm:$0xff] }
 0x66f   : > { %v8101_v36 = vadd.f32 %v8100_v3, %v20454_v48  ;;  %v20604_v7 = vpop.f32.mrf.mxu1  ;;  %9712 = vmatmul.mubr.bf16.gmra.mxu1 %v19847_v60 }
 0x670   : > { %v14490_v62 = vpop.f32.mrf.mxu0  ;;  %9719 = vmatprep.mubr.bf16.mxu1 %v19851_v16 }
 0x671   : > { %13334 = vst.msk [vmem:[%s17134_s8 + $0x538] sm:$0xff] %vm4119_vm15, %v8101_v36  ;;  %v7978_v50 = vpop.f32.mrf.mxu1  ;;  %v20622_v36 = vpack.c.bf16 %v13529_v34, %v13525_v45  ;;  %v20625_v62 = vpack.c.bf16 %v13538_v53, %v13534_v15  ;;  %v13533_v34 = vld [vmem:[%s15591_s14 + $0x1010] sm:$0xff]  ;;  %v13542_v53 = vld [vmem:[%s15591_s14 + $0x1058] sm:$0xff] }
 0x672   : > { %v8105_v19 = vpop.f32.mrf.mxu0  ;;  %9631 = vmatmul.mubr.bf16.gmra.mxu0 %v20599_v59 }
 0x673   : > { %v8106_v48 = vadd.f32 %v8105_v19, %v20469_v26  ;;  %13654 = vmatprep.mubr.msk.bf16.mxu0 %vm1006_vm1, %v20602_v4  ;;  %v20616_v39 = vpop.f32.mrf.mxu1  ;;  %22675 = vst [vmem:[#allocation56_spill] sm:$0xff] %v20622_v36  ;;  %22676 = vst [vmem:[#allocation57_spill] sm:$0xff] %v20625_v62 }
 0x674   : > { %v14493_v60 = vpop.f32.mrf.mxu0 }
 0x675   : > { %13337 = vst.msk [vmem:[%s17134_s8 + $0x550] sm:$0xff] %vm4119_vm15, %v8106_v48  ;;  %v7981_v16 = vpop.f32.mrf.mxu1  ;;  %v13537_v60 = vld [vmem:[%s15591_s14 + $0x1030] sm:$0xff] }
 0x676   : > { %v8108_v3 = vpop.f32.mrf.mxu0 }
 0x677   : > { %v8109_v26 = vadd.f32 %v8108_v3, %v20485_v40  ;;  %v20627_v50 = vpop.f32.mrf.mxu1  ;;  %9720 = vmatmul.mubr.bf16.gmra.mxu1 %v19873_v30 }
 0x678   : > { %v14494_v19 = vpop.f32.mrf.mxu0  ;;  %9727 = vmatprep.mubr.bf16.mxu1 %v19877_v44  ;;  %v13546_v44 = vld [vmem:[%s15591_s14 + $0x1078] sm:$0x1] }
 0x679   : > { %13340 = vst.msk [vmem:[%s17134_s8 + $0x568] sm:$0xff] %vm4119_vm15, %v8109_v26  ;;  %v20633_v48 = vpop.f32.mrf.mxu1  ;;  %v20649_v26 = vpack.c.bf16 %v13537_v60, %v13533_v34  ;;  %v20652_v19 = vpack.c.bf16 %v13546_v44, %v13542_v53  ;;  %v13541_v34 = vld [vmem:[%s15591_s14 + $0x1050] sm:$0xff] }
 0x67a   : > { %v8113_v45 = vpop.f32.mrf.mxu0  ;;  %9641 = vmatmul.mubr.bf16.gmra.mxu0 %v20622_v36  ;;  %v13545_v60 = vld [vmem:[%s15591_s14 + $0x1070] sm:$0x1] }
 0x67b   : > { %v8114_v40 = vadd.f32 %v8113_v45, %v20500_v56  ;;  %13655 = vmatprep.mubr.msk.bf16.mxu0 %vm1006_vm1, %v20625_v62  ;;  %v20641_v15 = vpop.f32.mrf.mxu1  ;;  %22677 = vst [vmem:[#allocation6_spill] sm:$0xff] %v20649_v26  ;;  %22678 = vst [vmem:[#allocation16_spill] sm:$0xff] %v20652_v19 }
 0x67c   : > { %v14497_v30 = vpop.f32.mrf.mxu0 }
 0x67d   : > { %13343 = vst.msk [vmem:[%s17134_s8 + $0x580] sm:$0xff] %vm4119_vm15, %v8114_v40  ;;  %v20647_v16 = vpop.f32.mrf.mxu1 }
 0x67e   : > { %v8116_v3 = vpop.f32.mrf.mxu0 }
 0x67f   : > { %v8117_v56 = vadd.f32 %v8116_v3, %v20516_v21  ;;  %v20654_v45 = vpop.f32.mrf.mxu1  ;;  %9728 = vmatmul.mubr.bf16.gmra.mxu1 %v19899_v17  ;;  %v20674_v3 = vpack.c.bf16 %v13545_v60, %v13541_v34 }
 0x680   : > { %v14498_v30 = vpop.f32.mrf.mxu0  ;;  %9735 = vmatprep.mubr.bf16.mxu1 %v19906_v42 }
 0x681   : > { %13346 = vst.msk [vmem:[%s17134_s8 + $0x598] sm:$0xff] %vm4119_vm15, %v8117_v56  ;;  %v20660_v40 = vpop.f32.mrf.mxu1  ;;  %22679 = vst [vmem:[#allocation7_spill] sm:$0xff] %v20674_v3 }
 0x682   : > { %v8121_v62 = vpop.f32.mrf.mxu0  ;;  %9651 = vmatmul.mubr.bf16.gmra.mxu0 %v20649_v26  ;;  %v22689_v26 = vld [vmem:[#allocation17_spill] sm:$0xff] }
 0x683   : > { %v8122_v21 = vadd.f32 %v8121_v62, %v20531_v11  ;;  %13656 = vmatprep.mubr.msk.bf16.mxu0 %vm1006_vm1, %v20652_v19  ;;  %v20668_v53 = vpop.f32.mrf.mxu1 }
 0x684   : > { %v14501_v17 = vpop.f32.mrf.mxu0 }
 0x685   : > { %13349 = vst.msk [vmem:[%s17134_s8 + $0x5b0] sm:$0xff] %vm4119_vm15, %v8122_v21  ;;  %v20672_v42 = vpop.f32.mrf.mxu1 }
 0x686   : > { %v8124_v44 = vpop.f32.mrf.mxu0 }
 0x687   : > { %v8125_v56 = vadd.f32 %v8124_v44, %v20545_v43  ;;  %v20677_v30 = vpop.f32.mrf.mxu1  ;;  %9736 = vmatmul.mubr.bf16.gmra.mxu1 %v19933_v61 }
 0x688   : > { %v14502_v11 = vpop.f32.mrf.mxu0  ;;  %9743 = vmatprep.mubr.bf16.mxu1 %v19942_v25 }
 0x689   : > { %13352 = vst.msk [vmem:[%s17134_s8 + $0x5c8] sm:$0xff] %vm4119_vm15, %v8125_v56  ;;  %v20683_v62 = vpop.f32.mrf.mxu1 }
 0x68a   : > { %v8129_v21 = vpop.f32.mrf.mxu0  ;;  %9661 = vmatmul.mubr.bf16.gmra.mxu0 %v20674_v3 }
 0x68b   : > { %v8130_v34 = vadd.f32 %v8129_v21, %v20558_v51  ;;  %13657 = vmatprep.mubr.msk.bf16.mxu0 %vm1006_vm1, %v19947_v2  ;;  %v20689_v43 = vpop.f32.mrf.mxu1 }
 0x68c   : > { %v14505_v60 = vpop.f32.mrf.mxu0 }
 0x68d   : > { %13355 = vst.msk [vmem:[%s17134_s8 + $0x5e0] sm:$0xff] %vm4119_vm15, %v8130_v34  ;;  %v20693_v61 = vpop.f32.mrf.mxu1 }
 0x68e   : > { %v8132_v25 = vpop.f32.mrf.mxu0 }
 0x68f   : > { %v8133_v17 = vadd.f32 %v8132_v25, %v20570_v35  ;;  %v20696_v44 = vpop.f32.mrf.mxu1  ;;  %9744 = vmatmul.mubr.bf16.gmra.mxu1 %v19975_v14 }
 0x690   : > { %v14506_v56 = vpop.f32.mrf.mxu0  ;;  %9751 = vmatprep.mubr.bf16.mxu1 %v19984_v55 }
 0x691   : > { %13358 = vst.msk [vmem:[%s17134_s8 + $0x5f8] sm:$0xff] %vm4119_vm15, %v8133_v17  ;;  %v20702_v2 = vpop.f32.mrf.mxu1 }
 0x692   : > { %v8137_v51 = vpop.f32.mrf.mxu0  ;;  %9913 = vmatmul.mubr.bf16.vlgmr.msra.gmra.mxu0 %v19988_v9 }
 0x693   : > { %v8138_v11 = vadd.f32 %v8137_v51, %v20581_v47  ;;  %13658 = vmatprep.mubr.msk.bf16.mxu0 %vm1006_vm1, %v19991_v31  ;;  %v20708_v35 = vpop.f32.mrf.mxu1 }
 0x694   : > { %v14509_v21 = vpop.f32.mrf.mxu0 }
 0x695   : > { %13361 = vst.msk [vmem:[%s17134_s8 + $0x610] sm:$0xff] %vm4119_vm15, %v8138_v11  ;;  %v20712_v14 = vpop.f32.mrf.mxu1 }
 0x696   : > { %v8140_v55 = vpop.f32.mrf.mxu0 }
 0x697   : > { %v8141_v34 = vadd.f32 %v8140_v55, %v20593_v13  ;;  %v20715_v60 = vpop.f32.mrf.mxu1  ;;  %9752 = vmatmul.mubr.bf16.gmra.mxu1 %v20019_v49 }
 0x698   : > { %v14510_v9 = vpop.f32.mrf.mxu0  ;;  %9759 = vmatprep.mubr.bf16.mxu1 %v20031_v12 }
 0x699   : > { %13364 = vst.msk [vmem:[%s17134_s8 + $0x628] sm:$0xff] %vm4119_vm15, %v8141_v34  ;;  %v20721_v31 = vpop.f32.mrf.mxu1 }
 0x69a   : > { %v8145_v47 = vpop.f32.mrf.mxu0  ;;  %9921 = vmatmul.mubr.bf16.gmra.mxu0 %v20036_v46 }
 0x69b   : > { %v8146_v25 = vadd.f32 %v8145_v47, %v20604_v7  ;;  %13659 = vmatprep.mubr.msk.bf16.mxu0 %vm1006_vm1, %v20039_v0  ;;  %v20727_v13 = vpop.f32.mrf.mxu1 }
 0x69c   : > { %v14513_v17 = vpop.f32.mrf.mxu0 }
 0x69d   : > { %13367 = vst.msk [vmem:[%s17134_s8 + $0x640] sm:$0xff] %vm4119_vm15, %v8146_v25  ;;  %v20731_v49 = vpop.f32.mrf.mxu1 }
 0x69e   : > { %v8148_v12 = vpop.f32.mrf.mxu0 }
 0x69f   : > { %v8149_v56 = vadd.f32 %v8148_v12, %v20616_v39  ;;  %v20734_v51 = vpop.f32.mrf.mxu1  ;;  %9760 = vmatmul.mubr.bf16.gmra.mxu1 %v20068_v24 }
 0x6a0   : > { %v14514_v46 = vpop.f32.mrf.mxu0  ;;  %9767 = vmatprep.mubr.bf16.mxu1 %v20078_v27 }
 0x6a1   : > { %13370 = vst.msk [vmem:[%s17134_s8 + $0x658] sm:$0x3f] %vm4219_vm2, %v8149_v56  ;;  %v20740_v0 = vpop.f32.mrf.mxu1 }
 0x6a2   : > { %v9452_v7 = vpop.f32.mrf.mxu0  ;;  %9929 = vmatmul.mubr.bf16.gmra.mxu0 %v20083_v41 }
 0x6a3   : > { %13660 = vmatprep.mubr.msk.bf16.mxu0 %vm1006_vm1, %v20086_v23  ;;  %v20745_v11 = vpop.f32.mrf.mxu1  ;;  %v20748_v21 = vadd.f32 %v9452_v7, %v20627_v50 }
 0x6a4   : > { %v9454_v39 = vpop.f32.mrf.mxu0 }
 0x6a5   : > { %v20751_v24 = vadd.f32 %v9454_v39, %v20633_v48  ;;  %v20753_v27 = vpop.f32.mrf.mxu1 }
 0x6a6   : > { %v9456_v55 = vpop.f32.mrf.mxu0 }
 0x6a7   : > { %v20755_v34 = vpop.f32.mrf.mxu1  ;;  %9768 = vmatmul.mubr.bf16.gmra.mxu1 %v20117_v38  ;;  %v20760_v23 = vadd.f32 %v9456_v55, %v20641_v15 }
 0x6a8   : > { %v9458_v41 = vpop.f32.mrf.mxu0  ;;  %9775 = vmatprep.mubr.bf16.mxu1 %v20127_v63 }
 0x6a9   : > { %v20763_v9 = vadd.f32 %v9458_v41, %v20647_v16  ;;  %v20765_v50 = vpop.f32.mrf.mxu1 }
 0x6aa   : > { %v9462_v48 = vpop.f32.mrf.mxu0  ;;  %9937 = vmatmul.mubr.bf16.gmra.mxu0 %v20131_v32 }
 0x6ab   : > { %13661 = vmatprep.mubr.msk.bf16.mxu0 %vm1006_vm1, %v20134_v20  ;;  %v20770_v47 = vpop.f32.mrf.mxu1  ;;  %v20773_v25 = vadd.f32 %v9462_v48, %v20654_v45 }
 0x6ac   : > { %v9464_v38 = vpop.f32.mrf.mxu0 }
 0x6ad   : > { %v20776_v63 = vadd.f32 %v9464_v38, %v20660_v40  ;;  %v20778_v15 = vpop.f32.mrf.mxu1 }
 0x6ae   : > { %v9466_v17 = vpop.f32.mrf.mxu0 }
 0x6af   : > { %v20784_v12 = vpop.f32.mrf.mxu1  ;;  %9776 = vmatmul.mubr.bf16.gmra.mxu1 %v20160_v8  ;;  %v20789_v45 = vadd.f32 %v9466_v17, %v20668_v53 }
 0x6b0   : > { %v9468_v20 = vpop.f32.mrf.mxu0  ;;  %9783 = vmatprep.mubr.bf16.mxu1 %v20170_v58 }
 0x6b1   : > { %v20792_v40 = vadd.f32 %v9468_v20, %v20672_v42  ;;  %v20794_v56 = vpop.f32.mrf.mxu1  ;;  %v22685_v42 = vld [vmem:[#allocation13_spill] sm:$0xff] }
 0x6b2   : > { %v9472_v46 = vpop.f32.mrf.mxu0  ;;  %9945 = vmatmul.mubr.bf16.gmra.mxu0 %v20176_v54 }
 0x6b3   : > { %13662 = vmatprep.mubr.msk.bf16.mxu0 %vm1006_vm1, %v20179_v22  ;;  %v20799_v7 = vpop.f32.mrf.mxu1  ;;  %v20802_v39 = vadd.f32 %v9472_v46, %v20677_v30 }
 0x6b4   : > { %v9474_v8 = vpop.f32.mrf.mxu0 }
 0x6b5   : > { %v20805_v58 = vadd.f32 %v9474_v8, %v20683_v62  ;;  %v20807_v53 = vpop.f32.mrf.mxu1  ;;  %v22680_v8 = vld [vmem:[#allocation18_spill] sm:$0xff] }
 0x6b6   : > { %v9476_v55 = vpop.f32.mrf.mxu0 }
 0x6b7   : > { %v20813_v41 = vpop.f32.mrf.mxu1  ;;  %9784 = vmatmul.mubr.bf16.gmra.mxu1 %v20202_v52  ;;  %v20818_v30 = vadd.f32 %v9476_v55, %v20689_v43  ;;  %v22681_v55 = vld [vmem:[#allocation9_spill] sm:$0xff] }
 0x6b8   : > { %v9478_v22 = vpop.f32.mrf.mxu0  ;;  %9791 = vmatprep.mubr.bf16.mxu1 %v20212_v37 }
 0x6b9   : > { %v20821_v62 = vadd.f32 %v9478_v22, %v20693_v61  ;;  %v20823_v48 = vpop.f32.mrf.mxu1 }
 0x6ba   : > { %v9482_v38 = vpop.f32.mrf.mxu0  ;;  %9953 = vmatmul.mubr.bf16.gmra.mxu0 %v20215_v5 }
 0x6bb   : > { %13663 = vmatprep.mubr.msk.bf16.mxu0 %vm1006_vm1, %v20218_v57  ;;  %v20828_v17 = vpop.f32.mrf.mxu1  ;;  %v20831_v20 = vadd.f32 %v9482_v38, %v20696_v44  ;;  %v22682_v38 = vld [vmem:[#allocation20_spill] sm:$0xff] }
 0x6bc   : > { %v9484_v52 = vpop.f32.mrf.mxu0 }
 0x6bd   : > { %v20834_v37 = vadd.f32 %v9484_v52, %v20702_v2  ;;  %v20836_v43 = vpop.f32.mrf.mxu1  ;;  %v22683_v52 = vld [vmem:[#allocation11_spill] sm:$0xff] }
 0x6be   : > { %v9486_v61 = vpop.f32.mrf.mxu0 }
 0x6bf   : > { %v20838_v46 = vpop.f32.mrf.mxu1  ;;  %9792 = vmatmul.mubr.bf16.gmra.mxu1 %v22680_v8  ;;  %v20843_v57 = vadd.f32 %v9486_v61, %v20708_v35 }
 0x6c0   : > { %v9488_v5 = vpop.f32.mrf.mxu0  ;;  %9799 = vmatprep.mubr.bf16.mxu1 %v22681_v55  ;;  %v22684_v55 = vld [vmem:[#allocation22_spill] sm:$0xff] }
 0x6c1   : > { %v20846_v22 = vadd.f32 %v9488_v5, %v20712_v14  ;;  %v20848_v44 = vpop.f32.mrf.mxu1 }
 0x6c2   : > { %v9492_v2 = vpop.f32.mrf.mxu0  ;;  %9961 = vmatmul.mubr.bf16.gmra.mxu0 %v22682_v38 }
 0x6c3   : > { %13664 = vmatprep.mubr.msk.bf16.mxu0 %vm1006_vm1, %v22683_v52  ;;  %v20853_v16 = vpop.f32.mrf.mxu1  ;;  %v20856_v32 = vadd.f32 %v9492_v2, %v20715_v60  ;;  %v22686_v2 = vld [vmem:[#allocation24_spill] sm:$0xff] }
 0x6c4   : > { %v9494_v8 = vpop.f32.mrf.mxu0 }
 0x6c5   : > { %v20859_v35 = vadd.f32 %v9494_v8, %v20721_v31  ;;  %v20861_v61 = vpop.f32.mrf.mxu1  ;;  %v22687_v8 = vld [vmem:[#allocation15_spill] sm:$0xff] }
 0x6c6   : > { %v9496_v14 = vpop.f32.mrf.mxu0 }
 0x6c7   : > { %v20863_v5 = vpop.f32.mrf.mxu1  ;;  %9800 = vmatmul.mubr.bf16.gmra.mxu1 %v22684_v55  ;;  %v20868_v52 = vadd.f32 %v9496_v14, %v20727_v13 }
 0x6c8   : > { %v9498_v38 = vpop.f32.mrf.mxu0  ;;  %9807 = vmatprep.mubr.bf16.mxu1 %v22685_v42 }
 0x6c9   : > { %v20871_v54 = vadd.f32 %v9498_v38, %v20731_v49  ;;  %v20873_v60 = vpop.f32.mrf.mxu1  ;;  %v22688_v38 = vld [vmem:[#allocation26_spill] sm:$0xff] }
 0x6ca   : > { %v9502_v31 = vpop.f32.mrf.mxu0  ;;  %9969 = vmatmul.mubr.bf16.gmra.mxu0 %v22686_v2 }
 0x6cb   : > { %13665 = vmatprep.mubr.msk.bf16.mxu0 %vm1006_vm1, %v22687_v8  ;;  %v20878_v3 = vpop.f32.mrf.mxu1  ;;  %v20881_v19 = vadd.f32 %v9502_v31, %v20734_v51  ;;  %v22690_v31 = vld [vmem:[#allocation28_spill] sm:$0xff] }
 0x6cc   : > { %v9504_v55 = vpop.f32.mrf.mxu0 }
 0x6cd   : > { %v20884_v13 = vadd.f32 %v9504_v55, %v20740_v0  ;;  %v20886_v42 = vpop.f32.mrf.mxu1  ;;  %v22691_v55 = vld [vmem:[#allocation19_spill] sm:$0xff] }
 0x6ce   : > { %v9506_v49 = vpop.f32.mrf.mxu0 }
 0x6cf   : > { %v20888_v14 = vpop.f32.mrf.mxu1  ;;  %9808 = vmatmul.mubr.bf16.gmra.mxu1 %v22688_v38  ;;  %v20893_v8 = vadd.f32 %v9506_v49, %v20745_v11 }
 0x6d0   : > { %v9508_v2 = vpop.f32.mrf.mxu0  ;;  %9815 = vmatprep.mubr.bf16.mxu1 %v22689_v26 }
 0x6d1   : > { %v20896_v36 = vadd.f32 %v9508_v2, %v20753_v27  ;;  %v20898_v51 = vpop.f32.mrf.mxu1  ;;  %v22692_v2 = vld [vmem:[#allocation30_spill] sm:$0xff] }
 0x6d2   : > { %v9512_v0 = vpop.f32.mrf.mxu0  ;;  %9977 = vmatmul.mubr.bf16.gmra.mxu0 %v22690_v31 }
 0x6d3   : > { %13666 = vmatprep.mubr.msk.bf16.mxu0 %vm1006_vm1, %v22691_v55  ;;  %v20903_v4 = vpop.f32.mrf.mxu1  ;;  %v9513_v59 = vadd.f32 %v9512_v0, %v20755_v34  ;;  %v22694_v34 = vld [vmem:[#allocation32_spill] sm:$0xff] }
 0x6d4   : > { %v9514_v38 = vpop.f32.mrf.mxu0 }
 0x6d5   : > { %v9515_v26 = vadd.f32 %v9514_v38, %v20765_v50  ;;  %v20907_v11 = vpop.f32.mrf.mxu1  ;;  %v22695_v50 = vld [vmem:[#allocation23_spill] sm:$0xff] }
 0x6d6   : > { %v9516_v49 = vpop.f32.mrf.mxu0 }
 0x6d7   : > { %v20909_v27 = vpop.f32.mrf.mxu1  ;;  %9816 = vmatmul.mubr.bf16.gmra.mxu1 %v22692_v2  ;;  %v9517_v31 = vadd.f32 %v9516_v49, %v20770_v47 }
 0x6d8   : > { %v9518_v6 = vpop.f32.mrf.mxu0  ;;  %9823 = vmatprep.mubr.bf16.mxu1 %v22693_v29 }
 0x6d9   : > { %v9519_v55 = vadd.f32 %v9518_v6, %v20778_v15  ;;  %v20915_v1 = vpop.f32.mrf.mxu1  ;;  %v22698_v6 = vld [vmem:[#allocation25_spill] sm:$0xff] }
 0x6da   : > { %v9522_v28 = vpop.f32.mrf.mxu0  ;;  %9985 = vmatmul.mubr.bf16.gmra.mxu0 %v22694_v34 }
 0x6db   : > { %13667 = vmatprep.mubr.msk.bf16.mxu0 %vm1006_vm1, %v22695_v50  ;;  %v20920_v0 = vpop.f32.mrf.mxu1  ;;  %v9523_v2 = vadd.f32 %v9522_v28, %v20784_v12  ;;  %v22701_v28 = vld [vmem:[#allocation29_spill] sm:$0xff]  ;;  %v22702_v12 = vld [vmem:[#allocation31_spill] sm:$0xff] }
 0x6dc   : > { %22696 = vst [vmem:[#allocation18_spill] sm:$0xff] %v20920_v0  ;;  %v9524_v38 = vpop.f32.mrf.mxu0 }
 0x6dd   : > { %v9525_v10 = vadd.f32 %v9524_v38, %v20794_v56  ;;  %v20924_v29 = vpop.f32.mrf.mxu1 }
 0x6de   : > { %v9526_v47 = vpop.f32.mrf.mxu0 }
 0x6df   : > { %v20926_v49 = vpop.f32.mrf.mxu1  ;;  %9824 = vmatmul.mubr.bf16.gmra.mxu1 %v22698_v6  ;;  %v9527_v34 = vadd.f32 %v9526_v47, %v20799_v7 }
 0x6e0   : > { %22697 = vst [vmem:[#allocation9_spill] sm:$0xff] %v20926_v49  ;;  %v9528_v15 = vpop.f32.mrf.mxu0  ;;  %9831 = vmatprep.mubr.bf16.mxu1 %v22699_v33  ;;  %v22704_v49 = vld [vmem:[#allocation33_spill] sm:$0xff] }
 0x6e1   : > { %v9529_v50 = vadd.f32 %v9528_v15, %v20807_v53  ;;  %v20932_v0 = vpop.f32.mrf.mxu1  ;;  %v15395_v7 = vpack.c.bf16 %v9527_v34, %v9523_v2  ;;  %v22706_v2 = vld [vmem:[#allocation35_spill] sm:$0xff] }
 0x6e2   : > { %22700 = vst [vmem:[#allocation20_spill] sm:$0xff] %v20932_v0  ;;  %v9532_v18 = vpop.f32.mrf.mxu0  ;;  %9993 = vmatmul.mubr.bf16.gmra.mxu0 %v22701_v28  ;;  %v15397_v0 = vpack.c.bf16 %v9519_v55, %v9515_v26  ;;  %v15398_v26 = vpack.c.bf16 %v9517_v31, %v9513_v59  ;;  %v22707_v55 = vld [vmem:[#allocation36_spill] sm:$0xff] }
 0x6e3   : > { %13668 = vmatprep.mubr.msk.bf16.mxu0 %vm1006_vm1, %v22702_v12  ;;  %v20937_v56 = vpop.f32.mrf.mxu1  ;;  %v20940_v6 = vadd.f32 %v9532_v18, %v20813_v41  ;;  %v15396_v47 = vpack.c.bf16 %v9529_v50, %v9525_v10 }
 0x6e4   : > { %22703 = vst [vmem:[#allocation11_spill] sm:$0xff] %v20937_v56  ;;  %v9534_v38 = vpop.f32.mrf.mxu0  ;;  %v22705_v56 = vld [vmem:[#allocation34_spill] sm:$0xff] }
 0x6e5   : > { %v20943_v33 = vadd.f32 %v9534_v38, %v20823_v48  ;;  %v20945_v53 = vpop.f32.mrf.mxu1  ;;  %11442 = vmatprep.subr.bf16.mxu1 %v15396_v47 }
 0x6e6   : > { %v9536_v15 = vpop.f32.mrf.mxu0  ;;  %11443 = vmatpush1.bf16.msra.mxu1 %v15395_v7  ;;  %v22709_v7 = vld [vmem:[#allocation38_spill] sm:$0xff] }
 0x6e7   : > { %v20947_v28 = vpop.f32.mrf.mxu1  ;;  %9832 = vmatmul.mubr.bf16.gmra.mxu1 %v22704_v49  ;;  %v20952_v18 = vadd.f32 %v9536_v15, %v20828_v17  ;;  %11444 = vmatprep.subr.bf16.mxu1 %v15397_v0  ;;  %v15399_v49 = vpack.c.bf16 %v20896_v36, %v20884_v13  ;;  %v15402_v13 = vpack.c.bf16 %v20893_v8, %v20881_v19  ;;  %v22710_v8 = vld [vmem:[#allocation39_spill] sm:$0xff] }
 0x6e8   : > { %v9538_v12 = vpop.f32.mrf.mxu0  ;;  %9839 = vmatprep.mubr.bf16.mxu1 %v22705_v56 }
 0x6e9   : > { %v20955_v41 = vadd.f32 %v9538_v12, %v20836_v43  ;;  %v20957_v10 = vpop.f32.mrf.mxu1 }
 0x6ea   : > { %v9542_v48 = vpop.f32.mrf.mxu0  ;;  %10001 = vmatmul.mubr.bf16.gmra.mxu0 %v22706_v2  ;;  %11445 = vmatpush1.bf16.msra.mxu1 %v15398_v26 }
 0x6eb   : > { %13669 = vmatprep.mubr.msk.bf16.mxu0 %vm1006_vm1, %v22707_v55  ;;  %v20964_v34 = vpop.f32.mrf.mxu1  ;;  %v20967_v43 = vadd.f32 %v9542_v48, %v20838_v46  ;;  %11446 = vmatprep.subr.bf16.mxu1 %v15399_v49  ;;  %v15403_v46 = vpack.c.bf16 %v20871_v54, %v20859_v35  ;;  %v15404_v54 = vpack.c.bf16 %v20868_v52, %v20856_v32  ;;  %v22711_v35 = vld [vmem:[#allocation40_spill] sm:$0xff]  ;;  %v22740_v52 = vld [vmem:[#allocation54_spill] sm:$0xff] }
 0x6ec   : > { %v9544_v17 = vpop.f32.mrf.mxu0  ;;  %v15405_v48 = vpack.c.bf16 %v20846_v22, %v20834_v37  ;;  %v15408_v22 = vpack.c.bf16 %v20843_v57, %v20831_v20  ;;  %v22714_v57 = vld [vmem:[#allocation43_spill] sm:$0xff] }
 0x6ed   : > { %v20970_v0 = vadd.f32 %v9544_v17, %v20848_v44  ;;  %v20972_v50 = vpop.f32.mrf.mxu1  ;;  %v22708_v44 = vld [vmem:[#allocation37_spill] sm:$0xff] }
 0x6ee   : > { %v9546_v36 = vpop.f32.mrf.mxu0  ;;  %11447 = vmatpush1.bf16.msra.mxu1 %v15402_v13 }
 0x6ef   : > { %v20982_v56 = vpop.f32.mrf.mxu1  ;;  %9840 = vmatmul.mubr.bf16.gmra.mxu1 %v22708_v44  ;;  %v20987_v47 = vadd.f32 %v9546_v36, %v20853_v16  ;;  %11448 = vmatprep.subr.bf16.mxu1 %v15403_v46  ;;  %v22713_v36 = vld [vmem:[#allocation42_spill] sm:$0xff] }
 0x6f0   : > { %v9548_v38 = vpop.f32.mrf.mxu0  ;;  %9847 = vmatprep.mubr.bf16.mxu1 %v22709_v7 }
 0x6f1   : > { %v20990_v15 = vadd.f32 %v9548_v38, %v20861_v61  ;;  %v20992_v12 = vpop.f32.mrf.mxu1 }
 0x6f2   : > { %v9552_v19 = vpop.f32.mrf.mxu0  ;;  %10009 = vmatmul.mubr.bf16.gmra.mxu0 %v22710_v8  ;;  %11449 = vmatpush1.bf16.msra.mxu1 %v15404_v54  ;;  %v22717_v54 = vld [vmem:[#allocation44_spill] sm:$0xff] }
 0x6f3   : > { %13670 = vmatprep.mubr.msk.bf16.mxu0 %vm1006_vm1, %v22711_v35  ;;  %v21001_v16 = vpop.f32.mrf.mxu1  ;;  %v21004_v61 = vadd.f32 %v9552_v19, %v20863_v5  ;;  %11450 = vmatprep.subr.bf16.mxu1 %v15405_v48  ;;  %v15409_v5 = vpack.c.bf16 %v20821_v62, %v20805_v58  ;;  %v15410_v58 = vpack.c.bf16 %v20818_v30, %v20802_v39  ;;  %v22715_v62 = vld [vmem:[#allocation4_spill] sm:$0xff] }
 0x6f4   : > { %v9554_v2 = vpop.f32.mrf.mxu0  ;;  %v22716_v19 = vpack.c.bf16 %v20792_v40, %v20776_v63  ;;  %v22718_v48 = vpack.c.bf16 %v20789_v45, %v20773_v25  ;;  %v22720_v40 = vpack.c.bf16 %v20763_v9, %v20751_v24 }
 0x6f5   : > { %v21007_v26 = vadd.f32 %v9554_v2, %v20873_v60  ;;  %v21009_v55 = vpop.f32.mrf.mxu1  ;;  %v22712_v60 = vld [vmem:[#allocation41_spill] sm:$0xff] }
 0x6f6   : > { %v9556_v37 = vpop.f32.mrf.mxu0  ;;  %11451 = vmatpush1.bf16.msra.mxu1 %v15408_v22  ;;  %v22721_v22 = vld [vmem:[#allocation12_spill] sm:$0xff] }
 0x6f7   : > { %v21019_v49 = vpop.f32.mrf.mxu1  ;;  %9848 = vmatmul.mubr.bf16.gmra.mxu1 %v22712_v60  ;;  %v21024_v13 = vadd.f32 %v9556_v37, %v20878_v3  ;;  %11452 = vmatprep.subr.bf16.mxu1 %v15409_v5  ;;  %v22722_v5 = vld [vmem:[#allocation5_spill] sm:$0xff] }
 0x6f8   : > { %v9558_v17 = vpop.f32.mrf.mxu0  ;;  %9855 = vmatprep.mubr.bf16.mxu1 %v22713_v36  ;;  %v22724_v36 = vld [vmem:[#allocation46_spill] sm:$0xff] }
 0x6f9   : > { %v21027_v46 = vadd.f32 %v9558_v17, %v20886_v42  ;;  %v21029_v44 = vpop.f32.mrf.mxu1 }
 0x6fa   : > { %v9562_v20 = vpop.f32.mrf.mxu0  ;;  %10017 = vmatmul.mubr.bf16.gmra.mxu0 %v22714_v57  ;;  %11453 = vmatpush1.bf16.msra.mxu1 %v15410_v58  ;;  %v22725_v57 = vld [vmem:[#allocation14_spill] sm:$0xff] }
 0x6fb   : > { %13671 = vmatprep.mubr.msk.bf16.mxu0 %vm1006_vm1, %v22715_v62  ;;  %v21036_v38 = vpop.f32.mrf.mxu1  ;;  %v21039_v3 = vadd.f32 %v9562_v20, %v20888_v14  ;;  %11454 = vmatprep.subr.bf16.mxu1 %v22716_v19  ;;  %v22719_v14 = vld [vmem:[#allocation45_spill] sm:$0xff]  ;;  %v22726_v58 = vld [vmem:[#allocation18_spill] sm:$0xff] }
 0x6fc   : > { %v9564_v7 = vpop.f32.mrf.mxu0 }
 0x6fd   : > { %v21042_v42 = vadd.f32 %v9564_v7, %v20898_v51  ;;  %v21047_v8 = vpop.f32.mrf.mxu1  ;;  %v22728_v7 = vld [vmem:[#allocation48_spill] sm:$0xff] }
 0x6fe   : > { %v9566_v39 = vpop.f32.mrf.mxu0  ;;  %11455 = vmatpush1.bf16.msra.mxu1 %v22718_v48  ;;  %v22730_v48 = vld [vmem:[#allocation20_spill] sm:$0xff] }
 0x6ff   : > { %v21049_v30 = vpop.f32.mrf.mxu1  ;;  %9856 = vmatmul.mubr.bf16.gmra.mxu1 %v22717_v54  ;;  %v21057_v51 = vadd.f32 %v9566_v39, %v20903_v4  ;;  %11456 = vmatprep.subr.bf16.mxu1 %v22720_v40  ;;  %v22723_v4 = vpack.c.bf16 %v20760_v23, %v20748_v21  ;;  %v22729_v54 = vld [vmem:[#allocation9_spill] sm:$0xff] }
 0x700   : > { %v9568_v35 = vpop.f32.mrf.mxu0  ;;  %9863 = vmatprep.mubr.bf16.mxu1 %v22719_v14 }
 0x701   : > { %v21060_v63 = vadd.f32 %v9568_v35, %v20907_v11  ;;  %v21065_v2 = vpop.f32.mrf.mxu1 }
 0x702   : > { %v9572_v37 = vpop.f32.mrf.mxu0  ;;  %10025 = vmatmul.mubr.bf16.gmra.mxu0 %v22721_v22  ;;  %11457 = vmatpush1.bf16.msra.mxu1 %v22723_v4  ;;  %v22731_v22 = vld [vmem:[#allocation49_spill] sm:$0xff] }
 0x703   : > { %13672 = vmatprep.mubr.msk.bf16.mxu0 %vm1006_vm1, %v22722_v5  ;;  %v21070_v25 = vpop.f32.mrf.mxu1  ;;  %v21076_v11 = vadd.f32 %v9572_v37, %v20909_v27  ;;  %v22727_v27 = vld [vmem:[#allocation47_spill] sm:$0xff] }
 0x704   : > { %v9574_v45 = vpop.f32.mrf.mxu0 }
 0x705   : > { %v21079_v24 = vadd.f32 %v9574_v45, %v20915_v1  ;;  %v21081_v9 = vpop.f32.mrf.mxu1  ;;  %v22732_v45 = vld [vmem:[#allocation11_spill] sm:$0xff] }
 0x706   : > { %v9576_v60 = vpop.f32.mrf.mxu0 }
 0x707   : > { %v21083_v17 = vpop.f32.mrf.mxu1  ;;  %9864 = vmatmul.mubr.bf16.gmra.mxu1 %v22724_v36  ;;  %v21088_v62 = vadd.f32 %v9576_v60, %v22726_v58  ;;  %v22734_v58 = vld [vmem:[#allocation51_spill] sm:$0xff] }
 0x708   : > { %v9578_v20 = vpop.f32.mrf.mxu0  ;;  %9871 = vmatprep.mubr.bf16.mxu1 %v22725_v57  ;;  %v22733_v57 = vld [vmem:[#allocation50_spill] sm:$0xff] }
 0x709   : > { %v21091_v21 = vadd.f32 %v9578_v20, %v20924_v29  ;;  %v21093_v23 = vpop.f32.mrf.mxu1 }
 0x70a   : > { %v9582_v1 = vpop.f32.mrf.mxu0  ;;  %10033 = vmatmul.mubr.bf16.gmra.mxu0 %v22727_v27 }
 0x70b   : > { %13673 = vmatprep.mubr.msk.bf16.mxu0 %vm1006_vm1, %v22728_v7  ;;  %v21098_v19 = vpop.f32.mrf.mxu1  ;;  %v21101_v35 = vadd.f32 %v9582_v1, %v22729_v54 }
 0x70c   : > { %v9584_v39 = vpop.f32.mrf.mxu0 }
 0x70d   : > { %v21104_v14 = vadd.f32 %v9584_v39, %v22730_v48  ;;  %v21106_v40 = vpop.f32.mrf.mxu1 }
 0x70e   : > { %v9586_v29 = vpop.f32.mrf.mxu0 }
 0x70f   : > { %v21108_v37 = vpop.f32.mrf.mxu1  ;;  %9872 = vmatmul.mubr.bf16.gmra.mxu1 %v22731_v22  ;;  %v21112_v4 = vadd.f32 %v9586_v29, %v22732_v45 }
 0x710   : > { %v9588_v5 = vpop.f32.mrf.mxu0 }
 0x711   : > { %v9589_v60 = vadd.f32 %v9588_v5, %v20945_v53  ;;  %v21115_v36 = vpop.f32.mrf.mxu1  ;;  %v15136_v53 = vld [vmem:[%s22269_s2 + $0x4] ss:$12 sps:$4 sm:$0xff]  }
 0x712   : > { %v9592_v20 = vpop.f32.mrf.mxu0  ;;  %10041 = vmatmul.mubr.bf16.gmra.mxu0 %v22733_v57  ;;  %11474 = vmatprep.mubr.bf16.mxu1 %v15136_v53 }
 0x713   : > { %13674 = vmatprep.mubr.msk.bf16.mxu0 %vm1006_vm1, %v22734_v58  ;;  %v21120_v1 = vpop.f32.mrf.mxu1  ;;  %v9593_v7 = vadd.f32 %v9592_v20, %v20947_v28  ;;  %v22735_v20 = vld [vmem:[#allocation52_spill] sm:$0xff] }
 0x714   : > { %v9594_v27 = vpop.f32.mrf.mxu0 }
 0x715   : > { %v9595_v39 = vadd.f32 %v9594_v27, %v20957_v10  ;;  %v21124_v54 = vpop.f32.mrf.mxu1  ;;  %v22736_v10 = vld [vmem:[#allocation53_spill] sm:$0xff] }
 0x716   : > { %v9596_v48 = vpop.f32.mrf.mxu0 }
 0x717   : > { %v21129_v29 = vpop.f32.mrf.mxu1  ;;  %v9597_v5 = vadd.f32 %v9596_v48, %v20964_v34 }
 0x718   : > { %v9598_v22 = vpop.f32.mrf.mxu0 }
 0x719   : > { %v9599_v45 = vadd.f32 %v9598_v22, %v20972_v50  ;;  %v21133_v57 = vpop.f32.mrf.mxu1 }
 0x71a   : > { %v9602_v28 = vpop.f32.mrf.mxu0  ;;  %10049 = vmatmul.mubr.bf16.gmra.mxu0 %v22735_v20 }
 0x71b   : > { %13675 = vmatprep.mubr.msk.bf16.mxu0 %vm1006_vm1, %v22736_v10  ;;  %v21138_v58 = vpop.f32.mrf.mxu1  ;;  %v9603_v59 = vadd.f32 %v9602_v28, %v20982_v56 }
 0x71c   : > { %22737 = vst [vmem:[#allocation22_spill] sm:$0xff] %v21138_v58  ;;  %v9604_v27 = vpop.f32.mrf.mxu0  ;;  %v22741_v58 = vld [vmem:[#allocation55_spill] sm:$0xff] }
 0x71d   : > { %v9605_v53 = vadd.f32 %v9604_v27, %v20992_v12  ;;  %v21142_v31 = vpop.f32.mrf.mxu1 }
 0x71e   : > { %v9606_v34 = vpop.f32.mrf.mxu0 }
 0x71f   : > { %v21144_v48 = vpop.f32.mrf.mxu1  ;;  %v9607_v22 = vadd.f32 %v9606_v34, %v21001_v16 }
 0x720   : > { %22738 = vst [vmem:[#allocation13_spill] sm:$0xff] %v21144_v48  ;;  %v9608_v50 = vpop.f32.mrf.mxu0 }
 0x721   : > { %v9609_v20 = vadd.f32 %v9608_v50, %v21009_v55  ;;  %v21148_v32 = vpop.f32.mrf.mxu1  ;;  %v15411_v16 = vpack.c.bf16 %v9607_v22, %v9603_v59  ;;  %v22742_v59 = vld [vmem:[#allocation56_spill] sm:$0xff]  ;;  %v22743_v22 = vld [vmem:[#allocation57_spill] sm:$0xff] }
 0x722   : > { %22739 = vst [vmem:[#allocation24_spill] sm:$0xff] %v21148_v32  ;;  %v9612_v10 = vpop.f32.mrf.mxu0  ;;  %10057 = vmatmul.mubr.bf16.gmra.mxu0 %v22740_v52  ;;  %v15413_v32 = vpack.c.bf16 %v9599_v45, %v9595_v39  ;;  %v15415_v39 = vpack.c.bf16 %v9589_v60, %v21104_v14  ;;  %v15418_v14 = vpack.c.bf16 %v21112_v4, %v21101_v35  ;;  %v22745_v4 = vld [vmem:[#allocation16_spill] sm:$0xff] }
 0x723   : > { %13676 = vmatprep.mubr.msk.bf16.mxu0 %vm1006_vm1, %v22741_v58  ;;  %v21153_v56 = vpop.f32.mrf.mxu1  ;;  %v21156_v28 = vadd.f32 %v9612_v10, %v21019_v49  ;;  %v15412_v34 = vpack.c.bf16 %v9609_v20, %v9605_v53  ;;  %v15414_v53 = vpack.c.bf16 %v9597_v5, %v9593_v7  ;;  %v15419_v60 = vpack.c.bf16 %v21091_v21, %v21079_v24 }
 0x724   : > { %v9614_v12 = vpop.f32.mrf.mxu0  ;;  %v15420_v35 = vpack.c.bf16 %v21088_v62, %v21076_v11  ;;  %v15421_v24 = vpack.c.bf16 %v21060_v63, %v21042_v42  ;;  %v15422_v11 = vpack.c.bf16 %v21057_v51, %v21039_v3  ;;  %v15423_v62 = vpack.c.bf16 %v21027_v46, %v21007_v26 }
 0x725   : > { %v21159_v27 = vadd.f32 %v9614_v12, %v21029_v44  ;;  %v21161_v55 = vpop.f32.mrf.mxu1  ;;  %11458 = vmatprep.subr.bf16.mxu1 %v15412_v34  ;;  %v15424_v3 = vpack.c.bf16 %v21024_v13, %v21004_v61  ;;  %v22747_v26 = vmov 0   ;;  %v22749_v13 = vpack.c.bf16 %v20987_v47, %v20967_v43 }
 0x726   : > { %v9616_v50 = vpop.f32.mrf.mxu0  ;;  %11459 = vmatpush2.bf16.msra.mxu1 %v15411_v16  ;;  %v22751_v47 = vpack.c.bf16 %v20952_v18, %v20940_v6  ;;  %v22752_v6 = vld [vmem:[#allocation22_spill] sm:$0xff] }
 0x727   : > { %v21163_v52 = vpop.f32.mrf.mxu1  ;;  %v21166_v58 = vadd.f32 %v9616_v50, %v21036_v38  ;;  %11460 = vmatprep.subr.bf16.mxu1 %v15413_v32 }
 0x728   : > { %v9618_v48 = vpop.f32.mrf.mxu0 }
 0x729   : > { %v21169_v49 = vadd.f32 %v9618_v48, %v21047_v8  ;;  %v9707_v44 = vpop.f32.mrf.mxu1  ;;  %v15416_v7 = vpack.c.bf16 %v21166_v58, %v21156_v28 }
 0x72a   : > { %v9622_v10 = vpop.f32.mrf.mxu0  ;;  %10065 = vmatmul.mubr.bf16.gmra.mxu0 %v22742_v59  ;;  %11461 = vmatpush2.bf16.msra.mxu1 %v15414_v53  ;;  %v22744_v44 = vld [vmem:[#allocation6_spill] sm:$0xff] }
 0x72b   : > { %13677 = vmatprep.mubr.msk.bf16.mxu0 %vm1006_vm1, %v22743_v22  ;;  %v21175_v45 = vpop.f32.mrf.mxu1  ;;  %v21178_v38 = vadd.f32 %v9622_v10, %v21049_v30  ;;  %11462 = vmatprep.subr.bf16.mxu1 %v15415_v39  ;;  %v15417_v5 = vpack.c.bf16 %v21169_v49, %v21159_v27 }
 0x72c   : > { %v9624_v20 = vpop.f32.mrf.mxu0 }
 0x72d   : > { %v21181_v8 = vadd.f32 %v9624_v20, %v21065_v2  ;;  %v9710_v32 = vpop.f32.mrf.mxu1  ;;  %v22746_v20 = vld [vmem:[#allocation7_spill] sm:$0xff] }
 0x72e   : > { %v9626_v48 = vpop.f32.mrf.mxu0  ;;  %11463 = vmatpush2.bf16.msra.mxu1 %v15418_v14  ;;  %v22748_v32 = vpack.c.bf16 %v20990_v15, %v20970_v0 }
 0x72f   : > { %v21191_v30 = vpop.f32.mrf.mxu1  ;;  %v21194_v2 = vadd.f32 %v9626_v48, %v21070_v25  ;;  %11464 = vmatprep.subr.bf16.mxu1 %v15419_v60 }
 0x730   : > { %v9628_v12 = vpop.f32.mrf.mxu0 }
 0x731   : > { %v21197_v16 = vadd.f32 %v9628_v12, %v21081_v9  ;;  %v9715_v34 = vpop.f32.mrf.mxu1 }
 0x732   : > { %v9632_v50 = vpop.f32.mrf.mxu0  ;;  %10073 = vmatmul.mubr.bf16.gmra.mxu0 %v22744_v44  ;;  %11465 = vmatpush2.bf16.msra.mxu1 %v15420_v35 }
 0x733   : > { %13678 = vmatprep.mubr.msk.bf16.mxu0 %vm1006_vm1, %v22745_v4  ;;  %v21206_v21 = vpop.f32.mrf.mxu1  ;;  %v21209_v9 = vadd.f32 %v9632_v50, %v21083_v17  ;;  %11466 = vmatprep.subr.bf16.mxu1 %v15421_v24  ;;  %v15134_v50 = vld [vmem:[%s22269_s2] ss:$12 sps:$4 sm:$0xff]  }
 0x734   : > { %v9634_v25 = vpop.f32.mrf.mxu0 }
 0x735   : > { %v21212_v10 = vadd.f32 %v9634_v25, %v21093_v23  ;;  %v9718_v59 = vpop.f32.mrf.mxu1 }
 0x736   : > { %v9636_v53 = vpop.f32.mrf.mxu0  ;;  %11467 = vmatpush2.bf16.msra.mxu1 %v15422_v11  ;;  %v15163_v11 = vld [vmem:[%s22269_s2 + $0x34] ss:$12 sps:$4 sm:$0xff]  }
 0x737   : > { %v21218_v42 = vpop.f32.mrf.mxu1  ;;  %v21221_v22 = vadd.f32 %v9636_v53, %v21098_v19  ;;  %11468 = vmatprep.subr.bf16.mxu1 %v15423_v62  ;;  %v22753_v62 = vld [vmem:[#allocation13_spill] sm:$0xff] }
 0x738   : > { %v9638_v63 = vpop.f32.mrf.mxu0 }
 0x739   : > { %v21224_v17 = vadd.f32 %v9638_v63, %v21106_v40  ;;  %v9723_v23 = vpop.f32.mrf.mxu1 }
 0x73a   : > { %v9642_v39 = vpop.f32.mrf.mxu0  ;;  %10081 = vmatmul.mubr.bf16.gmra.mxu0 %v22746_v20  ;;  %11469 = vmatpush2.bf16.msra.mxu1 %v15424_v3  ;;  %v22754_v23 = vld [vmem:[#allocation24_spill] sm:$0xff] }
 0x73b   : > { %v21229_v51 = vpop.f32.mrf.mxu1  ;;  %11677 = vmatprep.mubr.bf16.mxu0 %v22747_v26  ;;  %v21233_v19 = vadd.f32 %v9642_v39, %v21108_v37  ;;  %11470 = vmatprep.subr.bf16.mxu1 %v22748_v32 }
 0x73c   : > { %v9644_v46 = vpop.f32.mrf.mxu0 }
 0x73d   : > { %v21236_v40 = vadd.f32 %v9644_v46, %v21115_v36  ;;  %v9726_v48 = vpop.f32.mrf.mxu1  ;;  %v22750_v36 = vpack.c.bf16 %v20955_v41, %v20943_v33 }
 0x73e   : > { %v9646_v14 = vpop.f32.mrf.mxu0  ;;  %11471 = vmatpush2.bf16.msra.mxu1 %v22749_v13  ;;  %v10616_v13 = vld [vmem:[#allocation2 + $0x624] sm:$0x11] }
 0x73f   : > { %v21241_v60 = vpop.f32.mrf.mxu1  ;;  %v21247_v12 = vadd.f32 %v9646_v14, %v21120_v1  ;;  %11472 = vmatprep.subr.bf16.mxu1 %v22750_v36  ;;  %v15157_v1 = vld [vmem:[%s22269_s2 + $0x1c] ss:$12 sps:$4 sm:$0xff]  }
 0x740   : > { %v9648_v61 = vpop.f32.mrf.mxu0 }
 0x741   : > { %v21250_v37 = vadd.f32 %v9648_v61, %v21124_v54  ;;  %v9731_v0 = vpop.f32.mrf.mxu1 }
 0x742   : > { %v9652_v15 = vpop.f32.mrf.mxu0  ;;  %11473 = vmatpush2.bf16.msra.mxu1 %v22751_v47 }
 0x743   : > { %v21255_v34 = vpop.f32.mrf.mxu1  ;;  %v21267_v33 = vadd.f32 %v9652_v15, %v21129_v29  ;;  %11848 = vmatprep.subr.bf16.mxu1 %v22747_v26 }
 0x744   : > { %v9654_v43 = vpop.f32.mrf.mxu0 }
 0x745   : > { %v21270_v41 = vadd.f32 %v9654_v43, %v21133_v57  ;;  %v9734_v54 = vpop.f32.mrf.mxu1  ;;  %11475 = vmatmul.mubr.bf16.vlgmr.msra.gmra.mxu1 %v15134_v50  ;;  %v15155_v57 = vld [vmem:[%s22269_s2 + $0x18] ss:$12 sps:$4 sm:$0xff]   ;;  %v15161_v43 = vld [vmem:[%s22269_s2 + $0x30] ss:$12 sps:$4 sm:$0xff]  }
 0x746   : > { %v9656_v44 = vpop.f32.mrf.mxu0  ;;  %11484 = vmatprep.mubr.bf16.mxu1 %v15157_v1  ;;  %v15169_v1 = vld [vmem:[%s22269_s2 + $0x4c] ss:$12 sps:$4 sm:$0xff]  }
 0x747   : > { %v21273_v35 = vpop.f32.mrf.mxu1  ;;  %v21276_v18 = vadd.f32 %v9656_v44, %v22752_v6 }
 0x748   : > { %v9658_v4 = vpop.f32.mrf.mxu0 }
 0x749   : > { %v21279_v24 = vadd.f32 %v9658_v4, %v21142_v31  ;;  %v9739_v29 = vpop.f32.mrf.mxu1 }
 0x74a   : > { %v9662_v25 = vpop.f32.mrf.mxu0 }
 0x74b   : > { %v21281_v59 = vpop.f32.mrf.mxu1  ;;  %v9663_v63 = vadd.f32 %v9662_v25, %v22753_v62 }
 0x74c   : > { %v9664_v53 = vpop.f32.mrf.mxu0 }
 0x74d   : > { %v9665_v39 = vadd.f32 %v9664_v53, %v22754_v23  ;;  %v9742_v20 = vpop.f32.mrf.mxu1  ;;  %11485 = vmatmul.mubr.bf16.gmra.mxu1 %v15155_v57 }
 0x74e   : > { %v9666_v31 = vpop.f32.mrf.mxu0  ;;  %11494 = vmatprep.mubr.bf16.mxu1 %v15163_v11 }
 0x74f   : > { %v14282_v3 = vpack.c.bf16 %v9665_v39, %v9663_v63  ;;  %v21291_v46 = vpop.f32.mrf.mxu1  ;;  %v9667_v48 = vadd.f32 %v9666_v31, %v21153_v56  ;;  %v15167_v63 = vld [vmem:[%s22269_s2 + $0x48] ss:$12 sps:$4 sm:$0xff]  }
 0x750   : > { %v9668_v32 = vpop.f32.mrf.mxu0 }
 0x751   : > { %v9669_v14 = vadd.f32 %v9668_v32, %v21161_v55  ;;  %v9747_v61 = vpop.f32.mrf.mxu1 }
 0x752   : > { %v9914_v36 = vpop.f32.mrf.mxu0 }
 0x753   : > { %v14284_v0 = vpack.c.bf16 %v9669_v14, %v9667_v48  ;;  %v9915_v15 = vadd.f32 %v9914_v36, %v21163_v52  ;;  %v21296_v50 = vpop.f32.mrf.mxu1  ;;  %v22756_v36 = vld [vmem:[#allocation3_spill] sm:$0xff] }
 0x754   : > { %v9916_v47 = vpop.f32.mrf.mxu0 }
 0x755   : > { %v10617_v55 = vsel %vm16580_vm8, %v14284_v0, %v10616_v13  ;;  %v14199_v54 = vpack.c.bf16 %v9915_v15, %v9915_v15  ;;  %v9750_v44 = vpop.f32.mrf.mxu1  ;;  %11495 = vmatmul.mubr.bf16.gmra.mxu1 %v15161_v43 }
 0x756   : > { %10618 = vst [vmem:[#allocation2 + $0x624] sm:$0x11] %v10617_v55  ;;  %v9917_v4 = vpop.f32.mrf.mxu0  ;;  %11504 = vmatprep.mubr.bf16.mxu1 %v15169_v1  ;;  %v21335_v55 = vld [vmem:[%s22269_s2 + $0x60] ss:$12 sps:$4 sm:$0xff]   ;;  %v21340_v44 = vld [vmem:[%s22269_s2 + $0x7c] ss:$12 sps:$4 sm:$0xff]  }
 0x757   : > { %10531 = vst.msk [vmem:[#allocation2 + $0x428] sm:$0xf] %vm2448_vm9, %v14199_v54  ;;  %v9918_v52 = vadd.f32 %v9917_v4, %v21175_v45  ;;  %v21308_v6 = vpop.f32.mrf.mxu1  ;;  %v15174_v45 = vld [vmem:[%s22269_s2 + $0x64] ss:$12 sps:$4 sm:$0xff]  }
 0x758   : > { %v9919_v29 = vpop.f32.mrf.mxu0 }
 0x759   : > { %v14201_v25 = vpack.c.bf16 %v9918_v52, %v9918_v52  ;;  %v9755_v57 = vpop.f32.mrf.mxu1  ;;  %v15427_v52 = vpack.c.bf16 %v21250_v37, %v21236_v40  ;;  %v15429_v40 = vpack.c.bf16 %v21224_v17, %v21212_v10  ;;  %v15430_v17 = vpack.c.bf16 %v21221_v22, %v21209_v9 }
 0x75a   : > { %v9922_v53 = vpop.f32.mrf.mxu0  ;;  %v15432_v9 = vpack.c.bf16 %v21194_v2, %v21178_v38  ;;  %v21397_v38 = vld [vmem:[%s22269_s2 + $0xac] ss:$12 sps:$4 sm:$0xff]  }
 0x75b   : > { %10533 = vst.msk [vmem:[#allocation2 + $0x434] sm:$0xf] %vm2448_vm9, %v14201_v25  ;;  %v9923_v11 = vadd.f32 %v9922_v53, %v21191_v30  ;;  %v21312_v62 = vpop.f32.mrf.mxu1 }
 0x75c   : > { %v9924_v23 = vpop.f32.mrf.mxu0 }
 0x75d   : > { %v14203_v39 = vpack.c.bf16 %v9923_v11, %v9923_v11  ;;  %v10776_v20 = vld [vmem:[#allocation2 + $0x624] sm:$0x11]  ;;  %v9758_v31 = vpop.f32.mrf.mxu1  ;;  %11505 = vmatmul.mubr.bf16.gmra.mxu1 %v15167_v63 }
 0x75e   : > { %v9925_v32 = vpop.f32.mrf.mxu0  ;;  %v13881_v48 = vcombine.low %v14282_v3, %v10776_v20  ;;  %v13882_v14 = vcombine.high %v14282_v3, %v10776_v20  ;;  %11514 = vmatprep.mubr.bf16.mxu1 %v15174_v45  ;;  %v15425_v3 = vpack.c.bf16 %v21279_v24, %v21270_v41  ;;  %v15426_v24 = vpack.c.bf16 %v21276_v18, %v21267_v33  ;;  %v21363_v63 = vld [vmem:[%s22269_s2 + $0x78] ss:$12 sps:$4 sm:$0xff]  }
 0x75f   : > { %10535 = vst.msk [vmem:[#allocation2 + $0x440] sm:$0xf] %vm2448_vm9, %v14203_v39  ;;  %v9926_v30 = vadd.f32 %v9925_v32, %v21206_v21  ;;  %v21322_v61 = vpop.f32.mrf.mxu1  ;;  %v15428_v33 = vpack.c.bf16 %v21247_v12, %v21233_v19  ;;  %v21368_v19 = vld [vmem:[%s22269_s2 + $0x94] ss:$12 sps:$4 sm:$0xff]   ;;  %v15431_v45 = vpack.c.bf16 %v21197_v16, %v21181_v8 }
 0x760   : > { %v9927_v13 = vpop.f32.mrf.mxu0  ;;  %v11437_v0 = vand.u32 %v13882_v14, %v22756_v36  ;;  %v11434_v15 = vand.u32 %v13881_v48, %v22756_v36 }
 0x761   : > { %v14205_v43 = vpack.c.bf16 %v9926_v30, %v9926_v30  ;;  %v9763_v47 = vpop.f32.mrf.mxu1  ;;  %v21402_v13 = vld [vmem:[%s22269_s2 + $0x8] ss:$12 sps:$4 sm:$0xff]  }
 0x762   : > { %v9930_v1 = vpop.f32.mrf.mxu0  ;;  %11649 = vmatprep.subr.bf16.mxu0 %v11437_v0 }
 0x763   : > { %10537 = vst.msk [vmem:[#allocation2 + $0x44c] sm:$0xf] %vm2448_vm9, %v14205_v43  ;;  %v9931_v21 = vadd.f32 %v9930_v1, %v21218_v42  ;;  %11650 = vmatpush1.bf16.msra.mxu0 %v11434_v15  ;;  %v21330_v56 = vpop.f32.mrf.mxu1  ;;  %v21429_v1 = vld [vmem:[%s22269_s2 + $0xc4] ss:$12 sps:$4 sm:$0xff]  }
 0x764   : > { %v9932_v54 = vpop.f32.mrf.mxu0  ;;  %11651 = vmatprep.subr.bf16.mxu0 %v15425_v3 }
 0x765   : > { %v14207_v41 = vpack.c.bf16 %v9931_v21, %v9931_v21  ;;  %v9766_v42 = vpop.f32.mrf.mxu1  ;;  %11515 = vmatmul.mubr.bf16.gmra.mxu1 %v21335_v55 }
 0x766   : > { %v9933_v4 = vpop.f32.mrf.mxu0  ;;  %11524 = vmatprep.mubr.bf16.mxu1 %v21340_v44 }
 0x767   : > { %10539 = vst.msk [vmem:[#allocation2 + $0x458] sm:$0xf] %vm2448_vm9, %v14207_v41  ;;  %v9934_v29 = vadd.f32 %v9933_v4, %v21229_v51  ;;  %11652 = vmatpush1.bf16.msra.mxu0 %v15426_v24  ;;  %v21348_v25 = vpop.f32.mrf.mxu1 }
 0x768   : > { %v9935_v57 = vpop.f32.mrf.mxu0  ;;  %11653 = vmatprep.subr.bf16.mxu0 %v15427_v52 }
 0x769   : > { %v14209_v53 = vpack.c.bf16 %v9934_v29, %v9934_v29  ;;  %v9771_v18 = vpop.f32.mrf.mxu1 }
 0x76a   : > { %v9938_v11 = vpop.f32.mrf.mxu0  ;;  %v21457_v18 = vld [vmem:[%s22269_s2 + $0xdc] ss:$12 sps:$4 sm:$0xff]  }
 0x76b   : > { %10541 = vst.msk [vmem:[#allocation2 + $0x464] sm:$0xf] %vm2448_vm9, %v14209_v53  ;;  %v9939_v51 = vadd.f32 %v9938_v11, %v21241_v60  ;;  %11654 = vmatpush1.bf16.msra.mxu0 %v15428_v33  ;;  %v21358_v37 = vpop.f32.mrf.mxu1 }
 0x76c   : > { %v9940_v23 = vpop.f32.mrf.mxu0  ;;  %11655 = vmatprep.subr.bf16.mxu0 %v15429_v40 }
 0x76d   : > { %v14211_v10 = vpack.c.bf16 %v9939_v51, %v9939_v51  ;;  %v9774_v60 = vpop.f32.mrf.mxu1  ;;  %11525 = vmatmul.mubr.bf16.gmra.mxu1 %v21363_v63 }
 0x76e   : > { %v9941_v12 = vpop.f32.mrf.mxu0  ;;  %11534 = vmatprep.mubr.bf16.mxu1 %v21368_v19 }
 0x76f   : > { %10543 = vst.msk [vmem:[#allocation2 + $0x470] sm:$0xf] %vm2448_vm9, %v14211_v10  ;;  %v9942_v39 = vadd.f32 %v9941_v12, %v21255_v34  ;;  %11656 = vmatpush1.bf16.msra.mxu0 %v15430_v17  ;;  %v21376_v20 = vpop.f32.mrf.mxu1  ;;  %v21389_v34 = vld [vmem:[%s22269_s2 + $0x90] ss:$12 sps:$4 sm:$0xff]  }
 0x770   : > { %v9943_v31 = vpop.f32.mrf.mxu0  ;;  %11657 = vmatprep.subr.bf16.mxu0 %v15431_v45 }
 0x771   : > { %v14213_v32 = vpack.c.bf16 %v9942_v39, %v9942_v39  ;;  %v9779_v22 = vpop.f32.mrf.mxu1 }
 0x772   : > { %v9946_v48 = vpop.f32.mrf.mxu0 }
 0x773   : > { %10545 = vst.msk [vmem:[#allocation2 + $0x47c] sm:$0xf] %vm2448_vm9, %v14213_v32  ;;  %v9947_v8 = vadd.f32 %v9946_v48, %v21273_v35  ;;  %11658 = vmatpush1.bf16.msra.mxu0 %v15432_v9  ;;  %v21384_v16 = vpop.f32.mrf.mxu1  ;;  %v21485_v9 = vld [vmem:[%s22269_s2 + $0xf4] ss:$12 sps:$4 sm:$0xff]  }
 0x774   : > { %v9948_v14 = vpop.f32.mrf.mxu0  ;;  %11659 = vmatprep.subr.bf16.mxu0 %v15417_v5  ;;  %v22757_v5 = vmov 0.0  }
 0x775   : > { %v14215_v2 = vpack.c.bf16 %v9947_v8, %v9947_v8  ;;  %v9782_v35 = vpop.f32.mrf.mxu1  ;;  %11535 = vmatmul.mubr.bf16.gmra.mxu1 %v21389_v34 }
 0x776   : > { %v9949_v30 = vpop.f32.mrf.mxu0  ;;  %11544 = vmatprep.mubr.bf16.mxu1 %v21397_v38 }
 0x777   : > { %10547 = vst.msk [vmem:[#allocation2 + $0x488] sm:$0xf] %vm2448_vm9, %v14215_v2  ;;  %v9950_v0 = vadd.f32 %v9949_v30, %v21281_v59  ;;  %11660 = vmatpush1.bf16.msra.mxu0 %v15416_v7  ;;  %v21409_v27 = vpop.f32.mrf.mxu1  ;;  %v21424_v7 = vld [vmem:[%s22269_s2 + $0xa8] ss:$12 sps:$4 sm:$0xff]  }
 0x778   : > { %v9951_v49 = vpop.f32.mrf.mxu0  ;;  %14515 = vmatprep.subr.bf16.mxu0 %v22757_v5 }
 0x779   : > { %v14217_v15 = vpack.c.bf16 %v9950_v0, %v9950_v0  ;;  %v9787_v43 = vpop.f32.mrf.mxu1 }
 0x77a   : > { %v9954_v47 = vpop.f32.mrf.mxu0  ;;  %13884 = vmatmul.mubr.msk.bf16.vlgmr.msra.gmra.mxu0 %vm3309_vm11, %v21402_v13 }
 0x77b   : > { %10549 = vst.msk [vmem:[#allocation2 + $0x494] sm:$0xf] %vm2448_vm9, %v14217_v15  ;;  %v9955_v28 = vadd.f32 %v9954_v47, %v21291_v46  ;;  %v21418_v58 = vpop.f32.mrf.mxu1  ;;  %11687 = vmatprep.mubr.bf16.mxu0 %v22747_v26  ;;  %v21434_v46 = vld [vmem:[%s22269_s2 + $0x20] ss:$12 sps:$4 sm:$0xff]  }
 0x77c   : > { %v9956_v59 = vpop.f32.mrf.mxu0 }
 0x77d   : > { %v14219_v3 = vpack.c.bf16 %v9955_v28, %v9955_v28  ;;  %v9790_v21 = vpop.f32.mrf.mxu1  ;;  %11545 = vmatmul.mubr.bf16.gmra.mxu1 %v21424_v7  ;;  %v21513_v28 = vld [vmem:[%s22269_s2 + $0x10c] ss:$12 sps:$4 sm:$0xff]  }
 0x77e   : > { %v9957_v54 = vpop.f32.mrf.mxu0  ;;  %11554 = vmatprep.mubr.bf16.mxu1 %v21429_v1 }
 0x77f   : > { %10551 = vst.msk [vmem:[#allocation2 + $0x4a0] sm:$0xf] %vm2448_vm9, %v14219_v3  ;;  %v9958_v41 = vadd.f32 %v9957_v54, %v21296_v50  ;;  %v21438_v24 = vpop.f32.mrf.mxu1  ;;  %v21452_v50 = vld [vmem:[%s22269_s2 + $0xc0] ss:$12 sps:$4 sm:$0xff]  }
 0x780   : > { %v9959_v42 = vpop.f32.mrf.mxu0 }
 0x781   : > { %v14221_v4 = vpack.c.bf16 %v9958_v41, %v9958_v41  ;;  %v9795_v52 = vpop.f32.mrf.mxu1 }
 0x782   : > { %v9962_v29 = vpop.f32.mrf.mxu0  ;;  %13885 = vmatmul.mubr.msk.bf16.gmra.mxu0 %vm3309_vm11, %v21434_v46 }
 0x783   : > { %10553 = vst.msk [vmem:[#allocation2 + $0x4ac] sm:$0xf] %vm2448_vm9, %v14221_v4  ;;  %v9963_v57 = vadd.f32 %v9962_v29, %v21308_v6  ;;  %v21446_v53 = vpop.f32.mrf.mxu1  ;;  %11697 = vmatprep.mubr.bf16.mxu0 %v22747_v26  ;;  %v21462_v6 = vld [vmem:[%s22269_s2 + $0x38] ss:$12 sps:$4 sm:$0xff]  }
 0x784   : > { %v9964_v33 = vpop.f32.mrf.mxu0 }
 0x785   : > { %v14223_v11 = vpack.c.bf16 %v9963_v57, %v9963_v57  ;;  %v9798_v40 = vpop.f32.mrf.mxu1  ;;  %11555 = vmatmul.mubr.bf16.gmra.mxu1 %v21452_v50 }
 0x786   : > { %v9965_v51 = vpop.f32.mrf.mxu0  ;;  %11564 = vmatprep.mubr.bf16.mxu1 %v21457_v18 }
 0x787   : > { %10555 = vst.msk [vmem:[#allocation2 + $0x4b8] sm:$0xf] %vm2448_vm9, %v14223_v11  ;;  %v9966_v23 = vadd.f32 %v9965_v51, %v21312_v62  ;;  %v21466_v10 = vpop.f32.mrf.mxu1  ;;  %v21480_v62 = vld [vmem:[%s22269_s2 + $0xd8] ss:$12 sps:$4 sm:$0xff]  }
 0x788   : > { %v9967_v17 = vpop.f32.mrf.mxu0  ;;  %v21541_v51 = vld [vmem:[%s22269_s2 + $0x124] ss:$12 sps:$4 sm:$0xff]  }
 0x789   : > { %v14225_v60 = vpack.c.bf16 %v9966_v23, %v9966_v23  ;;  %v9803_v12 = vpop.f32.mrf.mxu1 }
 0x78a   : > { %v9970_v45 = vpop.f32.mrf.mxu0  ;;  %13886 = vmatmul.mubr.msk.bf16.gmra.mxu0 %vm3309_vm11, %v21462_v6  ;;  %v21547_v12 = vld [vmem:[%s22269_s2 + $0x80] ss:$12 sps:$4 sm:$0xff]  }
 0x78b   : > { %10557 = vst.msk [vmem:[#allocation2 + $0x4c4] sm:$0xf] %vm2448_vm9, %v14225_v60  ;;  %v9971_v39 = vadd.f32 %v9970_v45, %v21322_v61  ;;  %v21474_v31 = vpop.f32.mrf.mxu1  ;;  %11707 = vmatprep.mubr.bf16.mxu0 %v22747_v26  ;;  %v21490_v61 = vld [vmem:[%s22269_s2 + $0x50] ss:$12 sps:$4 sm:$0xff]  }
 0x78c   : > { %v9972_v32 = vpop.f32.mrf.mxu0 }
 0x78d   : > { %v14227_v22 = vpack.c.bf16 %v9971_v39, %v9971_v39  ;;  %v9806_v48 = vpop.f32.mrf.mxu1  ;;  %11565 = vmatmul.mubr.bf16.gmra.mxu1 %v21480_v62 }
 0x78e   : > { %v9973_v8 = vpop.f32.mrf.mxu0  ;;  %11574 = vmatprep.mubr.bf16.mxu1 %v21485_v9 }
 0x78f   : > { %10559 = vst.msk [vmem:[#allocation2 + $0x4d0] sm:$0xf] %vm2448_vm9, %v14227_v22  ;;  %v9974_v14 = vadd.f32 %v9973_v8, %v21330_v56  ;;  %v21494_v2 = vpop.f32.mrf.mxu1  ;;  %v21508_v56 = vld [vmem:[%s22269_s2 + $0xf0] ss:$12 sps:$4 sm:$0xff]  }
 0x790   : > { %v9975_v35 = vpop.f32.mrf.mxu0 }
 0x791   : > { %v14229_v30 = vpack.c.bf16 %v9974_v14, %v9974_v14  ;;  %v9811_v0 = vpop.f32.mrf.mxu1  ;;  %v15139_v14 = vld [vmem:[#allocation2 + $0x4a0] ss:$12 sps:$4 sm:$0xff]  }
 0x792   : > { %v9978_v49 = vpop.f32.mrf.mxu0  ;;  %13887 = vmatmul.mubr.msk.bf16.gmra.mxu0 %vm3309_vm11, %v21490_v61  ;;  %v15138_v60 = vld [vmem:[#allocation2 + $0x4b8] ss:$12 sps:$4 sm:$0xff]  }
 0x793   : > { %10561 = vst.msk [vmem:[#allocation2 + $0x4dc] sm:$0xf] %vm2448_vm9, %v14229_v30  ;;  %v9979_v15 = vadd.f32 %v9978_v49, %v21348_v25  ;;  %v21502_v43 = vpop.f32.mrf.mxu1  ;;  %11717 = vmatprep.mubr.bf16.mxu0 %v22747_v26  ;;  %v21518_v25 = vld [vmem:[%s22269_s2 + $0x68] ss:$12 sps:$4 sm:$0xff]   ;;  %v21566_v30 = vld [vmem:[%s22269_s2 + $0x120] ss:$12 sps:$4 sm:$0xff]  }
 0x794   : > { %v9980_v47 = vpop.f32.mrf.mxu0  ;;  %v21571_v49 = vld [vmem:[%s22269_s2 + $0x13c] ss:$12 sps:$4 sm:$0xff]  }
 0x795   : > { %v14231_v59 = vpack.c.bf16 %v9979_v15, %v9979_v15  ;;  %v9814_v3 = vpop.f32.mrf.mxu1  ;;  %11575 = vmatmul.mubr.bf16.gmra.mxu1 %v21508_v56 }
 0x796   : > { %v9981_v21 = vpop.f32.mrf.mxu0  ;;  %11584 = vmatprep.mubr.bf16.mxu1 %v21513_v28  ;;  %v21577_v3 = vld [vmem:[%s22269_s2 + $0x98] ss:$12 sps:$4 sm:$0xff]  }
 0x797   : > { %10563 = vst.msk [vmem:[#allocation2 + $0x4e8] sm:$0xf] %vm2448_vm9, %v14231_v59  ;;  %v9982_v54 = vadd.f32 %v9981_v21, %v21358_v37  ;;  %v21522_v41 = vpop.f32.mrf.mxu1  ;;  %v21536_v37 = vld [vmem:[%s22269_s2 + $0x108] ss:$12 sps:$4 sm:$0xff]  }
 0x798   : > { %v9983_v42 = vpop.f32.mrf.mxu0  ;;  %v15140_v59 = vld [vmem:[#allocation2 + $0x488] ss:$12 sps:$4 sm:$0xff]  }
 0x799   : > { %v14233_v4 = vpack.c.bf16 %v9982_v54, %v9982_v54  ;;  %v9819_v52 = vpop.f32.mrf.mxu1 }
 0x79a   : > { %v9986_v29 = vpop.f32.mrf.mxu0  ;;  %v15137_v57 = vld [vmem:[#allocation2 + $0x4d0] ss:$12 sps:$4 sm:$0xff]   ;;  %13888 = vmatmul.mubr.msk.bf16.gmra.mxu0 %vm3309_vm11, %v21518_v25 }
 0x79b   : > { %10565 = vst.msk [vmem:[#allocation2 + $0x4f4] sm:$0xf] %vm2448_vm9, %v14233_v4  ;;  %v9987_v33 = vadd.f32 %v9986_v29, %v21376_v20  ;;  %v21530_v11 = vpop.f32.mrf.mxu1  ;;  %11727 = vmatprep.mubr.bf16.mxu0 %v22747_v26  ;;  %11849 = vmatpush1.bf16.msra.mxu1 %v15137_v57  ;;  %v15141_v57 = vld [vmem:[#allocation2 + $0x470] ss:$12 sps:$4 sm:$0xff]  }
 0x79c   : > { %v9988_v40 = vpop.f32.mrf.mxu0  ;;  %11850 = vmatprep.subr.bf16.mxu1 %v22747_v26 }
 0x79d   : > { %v14235_v23 = vpack.c.bf16 %v9987_v33, %v9987_v33  ;;  %v9822_v20 = vpop.f32.mrf.mxu1  ;;  %11585 = vmatmul.mubr.bf16.gmra.mxu1 %v21536_v37  ;;  %v21596_v40 = vld [vmem:[%s22269_s2 + $0x138] ss:$12 sps:$4 sm:$0xff]  }
 0x79e   : > { %v9989_v17 = vpop.f32.mrf.mxu0  ;;  %11594 = vmatprep.mubr.bf16.mxu1 %v21541_v51  ;;  %v21601_v20 = vld [vmem:[%s22269_s2 + $0x154] ss:$12 sps:$4 sm:$0xff]  }
 0x79f   : > { %10567 = vst.msk [vmem:[#allocation2 + $0x500] sm:$0xf] %vm2448_vm9, %v14235_v23  ;;  %v9990_v45 = vadd.f32 %v9989_v17, %v21384_v16  ;;  %v21551_v39 = vpop.f32.mrf.mxu1  ;;  %11851 = vmatpush1.bf16.msra.mxu1 %v15138_v60 }
 0x7a0   : > { %v9991_v32 = vpop.f32.mrf.mxu0  ;;  %11852 = vmatprep.subr.bf16.mxu1 %v22747_v26 }
 0x7a1   : > { %v14237_v22 = vpack.c.bf16 %v9990_v45, %v9990_v45  ;;  %v9827_v48 = vpop.f32.mrf.mxu1  ;;  %v15142_v45 = vld [vmem:[#allocation2 + $0x458] ss:$12 sps:$4 sm:$0xff]   ;;  %v21607_v32 = vld [vmem:[%s22269_s2 + $0xb0] ss:$12 sps:$4 sm:$0xff]  }
 0x7a2   : > { %v9994_v8 = vpop.f32.mrf.mxu0  ;;  %13889 = vmatmul.mubr.msk.bf16.gmra.mxu0 %vm3309_vm11, %v21547_v12 }
 0x7a3   : > { %10569 = vst.msk [vmem:[#allocation2 + $0x50c] sm:$0xf] %vm2448_vm9, %v14237_v22  ;;  %v9995_v16 = vadd.f32 %v9994_v8, %v21409_v27  ;;  %v21560_v35 = vpop.f32.mrf.mxu1  ;;  %11737 = vmatprep.mubr.bf16.mxu0 %v22747_v26  ;;  %11853 = vmatpush1.bf16.msra.mxu1 %v15139_v14 }
 0x7a4   : > { %v9996_v0 = vpop.f32.mrf.mxu0  ;;  %11854 = vmatprep.subr.bf16.mxu1 %v22747_v26 }
 0x7a5   : > { %v14239_v15 = vpack.c.bf16 %v9995_v16, %v9995_v16  ;;  %v9830_v27 = vpop.f32.mrf.mxu1  ;;  %11595 = vmatmul.mubr.bf16.gmra.mxu1 %v21566_v30 }
 0x7a6   : > { %v9997_v47 = vpop.f32.mrf.mxu0  ;;  %11604 = vmatprep.mubr.bf16.mxu1 %v21571_v49 }
 0x7a7   : > { %10571 = vst.msk [vmem:[#allocation2 + $0x518] sm:$0xf] %vm2448_vm9, %v14239_v15  ;;  %v9998_v21 = vadd.f32 %v9997_v47, %v21418_v58  ;;  %v21581_v54 = vpop.f32.mrf.mxu1  ;;  %11855 = vmatpush1.bf16.msra.mxu1 %v15140_v59  ;;  %v15143_v15 = vld [vmem:[#allocation2 + $0x440] ss:$12 sps:$4 sm:$0xff]   ;;  %v21626_v47 = vld [vmem:[%s22269_s2 + $0x150] ss:$12 sps:$4 sm:$0xff]  }
 0x7a8   : > { %v9999_v42 = vpop.f32.mrf.mxu0  ;;  %11856 = vmatprep.subr.bf16.mxu1 %v22747_v26 }
 0x7a9   : > { %v14241_v4 = vpack.c.bf16 %v9998_v21, %v9998_v21  ;;  %v9835_v52 = vpop.f32.mrf.mxu1  ;;  %v21631_v21 = vld [vmem:[%s22269_s2 + $0x16c] ss:$12 sps:$4 sm:$0xff]  }
 0x7aa   : > { %v10002_v29 = vpop.f32.mrf.mxu0  ;;  %13890 = vmatmul.mubr.msk.bf16.gmra.mxu0 %vm3309_vm11, %v21577_v3  ;;  %v15144_v52 = vld [vmem:[#allocation2 + $0x428] ss:$12 sps:$4 sm:$0xff]  }
 0x7ab   : > { %10573 = vst.msk [vmem:[#allocation2 + $0x524] sm:$0xf] %vm2448_vm9, %v14241_v4  ;;  %v10003_v58 = vadd.f32 %v10002_v29, %v21438_v24  ;;  %v21590_v33 = vpop.f32.mrf.mxu1  ;;  %11747 = vmatprep.mubr.bf16.mxu0 %v22747_v26  ;;  %11857 = vmatpush1.bf16.msra.mxu1 %v15141_v57  ;;  %v21637_v29 = vld [vmem:[%s22269_s2 + $0xc8] ss:$12 sps:$4 sm:$0xff]  }
 0x7ac   : > { %v10004_v23 = vpop.f32.mrf.mxu0  ;;  %11858 = vmatprep.subr.bf16.mxu1 %v22747_v26 }
 0x7ad   : > { %v14243_v17 = vpack.c.bf16 %v10003_v58, %v10003_v58  ;;  %v9838_v24 = vpop.f32.mrf.mxu1  ;;  %11605 = vmatmul.mubr.bf16.gmra.mxu1 %v21596_v40 }
 0x7ae   : > { %v10005_v60 = vpop.f32.mrf.mxu0  ;;  %11614 = vmatprep.mubr.bf16.mxu1 %v21601_v20 }
 0x7af   : > { %10575 = vst.msk [vmem:[#allocation2 + $0x530] sm:$0xf] %vm2448_vm9, %v14243_v17  ;;  %v10006_v22 = vadd.f32 %v10005_v60, %v21446_v53  ;;  %v21611_v48 = vpop.f32.mrf.mxu1  ;;  %11859 = vmatpush1.bf16.msra.mxu1 %v15142_v45 }
 0x7b0   : > { %v10007_v8 = vpop.f32.mrf.mxu0  ;;  %11860 = vmatprep.subr.bf16.mxu1 %v22747_v26 }
 0x7b1   : > { %v14245_v14 = vpack.c.bf16 %v10006_v22, %v10006_v22  ;;  %v9843_v16 = vpop.f32.mrf.mxu1  ;;  %v21656_v22 = vld [vmem:[%s22269_s2 + $0x168] ss:$12 sps:$4 sm:$0xff]  }
 0x7b2   : > { %v10010_v0 = vpop.f32.mrf.mxu0  ;;  %13891 = vmatmul.mubr.msk.bf16.gmra.mxu0 %vm3309_vm11, %v21607_v32 }
 0x7b3   : > { %10577 = vst.msk [vmem:[#allocation2 + $0x53c] sm:$0xf] %vm2448_vm9, %v14245_v14  ;;  %v10011_v53 = vadd.f32 %v10010_v0, %v21466_v10  ;;  %v21620_v27 = vpop.f32.mrf.mxu1  ;;  %11757 = vmatprep.mubr.bf16.mxu0 %v22747_v26  ;;  %11861 = vmatpush1.bf16.msra.mxu1 %v15143_v15  ;;  %v21661_v14 = vld [vmem:[%s22269_s2 + $0x184] ss:$12 sps:$4 sm:$0x7f]  }
 0x7b4   : > { %v10012_v59 = vpop.f32.mrf.mxu0  ;;  %11862 = vmatprep.subr.bf16.mxu1 %v22747_v26 }
 0x7b5   : > { %v14247_v42 = vpack.c.bf16 %v10011_v53, %v10011_v53  ;;  %v9846_v10 = vpop.f32.mrf.mxu1  ;;  %11615 = vmatmul.mubr.bf16.gmra.mxu1 %v21626_v47 }
 0x7b6   : > { %v10013_v4 = vpop.f32.mrf.mxu0  ;;  %11624 = vmatprep.mubr.bf16.mxu1 %v21631_v21 }
 0x7b7   : > { %10579 = vst.msk [vmem:[#allocation2 + $0x548] sm:$0xf] %vm2448_vm9, %v14247_v42  ;;  %v10014_v57 = vadd.f32 %v10013_v4, %v21474_v31  ;;  %v21641_v58 = vpop.f32.mrf.mxu1  ;;  %11863 = vmatpush1.bf16.msra.mxu1 %v15144_v52 }
 0x7b8   : > { %v10015_v23 = vpop.f32.mrf.mxu0  ;;  %11864 = vmatprep.subr.bf16.mxu1 %v22747_v26 }
 0x7b9   : > { %v14249_v17 = vpack.c.bf16 %v10014_v57, %v10014_v57  ;;  %v9851_v24 = vpop.f32.mrf.mxu1 }
 0x7ba   : > { %v10018_v60 = vpop.f32.mrf.mxu0  ;;  %13892 = vmatmul.mubr.msk.bf16.gmra.mxu0 %vm3309_vm11, %v21637_v29 }
 0x7bb   : > { %10581 = vst.msk [vmem:[#allocation2 + $0x554] sm:$0xf] %vm2448_vm9, %v14249_v17  ;;  %v10019_v31 = vadd.f32 %v10018_v60, %v21494_v2  ;;  %v21650_v45 = vpop.f32.mrf.mxu1  ;;  %11767 = vmatprep.mubr.bf16.mxu0 %v22747_v26  ;;  %v21666_v2 = vld [vmem:[%s22269_s2 + $0xe0] ss:$12 sps:$4 sm:$0xff]  }
 0x7bc   : > { %v10020_v8 = vpop.f32.mrf.mxu0 }
 0x7bd   : > { %v14251_v16 = vpack.c.bf16 %v10019_v31, %v10019_v31  ;;  %v9854_v0 = vpop.f32.mrf.mxu1  ;;  %11625 = vmatmul.mubr.bf16.gmra.mxu1 %v21656_v22  ;;  %v21689_v8 = vld [vmem:[%s22269_s2 + $0xf8] ss:$12 sps:$4 sm:$0xff]  }
 0x7be   : > { %v10021_v15 = vpop.f32.mrf.mxu0  ;;  %11634 = vmatprep.mubr.bf16.mxu1 %v21661_v14 }
 0x7bf   : > { %10583 = vst.msk [vmem:[#allocation2 + $0x560] sm:$0xf] %vm2448_vm9, %v14251_v16  ;;  %v10022_v53 = vadd.f32 %v10021_v15, %v21502_v43  ;;  %v21670_v59 = vpop.f32.mrf.mxu1  ;;  %v21684_v43 = vld [vmem:[%s22269_s2 + $0x180] ss:$12 sps:$4 sm:$0x7f]  }
 0x7c0   : > { %v10023_v42 = vpop.f32.mrf.mxu0  ;;  %v15298_v15 = vld [vmem:[%s22269_s2 + $0x4] ss:$12 sps:$4 sm:$0xff]  }
 0x7c1   : > { %v14253_v10 = vpack.c.bf16 %v10022_v53, %v10022_v53  ;;  %v9859_v4 = vpop.f32.mrf.mxu1 }
 0x7c2   : > { %v10026_v52 = vpop.f32.mrf.mxu0  ;;  %13893 = vmatmul.mubr.msk.bf16.gmra.mxu0 %vm3309_vm11, %v21666_v2 }
 0x7c3   : > { %10585 = vst.msk [vmem:[#allocation2 + $0x56c] sm:$0xf] %vm2448_vm9, %v14253_v10  ;;  %v10027_v57 = vadd.f32 %v10026_v52, %v21522_v41  ;;  %v21678_v23 = vpop.f32.mrf.mxu1  ;;  %11777 = vmatprep.mubr.bf16.mxu0 %v22747_v26 }
 0x7c4   : > { %v10028_v17 = vpop.f32.mrf.mxu0 }
 0x7c5   : > { %v14255_v24 = vpack.c.bf16 %v10027_v57, %v10027_v57  ;;  %v9862_v60 = vpop.f32.mrf.mxu1  ;;  %11635 = vmatmul.mubr.bf16.gmra.mxu1 %v21684_v43 }
 0x7c6   : > { %v10029_v31 = vpop.f32.mrf.mxu0  ;;  %11880 = vmatprep.mubr.bf16.mxu1 %v15298_v15  ;;  %v21709_v60 = vld [vmem:[%s22269_s2 + $0x110] ss:$12 sps:$4 sm:$0xff]  }
 0x7c7   : > { %10587 = vst.msk [vmem:[#allocation2 + $0x578] sm:$0xf] %vm2448_vm9, %v14255_v24  ;;  %v10030_v41 = vadd.f32 %v10029_v31, %v21530_v11  ;;  %v21693_v16 = vpop.f32.mrf.mxu1 }
 0x7c8   : > { %v10031_v0 = vpop.f32.mrf.mxu0 }
 0x7c9   : > { %v14257_v53 = vpack.c.bf16 %v10030_v41, %v10030_v41  ;;  %v9867_v42 = vpop.f32.mrf.mxu1 }
 0x7ca   : > { %v10034_v10 = vpop.f32.mrf.mxu0  ;;  %13894 = vmatmul.mubr.msk.bf16.gmra.mxu0 %vm3309_vm11, %v21689_v8 }
 0x7cb   : > { %10589 = vst.msk [vmem:[#allocation2 + $0x584] sm:$0xf] %vm2448_vm9, %v14257_v53  ;;  %v10035_v11 = vadd.f32 %v10034_v10, %v21551_v39  ;;  %v21703_v4 = vpop.f32.mrf.mxu1  ;;  %11787 = vmatprep.mubr.bf16.mxu0 %v22747_v26 }
 0x7cc   : > { %v10036_v52 = vpop.f32.mrf.mxu0 }
 0x7cd   : > { %v14259_v57 = vpack.c.bf16 %v10035_v11, %v10035_v11  ;;  %v9870_v17 = vpop.f32.mrf.mxu1 }
 0x7ce   : > { %v10037_v24 = vpop.f32.mrf.mxu0  ;;  %v21725_v17 = vld [vmem:[%s22269_s2 + $0x128] ss:$12 sps:$4 sm:$0xff]  }
 0x7cf   : > { %10591 = vst.msk [vmem:[#allocation2 + $0x590] sm:$0xf] %vm2448_vm9, %v14259_v57  ;;  %v10038_v31 = vadd.f32 %v10037_v24, %v21560_v35  ;;  %v21713_v41 = vpop.f32.mrf.mxu1 }
 0x7d0   : > { %v10039_v39 = vpop.f32.mrf.mxu0 }
 0x7d1   : > { %v14261_v0 = vpack.c.bf16 %v10038_v31, %v10038_v31  ;;  %v9875_v15 = vpop.f32.mrf.mxu1 }
 0x7d2   : > { %v10042_v53 = vpop.f32.mrf.mxu0  ;;  %13895 = vmatmul.mubr.msk.bf16.gmra.mxu0 %vm3309_vm11, %v21709_v60 }
 0x7d3   : > { %10593 = vst.msk [vmem:[#allocation2 + $0x59c] sm:$0xf] %vm2448_vm9, %v14261_v0  ;;  %v10043_v42 = vadd.f32 %v10042_v53, %v21581_v54  ;;  %v21719_v10 = vpop.f32.mrf.mxu1  ;;  %11797 = vmatprep.mubr.bf16.mxu0 %v22747_v26 }
 0x7d4   : > { %v10044_v11 = vpop.f32.mrf.mxu0 }
 0x7d5   : > { %v14263_v52 = vpack.c.bf16 %v10043_v42, %v10043_v42  ;;  %v9878_v35 = vpop.f32.mrf.mxu1 }
 0x7d6   : > { %v10045_v57 = vpop.f32.mrf.mxu0 }
 0x7d7   : > { %10595 = vst.msk [vmem:[#allocation2 + $0x5a8] sm:$0xf] %vm2448_vm9, %v14263_v52  ;;  %v10046_v24 = vadd.f32 %v10045_v57, %v21590_v33  ;;  %v15146_v33 = vld [vmem:[#allocation2 + $0x578] ss:$12 sps:$4 sm:$0xff]   ;;  %v21738_v52 = vld [vmem:[%s22269_s2 + $0x140] ss:$12 sps:$4 sm:$0xff]  }
 0x7d8   : > { %v10047_v31 = vpop.f32.mrf.mxu0 }
 0x7d9   : > { %v14265_v39 = vpack.c.bf16 %v10046_v24, %v10046_v24  ;;  %v15147_v31 = vld [vmem:[#allocation2 + $0x560] ss:$12 sps:$4 sm:$0xff]  }
 0x7da   : > { %v10050_v54 = vpop.f32.mrf.mxu0  ;;  %v15145_v0 = vld [vmem:[#allocation2 + $0x590] ss:$12 sps:$4 sm:$0xff]   ;;  %13896 = vmatmul.mubr.msk.bf16.gmra.mxu0 %vm3309_vm11, %v21725_v17 }
 0x7db   : > { %10597 = vst.msk [vmem:[#allocation2 + $0x5b4] sm:$0xf] %vm2448_vm9, %v14265_v39  ;;  %v10051_v15 = vadd.f32 %v10050_v54, %v21611_v48  ;;  %11807 = vmatprep.mubr.bf16.mxu0 %v22747_v26  ;;  %11865 = vmatpush2.bf16.msra.mxu1 %v15145_v0 }
 0x7dc   : > { %v10052_v53 = vpop.f32.mrf.mxu0  ;;  %11866 = vmatprep.subr.bf16.mxu1 %v22747_v26 }
 0x7dd   : > { %v14267_v42 = vpack.c.bf16 %v10051_v15, %v10051_v15  ;;  %v15148_v15 = vld [vmem:[#allocation2 + $0x548] ss:$12 sps:$4 sm:$0xff]   ;;  %v21752_v53 = vld [vmem:[%s22269_s2 + $0x158] ss:$12 sps:$4 sm:$0xff]  }
 0x7de   : > { %v10053_v11 = vpop.f32.mrf.mxu0 }
 0x7df   : > { %10599 = vst.msk [vmem:[#allocation2 + $0x5c0] sm:$0xf] %vm2448_vm9, %v14267_v42  ;;  %v10054_v35 = vadd.f32 %v10053_v11, %v21620_v27  ;;  %11867 = vmatpush2.bf16.msra.mxu1 %v15146_v33 }
 0x7e0   : > { %v10055_v57 = vpop.f32.mrf.mxu0  ;;  %11868 = vmatprep.subr.bf16.mxu1 %v22747_v26 }
 0x7e1   : > { %v14269_v48 = vpack.c.bf16 %v10054_v35, %v10054_v35  ;;  %v15149_v35 = vld [vmem:[#allocation2 + $0x530] ss:$12 sps:$4 sm:$0xff]  }
 0x7e2   : > { %v10058_v24 = vpop.f32.mrf.mxu0  ;;  %13897 = vmatmul.mubr.msk.bf16.gmra.mxu0 %vm3309_vm11, %v21738_v52 }
 0x7e3   : > { %10601 = vst.msk [vmem:[#allocation2 + $0x5cc] sm:$0xf] %vm2448_vm9, %v14269_v48  ;;  %v10059_v39 = vadd.f32 %v10058_v24, %v21641_v58  ;;  %11817 = vmatprep.mubr.bf16.mxu0 %v22747_v26  ;;  %11869 = vmatpush2.bf16.msra.mxu1 %v15147_v31  ;;  %v15150_v31 = vld [vmem:[#allocation2 + $0x518] ss:$12 sps:$4 sm:$0xff]  }
 0x7e4   : > { %v10060_v54 = vpop.f32.mrf.mxu0  ;;  %11870 = vmatprep.subr.bf16.mxu1 %v22747_v26 }
 0x7e5   : > { %v14271_v0 = vpack.c.bf16 %v10059_v39, %v10059_v39  ;;  %v21766_v39 = vld [vmem:[%s22269_s2 + $0x170] ss:$12 sps:$4 sm:$0xff]  }
 0x7e6   : > { %v10061_v27 = vpop.f32.mrf.mxu0 }
 0x7e7   : > { %10603 = vst.msk [vmem:[#allocation2 + $0x5d8] sm:$0xf] %vm2448_vm9, %v14271_v0  ;;  %v10062_v42 = vadd.f32 %v10061_v27, %v21650_v45  ;;  %11871 = vmatpush2.bf16.msra.mxu1 %v15148_v15  ;;  %v15151_v15 = vld [vmem:[#allocation2 + $0x500] ss:$12 sps:$4 sm:$0xff]  }
 0x7e8   : > { %v10063_v11 = vpop.f32.mrf.mxu0  ;;  %11872 = vmatprep.subr.bf16.mxu1 %v22747_v26 }
 0x7e9   : > { %v14273_v58 = vpack.c.bf16 %v10062_v42, %v10062_v42 }
 0x7ea   : > { %v10066_v33 = vpop.f32.mrf.mxu0  ;;  %13898 = vmatmul.mubr.msk.bf16.gmra.mxu0 %vm3309_vm11, %v21752_v53 }
 0x7eb   : > { %10605 = vst.msk [vmem:[#allocation2 + $0x5e4] sm:$0xf] %vm2448_vm9, %v14273_v58  ;;  %v10067_v57 = vadd.f32 %v10066_v33, %v21670_v59  ;;  %11827 = vmatprep.mubr.bf16.mxu0 %v22747_v26  ;;  %11873 = vmatpush2.bf16.msra.mxu1 %v15149_v35  ;;  %v15152_v35 = vld [vmem:[#allocation2 + $0x4e8] ss:$12 sps:$4 sm:$0xff]  }
 0x7ec   : > { %v10068_v48 = vpop.f32.mrf.mxu0  ;;  %11874 = vmatprep.subr.bf16.mxu1 %v22747_v26 }
 0x7ed   : > { %v14275_v24 = vpack.c.bf16 %v10067_v57, %v10067_v57 }
 0x7ee   : > { %v10069_v45 = vpop.f32.mrf.mxu0 }
 0x7ef   : > { %10607 = vst.msk [vmem:[#allocation2 + $0x5f0] sm:$0xf] %vm2448_vm9, %v14275_v24  ;;  %v10070_v54 = vadd.f32 %v10069_v45, %v21678_v23  ;;  %11875 = vmatpush2.bf16.msra.mxu1 %v15150_v31  ;;  %v21780_v23 = vld [vmem:[%s22269_s2 + $0x188] ss:$12 sps:$4 sm:$0x7f]  }
 0x7f0   : > { %v10071_v0 = vpop.f32.mrf.mxu0  ;;  %11876 = vmatprep.subr.bf16.mxu1 %v22747_v26  ;;  %22758 = vst [vmem:[#allocation15_spill] sm:$0xff] %v21780_v23  ;;  %v15299_v45 = vld [vmem:[%s22269_s2] ss:$12 sps:$4 sm:$0xff]   ;;  %v15300_v31 = vld [vmem:[%s22269_s2 + $0x1c] ss:$12 sps:$4 sm:$0xff]  }
 0x7f1   : > { %v14277_v59 = vpack.c.bf16 %v10070_v54, %v10070_v54 }
 0x7f2   : > { %v10074_v27 = vpop.f32.mrf.mxu0  ;;  %13899 = vmatmul.mubr.msk.bf16.gmra.mxu0 %vm3309_vm11, %v21766_v39 }
 0x7f3   : > { %10609 = vst.msk [vmem:[#allocation2 + $0x5fc] sm:$0xf] %vm2448_vm9, %v14277_v59  ;;  %v10075_v42 = vadd.f32 %v10074_v27, %v21693_v16  ;;  %11837 = vmatprep.mubr.bf16.mxu0 %v22747_v26  ;;  %11877 = vmatpush2.bf16.msra.mxu1 %v15151_v15  ;;  %v10619_v59 = vld [vmem:[#allocation2 + $0x62c] sm:$0x1] }
 0x7f4   : > { %v10076_v11 = vpop.f32.mrf.mxu0  ;;  %11878 = vmatprep.subr.bf16.mxu1 %v22747_v26 }
 0x7f5   : > { %v14279_v58 = vpack.c.bf16 %v10075_v42, %v10075_v42  ;;  %v15164_v42 = vld [vmem:[#allocation2 + $0x5d8] ss:$12 sps:$4 sm:$0xff]  }
 0x7f6   : > { %v10077_v33 = vpop.f32.mrf.mxu0 }
 0x7f7   : > { %10611 = vst.msk [vmem:[#allocation2 + $0x608] sm:$0xf] %vm2448_vm9, %v14279_v58  ;;  %v10078_v57 = vadd.f32 %v10077_v33, %v21703_v4  ;;  %11879 = vmatpush2.bf16.msra.mxu1 %v15152_v35  ;;  %v15301_v58 = vld [vmem:[%s22269_s2 + $0x18] ss:$12 sps:$4 sm:$0xff]   ;;  %v15302_v33 = vld [vmem:[%s22269_s2 + $0x34] ss:$12 sps:$4 sm:$0xff]  }
 0x7f8   : > { %v10079_v48 = vpop.f32.mrf.mxu0 }
 0x7f9   : > { %v14281_v16 = vpack.c.bf16 %v10078_v57, %v10078_v57  ;;  %v15303_v48 = vld [vmem:[%s22269_s2 + $0x30] ss:$12 sps:$4 sm:$0xff]  }
 0x7fa   : > { %v10082_v24 = vpop.f32.mrf.mxu0  ;;  %13900 = vmatmul.mubr.msk.bf16.gmra.mxu0 %vm3309_vm11, %v21780_v23  ;;  %11881 = vmatmul.mubr.bf16.vlgmr.msra.gmra.mxu1 %v15299_v45 }
 0x7fb   : > { %10613 = vst.msk [vmem:[#allocation2 + $0x614] sm:$0xf] %vm2448_vm9, %v14281_v16  ;;  %v10083_v26 = vadd.f32 %v10082_v24, %v21713_v41  ;;  %14527 = vmatprep.mubr.msk.bf16.mxu0 %vm15444_vm12, %v22757_v5  ;;  %11888 = vmatprep.mubr.bf16.mxu1 %v15300_v31  ;;  %v15304_v24 = vld [vmem:[%s22269_s2 + $0x4c] ss:$12 sps:$4 sm:$0xff]  }
 0x7fc   : > { %v10084_v4 = vpop.f32.mrf.mxu0 }
 0x7fd   : > { %v14283_v54 = vpack.c.bf16 %v10083_v26, %v10083_v26 }
 0x7fe   : > { %v10085_v0 = vpop.f32.mrf.mxu0 }
 0x7ff   : > { %10615 = vst.msk [vmem:[#allocation2 + $0x620] sm:$0xf] %vm2448_vm9, %v14283_v54  ;;  %v10086_v41 = vadd.f32 %v10085_v0, %v21719_v10  ;;  %v15305_v0 = vld [vmem:[%s22269_s2 + $0x48] ss:$12 sps:$4 sm:$0xff]  }
 0x800   : > { %v10087_v27 = vpop.f32.mrf.mxu0 }
 0x801   : > { %v14285_v15 = vpack.c.bf16 %v10086_v41, %v10086_v41 }
 0x802   : > { %11889 = vmatmul.mubr.bf16.gmra.mxu1 %v15301_v58  ;;  %v15158_v31 = vld [vmem:[#allocation2 + $0x608] ss:$12 sps:$4 sm:$0xff]  }
 0x803   : > { %v10620_v11 = vsel %vm16886_vm14, %v14285_v15, %v10619_v59  ;;  %11896 = vmatprep.mubr.bf16.mxu1 %v15302_v33  ;;  %v15160_v59 = vld [vmem:[#allocation2 + $0x5f0] ss:$12 sps:$4 sm:$0xff]   ;;  %v15166_v33 = vld [vmem:[#allocation2 + $0x5c0] ss:$12 sps:$4 sm:$0xff]  }
 0x804   : > { %10621 = vst [vmem:[#allocation2 + $0x62c] sm:$0x1] %v10620_v11 }
 0x805   : > { %v21806_v35 = vpop.f32.mrf.mxu1 }
 0x807   : > { %v21808_v10 = vpop.f32.mrf.mxu1 }
 0x809   : > { %v21813_v16 = vpop.f32.mrf.mxu1 }
 0x80a   : > { %11897 = vmatmul.mubr.bf16.gmra.mxu1 %v15303_v48 }
 0x80b   : > { %v15154_v57 = vld [vmem:[#allocation2 + $0x620] ss:$12 sps:$4 sm:$0x1f]   ;;  %11904 = vmatprep.mubr.bf16.mxu1 %v15304_v24  ;;  %v21819_v45 = vpop.f32.mrf.mxu1  ;;  %v15170_v24 = vld [vmem:[#allocation2 + $0x5a8] ss:$12 sps:$4 sm:$0xff]  }
 0x80c   : > { %v11440_v26 = vand.u32 %v15154_v57, %v22756_v36  ;;  %v15306_v36 = vld [vmem:[%s22269_s2 + $0x64] ss:$12 sps:$4 sm:$0xff]  }
 0x80d   : > { %v21821_v4 = vpop.f32.mrf.mxu1 }
 0x80e   : > { %14516 = vmatpush3.bf16.msra.mxu0 %v11440_v26 }
 0x80f   : > { %14517 = vmatprep.subr.bf16.mxu0 %v22757_v5  ;;  %v21824_v54 = vpop.f32.mrf.mxu1 }
 0x811   : > { %v21829_v41 = vpop.f32.mrf.mxu1 }
 0x812   : > { %14518 = vmatpush3.bf16.msra.mxu0 %v15158_v31  ;;  %11905 = vmatmul.mubr.bf16.gmra.mxu1 %v15305_v0 }
 0x813   : > { %14519 = vmatprep.subr.bf16.mxu0 %v22757_v5  ;;  %11912 = vmatprep.mubr.bf16.mxu1 %v15306_v36  ;;  %v21835_v27 = vpop.f32.mrf.mxu1 }
 0x815   : > { %v21837_v15 = vpop.f32.mrf.mxu1 }
 0x816   : > { %14520 = vmatpush3.bf16.msra.mxu0 %v15160_v59 }
 0x817   : > { %14521 = vmatprep.subr.bf16.mxu0 %v22757_v5  ;;  %v21840_v11 = vpop.f32.mrf.mxu1 }
 0x819   : > { %v21843_v58 = vpop.f32.mrf.mxu1 }
 0x81a   : > { %14522 = vmatpush3.bf16.msra.mxu0 %v15164_v42  ;;  %11913 = vmatmul.mubr.bf16.gmra.mxu1 %v21335_v55 }
 0x81b   : > { %14523 = vmatprep.subr.bf16.mxu0 %v22757_v5  ;;  %11920 = vmatprep.mubr.bf16.mxu1 %v21340_v44  ;;  %v21847_v57 = vpop.f32.mrf.mxu1 }
 0x81d   : > { %v21849_v48 = vpop.f32.mrf.mxu1 }
 0x81e   : > { %14524 = vmatpush3.bf16.msra.mxu0 %v15166_v33 }
 0x81f   : > { %14525 = vmatprep.subr.bf16.mxu0 %v22757_v5  ;;  %v21852_v26 = vpop.f32.mrf.mxu1 }
 0x821   : > { %v21855_v55 = vpop.f32.mrf.mxu1 }
 0x822   : > { %14526 = vmatpush3.bf16.msra.mxu0 %v15170_v24  ;;  %11921 = vmatmul.mubr.bf16.gmra.mxu1 %v21363_v63 }
 0x823   : > { %11928 = vmatprep.mubr.bf16.mxu1 %v21368_v19  ;;  %v21858_v31 = vpop.f32.mrf.mxu1 }
 0x825   : > { %14528 = vmatmul.mubr.msk.bf16.vlgmr.msra.gmra.mxu0 %vm3309_vm11, %v21402_v13  ;;  %v21864_v44 = vpop.f32.mrf.mxu1 }
 0x826   : > { %14531 = vmatprep.mubr.msk.bf16.mxu0 %vm15444_vm12, %v22757_v5 }
 0x827   : > { %v21866_v0 = vpop.f32.mrf.mxu1 }
 0x829   : > { %v21869_v36 = vpop.f32.mrf.mxu1 }
 0x82a   : > { %11929 = vmatmul.mubr.bf16.gmra.mxu1 %v21389_v34 }
 0x82b   : > { %11936 = vmatprep.mubr.bf16.mxu1 %v21397_v38  ;;  %v21872_v63 = vpop.f32.mrf.mxu1 }
 0x82d   : > { %14532 = vmatmul.mubr.msk.bf16.gmra.mxu0 %vm3309_vm11, %v21434_v46  ;;  %v21878_v19 = vpop.f32.mrf.mxu1 }
 0x82e   : > { %14535 = vmatprep.mubr.msk.bf16.mxu0 %vm15444_vm12, %v22757_v5 }
 0x82f   : > { %v21880_v13 = vpop.f32.mrf.mxu1 }
 0x831   : > { %v21883_v34 = vpop.f32.mrf.mxu1 }
 0x832   : > { %11937 = vmatmul.mubr.bf16.gmra.mxu1 %v21424_v7 }
 0x833   : > { %11944 = vmatprep.mubr.bf16.mxu1 %v21429_v1  ;;  %v21886_v38 = vpop.f32.mrf.mxu1 }
 0x835   : > { %14536 = vmatmul.mubr.msk.bf16.gmra.mxu0 %vm3309_vm11, %v21462_v6  ;;  %v21892_v46 = vpop.f32.mrf.mxu1 }
 0x836   : > { %14539 = vmatprep.mubr.msk.bf16.mxu0 %vm15444_vm12, %v22757_v5 }
 0x837   : > { %v21894_v59 = vpop.f32.mrf.mxu1 }
 0x839   : > { %v21898_v1 = vpop.f32.mrf.mxu1 }
 0x83a   : > { %v11679_v42 = vpop.f32.mrf.mxu0  ;;  %11945 = vmatmul.mubr.bf16.gmra.mxu1 %v21452_v50 }
 0x83b   : > { %v11680_v7 = vadd.f32 %v11679_v42, %v21806_v35  ;;  %11952 = vmatprep.mubr.bf16.mxu1 %v21457_v18  ;;  %v21903_v24 = vpop.f32.mrf.mxu1 }
 0x83c   : > { %v11681_v33 = vpop.f32.mrf.mxu0 }
 0x83d   : > { %13918 = vst [vmem:[%s17134_s8 + $0x660] sm:$0xff] %v11680_v7  ;;  %v11682_v6 = vadd.f32 %v11681_v33, %v21808_v10  ;;  %14540 = vmatmul.mubr.msk.bf16.gmra.mxu0 %vm3309_vm11, %v21490_v61  ;;  %v21911_v35 = vpop.f32.mrf.mxu1 }
 0x83e   : > { %v11683_v23 = vpop.f32.mrf.mxu0  ;;  %14543 = vmatprep.mubr.msk.bf16.mxu0 %vm15444_vm12, %v22757_v5 }
 0x83f   : > { %13919 = vst [vmem:[%s17134_s8 + $0x668] sm:$0xff] %v11682_v6  ;;  %v11684_v50 = vadd.f32 %v11683_v23, %v21813_v16  ;;  %v21915_v10 = vpop.f32.mrf.mxu1 }
 0x840   : > { %v11685_v42 = vpop.f32.mrf.mxu0 }
 0x841   : > { %13921 = vst [vmem:[%s17134_s8 + $0x678] sm:$0xff] %v11684_v50  ;;  %v11686_v18 = vadd.f32 %v11685_v42, %v21819_v45  ;;  %v21920_v33 = vpop.f32.mrf.mxu1 }
 0x842   : > { %v11689_v7 = vpop.f32.mrf.mxu0  ;;  %11953 = vmatmul.mubr.bf16.gmra.mxu1 %v21480_v62 }
 0x843   : > { %13922 = vst [vmem:[%s17134_s8 + $0x680] sm:$0xff] %v11686_v18  ;;  %v11690_v61 = vadd.f32 %v11689_v7, %v21821_v4  ;;  %11960 = vmatprep.mubr.bf16.mxu1 %v21485_v9  ;;  %v21925_v16 = vpop.f32.mrf.mxu1 }
 0x844   : > { %v11691_v6 = vpop.f32.mrf.mxu0 }
 0x845   : > { %13924 = vst [vmem:[%s17134_s8 + $0x690] sm:$0xff] %v11690_v61  ;;  %v11692_v23 = vadd.f32 %v11691_v6, %v21824_v54  ;;  %14544 = vmatmul.mubr.msk.bf16.gmra.mxu0 %vm3309_vm11, %v21518_v25  ;;  %v21933_v4 = vpop.f32.mrf.mxu1 }
 0x846   : > { %v11693_v45 = vpop.f32.mrf.mxu0  ;;  %14547 = vmatprep.mubr.msk.bf16.mxu0 %vm15444_vm12, %v22757_v5 }
 0x847   : > { %13925 = vst [vmem:[%s17134_s8 + $0x698] sm:$0xff] %v11692_v23  ;;  %v11694_v62 = vadd.f32 %v11693_v45, %v21829_v41  ;;  %v21937_v54 = vpop.f32.mrf.mxu1 }
 0x848   : > { %v11695_v50 = vpop.f32.mrf.mxu0 }
 0x849   : > { %13927 = vst [vmem:[%s17134_s8 + $0x6a8] sm:$0xff] %v11694_v62  ;;  %v11696_v9 = vadd.f32 %v11695_v50, %v21835_v27  ;;  %v21942_v18 = vpop.f32.mrf.mxu1 }
 0x84a   : > { %v11699_v42 = vpop.f32.mrf.mxu0  ;;  %11961 = vmatmul.mubr.bf16.gmra.mxu1 %v21508_v56 }
 0x84b   : > { %13928 = vst [vmem:[%s17134_s8 + $0x6b0] sm:$0xff] %v11696_v9  ;;  %v11700_v25 = vadd.f32 %v11699_v42, %v21837_v15  ;;  %11968 = vmatprep.mubr.bf16.mxu1 %v21513_v28  ;;  %v21947_v61 = vpop.f32.mrf.mxu1 }
 0x84c   : > { %v11701_v7 = vpop.f32.mrf.mxu0 }
 0x84d   : > { %13930 = vst [vmem:[%s17134_s8 + $0x6c0] sm:$0xff] %v11700_v25  ;;  %v11702_v41 = vadd.f32 %v11701_v7, %v21840_v11  ;;  %14548 = vmatmul.mubr.msk.bf16.gmra.mxu0 %vm3309_vm11, %v21547_v12  ;;  %v21955_v15 = vpop.f32.mrf.mxu1 }
 0x84e   : > { %v11703_v27 = vpop.f32.mrf.mxu0  ;;  %14551 = vmatprep.mubr.msk.bf16.mxu0 %vm15444_vm12, %v22757_v5 }
 0x84f   : > { %13931 = vst [vmem:[%s17134_s8 + $0x6c8] sm:$0xff] %v11702_v41  ;;  %v11704_v56 = vadd.f32 %v11703_v27, %v21843_v58  ;;  %v21959_v11 = vpop.f32.mrf.mxu1 }
 0x850   : > { %v11705_v6 = vpop.f32.mrf.mxu0 }
 0x851   : > { %13933 = vst [vmem:[%s17134_s8 + $0x6d8] sm:$0xff] %v11704_v56  ;;  %v11706_v28 = vadd.f32 %v11705_v6, %v21847_v57  ;;  %v21964_v45 = vpop.f32.mrf.mxu1 }
 0x852   : > { %v11709_v23 = vpop.f32.mrf.mxu0  ;;  %11969 = vmatmul.mubr.bf16.gmra.mxu1 %v21536_v37 }
 0x853   : > { %13934 = vst [vmem:[%s17134_s8 + $0x6e0] sm:$0xff] %v11706_v28  ;;  %v11710_v12 = vadd.f32 %v11709_v23, %v21849_v48  ;;  %11976 = vmatprep.mubr.bf16.mxu1 %v21541_v51  ;;  %v21969_v50 = vpop.f32.mrf.mxu1 }
 0x854   : > { %v11711_v62 = vpop.f32.mrf.mxu0 }
 0x855   : > { %13936 = vst [vmem:[%s17134_s8 + $0x6f0] sm:$0xff] %v11710_v12  ;;  %v11712_v58 = vadd.f32 %v11711_v62, %v21852_v26  ;;  %14552 = vmatmul.mubr.msk.bf16.gmra.mxu0 %vm3309_vm11, %v21577_v3  ;;  %v21977_v48 = vpop.f32.mrf.mxu1 }
 0x856   : > { %v11713_v57 = vpop.f32.mrf.mxu0  ;;  %14555 = vmatprep.mubr.msk.bf16.mxu0 %vm15444_vm12, %v22757_v5 }
 0x857   : > { %13937 = vst [vmem:[%s17134_s8 + $0x6f8] sm:$0xff] %v11712_v58  ;;  %v11714_v37 = vadd.f32 %v11713_v57, %v21855_v55  ;;  %v21981_v26 = vpop.f32.mrf.mxu1 }
 0x858   : > { %v11715_v9 = vpop.f32.mrf.mxu0 }
 0x859   : > { %13939 = vst [vmem:[%s17134_s8 + $0x708] sm:$0xff] %v11714_v37  ;;  %v11716_v51 = vadd.f32 %v11715_v9, %v21858_v31  ;;  %v21986_v25 = vpop.f32.mrf.mxu1 }
 0x85a   : > { %v11719_v42 = vpop.f32.mrf.mxu0  ;;  %11977 = vmatmul.mubr.bf16.gmra.mxu1 %v21566_v30 }
 0x85b   : > { %13940 = vst [vmem:[%s17134_s8 + $0x710] sm:$0xff] %v11716_v51  ;;  %v11720_v3 = vadd.f32 %v11719_v42, %v21864_v44  ;;  %11984 = vmatprep.mubr.bf16.mxu1 %v21571_v49  ;;  %v21991_v41 = vpop.f32.mrf.mxu1 }
 0x85c   : > { %v11721_v7 = vpop.f32.mrf.mxu0 }
 0x85d   : > { %13942 = vst [vmem:[%s17134_s8 + $0x720] sm:$0xff] %v11720_v3  ;;  %v11722_v55 = vadd.f32 %v11721_v7, %v21866_v0  ;;  %14556 = vmatmul.mubr.msk.bf16.gmra.mxu0 %vm3309_vm11, %v21607_v32  ;;  %v21999_v44 = vpop.f32.mrf.mxu1 }
 0x85e   : > { %v11723_v31 = vpop.f32.mrf.mxu0  ;;  %14559 = vmatprep.mubr.msk.bf16.mxu0 %vm15444_vm12, %v22757_v5 }
 0x85f   : > { %13943 = vst [vmem:[%s17134_s8 + $0x728] sm:$0xff] %v11722_v55  ;;  %v11724_v30 = vadd.f32 %v11723_v31, %v21869_v36  ;;  %v22003_v0 = vpop.f32.mrf.mxu1 }
 0x860   : > { %v11725_v27 = vpop.f32.mrf.mxu0 }
 0x861   : > { %13945 = vst [vmem:[%s17134_s8 + $0x738] sm:$0xff] %v11724_v30  ;;  %v11726_v49 = vadd.f32 %v11725_v27, %v21872_v63  ;;  %v22008_v6 = vpop.f32.mrf.mxu1 }
 0x862   : > { %v11729_v56 = vpop.f32.mrf.mxu0  ;;  %11985 = vmatmul.mubr.bf16.gmra.mxu1 %v21596_v40 }
 0x863   : > { %13946 = vst [vmem:[%s17134_s8 + $0x740] sm:$0xff] %v11726_v49  ;;  %v11730_v32 = vadd.f32 %v11729_v56, %v21878_v19  ;;  %11992 = vmatprep.mubr.bf16.mxu1 %v21601_v20  ;;  %v22019_v19 = vpop.f32.mrf.mxu1 }
 0x864   : > { %v11731_v36 = vpop.f32.mrf.mxu0 }
 0x865   : > { %13948 = vst [vmem:[%s17134_s8 + $0x750] sm:$0xff] %v11730_v32  ;;  %v11732_v28 = vadd.f32 %v11731_v36, %v21880_v13  ;;  %14560 = vmatmul.mubr.msk.bf16.gmra.mxu0 %vm3309_vm11, %v21637_v29  ;;  %v22026_v13 = vpop.f32.mrf.mxu1 }
 0x866   : > { %v11733_v63 = vpop.f32.mrf.mxu0  ;;  %14563 = vmatprep.mubr.msk.bf16.mxu0 %vm15444_vm12, %v22757_v5 }
 0x867   : > { %13949 = vst [vmem:[%s17134_s8 + $0x758] sm:$0xff] %v11732_v28  ;;  %v11734_v40 = vadd.f32 %v11733_v63, %v21883_v34 }
 0x868   : > { %v11735_v23 = vpop.f32.mrf.mxu0 }
 0x869   : > { %13951 = vst [vmem:[%s17134_s8 + $0x768] sm:$0xff] %v11734_v40  ;;  %v11736_v20 = vadd.f32 %v11735_v23, %v21886_v38 }
 0x86a   : > { %v11739_v12 = vpop.f32.mrf.mxu0  ;;  %11993 = vmatmul.mubr.bf16.gmra.mxu1 %v21626_v47 }
 0x86b   : > { %13952 = vst [vmem:[%s17134_s8 + $0x770] sm:$0xff] %v11736_v20  ;;  %v11740_v29 = vadd.f32 %v11739_v12, %v21892_v46  ;;  %12000 = vmatprep.mubr.bf16.mxu1 %v21631_v21  ;;  %v22037_v46 = vpop.f32.mrf.mxu1 }
 0x86c   : > { %v11741_v62 = vpop.f32.mrf.mxu0 }
 0x86d   : > { %13954 = vst [vmem:[%s17134_s8 + $0x780] sm:$0xff] %v11740_v29  ;;  %v11742_v34 = vadd.f32 %v11741_v62, %v21894_v59  ;;  %14564 = vmatmul.mubr.msk.bf16.gmra.mxu0 %vm3309_vm11, %v21666_v2  ;;  %v22044_v59 = vpop.f32.mrf.mxu1 }
 0x86e   : > { %v11743_v38 = vpop.f32.mrf.mxu0  ;;  %14567 = vmatprep.mubr.msk.bf16.mxu0 %vm15444_vm12, %v22757_v5 }
 0x86f   : > { %13955 = vst [vmem:[%s17134_s8 + $0x788] sm:$0xff] %v11742_v34  ;;  %v11744_v47 = vadd.f32 %v11743_v38, %v21898_v1 }
 0x870   : > { %v11745_v58 = vpop.f32.mrf.mxu0 }
 0x871   : > { %13957 = vst [vmem:[%s17134_s8 + $0x798] sm:$0xff] %v11744_v47  ;;  %v11746_v21 = vadd.f32 %v11745_v58, %v21903_v24 }
 0x872   : > { %v11749_v57 = vpop.f32.mrf.mxu0  ;;  %12001 = vmatmul.mubr.bf16.gmra.mxu1 %v21656_v22 }
 0x873   : > { %13958 = vst [vmem:[%s17134_s8 + $0x7a0] sm:$0xff] %v11746_v21  ;;  %v11750_v2 = vadd.f32 %v11749_v57, %v21911_v35  ;;  %12008 = vmatprep.mubr.bf16.mxu1 %v21661_v14  ;;  %v22055_v35 = vpop.f32.mrf.mxu1 }
 0x874   : > { %v11751_v37 = vpop.f32.mrf.mxu0 }
 0x875   : > { %13960 = vst [vmem:[%s17134_s8 + $0x7b0] sm:$0xff] %v11750_v2  ;;  %v11752_v1 = vadd.f32 %v11751_v37, %v21915_v10  ;;  %14568 = vmatmul.mubr.msk.bf16.gmra.mxu0 %vm3309_vm11, %v21689_v8  ;;  %v22062_v8 = vpop.f32.mrf.mxu1  ;;  %v22760_v2 = vld [vmem:[#allocation15_spill] sm:$0xff] }
 0x876   : > { %v11753_v24 = vpop.f32.mrf.mxu0  ;;  %14571 = vmatprep.mubr.msk.bf16.mxu0 %vm15444_vm12, %v22757_v5 }
 0x877   : > { %13961 = vst [vmem:[%s17134_s8 + $0x7b8] sm:$0xff] %v11752_v1  ;;  %v11754_v22 = vadd.f32 %v11753_v24, %v21920_v33 }
 0x878   : > { %v11755_v9 = vpop.f32.mrf.mxu0 }
 0x879   : > { %13963 = vst [vmem:[%s17134_s8 + $0x7c8] sm:$0xff] %v11754_v22  ;;  %v11756_v14 = vadd.f32 %v11755_v9, %v21925_v16 }
 0x87a   : > { %v11759_v10 = vpop.f32.mrf.mxu0  ;;  %12009 = vmatmul.mubr.bf16.gmra.mxu1 %v21684_v43 }
 0x87b   : > { %13964 = vst [vmem:[%s17134_s8 + $0x7d0] sm:$0xff] %v11756_v14  ;;  %v11760_v51 = vadd.f32 %v11759_v10, %v21933_v4  ;;  %v22072_v4 = vpop.f32.mrf.mxu1 }
 0x87c   : > { %v11761_v42 = vpop.f32.mrf.mxu0 }
 0x87d   : > { %13966 = vst [vmem:[%s17134_s8 + $0x7e0] sm:$0xff] %v11760_v51  ;;  %v11762_v33 = vadd.f32 %v11761_v42, %v21937_v54  ;;  %14572 = vmatmul.mubr.msk.bf16.gmra.mxu0 %vm3309_vm11, %v21709_v60  ;;  %v22078_v54 = vpop.f32.mrf.mxu1 }
 0x87e   : > { %v11763_v3 = vpop.f32.mrf.mxu0  ;;  %14575 = vmatprep.mubr.msk.bf16.mxu0 %vm15444_vm12, %v22757_v5 }
 0x87f   : > { %13967 = vst [vmem:[%s17134_s8 + $0x7e8] sm:$0xff] %v11762_v33  ;;  %v11764_v16 = vadd.f32 %v11763_v3, %v21942_v18  ;;  %v22088_v27 = vpop.f32.mrf.mxu1 }
 0x880   : > { %v11765_v43 = vpop.f32.mrf.mxu0 }
 0x881   : > { %13969 = vst [vmem:[%s17134_s8 + $0x7f8] sm:$0xff] %v11764_v16  ;;  %v11766_v7 = vadd.f32 %v11765_v43, %v21947_v61 }
 0x882   : > { %v11769_v55 = vpop.f32.mrf.mxu0 }
 0x883   : > { %13970 = vst [vmem:[%s17134_s8 + $0x800] sm:$0xff] %v11766_v7  ;;  %v11770_v60 = vadd.f32 %v11769_v55, %v21955_v15 }
 0x884   : > { %v11771_v31 = vpop.f32.mrf.mxu0 }
 0x885   : > { %13972 = vst [vmem:[%s17134_s8 + $0x810] sm:$0xff] %v11770_v60  ;;  %v11772_v30 = vadd.f32 %v11771_v31, %v21959_v11  ;;  %14576 = vmatmul.mubr.msk.bf16.gmra.mxu0 %vm3309_vm11, %v21725_v17  ;;  %v11616_v11 = vpop.f32.mrf.mxu1 }
 0x886   : > { %v11773_v18 = vpop.f32.mrf.mxu0  ;;  %14579 = vmatprep.mubr.msk.bf16.mxu0 %vm15444_vm12, %v22757_v5 }
 0x887   : > { %13973 = vst [vmem:[%s17134_s8 + $0x818] sm:$0xff] %v11772_v30  ;;  %v11774_v61 = vadd.f32 %v11773_v18, %v21964_v45  ;;  %v11618_v28 = vpop.f32.mrf.mxu1 }
 0x888   : > { %v11775_v15 = vpop.f32.mrf.mxu0 }
 0x889   : > { %13975 = vst [vmem:[%s17134_s8 + $0x828] sm:$0xff] %v11774_v61  ;;  %v11776_v49 = vadd.f32 %v11775_v15, %v21969_v50 }
 0x88a   : > { %v11779_v56 = vpop.f32.mrf.mxu0 }
 0x88b   : > { %13976 = vst [vmem:[%s17134_s8 + $0x830] sm:$0xff] %v11776_v49  ;;  %v11780_v17 = vadd.f32 %v11779_v56, %v21977_v48 }
 0x88c   : > { %v11781_v32 = vpop.f32.mrf.mxu0 }
 0x88d   : > { %13978 = vst [vmem:[%s17134_s8 + $0x840] sm:$0xff] %v11780_v17  ;;  %v11782_v36 = vadd.f32 %v11781_v32, %v21981_v26  ;;  %14580 = vmatmul.mubr.msk.bf16.gmra.mxu0 %vm3309_vm11, %v21738_v52  ;;  %v11620_v52 = vpop.f32.mrf.mxu1 }
 0x88e   : > { %v11783_v45 = vpop.f32.mrf.mxu0  ;;  %14583 = vmatprep.mubr.msk.bf16.mxu0 %vm15444_vm12, %v22757_v5 }
 0x88f   : > { %13979 = vst [vmem:[%s17134_s8 + $0x848] sm:$0xff] %v11782_v36  ;;  %v11784_v50 = vadd.f32 %v11783_v45, %v21986_v25  ;;  %v11622_v12 = vpop.f32.mrf.mxu1 }
 0x890   : > { %v11785_v63 = vpop.f32.mrf.mxu0 }
 0x891   : > { %13981 = vst [vmem:[%s17134_s8 + $0x858] sm:$0xff] %v11784_v50  ;;  %v11786_v48 = vadd.f32 %v11785_v63, %v21991_v41 }
 0x892   : > { %v11789_v40 = vpop.f32.mrf.mxu0 }
 0x893   : > { %13982 = vst [vmem:[%s17134_s8 + $0x860] sm:$0xff] %v11786_v48  ;;  %v11790_v26 = vadd.f32 %v11789_v40, %v21999_v44 }
 0x894   : > { %v11791_v23 = vpop.f32.mrf.mxu0 }
 0x895   : > { %13984 = vst [vmem:[%s17134_s8 + $0x870] sm:$0xff] %v11790_v26  ;;  %v11792_v20 = vadd.f32 %v11791_v23, %v22003_v0  ;;  %14584 = vmatmul.mubr.msk.bf16.gmra.mxu0 %vm3309_vm11, %v21752_v53  ;;  %v11626_v53 = vpop.f32.mrf.mxu1 }
 0x896   : > { %v11793_v25 = vpop.f32.mrf.mxu0  ;;  %14587 = vmatprep.mubr.msk.bf16.mxu0 %vm15444_vm12, %v22757_v5 }
 0x897   : > { %13985 = vst [vmem:[%s17134_s8 + $0x878] sm:$0xff] %v11792_v20  ;;  %v11794_v41 = vadd.f32 %v11793_v25, %v22008_v6  ;;  %v11628_v47 = vpop.f32.mrf.mxu1 }
 0x898   : > { %v11795_v29 = vpop.f32.mrf.mxu0 }
 0x899   : > { %13987 = vst [vmem:[%s17134_s8 + $0x888] sm:$0xff] %v11794_v41  ;;  %v11796_v44 = vadd.f32 %v11795_v29, %v22019_v19 }
 0x89a   : > { %v11799_v62 = vpop.f32.mrf.mxu0 }
 0x89b   : > { %13988 = vst [vmem:[%s17134_s8 + $0x890] sm:$0xff] %v11796_v44  ;;  %v11800_v0 = vadd.f32 %v11799_v62, %v22026_v13 }
 0x89c   : > { %v11801_v34 = vpop.f32.mrf.mxu0 }
 0x89d   : > { %13990 = vst [vmem:[%s17134_s8 + $0x8a0] sm:$0xff] %v11800_v0  ;;  %v11802_v38 = vadd.f32 %v11801_v34, %v22037_v46  ;;  %14588 = vmatmul.mubr.msk.bf16.gmra.mxu0 %vm3309_vm11, %v21766_v39  ;;  %v11630_v39 = vpop.f32.mrf.mxu1 }
 0x89e   : > { %v11803_v6 = vpop.f32.mrf.mxu0  ;;  %14591 = vmatprep.mubr.msk.bf16.mxu0 %vm15444_vm12, %v22757_v5 }
 0x89f   : > { %13991 = vst [vmem:[%s17134_s8 + $0x8a8] sm:$0xff] %v11802_v38  ;;  %v11804_v19 = vadd.f32 %v11803_v6, %v22044_v59  ;;  %v11632_v1 = vpop.f32.mrf.mxu1 }
 0x8a0   : > { %v11805_v58 = vpop.f32.mrf.mxu0 }
 0x8a1   : > { %13993 = vst [vmem:[%s17134_s8 + $0x8b8] sm:$0xff] %v11804_v19  ;;  %v11806_v13 = vadd.f32 %v11805_v58, %v22055_v35  ;;  %v11636_v14 = vpop.f32.mrf.mxu1 }
 0x8a2   : > { %v11809_v21 = vpop.f32.mrf.mxu0 }
 0x8a3   : > { %13994 = vst [vmem:[%s17134_s8 + $0x8c0] sm:$0xff] %v11806_v13  ;;  %v11810_v46 = vadd.f32 %v11809_v21, %v22062_v8  ;;  %v11638_v33 = vpop.f32.mrf.mxu1 }
 0x8a4   : > { %v11811_v57 = vpop.f32.mrf.mxu0 }
 0x8a5   : > { %13996 = vst [vmem:[%s17134_s8 + $0x8d0] sm:$0xff] %v11810_v46  ;;  %v11812_v5 = vadd.f32 %v11811_v57, %v22072_v4  ;;  %14592 = vmatmul.mubr.msk.bf16.gmra.mxu0 %vm3309_vm11, %v22760_v2  ;;  %v11640_v7 = vpop.f32.mrf.mxu1 }
 0x8a6   : > { %v11813_v59 = vpop.f32.mrf.mxu0 }
 0x8a7   : > { %13997 = vst [vmem:[%s17134_s8 + $0x8d8] sm:$0xff] %v11812_v5  ;;  %v11814_v37 = vadd.f32 %v11813_v59, %v22078_v54  ;;  %v11642_v30 = vpop.f32.mrf.mxu1 }
 0x8a8   : > { %v11815_v24 = vpop.f32.mrf.mxu0 }
 0x8a9   : > { %13999 = vst [vmem:[%s17134_s8 + $0x8e8] sm:$0xff] %v11814_v37  ;;  %v11816_v22 = vadd.f32 %v11815_v24, %v22088_v27 }
 0x8aa   : > { %v11819_v35 = vpop.f32.mrf.mxu0 }
 0x8ab   : > { %14000 = vst [vmem:[%s17134_s8 + $0x8f0] sm:$0xff] %v11816_v22  ;;  %v11820_v9 = vadd.f32 %v11819_v35, %v11616_v11 }
 0x8ac   : > { %v11821_v10 = vpop.f32.mrf.mxu0 }
 0x8ad   : > { %14002 = vst [vmem:[%s17134_s8 + $0x900] sm:$0xff] %v11820_v9  ;;  %v11822_v51 = vadd.f32 %v11821_v10, %v11618_v28 }
 0x8ae   : > { %v11823_v8 = vpop.f32.mrf.mxu0 }
 0x8af   : > { %14003 = vst [vmem:[%s17134_s8 + $0x908] sm:$0xff] %v11822_v51  ;;  %v11824_v42 = vadd.f32 %v11823_v8, %v11620_v52 }
 0x8b0   : > { %v11825_v3 = vpop.f32.mrf.mxu0 }
 0x8b1   : > { %14005 = vst [vmem:[%s17134_s8 + $0x918] sm:$0xff] %v11824_v42  ;;  %v11826_v16 = vadd.f32 %v11825_v3, %v11622_v12 }
 0x8b2   : > { %v11829_v4 = vpop.f32.mrf.mxu0 }
 0x8b3   : > { %14006 = vst [vmem:[%s17134_s8 + $0x920] sm:$0xff] %v11826_v16  ;;  %v11830_v43 = vadd.f32 %v11829_v4, %v11626_v53 }
 0x8b4   : > { %v11831_v55 = vpop.f32.mrf.mxu0 }
 0x8b5   : > { %14008 = vst [vmem:[%s17134_s8 + $0x930] sm:$0xff] %v11830_v43  ;;  %v11832_v60 = vadd.f32 %v11831_v55, %v11628_v47 }
 0x8b6   : > { %v11833_v54 = vpop.f32.mrf.mxu0 }
 0x8b7   : > { %14009 = vst [vmem:[%s17134_s8 + $0x938] sm:$0xff] %v11832_v60  ;;  %v11834_v31 = vadd.f32 %v11833_v54, %v11630_v39 }
 0x8b8   : > { %v11835_v18 = vpop.f32.mrf.mxu0 }
 0x8b9   : > { %14011 = vst [vmem:[%s17134_s8 + $0x948] sm:$0xff] %v11834_v31  ;;  %v11836_v61 = vadd.f32 %v11835_v18, %v11632_v1 }
 0x8ba   : > { %v11839_v27 = vpop.f32.mrf.mxu0  ;;  %v11882_v49 = vpop.f32.mrf.mxu1 }
 0x8bb   : > { %14012 = vst [vmem:[%s17134_s8 + $0x950] sm:$0xff] %v11836_v61  ;;  %v11840_v15 = vadd.f32 %v11839_v27, %v11636_v14 }
 0x8bc   : > { %v11841_v56 = vpop.f32.mrf.mxu0  ;;  %v11884_v11 = vpop.f32.mrf.mxu1 }
 0x8bd   : > { %14014 = vst [vmem:[%s17134_s8 + $0x960] sm:$0xff] %v11840_v15  ;;  %v11842_v17 = vadd.f32 %v11841_v56, %v11638_v33 }
 0x8be   : > { %v11843_v32 = vpop.f32.mrf.mxu0  ;;  %v11885_v45 = vpop.f32.mrf.mxu1 }
 0x8bf   : > { %14015 = vst [vmem:[%s17134_s8 + $0x968] sm:$0xff] %v11842_v17  ;;  %v11844_v36 = vadd.f32 %v11843_v32, %v11640_v7 }
 0x8c0   : > { %v11845_v50 = vpop.f32.mrf.mxu0  ;;  %v11887_v63 = vpop.f32.mrf.mxu1 }
 0x8c1   : > { %14017 = vst [vmem:[%s17134_s8 + $0x978] sm:$0x3f] %v11844_v36  ;;  %v11846_v28 = vadd.f32 %v11845_v50, %v11642_v30 }
 0x8c2   : > { %v11890_v48 = vpop.f32.mrf.mxu1 }
 0x8c3   : > { %14018 = vst [vmem:[%s17134_s8 + $0x980] sm:$0x3f] %v11846_v28 }
 0x8c4   : > { %v11892_v40 = vpop.f32.mrf.mxu1 }
 0x8c6   : > { %v11893_v26 = vpop.f32.mrf.mxu1 }
 0x8c8   : > { %v11895_v52 = vpop.f32.mrf.mxu1 }
 0x8ca   : > { %v11898_v23 = vpop.f32.mrf.mxu1 }
 0x8cc   : > { %v11900_v20 = vpop.f32.mrf.mxu1 }
 0x8ce   : > { %v11901_v25 = vpop.f32.mrf.mxu1 }
 0x8d0   : > { %v11903_v41 = vpop.f32.mrf.mxu1 }
 0x8d2   : > { %v11906_v12 = vpop.f32.mrf.mxu1 }
 0x8d4   : > { %v11908_v29 = vpop.f32.mrf.mxu1 }
 0x8d6   : > { %v11909_v44 = vpop.f32.mrf.mxu1 }
 0x8d8   : > { %v11911_v62 = vpop.f32.mrf.mxu1 }
 0x8da   : > { %v11914_v0 = vpop.f32.mrf.mxu1 }
 0x8dc   : > { %v11916_v53 = vpop.f32.mrf.mxu1 }
 0x8de   : > { %v11917_v34 = vpop.f32.mrf.mxu1 }
 0x8e0   : > { %v11919_v38 = vpop.f32.mrf.mxu1 }
 0x8e2   : > { %v22151_v6 = vpop.f32.mrf.mxu1 }
 0x8e4   : > { %v11924_v19 = vpop.f32.mrf.mxu1 }
 0x8e5   : > { %v12051_v47 = vpop.f32.mrf.mxu0 }
 0x8e6   : > { %v12052_v58 = vadd.f32 %v12051_v47, %v11882_v49  ;;  %v22153_v13 = vpop.f32.mrf.mxu1 }
 0x8e7   : > { %v14529_v21 = vpop.f32.mrf.mxu0 }
 0x8e8   : > { %13920 = vst.msk [vmem:[%s17134_s8 + $0x670] sm:$0xff] %vm4119_vm15, %v12052_v58  ;;  %v11927_v46 = vpop.f32.mrf.mxu1 }
 0x8e9   : > { %v12054_v39 = vpop.f32.mrf.mxu0 }
 0x8ea   : > { %v12055_v57 = vadd.f32 %v12054_v39, %v11885_v45  ;;  %v22157_v5 = vpop.f32.mrf.mxu1 }
 0x8eb   : > { %v14530_v2 = vpop.f32.mrf.mxu0 }
 0x8ec   : > { %13923 = vst.msk [vmem:[%s17134_s8 + $0x688] sm:$0xff] %vm4119_vm15, %v12055_v57  ;;  %v11932_v59 = vpop.f32.mrf.mxu1 }
 0x8ed   : > { %v12059_v37 = vpop.f32.mrf.mxu0 }
 0x8ee   : > { %v12060_v1 = vadd.f32 %v12059_v37, %v11890_v48  ;;  %v22161_v24 = vpop.f32.mrf.mxu1 }
 0x8ef   : > { %v14533_v22 = vpop.f32.mrf.mxu0 }
 0x8f0   : > { %13926 = vst.msk [vmem:[%s17134_s8 + $0x6a0] sm:$0xff] %vm4119_vm15, %v12060_v1  ;;  %v11935_v35 = vpop.f32.mrf.mxu1 }
 0x8f1   : > { %v12062_v9 = vpop.f32.mrf.mxu0 }
 0x8f2   : > { %v12063_v14 = vadd.f32 %v12062_v9, %v11893_v26  ;;  %v22165_v10 = vpop.f32.mrf.mxu1 }
 0x8f3   : > { %v14534_v51 = vpop.f32.mrf.mxu0 }
 0x8f4   : > { %13929 = vst.msk [vmem:[%s17134_s8 + $0x6b8] sm:$0xff] %vm4119_vm15, %v12063_v14  ;;  %v11940_v8 = vpop.f32.mrf.mxu1 }
 0x8f5   : > { %v12067_v42 = vpop.f32.mrf.mxu0 }
 0x8f6   : > { %v12068_v33 = vadd.f32 %v12067_v42, %v11898_v23  ;;  %v22169_v3 = vpop.f32.mrf.mxu1 }
 0x8f7   : > { %v14537_v16 = vpop.f32.mrf.mxu0 }
 0x8f8   : > { %13932 = vst.msk [vmem:[%s17134_s8 + $0x6d0] sm:$0xff] %vm4119_vm15, %v12068_v33  ;;  %v11943_v4 = vpop.f32.mrf.mxu1 }
 0x8f9   : > { %v12070_v43 = vpop.f32.mrf.mxu0 }
 0x8fa   : > { %v12071_v7 = vadd.f32 %v12070_v43, %v11901_v25  ;;  %v22173_v55 = vpop.f32.mrf.mxu1 }
 0x8fb   : > { %v14538_v60 = vpop.f32.mrf.mxu0 }
 0x8fc   : > { %13935 = vst.msk [vmem:[%s17134_s8 + $0x6e8] sm:$0xff] %vm4119_vm15, %v12071_v7  ;;  %v11948_v54 = vpop.f32.mrf.mxu1 }
 0x8fd   : > { %v12075_v31 = vpop.f32.mrf.mxu0 }
 0x8fe   : > { %v12076_v30 = vadd.f32 %v12075_v31, %v11906_v12  ;;  %v22177_v18 = vpop.f32.mrf.mxu1 }
 0x8ff   : > { %v14541_v61 = vpop.f32.mrf.mxu0 }
 0x900   : > { %13938 = vst.msk [vmem:[%s17134_s8 + $0x700] sm:$0xff] %vm4119_vm15, %v12076_v30  ;;  %v11951_v27 = vpop.f32.mrf.mxu1 }
 0x901   : > { %v12078_v15 = vpop.f32.mrf.mxu0 }
 0x902   : > { %v12079_v49 = vadd.f32 %v12078_v15, %v11909_v44  ;;  %v22181_v56 = vpop.f32.mrf.mxu1 }
 0x903   : > { %v14542_v17 = vpop.f32.mrf.mxu0 }
 0x904   : > { %13941 = vst.msk [vmem:[%s17134_s8 + $0x718] sm:$0xff] %vm4119_vm15, %v12079_v49  ;;  %v11956_v11 = vpop.f32.mrf.mxu1 }
 0x905   : > { %v12083_v32 = vpop.f32.mrf.mxu0 }
 0x906   : > { %v12084_v36 = vadd.f32 %v12083_v32, %v11914_v0  ;;  %v22185_v45 = vpop.f32.mrf.mxu1 }
 0x907   : > { %v14545_v50 = vpop.f32.mrf.mxu0 }
 0x908   : > { %13944 = vst.msk [vmem:[%s17134_s8 + $0x730] sm:$0xff] %vm4119_vm15, %v12084_v36  ;;  %v11959_v28 = vpop.f32.mrf.mxu1 }
 0x909   : > { %v12086_v63 = vpop.f32.mrf.mxu0 }
 0x90a   : > { %v12087_v48 = vadd.f32 %v12086_v63, %v11917_v34  ;;  %v22189_v40 = vpop.f32.mrf.mxu1 }
 0x90b   : > { %v14546_v26 = vpop.f32.mrf.mxu0 }
 0x90c   : > { %13947 = vst.msk [vmem:[%s17134_s8 + $0x748] sm:$0xff] %vm4119_vm15, %v12087_v48  ;;  %v11964_v52 = vpop.f32.mrf.mxu1 }
 0x90d   : > { %v12091_v23 = vpop.f32.mrf.mxu0 }
 0x90e   : > { %v12092_v20 = vadd.f32 %v12091_v23, %v22151_v6  ;;  %v22194_v25 = vpop.f32.mrf.mxu1 }
 0x90f   : > { %v14549_v41 = vpop.f32.mrf.mxu0 }
 0x910   : > { %13950 = vst.msk [vmem:[%s17134_s8 + $0x760] sm:$0xff] %vm4119_vm15, %v12092_v20  ;;  %v11967_v12 = vpop.f32.mrf.mxu1 }
 0x911   : > { %v12094_v29 = vpop.f32.mrf.mxu0 }
 0x912   : > { %v12095_v44 = vadd.f32 %v12094_v29, %v22153_v13  ;;  %v22199_v62 = vpop.f32.mrf.mxu1 }
 0x913   : > { %v14550_v0 = vpop.f32.mrf.mxu0 }
 0x914   : > { %13953 = vst.msk [vmem:[%s17134_s8 + $0x778] sm:$0xff] %vm4119_vm15, %v12095_v44  ;;  %v11972_v53 = vpop.f32.mrf.mxu1 }
 0x915   : > { %v12099_v34 = vpop.f32.mrf.mxu0 }
 0x916   : > { %v12100_v38 = vadd.f32 %v12099_v34, %v22157_v5  ;;  %v22204_v6 = vpop.f32.mrf.mxu1 }
 0x917   : > { %v14553_v19 = vpop.f32.mrf.mxu0 }
 0x918   : > { %13956 = vst.msk [vmem:[%s17134_s8 + $0x790] sm:$0xff] %vm4119_vm15, %v12100_v38  ;;  %v11975_v47 = vpop.f32.mrf.mxu1 }
 0x919   : > { %v12102_v58 = vpop.f32.mrf.mxu0 }
 0x91a   : > { %v12103_v13 = vadd.f32 %v12102_v58, %v22161_v24  ;;  %v22209_v21 = vpop.f32.mrf.mxu1 }
 0x91b   : > { %v14554_v46 = vpop.f32.mrf.mxu0 }
 0x91c   : > { %13959 = vst.msk [vmem:[%s17134_s8 + $0x7a8] sm:$0xff] %vm4119_vm15, %v12103_v13  ;;  %v11980_v39 = vpop.f32.mrf.mxu1 }
 0x91d   : > { %v12107_v57 = vpop.f32.mrf.mxu0 }
 0x91e   : > { %v12108_v5 = vadd.f32 %v12107_v57, %v22165_v10  ;;  %v11981_v2 = vpop.f32.mrf.mxu1 }
 0x91f   : > { %v14557_v59 = vpop.f32.mrf.mxu0 }
 0x920   : > { %13962 = vst.msk [vmem:[%s17134_s8 + $0x7c0] sm:$0xff] %vm4119_vm15, %v12108_v5  ;;  %v11983_v37 = vpop.f32.mrf.mxu1 }
 0x921   : > { %v12110_v1 = vpop.f32.mrf.mxu0 }
 0x922   : > { %v12111_v22 = vadd.f32 %v12110_v1, %v22169_v3  ;;  %v11986_v24 = vpop.f32.mrf.mxu1 }
 0x923   : > { %v14558_v35 = vpop.f32.mrf.mxu0 }
 0x924   : > { %13965 = vst.msk [vmem:[%s17134_s8 + $0x7d8] sm:$0xff] %vm4119_vm15, %v12111_v22  ;;  %v11988_v9 = vpop.f32.mrf.mxu1 }
 0x925   : > { %v12115_v14 = vpop.f32.mrf.mxu0 }
 0x926   : > { %v12116_v51 = vadd.f32 %v12115_v14, %v22173_v55  ;;  %v11989_v8 = vpop.f32.mrf.mxu1 }
 0x927   : > { %v14561_v10 = vpop.f32.mrf.mxu0 }
 0x928   : > { %13968 = vst.msk [vmem:[%s17134_s8 + $0x7f0] sm:$0xff] %vm4119_vm15, %v12116_v51  ;;  %v11991_v42 = vpop.f32.mrf.mxu1 }
 0x929   : > { %v12118_v33 = vpop.f32.mrf.mxu0 }
 0x92a   : > { %v12119_v16 = vadd.f32 %v12118_v33, %v22177_v18  ;;  %v11994_v4 = vpop.f32.mrf.mxu1 }
 0x92b   : > { %v14562_v3 = vpop.f32.mrf.mxu0 }
 0x92c   : > { %13971 = vst.msk [vmem:[%s17134_s8 + $0x808] sm:$0xff] %vm4119_vm15, %v12119_v16  ;;  %v11996_v43 = vpop.f32.mrf.mxu1 }
 0x92d   : > { %v12123_v7 = vpop.f32.mrf.mxu0 }
 0x92e   : > { %v12124_v60 = vadd.f32 %v12123_v7, %v22181_v56  ;;  %v11997_v54 = vpop.f32.mrf.mxu1 }
 0x92f   : > { %v14565_v55 = vpop.f32.mrf.mxu0 }
 0x930   : > { %13974 = vst.msk [vmem:[%s17134_s8 + $0x820] sm:$0xff] %vm4119_vm15, %v12124_v60  ;;  %v11999_v31 = vpop.f32.mrf.mxu1 }
 0x931   : > { %v12126_v30 = vpop.f32.mrf.mxu0 }
 0x932   : > { %v12127_v61 = vadd.f32 %v12126_v30, %v22185_v45  ;;  %v12002_v27 = vpop.f32.mrf.mxu1 }
 0x933   : > { %v14566_v18 = vpop.f32.mrf.mxu0 }
 0x934   : > { %13977 = vst.msk [vmem:[%s17134_s8 + $0x838] sm:$0xff] %vm4119_vm15, %v12127_v61  ;;  %v12004_v15 = vpop.f32.mrf.mxu1 }
 0x935   : > { %v12131_v49 = vpop.f32.mrf.mxu0 }
 0x936   : > { %v12132_v17 = vadd.f32 %v12131_v49, %v22189_v40  ;;  %v12005_v11 = vpop.f32.mrf.mxu1 }
 0x937   : > { %v14569_v56 = vpop.f32.mrf.mxu0 }
 0x938   : > { %13980 = vst.msk [vmem:[%s17134_s8 + $0x850] sm:$0xff] %vm4119_vm15, %v12132_v17  ;;  %v12007_v32 = vpop.f32.mrf.mxu1 }
 0x939   : > { %v12134_v36 = vpop.f32.mrf.mxu0 }
 0x93a   : > { %v12135_v50 = vadd.f32 %v12134_v36, %v22194_v25  ;;  %v12010_v28 = vpop.f32.mrf.mxu1 }
 0x93b   : > { %v14570_v45 = vpop.f32.mrf.mxu0 }
 0x93c   : > { %13983 = vst.msk [vmem:[%s17134_s8 + $0x868] sm:$0xff] %vm4119_vm15, %v12135_v50  ;;  %v12012_v63 = vpop.f32.mrf.mxu1 }
 0x93d   : > { %v12139_v48 = vpop.f32.mrf.mxu0 }
 0x93e   : > { %v12140_v26 = vadd.f32 %v12139_v48, %v22199_v62  ;;  %v12013_v40 = vpop.f32.mrf.mxu1 }
 0x93f   : > { %v14573_v52 = vpop.f32.mrf.mxu0 }
 0x940   : > { %13986 = vst.msk [vmem:[%s17134_s8 + $0x880] sm:$0xff] %vm4119_vm15, %v12140_v26  ;;  %v12015_v23 = vpop.f32.mrf.mxu1 }
 0x941   : > { %v12142_v20 = vpop.f32.mrf.mxu0 }
 0x942   : > { %v12143_v41 = vadd.f32 %v12142_v20, %v22204_v6 }
 0x943   : > { %v14574_v25 = vpop.f32.mrf.mxu0 }
 0x944   : > { %13989 = vst.msk [vmem:[%s17134_s8 + $0x898] sm:$0xff] %vm4119_vm15, %v12143_v41 }
 0x945   : > { %v12147_v12 = vpop.f32.mrf.mxu0 }
 0x946   : > { %v12148_v29 = vadd.f32 %v12147_v12, %v22209_v21 }
 0x947   : > { %v14577_v44 = vpop.f32.mrf.mxu0 }
 0x948   : > { %13992 = vst.msk [vmem:[%s17134_s8 + $0x8b0] sm:$0xff] %vm4119_vm15, %v12148_v29 }
 0x949   : > { %v12150_v62 = vpop.f32.mrf.mxu0 }
 0x94a   : > { %v12151_v0 = vadd.f32 %v12150_v62, %v11981_v2 }
 0x94b   : > { %v14578_v53 = vpop.f32.mrf.mxu0 }
 0x94c   : > { %13995 = vst.msk [vmem:[%s17134_s8 + $0x8c8] sm:$0xff] %vm4119_vm15, %v12151_v0 }
 0x94d   : > { %v12155_v34 = vpop.f32.mrf.mxu0 }
 0x94e   : > { %v12156_v38 = vadd.f32 %v12155_v34, %v11986_v24 }
 0x94f   : > { %v14581_v6 = vpop.f32.mrf.mxu0 }
 0x950   : > { %13998 = vst.msk [vmem:[%s17134_s8 + $0x8e0] sm:$0xff] %vm4119_vm15, %v12156_v38 }
 0x951   : > { %v12158_v19 = vpop.f32.mrf.mxu0 }
 0x952   : > { %v12159_v47 = vadd.f32 %v12158_v19, %v11989_v8 }
 0x953   : > { %v14582_v58 = vpop.f32.mrf.mxu0 }
 0x954   : > { %14001 = vst.msk [vmem:[%s17134_s8 + $0x8f8] sm:$0xff] %vm4119_vm15, %v12159_v47 }
 0x955   : > { %v12163_v13 = vpop.f32.mrf.mxu0 }
 0x956   : > { %v12164_v21 = vadd.f32 %v12163_v13, %v11994_v4 }
 0x957   : > { %v14585_v46 = vpop.f32.mrf.mxu0 }
 0x958   : > { %14004 = vst.msk [vmem:[%s17134_s8 + $0x910] sm:$0xff] %vm4119_vm15, %v12164_v21 }
 0x959   : > { %v12166_v39 = vpop.f32.mrf.mxu0 }
 0x95a   : > { %v12167_v57 = vadd.f32 %v12166_v39, %v11997_v54 }
 0x95b   : > { %v14586_v5 = vpop.f32.mrf.mxu0 }
 0x95c   : > { %14007 = vst.msk [vmem:[%s17134_s8 + $0x928] sm:$0xff] %vm4119_vm15, %v12167_v57 }
 0x95d   : > { %v12171_v2 = vpop.f32.mrf.mxu0 }
 0x95e   : > { %v12172_v59 = vadd.f32 %v12171_v2, %v12002_v27 }
 0x95f   : > { %v14589_v37 = vpop.f32.mrf.mxu0 }
 0x960   : > { %14010 = vst.msk [vmem:[%s17134_s8 + $0x940] sm:$0xff] %vm4119_vm15, %v12172_v59 }
 0x961   : > { %v12174_v1 = vpop.f32.mrf.mxu0 }
 0x962   : > { %v12175_v22 = vadd.f32 %v12174_v1, %v12005_v11 }
 0x963   : > { %v14590_v24 = vpop.f32.mrf.mxu0 }
 0x964   : > { %14013 = vst.msk [vmem:[%s17134_s8 + $0x958] sm:$0xff] %vm4119_vm15, %v12175_v22 }
 0x965   : > { %v12179_v35 = vpop.f32.mrf.mxu0 }
 0x966   : > { %v12180_v9 = vadd.f32 %v12179_v35, %v12010_v28 }
 0x967   : > { %v14593_v14 = vpop.f32.mrf.mxu0 }
 0x968   : > { %14016 = vst.msk [vmem:[%s17134_s8 + $0x970] sm:$0xff] %vm4119_vm15, %v12180_v9 }
 0x969   : > { %v12182_v51 = vpop.f32.mrf.mxu0 }
 0x96a   : > { %v12183_v8 = vadd.f32 %v12182_v51, %v12013_v40 }
 0x96b   : > { %v14594_v10 = vpop.f32.mrf.mxu0 }
 0x96c   : > { %14019 = vst.msk [vmem:[%s17134_s8 + $0x988] sm:$0x3f] %vm4219_vm2, %v12183_v8 }
 0x96d PF: > { %s13_s12 = sadd.s32 1, %s15439_s12  }
 0x96e   : > { %p10_p4 = scmp.ge.s32.totalorder %s13_s12, 4  }
 0x970   :  { %12 = sbr.rel (!%p10_p4) target bundleno = 1 (0x1), region = 68 }

</bundles_post_ra>
